<compile_context>
chip_gen: v7x
topology: tpu7x:2x2x1
jax: 0.10.0
libtpu: 0.0.40
codegen_flags: <defaults>
</compile_context>

<pallas_src>
import functools

import jax
import jax.numpy as jnp
from jax.experimental import pallas as pl
from jax.experimental.pallas import tpu as pltpu

INPLANES = 768     # MIL_SoftmaxAttention(inplanes=768, ...)
MIDPLANES = 512    # MIL_SoftmaxAttention(..., midplanes=512)
NPAD = 128         # N=1 Linear heads zero-padded to a full 128-lane MXU tile
NEG_SLOPE = 0.01   # nn.LeakyReLU default negative_slope
CLAMP_EPS = 1e-5   # torch.clamp(min=1e-5, max=1-1e-5)


def _pe_mil_kernel(feat_ref, w1_ref, b1_ref, w2p_ref, b2_ref,
                   wc1_ref, bc1_ref, wc2p_ref, bc2_ref, out_ref,
                   *, tile_b, n_inst):
    """One grid step processes TILE_B bags (TILE_B * n_inst instances).

    feat_ref : (tile_b*n_inst, HW, INPLANES) VMEM  -- lane axis = features
    w1/b1    : (INPLANES, INPLANES) bf16 / (1, INPLANES) f32
    w2p/b2   : (INPLANES, NPAD) f32 (only col 0 real) / (1,1) f32 SMEM scalar
    wc1/bc1  : (INPLANES, MIDPLANES) bf16 / (1, MIDPLANES) f32
    wc2p/bc2 : (MIDPLANES, NPAD) f32 (only col 0 real) / (1,1) f32 SMEM scalar
    out_ref  : (tile_b, 1) VMEM
    """
    # nn.AdaptiveMaxPool3d((None, 1, 1)): max over the spatial (H*W) axis,
    # which is the sublane axis here -> mostly vreg-vs-vreg VPU max, and the
    # result is lane-dense (768 lanes) and MXU-ready.
    bag = jnp.max(feat_ref[...], axis=1)                      # (M, 768) f32

    # --- MIL attention branch: Linear -> LeakyReLU -> Linear(->1) ---
    h = jnp.dot(bag.astype(jnp.bfloat16), w1_ref[...],
                preferred_element_type=jnp.float32) + b1_ref[...]
    h = jnp.where(h > 0, h, NEG_SLOPE * h)                    # LeakyReLU (f32)
    # w2 is padded to 128 output lanes (zeros past col 0) so the MXU pass is
    # unmasked; column 0 is the real logit.
    logit = jnp.dot(h, w2p_ref[...],
                    preferred_element_type=jnp.float32)[:, 0:1] + b2_ref[0, 0]

    # Per-bag softmax over instances (dim=1 of (B, n, 1)); the reshapes only
    # split the leading (sublane) axis on an 8-row boundary -> no relayout.
    logit3 = logit.reshape(tile_b, n_inst, 1)
    m = jnp.max(logit3, axis=1, keepdims=True)
    e = jnp.exp(logit3 - m)
    att = e * pl.reciprocal(jnp.sum(e, axis=1, keepdims=True), approx=False)

    # Weighted aggregation of instance features (VPU mul + small sublane sum;
    # n_inst is tiny so an MXU formulation would not pay off).
    bag3 = bag.reshape(tile_b, n_inst, INPLANES)
    agg = jnp.sum(att * bag3, axis=1)                         # (tile_b, 768)

    # --- classifier: Linear -> LeakyReLU -> Linear(->1) -> Sigmoid -> clamp ---
    hc = jnp.dot(agg.astype(jnp.bfloat16), wc1_ref[...],
                 preferred_element_type=jnp.float32) + bc1_ref[...]
    hc = jnp.where(hc > 0, hc, NEG_SLOPE * hc)
    y = jnp.dot(hc, wc2p_ref[...],
                preferred_element_type=jnp.float32)[:, 0:1] + bc2_ref[0, 0]
    y = 1.0 / (1.0 + jnp.exp(-y))                             # sigmoid
    y = jnp.clip(y, CLAMP_EPS, 1.0 - CLAMP_EPS)               # (tile_b, 1)

    out_ref[...] = y


def pe_mil_forward(feat, params, batch_size, tile_b=None):
    """feat: (b, C, D, H, W) float32 with C*D == INPLANES and b % batch_size == 0."""
    b, C, D, H, W = feat.shape
    assert C * D == INPLANES, "MIL inplanes mismatch"
    assert b % batch_size == 0
    n_inst = b // batch_size
    hw = H * W
    if tile_b is None:
        tile_b = batch_size                   # whole batch in one grid step
    assert batch_size % tile_b == 0

    # (b, C, D, H, W) -> (b, HW, 768): put the feature axis on TPU lanes.
    feat2 = jnp.transpose(feat.reshape(b, C * D, hw), (0, 2, 1))

    def wspec(shape):
        return pl.BlockSpec(shape, lambda i, _s=shape: (0,) * len(_s))

    smem_scalar = pl.BlockSpec(memory_space=pltpu.MemorySpace.SMEM)

    grid_spec = pltpu.PrefetchScalarGridSpec(
        num_scalar_prefetch=0,
        grid=(batch_size // tile_b,),
        in_specs=[
            # TILE_B bags (tile_b * n_inst instances) per grid step.
            pl.BlockSpec((tile_b * n_inst, hw, INPLANES), lambda i: (i, 0, 0)),
            wspec((INPLANES, INPLANES)),     # w1  (bf16)
            wspec((1, INPLANES)),            # b1
            wspec((INPLANES, NPAD)),         # w2 padded to 128 lanes
            smem_scalar,                     # b2 scalar (SMEM)
            wspec((INPLANES, MIDPLANES)),    # wc1 (bf16)
            wspec((1, MIDPLANES)),           # bc1
            wspec((MIDPLANES, NPAD)),        # wc2 padded to 128 lanes
            smem_scalar,                     # bc2 scalar (SMEM)
        ],
        out_specs=pl.BlockSpec((tile_b, 1), lambda i: (i, 0)),
    )

    kernel = functools.partial(_pe_mil_kernel, tile_b=tile_b, n_inst=n_inst)

    # TODO(synk): for realistic PENet spatial sizes, add an "arbitrary" grid
    # axis over HW tiles with a running-max VMEM scratch, and single-buffer
    # the constant weight BlockSpecs (pipeline_mode=pl.Buffered(1)) to
    # reclaim VMEM once the feat tile grows.
    out = pl.pallas_call(
        kernel,
        out_shape=jax.ShapeDtypeStruct((batch_size, 1), jnp.float32),
        grid_spec=grid_spec,
        compiler_params=pltpu.CompilerParams(
            # Bags are independent (no accumulator crosses the grid axis), so
            # Mosaic may shard grid steps across TensorCores on megacore parts.
            dimension_semantics=("parallel",),
            # Actual need at these shapes is ~12 MiB (feat tile x2 buffers +
            # weights); 32 MiB leaves headroom on every generation, including
            # v7x's 64 MiB physical VMEM.
            vmem_limit_bytes=32 << 20,
        ),
    )(feat2, params["w1"], params["b1"], params["w2p"], params["b2"],
      params["wc1"], params["bc1"], params["wc2p"], params["bc2"])
    return out.reshape(batch_size)


def reference_forward(feat, params, batch_size):
    """Pure-JAX reference reproducing the PyTorch MIL forward (with the same
    bf16 weight storage / f32 accumulation as the kernel)."""
    b, C, D, H, W = feat.shape
    bag = jnp.max(feat.reshape(b, C * D, H * W), axis=-1)             # (b, 768)
    h = jnp.dot(bag.astype(jnp.bfloat16), params["w1"],
                preferred_element_type=jnp.float32) + params["b1"]
    h = jnp.where(h > 0, h, NEG_SLOPE * h)
    logit = jnp.dot(h, params["w2p"][:, 0:1],
                    preferred_element_type=jnp.float32) + params["b2"]
    att = jax.nn.softmax(logit.reshape(batch_size, -1, 1), axis=1)
    bag3 = bag.reshape(batch_size, -1, INPLANES)
    agg = jnp.sum(att * bag3, axis=1)
    hc = jnp.dot(agg.astype(jnp.bfloat16), params["wc1"],
                 preferred_element_type=jnp.float32) + params["bc1"]
    hc = jnp.where(hc > 0, hc, NEG_SLOPE * hc)
    y = jax.nn.sigmoid(jnp.dot(hc, params["wc2p"][:, 0:1],
                               preferred_element_type=jnp.float32) + params["bc2"])
    y = jnp.clip(y, CLAMP_EPS, 1.0 - CLAMP_EPS)
    return y.reshape(batch_size)


def init_params(key):
    """Deterministic synthetic weights matching the nn.Linear shapes, stored
    pre-transposed as (in, out) so the kernels compute x @ W + b.  The two big
    matrices are bf16 (MXU-native); the N=1 heads are zero-padded to 128
    output lanes; scalar biases are (1,1) f32 passed through SMEM."""
    k1, k2, k3, k4, k5, k6, k7, k8 = jax.random.split(key, 8)
    s1 = 1.0 / jnp.sqrt(INPLANES)
    s2 = 1.0 / jnp.sqrt(MIDPLANES)
    w2 = jax.random.normal(k2, (INPLANES, 1), jnp.float32) * s1
    wc2 = jax.random.normal(k4, (MIDPLANES, 1), jnp.float32) * s2
    return {
        "w1":  (jax.random.normal(k1, (INPLANES, INPLANES), jnp.float32) * s1
                ).astype(jnp.bfloat16),
        "b1":  jax.random.normal(k5, (1, INPLANES), jnp.float32) * 0.1,
        "w2p": jnp.pad(w2, ((0, 0), (0, NPAD - 1))),
        "b2":  jax.random.normal(k6, (1, 1), jnp.float32) * 0.1,
        "wc1": (jax.random.normal(k3, (INPLANES, MIDPLANES), jnp.float32) * s1
                ).astype(jnp.bfloat16),
        "bc1": jax.random.normal(k7, (1, MIDPLANES), jnp.float32) * 0.1,
        "wc2p": jnp.pad(wc2, ((0, 0), (0, NPAD - 1))),
        "bc2": jax.random.normal(k8, (1, 1), jnp.float32) * 0.1,
    }


if __name__ == "__main__":
    key = jax.random.PRNGKey(0)
    k_feat, k_params = jax.random.split(key)

    batch_size = 2      # number of bags
    n_inst = 8          # instances per bag
    b = batch_size * n_inst
    C, D, H, W = INPLANES, 1, 8, 8   # C*D == 768 (MIL inplanes)

    feat = jax.random.normal(k_feat, (b, C, D, H, W), dtype=jnp.float32)
    params = init_params(k_params)

    y_pred = jax.block_until_ready(pe_mil_forward(feat, params, batch_size))
    y_ref = reference_forward(feat, params, batch_size)

    assert y_pred.shape == (batch_size,)
    assert jnp.allclose(y_pred, y_ref, atol=1e-3, rtol=1e-3), (y_pred, y_ref)

    print("KERNEL_OK")
</pallas_src>

<mosaic_0001>
module attributes {stable_mosaic.version = 11 : i64} {
  func.func @_pe_mil_kernel(%arg0: i32, %arg1: memref<16x64x768xf32, #tpu.memory_space<vmem>>, %arg2: memref<768x768xbf16, #tpu.memory_space<vmem>>, %arg3: memref<1x768xf32, #tpu.memory_space<vmem>>, %arg4: memref<768x128xf32, #tpu.memory_space<vmem>>, %arg5: memref<1x1xf32, #tpu.memory_space<smem>>, %arg6: memref<768x512xbf16, #tpu.memory_space<vmem>>, %arg7: memref<1x512xf32, #tpu.memory_space<vmem>>, %arg8: memref<512x128xf32, #tpu.memory_space<vmem>>, %arg9: memref<1x1xf32, #tpu.memory_space<smem>>, %arg10: memref<2x1xf32, #tpu.memory_space<vmem>>) attributes {dimension_semantics = [#tpu.dimension_semantics<parallel>], iteration_bounds = array<i64: 1>, scalar_prefetch = 0 : i64, scratch_operands = 0 : i64, tpu.core_type = #tpu.core_type<tc>, window_params = [{transform_indices = @transform_0, window_bounds = array<i64: 16, 64, 768>}, {pipeline_mode = #tpu.pipeline_mode<synchronous>, transform_indices = @transform_1, window_bounds = array<i64: 768, 768>}, {pipeline_mode = #tpu.pipeline_mode<synchronous>, transform_indices = @transform_2, window_bounds = array<i64: 1, 768>}, {pipeline_mode = #tpu.pipeline_mode<synchronous>, transform_indices = @transform_3, window_bounds = array<i64: 768, 128>}, {transform_indices = @transform_4, window_bounds = array<i64: 1, 1>}, {pipeline_mode = #tpu.pipeline_mode<synchronous>, transform_indices = @transform_5, window_bounds = array<i64: 768, 512>}, {pipeline_mode = #tpu.pipeline_mode<synchronous>, transform_indices = @transform_6, window_bounds = array<i64: 1, 512>}, {pipeline_mode = #tpu.pipeline_mode<synchronous>, transform_indices = @transform_7, window_bounds = array<i64: 512, 128>}, {transform_indices = @transform_8, window_bounds = array<i64: 1, 1>}, {transform_indices = @transform_9, window_bounds = array<i64: 2, 1>}]} {
    %c0 = arith.constant 0 : index
    %c0_0 = arith.constant 0 : index
    %c0_1 = arith.constant 0 : index
    %0 = vector.load %arg1[%c0, %c0_0, %c0_1] : memref<16x64x768xf32, #tpu.memory_space<vmem>>, vector<16x64x768xf32>
    %cst = arith.constant dense<0xFF800000> : vector<16x768xf32>
    %1 = vector.multi_reduction <maximumf>, %0, %cst [1] : vector<16x64x768xf32> to vector<16x768xf32>
    %2 = arith.truncf %1 : vector<16x768xf32> to vector<16x768xbf16>
    %c0_2 = arith.constant 0 : index
    %c0_3 = arith.constant 0 : index
    %3 = vector.load %arg2[%c0_2, %c0_3] : memref<768x768xbf16, #tpu.memory_space<vmem>>, vector<768x768xbf16>
    %cst_4 = arith.constant dense<0.000000e+00> : vector<16x768xf32>
    %4 = tpu.matmul %2, %3, %cst_4 {dimension_numbers = #tpu.dot_dimension_numbers<[1], [0], [0], [1], [0, 0, 1, 1], [], []>} : vector<16x768xbf16>, vector<768x768xbf16>, vector<16x768xf32> -> vector<16x768xf32>
    %c0_5 = arith.constant 0 : index
    %c0_6 = arith.constant 0 : index
    %5 = vector.load %arg3[%c0_5, %c0_6] : memref<1x768xf32, #tpu.memory_space<vmem>>, vector<1x768xf32>
    %6 = vector.broadcast %5 : vector<1x768xf32> to vector<16x768xf32>
    %7 = arith.addf %4, %6 : vector<16x768xf32>
    %cst_7 = arith.constant 0.000000e+00 : f32
    %8 = vector.broadcast %cst_7 : f32 to vector<16x768xf32>
    %9 = arith.cmpf ogt, %7, %8 : vector<16x768xf32>
    %cst_8 = arith.constant 0.00999999977 : f32
    %10 = vector.broadcast %cst_8 : f32 to vector<16x768xf32>
    %11 = arith.mulf %10, %7 : vector<16x768xf32>
    %12 = arith.select %9, %7, %11 : vector<16x768xi1>, vector<16x768xf32>
    %c0_9 = arith.constant 0 : index
    %c0_10 = arith.constant 0 : index
    %13 = vector.load %arg4[%c0_9, %c0_10] : memref<768x128xf32, #tpu.memory_space<vmem>>, vector<768x128xf32>
    %cst_11 = arith.constant dense<0.000000e+00> : vector<16x128xf32>
    %14 = tpu.matmul %12, %13, %cst_11 {dimension_numbers = #tpu.dot_dimension_numbers<[1], [0], [0], [1], [0, 0, 1, 1], [], []>} : vector<16x768xf32>, vector<768x128xf32>, vector<16x128xf32> -> vector<16x128xf32>
    %15 = vector.extract_strided_slice %14 {offsets = [0, 0], sizes = [16, 1], strides = [1, 1]} : vector<16x128xf32> to vector<16x1xf32>
    %c0_12 = arith.constant 0 : index
    %c0_13 = arith.constant 0 : index
    %16 = memref.load %arg5[%c0_12, %c0_13] : memref<1x1xf32, #tpu.memory_space<smem>>
    %17 = vector.broadcast %16 : f32 to vector<16x1xf32>
    %18 = arith.addf %15, %17 : vector<16x1xf32>
    %19 = vector.shape_cast %18 : vector<16x1xf32> to vector<2x8x1xf32>
    %cst_14 = arith.constant dense<0xFF800000> : vector<2x1xf32>
    %20 = vector.multi_reduction <maximumf>, %19, %cst_14 [1] : vector<2x8x1xf32> to vector<2x1xf32>
    %21 = vector.shape_cast %20 : vector<2x1xf32> to vector<2x1x1xf32>
    %22 = vector.broadcast %21 : vector<2x1x1xf32> to vector<2x8x1xf32>
    %23 = arith.subf %19, %22 : vector<2x8x1xf32>
    %24 = math.exp %23 : vector<2x8x1xf32>
    %cst_15 = arith.constant dense<0.000000e+00> : vector<2x1xf32>
    %25 = vector.multi_reduction <add>, %24, %cst_15 [1] : vector<2x8x1xf32> to vector<2x1xf32>
    %26 = vector.shape_cast %25 : vector<2x1xf32> to vector<2x1x1xf32>
    %27 = tpu.reciprocal %26 : vector<2x1x1xf32> -> vector<2x1x1xf32>
    %28 = vector.broadcast %27 : vector<2x1x1xf32> to vector<2x8x1xf32>
    %29 = arith.mulf %24, %28 : vector<2x8x1xf32>
    %30 = vector.shape_cast %1 : vector<16x768xf32> to vector<2x8x768xf32>
    %31 = vector.broadcast %29 : vector<2x8x1xf32> to vector<2x8x768xf32>
    %32 = arith.mulf %31, %30 : vector<2x8x768xf32>
    %cst_16 = arith.constant dense<0.000000e+00> : vector<2x768xf32>
    %33 = vector.multi_reduction <add>, %32, %cst_16 [1] : vector<2x8x768xf32> to vector<2x768xf32>
    %34 = arith.truncf %33 : vector<2x768xf32> to vector<2x768xbf16>
    %c0_17 = arith.constant 0 : index
    %c0_18 = arith.constant 0 : index
    %35 = vector.load %arg6[%c0_17, %c0_18] : memref<768x512xbf16, #tpu.memory_space<vmem>>, vector<768x512xbf16>
    %cst_19 = arith.constant dense<0.000000e+00> : vector<2x512xf32>
    %36 = tpu.matmul %34, %35, %cst_19 {dimension_numbers = #tpu.dot_dimension_numbers<[1], [0], [0], [1], [0, 0, 1, 1], [], []>} : vector<2x768xbf16>, vector<768x512xbf16>, vector<2x512xf32> -> vector<2x512xf32>
    %c0_20 = arith.constant 0 : index
    %c0_21 = arith.constant 0 : index
    %37 = vector.load %arg7[%c0_20, %c0_21] : memref<1x512xf32, #tpu.memory_space<vmem>>, vector<1x512xf32>
    %38 = vector.broadcast %37 : vector<1x512xf32> to vector<2x512xf32>
    %39 = arith.addf %36, %38 : vector<2x512xf32>
    %cst_22 = arith.constant 0.000000e+00 : f32
    %40 = vector.broadcast %cst_22 : f32 to vector<2x512xf32>
    %41 = arith.cmpf ogt, %39, %40 : vector<2x512xf32>
    %cst_23 = arith.constant 0.00999999977 : f32
    %42 = vector.broadcast %cst_23 : f32 to vector<2x512xf32>
    %43 = arith.mulf %42, %39 : vector<2x512xf32>
    %44 = arith.select %41, %39, %43 : vector<2x512xi1>, vector<2x512xf32>
    %c0_24 = arith.constant 0 : index
    %c0_25 = arith.constant 0 : index
    %45 = vector.load %arg8[%c0_24, %c0_25] : memref<512x128xf32, #tpu.memory_space<vmem>>, vector<512x128xf32>
    %cst_26 = arith.constant dense<0.000000e+00> : vector<2x128xf32>
    %46 = tpu.matmul %44, %45, %cst_26 {dimension_numbers = #tpu.dot_dimension_numbers<[1], [0], [0], [1], [0, 0, 1, 1], [], []>} : vector<2x512xf32>, vector<512x128xf32>, vector<2x128xf32> -> vector<2x128xf32>
    %47 = vector.extract_strided_slice %46 {offsets = [0, 0], sizes = [2, 1], strides = [1, 1]} : vector<2x128xf32> to vector<2x1xf32>
    %c0_27 = arith.constant 0 : index
    %c0_28 = arith.constant 0 : index
    %48 = memref.load %arg9[%c0_27, %c0_28] : memref<1x1xf32, #tpu.memory_space<smem>>
    %49 = vector.broadcast %48 : f32 to vector<2x1xf32>
    %50 = arith.addf %47, %49 : vector<2x1xf32>
    %cst_29 = arith.constant 0.000000e+00 : f32
    %51 = vector.broadcast %cst_29 : f32 to vector<2x1xf32>
    %52 = arith.subf %51, %50 : vector<2x1xf32>
    %53 = math.exp %52 : vector<2x1xf32>
    %cst_30 = arith.constant 1.000000e+00 : f32
    %54 = vector.broadcast %cst_30 : f32 to vector<2x1xf32>
    %55 = arith.addf %54, %53 : vector<2x1xf32>
    %cst_31 = arith.constant 1.000000e+00 : f32
    %56 = vector.broadcast %cst_31 : f32 to vector<2x1xf32>
    %57 = arith.divf %56, %55 : vector<2x1xf32>
    %cst_32 = arith.constant 9.99999974E-6 : f32
    %cst_33 = arith.constant 0.999989986 : f32
    %58 = vector.broadcast %cst_32 : f32 to vector<2x1xf32>
    %59 = arith.maximumf %58, %57 : vector<2x1xf32>
    %60 = vector.broadcast %cst_33 : f32 to vector<2x1xf32>
    %61 = arith.minimumf %60, %59 : vector<2x1xf32>
    %c0_34 = arith.constant 0 : index
    %c0_35 = arith.constant 0 : index
    %62 = vector.load %arg10[%c0_34, %c0_35] : memref<2x1xf32, #tpu.memory_space<vmem>>, vector<2x1xf32>
    tpu.vector_store %arg10[%c0_34, %c0_35], %61 {strides = array<i32>} : memref<2x1xf32, #tpu.memory_space<vmem>>, vector<2x1xf32>,
    return
  }
  func.func @transform_0(%arg0: i32) -> (i32, i32, i32) {
    %c0_i32 = arith.constant 0 : i32
    %c0_i32_0 = arith.constant 0 : i32
    %c0_i32_1 = arith.constant 0 : i32
    return %arg0, %c0_i32, %c0_i32_0 : i32, i32, i32
  }
  func.func @transform_1(%arg0: i32) -> (i32, i32) {
    %c0_i32 = arith.constant 0 : i32
    %c0_i32_0 = arith.constant 0 : i32
    %c0_i32_1 = arith.constant 0 : i32
    return %c0_i32, %c0_i32_0 : i32, i32
  }
  func.func @transform_2(%arg0: i32) -> (i32, i32) {
    %c0_i32 = arith.constant 0 : i32
    %c0_i32_0 = arith.constant 0 : i32
    %c0_i32_1 = arith.constant 0 : i32
    return %c0_i32, %c0_i32_0 : i32, i32
  }
  func.func @transform_3(%arg0: i32) -> (i32, i32) {
    %c0_i32 = arith.constant 0 : i32
    %c0_i32_0 = arith.constant 0 : i32
    %c0_i32_1 = arith.constant 0 : i32
    return %c0_i32, %c0_i32_0 : i32, i32
  }
  func.func @transform_4(%arg0: i32) -> (i32, i32) {
    %c0_i32 = arith.constant 0 : i32
    %c0_i32_0 = arith.constant 0 : i32
    %c0_i32_1 = arith.constant 0 : i32
    return %c0_i32, %c0_i32_0 : i32, i32
  }
  func.func @transform_5(%arg0: i32) -> (i32, i32) {
    %c0_i32 = arith.constant 0 : i32
    %c0_i32_0 = arith.constant 0 : i32
    %c0_i32_1 = arith.constant 0 : i32
    return %c0_i32, %c0_i32_0 : i32, i32
  }
  func.func @transform_6(%arg0: i32) -> (i32, i32) {
    %c0_i32 = arith.constant 0 : i32
    %c0_i32_0 = arith.constant 0 : i32
    %c0_i32_1 = arith.constant 0 : i32
    return %c0_i32, %c0_i32_0 : i32, i32
  }
  func.func @transform_7(%arg0: i32) -> (i32, i32) {
    %c0_i32 = arith.constant 0 : i32
    %c0_i32_0 = arith.constant 0 : i32
    %c0_i32_1 = arith.constant 0 : i32
    return %c0_i32, %c0_i32_0 : i32, i32
  }
  func.func @transform_8(%arg0: i32) -> (i32, i32) {
    %c0_i32 = arith.constant 0 : i32
    %c0_i32_0 = arith.constant 0 : i32
    %c0_i32_1 = arith.constant 0 : i32
    return %c0_i32, %c0_i32_0 : i32, i32
  }
  func.func @transform_9(%arg0: i32) -> (i32, i32) {
    %c0_i32 = arith.constant 0 : i32
    %c0_i32_0 = arith.constant 0 : i32
    return %arg0, %c0_i32 : i32, i32
  }
}

</mosaic_0001>

<bundles_post_ra>
// kernel: tpu_custom_call.1
= control target key start
LH: loop header
LB: loop body
LE: loop exit
PB: predicated region body
PF: predicated region fallthrough
CT: control target
= control target key end

     0   :  { %16 = vsyncpa [#allocation5], 0  ;;  %s10016_s0 = inlined_call_operand.hbm [shape: f32[16,64,768], index: 0, kind: input, shape index: {}]   ;;  %s10017_s1 = inlined_call_operand.hbm [shape: bf16[768,768], index: 1, kind: input, shape index: {}]   ;;  %s10018_s2 = inlined_call_operand.hbm [shape: f32[1,768], index: 2, kind: input, shape index: {}]   ;;  %s10019_s3 = inlined_call_operand.hbm [shape: f32[768,128], index: 3, kind: input, shape index: {}]   ;;  %s10020_s4 = inlined_call_operand.<no memory space> [shape: f32[1,1], index: 4, kind: input, shape index: {}]   ;;  %s10021_s5 = inlined_call_operand.hbm [shape: bf16[768,512], index: 5, kind: input, shape index: {}]   ;;  %s10022_s6 = inlined_call_operand.hbm [shape: f32[1,512], index: 6, kind: input, shape index: {}]   ;;  %s10023_s7 = inlined_call_operand.hbm [shape: f32[512,128], index: 7, kind: input, shape index: {}]   ;;  %s10024_s8 = inlined_call_operand.<no memory space> [shape: f32[1,1], index: 8, kind: input, shape index: {}]   ;;  %s10025_s9 = inlined_call_operand.vmem [shape: f32[2,1], index: 9, kind: output, shape index: {}]  }
   0x1   :  { %17 = vsyncpa [#allocation7], 0 }
   0x2   :  { %18 = vsyncpa [#allocation10], 0 }
   0x3   :  { %19 = vsyncpa [#allocation13], 0  ;;  %s8867_s30 = smov [#allocation6]   ;;  %s8705_s13 = scalar_lea.hbm %s10017_s1, 36864 }
   0x4   :  { %s37_s10 = sshll.u32 %s8867_s30, 4  ;;  %p8706_p0 = scmp.ne.s32.totalorder %s10017_s1, %s8705_s13  ;;  %s38_s10 = int_to_ptr.vmem [resolvable:$true] %s37_s10 }
   0x5   :  { %p8709_p1 = scmp.lt.u32.totalorder %s8705_s13, %s10017_s1 }
   0x7   :  { %p8711_p2 = pnand %p8709_p1, %p8706_p0 }
   0x9   :  { %8714 = shalt.err (!%p8711_p2)
}
   0xa   :  { %s8715_s18 = scalar_lea.vmem %s38_s10, 36864  ;;  %p8720_p4 = scmp.lt.s32.totalorder %s38_s10, %s38_s10 }
   0xb   :  { %p8716_p3 = scmp.ne.s32.totalorder %s38_s10, %s8715_s18  ;;  %p8721_p5 = scmp.lt.s32.totalorder %s8715_s18, %s8715_s18 }
   0xd   :  { %p8722_p6 = por %p8721_p5, %p8720_p4 }
   0xf   :  { %p8723_p7 = pnand %p8722_p6, %p8716_p3 }
  0x11   :  { %8726 = shalt.err (!%p8723_p7)
}
  0x12   :  { %s8868_s19 = smov 384   ;;  %s8869_s20 = smov 24  }
  0x13   :  { %43 = dma.hbm_to_vmem [thread:$0]  %s10017_s1, 36864, %s38_s10, [#allocation7], %s8868_s19, %s8868_s19, %s8869_s20  }
  0x14   :  { %s8870_s23 = smov [#allocation9]   ;;  %s8727_s27 = scalar_lea.hbm %s10019_s3, 12288 }
  0x15   :  { %s59_s24 = sshll.u32 %s8870_s23, 4  ;;  %p8728_p8 = scmp.ne.s32.totalorder %s10019_s3, %s8727_s27  ;;  %s60_s24 = int_to_ptr.vmem [resolvable:$true] %s59_s24 }
  0x16   :  { %p8731_p9 = scmp.lt.u32.totalorder %s8727_s27, %s10019_s3 }
  0x18   :  { %p8733_p10 = pnand %p8731_p9, %p8728_p8 }
  0x1a   :  { %8736 = shalt.err (!%p8733_p10)
}
  0x1b   :  { %s8737_s12 = scalar_lea.vmem %s60_s24, 12288  ;;  %p8742_p12 = scmp.lt.s32.totalorder %s60_s24, %s60_s24 }
  0x1c   :  { %p8738_p11 = scmp.ne.s32.totalorder %s60_s24, %s8737_s12  ;;  %p8743_p13 = scmp.lt.s32.totalorder %s8737_s12, %s8737_s12 }
  0x1e   :  { %p8744_p0 = por %p8743_p13, %p8742_p12 }
  0x20   :  { %p8745_p1 = pnand %p8744_p0, %p8738_p11 }
  0x22   :  { %8748 = shalt.err (!%p8745_p1)
}
  0x23   :  { %s8871_s1 = smov 128   ;;  %s8872_s10 = smov 8  }
  0x24   :  { %65 = dma.hbm_to_vmem [thread:$0]  %s10019_s3, 12288, %s60_s24, [#allocation10], %s8871_s1, %s8871_s1, %s8872_s10  }
  0x25   :  { %s8873_s15 = smov [#allocation12]   ;;  %s8874_s17 = smov [#allocation4]  }
  0x26   :  { %s86_s16 = sshll.u32 %s8873_s15, 4  ;;  %s25_s18 = sshll.u32 %s8874_s17, 4  ;;  %s87_s16 = int_to_ptr.vmem [resolvable:$true] %s86_s16  ;;  %s8960_s18 = int_to_ptr.vmem [resolvable:$true] %s25_s18 }
  0x27   :  { %s8749_s21 = scalar_lea.hbm %s10022_s6, 64 }
  0x28   :  { %p8750_p2 = scmp.ne.s32.totalorder %s10022_s6, %s8749_s21  ;;  %p8753_p3 = scmp.lt.u32.totalorder %s8749_s21, %s10022_s6 }
  0x2a   :  { %p8755_p4 = pnand %p8753_p3, %p8750_p2 }
  0x2c   :  { %8758 = shalt.err (!%p8755_p4)
}
  0x2d   :  { %s8759_s3 = scalar_lea.vmem %s87_s16, 64  ;;  %p8764_p6 = scmp.lt.s32.totalorder %s87_s16, %s87_s16 }
  0x2e   :  { %p8760_p5 = scmp.ne.s32.totalorder %s87_s16, %s8759_s3  ;;  %p8765_p7 = scmp.lt.s32.totalorder %s8759_s3, %s8759_s3 }
  0x30   :  { %p8766_p8 = por %p8765_p7, %p8764_p6 }
  0x32   :  { %p8767_p9 = pnand %p8766_p8, %p8760_p5 }
  0x34   :  { %8770 = shalt.err (!%p8767_p9)
}
  0x35   :  { %89 = dma.hbm_to_vmem [thread:$0]  %s10022_s6, 64, %s87_s16, [#allocation13]  }
  0x36   :  { %s8771_s30 = scalar_lea.hbm %s10016_s0, 98304 }
  0x37   :  { %p8772_p10 = scmp.ne.s32.totalorder %s10016_s0, %s8771_s30  ;;  %p8775_p11 = scmp.lt.u32.totalorder %s8771_s30, %s10016_s0 }
  0x39   :  { %p8777_p12 = pnand %p8775_p11, %p8772_p10 }
  0x3b   :  { %8780 = shalt.err (!%p8777_p12)
}
  0x3c   :  { %s8781_s15 = scalar_lea.vmem %s8960_s18, 98304  ;;  %p8786_p0 = scmp.lt.s32.totalorder %s8960_s18, %s8960_s18 }
  0x3d   :  { %p8782_p13 = scmp.ne.s32.totalorder %s8960_s18, %s8781_s15  ;;  %p8787_p1 = scmp.lt.s32.totalorder %s8781_s15, %s8781_s15 }
  0x3f   :  { %p8788_p2 = por %p8787_p1, %p8786_p0 }
  0x41   :  { %p8789_p3 = pnand %p8788_p2, %p8782_p13 }
  0x43   :  { %8792 = shalt.err (!%p8789_p3)
}
  0x44   :  { %s8875_s6 = smov 768   ;;  %s8876_s16 = smov 48  }
  0x45   :  { %31 = dma.hbm_to_vmem [thread:$0]  %s10016_s0, 98304, %s8960_s18, [#allocation5], %s8875_s6, %s8875_s6, %s8876_s16  }
  0x46   :  { %s8877_s20 = smov [#allocation8]   ;;  %s8878_s22 = smov [#allocation11]  }
  0x47   :  { %s50_s21 = sshll.u32 %s8877_s20, 4  ;;  %s73_s23 = sshll.u32 %s8878_s22, 4  ;;  %s51_s21 = int_to_ptr.vmem [resolvable:$true] %s50_s21  ;;  %s8991_s23 = int_to_ptr.vmem [resolvable:$true] %s73_s23 }
  0x48   :  { %s8793_s3 = scalar_lea.hbm %s10018_s2, 96 }
  0x49   :  { %p8794_p4 = scmp.ne.s32.totalorder %s10018_s2, %s8793_s3  ;;  %p8797_p5 = scmp.lt.u32.totalorder %s8793_s3, %s10018_s2 }
  0x4b   :  { %p8799_p6 = pnand %p8797_p5, %p8794_p4 }
  0x4d   :  { %8802 = shalt.err (!%p8799_p6)
}
  0x4e   :  { %s8803_s0 = scalar_lea.vmem %s51_s21, 96  ;;  %p8808_p8 = scmp.lt.s32.totalorder %s51_s21, %s51_s21 }
  0x4f   :  { %p8804_p7 = scmp.ne.s32.totalorder %s51_s21, %s8803_s0  ;;  %p8809_p9 = scmp.lt.s32.totalorder %s8803_s0, %s8803_s0 }
  0x51   :  { %p8810_p10 = por %p8809_p9, %p8808_p8 }
  0x53   :  { %p8811_p11 = pnand %p8810_p10, %p8804_p7 }
  0x55   :  { %8814 = shalt.err (!%p8811_p11)
}
  0x56   :  { %53 = dma.hbm_to_vmem [thread:$0]  %s10018_s2, 96, %s51_s21, [#allocation7]  }
  0x57   :  { %s8815_s13 = scalar_lea.hbm %s10021_s5, 24576 }
  0x58   :  { %p8816_p12 = scmp.ne.s32.totalorder %s10021_s5, %s8815_s13  ;;  %p8819_p13 = scmp.lt.u32.totalorder %s8815_s13, %s10021_s5 }
  0x5a   :  { %p8821_p0 = pnand %p8819_p13, %p8816_p12 }
  0x5c   :  { %8824 = shalt.err (!%p8821_p0)
}
  0x5d   :  { %s8825_s17 = scalar_lea.vmem %s8991_s23, 24576  ;;  %p8830_p2 = scmp.lt.s32.totalorder %s8991_s23, %s8991_s23 }
  0x5e   :  { %p8826_p1 = scmp.ne.s32.totalorder %s8991_s23, %s8825_s17  ;;  %p8831_p3 = scmp.lt.s32.totalorder %s8825_s17, %s8825_s17 }
  0x60   :  { %p8832_p4 = por %p8831_p3, %p8830_p2 }
  0x62   :  { %p8833_p5 = pnand %p8832_p4, %p8826_p1 }
  0x64   :  { %8836 = shalt.err (!%p8833_p5)
}
  0x65   :  { %s8879_s2 = smov 256   ;;  %s8880_s19 = smov 16  }
  0x66   :  { %79 = dma.hbm_to_vmem [thread:$0]  %s10021_s5, 24576, %s8991_s23, [#allocation10], %s8879_s2, %s8879_s2, %s8880_s19  }
  0x67   :  { %s8881_s22 = smov [#allocation14]   ;;  %s8837_s24 = scalar_lea.hbm %s10023_s7, 8192 }
  0x68   :  { %s95_s25 = sshll.u32 %s8881_s22, 4  ;;  %p8838_p6 = scmp.ne.s32.totalorder %s10023_s7, %s8837_s24  ;;  %s96_s25 = int_to_ptr.vmem [resolvable:$true] %s95_s25 }
  0x69   :  { %p8841_p7 = scmp.lt.u32.totalorder %s8837_s24, %s10023_s7 }
  0x6b   :  { %p8843_p8 = pnand %p8841_p7, %p8838_p6 }
  0x6d   :  { %8846 = shalt.err (!%p8843_p8)
}
  0x6e   :  { %s8847_s18 = scalar_lea.vmem %s96_s25, 8192  ;;  %p8852_p10 = scmp.lt.s32.totalorder %s96_s25, %s96_s25 }
  0x6f   :  { %p8848_p9 = scmp.ne.s32.totalorder %s96_s25, %s8847_s18  ;;  %p8853_p11 = scmp.lt.s32.totalorder %s8847_s18, %s8847_s18 }
  0x71   :  { %p8854_p12 = por %p8853_p11, %p8852_p10 }
  0x73   :  { %p8855_p13 = pnand %p8854_p12, %p8848_p9 }
  0x75   :  { %8858 = shalt.err (!%p8855_p13)
}
  0x76   :  { %101 = dma.hbm_to_vmem [thread:$0]  %s10023_s7, 8192, %s96_s25, [#allocation13], %s8871_s1, %s8871_s1, %s8872_s10  }
  0x77   :  { %8859 = dma.done.wait [#allocation5], 98304  }
  0x78   :  { %8860 = vsyncadd [#allocation5], 4294868992 }
  0x79   :  { %8861 = dma.done.wait [#allocation7], 36960  }
  0x7a   :  { %8862 = vsyncadd [#allocation7], 4294930336 }
  0x7b   :  { %8863 = dma.done.wait [#allocation10], 36864  }
  0x7c   :  { %8864 = vsyncadd [#allocation10], 4294930432 }
  0x7d   :  { %8865 = dma.done.wait [#allocation13], 8256  }
  0x7e   :  { %8866 = vsyncadd [#allocation13], 4294959040  ;;  %v7973_v0 = vld [vmem:[#allocation6 + $0x4] ss:$24 sps:$4 sm:$0xff]   ;;  %v7975_v1 = vld [vmem:[#allocation6] ss:$24 sps:$4 sm:$0xff]  }
  0x7f   :  { %4292 = vmatprep.subr.bf16.mxu0 %v7973_v0  ;;  %v7976_v2 = vld [vmem:[#allocation6 + $0x34] ss:$24 sps:$4 sm:$0xff]   ;;  %v7978_v3 = vld [vmem:[#allocation6 + $0x30] ss:$24 sps:$4 sm:$0xff]   ;;  %v7979_v4 = vld [vmem:[#allocation6 + $0x64] ss:$24 sps:$4 sm:$0xff]  }
  0x80   :  { %4293 = vmatpush1.bf16.msra.mxu0 %v7975_v1  ;;  %v7981_v5 = vld [vmem:[#allocation6 + $0x60] ss:$24 sps:$4 sm:$0xff]   ;;  %v7982_v6 = vld [vmem:[#allocation6 + $0x94] ss:$24 sps:$4 sm:$0xff]   ;;  %v7984_v7 = vld [vmem:[#allocation6 + $0x90] ss:$24 sps:$4 sm:$0xff]  }
  0x81   :  { %4294 = vmatprep.subr.bf16.mxu0 %v7976_v2  ;;  %v7997_v8 = vld [vmem:[#allocation6 + $0xc] ss:$24 sps:$4 sm:$0xff]   ;;  %v7999_v9 = vld [vmem:[#allocation6 + $0x8] ss:$24 sps:$4 sm:$0xff]   ;;  %v8003_v11 = vld [vmem:[#allocation6 + $0x3c] ss:$24 sps:$4 sm:$0xff]  }
  0x82   :  { %v7985_v10 = vld [vmem:[#allocation6 + $0xc4] ss:$24 sps:$4 sm:$0xff]   ;;  %4421 = vmatprep.subr.bf16.mxu1 %v7997_v8  ;;  %v8005_v12 = vld [vmem:[#allocation6 + $0x38] ss:$24 sps:$4 sm:$0xff]   ;;  %v7988_v14 = vld [vmem:[#allocation6 + $0xf4] ss:$24 sps:$4 sm:$0xff]  }
  0x83   :  { %4422 = vmatpush1.bf16.msra.mxu1 %v7999_v9  ;;  %v7987_v13 = vld [vmem:[#allocation6 + $0xc0] ss:$24 sps:$4 sm:$0xff]   ;;  %v8009_v15 = vld [vmem:[#allocation6 + $0x6c] ss:$24 sps:$4 sm:$0xff]   ;;  %v7990_v17 = vld [vmem:[#allocation6 + $0xf0] ss:$24 sps:$4 sm:$0xff]  }
  0x84   :  { %4295 = vmatpush1.bf16.msra.mxu0 %v7978_v3  ;;  %4423 = vmatprep.subr.bf16.mxu1 %v8003_v11  ;;  %v8011_v16 = vld [vmem:[#allocation6 + $0x68] ss:$24 sps:$4 sm:$0xff]   ;;  %v8015_v18 = vld [vmem:[#allocation6 + $0x9c] ss:$24 sps:$4 sm:$0xff]   ;;  %v8017_v20 = vld [vmem:[#allocation6 + $0x98] ss:$24 sps:$4 sm:$0xff]  }
  0x85   :  { %4296 = vmatprep.subr.bf16.mxu0 %v7979_v4  ;;  %v7991_v19 = vld [vmem:[#allocation6 + $0x124] ss:$24 sps:$4 sm:$0xff]   ;;  %v7993_v21 = vld [vmem:[#allocation6 + $0x120] ss:$24 sps:$4 sm:$0xff]   ;;  %v7994_v23 = vld [vmem:[#allocation6 + $0x154] ss:$24 sps:$4 sm:$0xff]  }
  0x86   :  { %v8021_v22 = vld [vmem:[#allocation6 + $0xcc] ss:$24 sps:$4 sm:$0xff]   ;;  %v8023_v24 = vld [vmem:[#allocation6 + $0xc8] ss:$24 sps:$4 sm:$0xff]   ;;  %v8027_v26 = vld [vmem:[#allocation6 + $0xfc] ss:$24 sps:$4 sm:$0xff]  }
  0x87   :  { %4424 = vmatpush1.bf16.msra.mxu1 %v8005_v12  ;;  %v7996_v25 = vld [vmem:[#allocation6 + $0x150] ss:$24 sps:$4 sm:$0xff]   ;;  %v8000_v27 = vld [vmem:[#allocation6 + $0x184] ss:$24 sps:$4 sm:$0xff]   ;;  %v8002_v29 = vld [vmem:[#allocation6 + $0x180] ss:$24 sps:$4 sm:$0xff]  }
  0x88   :  { %4297 = vmatpush1.bf16.msra.mxu0 %v7981_v5  ;;  %4425 = vmatprep.subr.bf16.mxu1 %v8009_v15  ;;  %v8029_v28 = vld [vmem:[#allocation6 + $0xf8] ss:$24 sps:$4 sm:$0xff]   ;;  %v8033_v30 = vld [vmem:[#allocation6 + $0x12c] ss:$24 sps:$4 sm:$0xff]   ;;  %v8035_v35 = vld [vmem:[#allocation6 + $0x128] ss:$24 sps:$4 sm:$0xff]  }
  0x89   :  { %4298 = vmatprep.subr.bf16.mxu0 %v7982_v6  ;;  %v8006_v31 = vld [vmem:[#allocation6 + $0x1b4] ss:$24 sps:$4 sm:$0xff]   ;;  %v132_v33 = vld [vmem:[#allocation4 + $0x38] sm:$0xff]  ;;  %v8008_v34 = vld [vmem:[#allocation6 + $0x1b0] ss:$24 sps:$4 sm:$0xff]   ;;  %vm2749_vm0 = vcmask 1041409  }
  0x8a   :  { %v126_v32 = vld [vmem:[#allocation4 + $0x8] sm:$0xff]  ;;  %v8012_v38 = vld [vmem:[#allocation6 + $0x1e4] ss:$24 sps:$4 sm:$0xff]   ;;  %v8014_v45 = vld [vmem:[#allocation6 + $0x1e0] ss:$24 sps:$4 sm:$0xff]   ;;  %vm2751_vm1 = vcmask 1042434  }
  0x8b   :  { %4426 = vmatpush1.bf16.msra.mxu1 %v8011_v16  ;;  %v138_v36 = vld [vmem:[#allocation4 + $0x68] sm:$0xff]  ;;  %v906_v37 = vmax.f32 %v126_v32, %v132_v33  ;;  %v8039_v39 = vld [vmem:[#allocation6 + $0x15c] ss:$24 sps:$4 sm:$0xff]   ;;  %v8041_v46 = vld [vmem:[#allocation6 + $0x158] ss:$24 sps:$4 sm:$0xff]   ;;  %vm2753_vm2 = vcmask 1043459  }
  0x8c   :  { %4299 = vmatpush1.bf16.msra.mxu0 %v7984_v7  ;;  %4427 = vmatprep.subr.bf16.mxu1 %v8015_v18  ;;  %v144_v40 = vld [vmem:[#allocation4 + $0x98] sm:$0xff]  ;;  %v174_v41 = vld [vmem:[#allocation4 + $0x188] sm:$0xff]  ;;  %vm2755_vm3 = vcmask 1044484   ;;  %vm2757_vm4 = vcmask 1045509   ;;  %vm2759_vm5 = vcmask 1046534   ;;  %vm2761_vm6 = vcmask 1047559  }
  0x8d   :  { %4300 = vmatprep.subr.bf16.mxu0 %v7985_v10  ;;  %v180_v42 = vld [vmem:[#allocation4 + $0x1b8] sm:$0xff]  ;;  %v186_v43 = vld [vmem:[#allocation4 + $0x1e8] sm:$0xff]  ;;  %v907_v44 = vmax.f32 %v906_v37, %v138_v36 }
  0x8e   :  { %v150_v47 = vld [vmem:[#allocation4 + $0xc8] sm:$0xff]  ;;  %v984_v48 = vmax.f32 %v174_v41, %v180_v42  ;;  %v192_v51 = vld [vmem:[#allocation4 + $0x218] sm:$0xff] }
  0x8f   :  { %4428 = vmatpush1.bf16.msra.mxu1 %v8017_v20  ;;  %v8018_v49 = vld [vmem:[#allocation6 + $0x214] ss:$24 sps:$4 sm:$0xff]   ;;  %v908_v53 = vmax.f32 %v907_v44, %v144_v40  ;;  %v156_v54 = vld [vmem:[#allocation4 + $0xf8] sm:$0xff]  ;;  %v8047_v58 = vld [vmem:[#allocation6 + $0x188] ss:$24 sps:$4 sm:$0xff]  }
  0x90   :  { %4301 = vmatpush1.bf16.msra.mxu0 %v7987_v13  ;;  %4429 = vmatprep.subr.bf16.mxu1 %v8021_v22  ;;  %v8045_v50 = vld [vmem:[#allocation6 + $0x18c] ss:$24 sps:$4 sm:$0xff]   ;;  %v228_v55 = vld [vmem:[#allocation4 + $0x338] sm:$0xff]  ;;  %v985_v57 = vmax.f32 %v984_v48, %v186_v43  ;;  %v8020_v63 = vld [vmem:[#allocation6 + $0x210] ss:$24 sps:$4 sm:$0xff]  }
  0x91   :  { %4302 = vmatprep.subr.bf16.mxu0 %v7988_v14  ;;  %v222_v52 = vld [vmem:[#allocation4 + $0x308] sm:$0xff]  ;;  %v909_v61 = vmax.f32 %v908_v53, %v150_v47  ;;  %v240_v0 = vld [vmem:[#allocation4 + $0x398] sm:$0xff] }
  0x92   :  { %v234_v56 = vld [vmem:[#allocation4 + $0x368] sm:$0xff]  ;;  %v1062_v62 = vmax.f32 %v222_v52, %v228_v55  ;;  %v276_v2 = vld [vmem:[#allocation4 + $0x4b8] sm:$0xff]  ;;  %v986_v3 = vmax.f32 %v985_v57, %v192_v51 }
  0x93   :  { %4430 = vmatpush1.bf16.msra.mxu1 %v8023_v24  ;;  %v162_v59 = vld [vmem:[#allocation4 + $0x128] sm:$0xff]  ;;  %v8024_v4 = vld [vmem:[#allocation6 + $0x244] ss:$24 sps:$4 sm:$0xff]   ;;  %v910_v8 = vmax.f32 %v909_v61, %v156_v54 }
  0x94   :  { %4303 = vmatpush1.bf16.msra.mxu0 %v7990_v17  ;;  %4431 = vmatprep.subr.bf16.mxu1 %v8027_v26  ;;  %v198_v60 = vld [vmem:[#allocation4 + $0x248] sm:$0xff]  ;;  %v168_v5 = vld [vmem:[#allocation4 + $0x158] sm:$0xff]  ;;  %v1063_v9 = vmax.f32 %v1062_v62, %v234_v56 }
  0x95   :  { %4304 = vmatprep.subr.bf16.mxu0 %v7991_v19  ;;  %v270_v1 = vld [vmem:[#allocation4 + $0x488] sm:$0xff]  ;;  %v204_v6 = vld [vmem:[#allocation4 + $0x278] sm:$0xff]  ;;  %v987_v14 = vmax.f32 %v986_v3, %v198_v60  ;;  %v911_v18 = vmax.f32 %v910_v8, %v162_v59 }
  0x96   :  { %v282_v7 = vld [vmem:[#allocation4 + $0x4e8] sm:$0xff]  ;;  %v1140_v10 = vmax.f32 %v270_v1, %v276_v2  ;;  %v288_v13 = vld [vmem:[#allocation4 + $0x518] sm:$0xff]  ;;  %v1064_v19 = vmax.f32 %v1063_v9, %v240_v0 }
  0x97   :  { %4432 = vmatpush1.bf16.msra.mxu1 %v8029_v28  ;;  %v210_v11 = vld [vmem:[#allocation4 + $0x2a8] sm:$0xff]  ;;  %v324_v16 = vld [vmem:[#allocation4 + $0x638] sm:$0xff] }
  0x98   :  { %4305 = vmatpush1.bf16.msra.mxu0 %v7993_v21  ;;  %4433 = vmatprep.subr.bf16.mxu1 %v8033_v30  ;;  %v246_v12 = vld [vmem:[#allocation4 + $0x3c8] sm:$0xff]  ;;  %v1141_v20 = vmax.f32 %v1140_v10, %v282_v7  ;;  %v8026_v21 = vld [vmem:[#allocation6 + $0x240] ss:$24 sps:$4 sm:$0xff]   ;;  %v8036_v52 = vld [vmem:[#allocation6 + $0x2a4] ss:$24 sps:$4 sm:$0xff]  }
  0x99   :  { %4306 = vmatprep.subr.bf16.mxu0 %v7994_v23  ;;  %v318_v15 = vld [vmem:[#allocation4 + $0x608] sm:$0xff]  ;;  %v216_v22 = vld [vmem:[#allocation4 + $0x2d8] sm:$0xff]  ;;  %v1065_v32 = vmax.f32 %v1064_v19, %v246_v12 }
  0x9a   :  { %v330_v17 = vld [vmem:[#allocation4 + $0x668] sm:$0xff]  ;;  %v252_v23 = vld [vmem:[#allocation4 + $0x3f8] sm:$0xff]  ;;  %v1218_v26 = vmax.f32 %v318_v15, %v324_v16  ;;  %v1142_v33 = vmax.f32 %v1141_v20, %v288_v13 }
  0x9b   :  { %4434 = vmatpush1.bf16.msra.mxu1 %v8035_v35  ;;  %v294_v24 = vld [vmem:[#allocation4 + $0x548] sm:$0xff]  ;;  %v372_v35 = vld [vmem:[#allocation4 + $0x7b8] sm:$0xff]  ;;  %v1066_v43 = vmax.f32 %v1065_v32, %v252_v23 }
  0x9c   :  { %4307 = vmatpush1.bf16.msra.mxu0 %v7996_v25  ;;  %4435 = vmatprep.subr.bf16.mxu1 %v8039_v39  ;;  %v988_v25 = vmax.f32 %v987_v14, %v204_v6  ;;  %v258_v28 = vld [vmem:[#allocation4 + $0x428] sm:$0xff]  ;;  %v264_v39 = vld [vmem:[#allocation4 + $0x458] sm:$0xff]  ;;  %v1143_v44 = vmax.f32 %v1142_v33, %v294_v24 }
  0x9d   :  { %4308 = vmatprep.subr.bf16.mxu0 %v8000_v27  ;;  %v8030_v27 = vld [vmem:[#allocation6 + $0x274] ss:$24 sps:$4 sm:$0xff]   ;;  %v384_v47 = vld [vmem:[#allocation4 + $0x818] sm:$0xff]  ;;  %v1067_v57 = vmax.f32 %v1066_v43, %v258_v28 }
  0x9e   :  { %v366_v30 = vld [vmem:[#allocation4 + $0x788] sm:$0xff]  ;;  %v989_v37 = vmax.f32 %v988_v25, %v210_v11  ;;  %v312_v53 = vld [vmem:[#allocation4 + $0x5d8] sm:$0xff] }
  0x9f   :  { %4436 = vmatpush1.bf16.msra.mxu1 %v8041_v46  ;;  %v378_v36 = vld [vmem:[#allocation4 + $0x7e8] sm:$0xff]  ;;  %v348_v54 = vld [vmem:[#allocation4 + $0x6f8] sm:$0xff]  ;;  %v1068_v6 = vmax.f32 %v1067_v57, %v264_v39 }
  0xa0   :  { %4309 = vmatpush1.bf16.msra.mxu0 %v8002_v29  ;;  %4437 = vmatprep.subr.bf16.mxu1 %v8045_v50  ;;  %v336_v29 = vld [vmem:[#allocation4 + $0x698] sm:$0xff]  ;;  %v306_v40 = vld [vmem:[#allocation4 + $0x5a8] sm:$0xff]  ;;  %v990_v50 = vmax.f32 %v989_v37, %v216_v22 }
  0xa1   :  { %4310 = vmatprep.subr.bf16.mxu0 %v8006_v31  ;;  %v912_v31 = vmax.f32 %v911_v18, %v168_v5  ;;  %v342_v41 = vld [vmem:[#allocation4 + $0x6c8] sm:$0xff]  ;;  %v432_v62 = vld [vmem:[#allocation4 + $0x998] sm:$0xff]  ;;  %v1069_v18 = vrot.slane %v1068_v6, 4 }
  0xa2   :  { %v8032_v46 = vld [vmem:[#allocation6 + $0x270] ss:$24 sps:$4 sm:$0xff]   ;;  %v468_v3 = vld [vmem:[#allocation4 + $0xab8] sm:$0xff] }
  0xa3   :  { %4438 = vmatpush1.bf16.msra.mxu1 %v8047_v58  ;;  %v913_v42 = vrot.slane %v912_v31, 4  ;;  %v414_v48 = vld [vmem:[#allocation4 + $0x908] sm:$0xff]  ;;  %v396_v9 = vld [vmem:[#allocation4 + $0x878] sm:$0xff] }
  0xa4   :  { %4311 = vmatpush1.bf16.msra.mxu0 %v8008_v34  ;;  %v300_v34 = vld [vmem:[#allocation4 + $0x578] sm:$0xff]  ;;  %v426_v55 = vld [vmem:[#allocation4 + $0x968] sm:$0xff] }
  0xa5   :  { %4312 = vmatprep.subr.bf16.mxu0 %v8012_v38  ;;  %v1219_v38 = vmax.f32 %v1218_v26, %v330_v17  ;;  %v914_v56 = vmax.f32 %v912_v31, %v913_v42  ;;  %v1144_v58 = vmax.f32 %v1143_v44, %v300_v34  ;;  %v354_v60 = vld [vmem:[#allocation4 + $0x728] sm:$0xff]  ;;  %v360_v14 = vld [vmem:[#allocation4 + $0x758] sm:$0xff]  ;;  %v1070_v31 = vmax.f32 %v1068_v6, %v1069_v18 }
  0xa6   :  { %v390_v61 = vld [vmem:[#allocation4 + $0x848] sm:$0xff]  ;;  %v480_v16 = vld [vmem:[#allocation4 + $0xb18] sm:$0xff] }
  0xa7   :  { %v1220_v51 = vmax.f32 %v1219_v38, %v336_v29  ;;  %v462_v2 = vld [vmem:[#allocation4 + $0xa88] sm:$0xff]  ;;  %v915_v5 = vrot.slane %v914_v56, 2  ;;  %v1145_v7 = vmax.f32 %v1144_v58, %v306_v40  ;;  %v444_v28 = vld [vmem:[#allocation4 + $0x9f8] sm:$0xff]  ;;  %v1071_v44 = vrot.slane %v1070_v31, 2 }
  0xa8   :  { %4313 = vmatpush1.bf16.msra.mxu0 %v8014_v45  ;;  %v1296_v45 = vmax.f32 %v366_v30, %v372_v35  ;;  %v1452_v13 = vmax.f32 %v462_v2, %v468_v3  ;;  %v438_v15 = vld [vmem:[#allocation4 + $0x9c8] sm:$0xff]  ;;  %v408_v34 = vld [vmem:[#allocation4 + $0x8d8] sm:$0xff] }
  0xa9   :  { %4314 = vmatprep.subr.bf16.mxu0 %v8018_v49  ;;  %v420_v49 = vld [vmem:[#allocation4 + $0x938] sm:$0xff]  ;;  %v1221_v0 = vmax.f32 %v1220_v51, %v342_v41  ;;  %v916_v17 = vmax.f32 %v914_v56, %v915_v5  ;;  %v1146_v19 = vmax.f32 %v1145_v7, %v312_v53  ;;  %v402_v22 = vld [vmem:[#allocation4 + $0x8a8] sm:$0xff]  ;;  %v1072_v57 = vmax.f32 %v1070_v31, %v1071_v44 }
  0xaa   :  { %v1297_v59 = vmax.f32 %v1296_v45, %v378_v36  ;;  %v1374_v1 = vmax.f32 %v414_v48, %v420_v49  ;;  %v486_v29 = vld [vmem:[#allocation4 + $0xb48] sm:$0xff]  ;;  %v516_v36 = vld [vmem:[#allocation4 + $0xc38] sm:$0xff] }
  0xab   :  { %v1222_v11 = vmax.f32 %v1221_v0, %v348_v54  ;;  %v917_v30 = vrot.slane %v916_v17, 1  ;;  %v1147_v32 = vrot.slane %v1146_v19, 4  ;;  %v510_v35 = vld [vmem:[#allocation4 + $0xc08] sm:$0xff]  ;;  %v492_v42 = vld [vmem:[#allocation4 + $0xb78] sm:$0xff] }
  0xac   :  { %4315 = vmatpush1.bf16.msra.mxu0 %v8020_v63  ;;  %v991_v63 = vrot.slane %v990_v50, 4  ;;  %v1298_v8 = vmax.f32 %v1297_v59, %v384_v47  ;;  %v1375_v12 = vmax.f32 %v1374_v1, %v426_v55  ;;  %v450_v41 = vld [vmem:[#allocation4 + $0xa28] sm:$0xff]  ;;  %v456_v48 = vld [vmem:[#allocation4 + $0xa58] sm:$0xff] }
  0xad   :  { %4316 = vmatprep.subr.bf16.mxu0 %v8024_v4  ;;  %v474_v4 = vld [vmem:[#allocation4 + $0xae8] sm:$0xff]  ;;  %v1223_v24 = vmax.f32 %v1222_v11, %v354_v60  ;;  %v9037_v43 = vmax.f32 %v916_v17, %v917_v30  ;;  %v1148_v45 = vmax.f32 %v1146_v19, %v1147_v32  ;;  %v564_v56 = vld [vmem:[#allocation4 + $0xdb8] sm:$0xff]  ;;  %v1530_v60 = vmax.f32 %v510_v35, %v516_v36 }
  0xae   :  { %v992_v10 = vmax.f32 %v990_v50, %v991_v63  ;;  %v1299_v20 = vmax.f32 %v1298_v8, %v390_v61  ;;  %v1376_v25 = vmax.f32 %v1375_v12, %v432_v62  ;;  %v1453_v26 = vmax.f32 %v1452_v13, %v474_v4  ;;  %v8044_v47 = vld [vmem:[#allocation6 + $0x2d0] ss:$24 sps:$4 sm:$0xff]   ;;  %v528_v61 = vld [vmem:[#allocation4 + $0xc98] sm:$0xff] }
  0xaf   :  { %v1224_v38 = vmax.f32 %v1223_v24, %v360_v14  ;;  %10104 = vst [vmem:[#allocation19_spill] sm:$0xff] %v9037_v43  ;;  %v522_v49 = vld [vmem:[#allocation4 + $0xc68] sm:$0xff]  ;;  %v1149_v58 = vrot.slane %v1148_v45, 2  ;;  %v504_v2 = vld [vmem:[#allocation4 + $0xbd8] sm:$0xff]  ;;  %v1073_v4 = vrot.slane %v1072_v57, 1 }
  0xb0   :  { %4317 = vmatpush1.bf16.msra.mxu0 %v8026_v21  ;;  %v8038_v21 = vld [vmem:[#allocation6 + $0x2a0] ss:$24 sps:$4 sm:$0xff]   ;;  %v993_v23 = vrot.slane %v992_v10, 2  ;;  %v1300_v33 = vmax.f32 %v1299_v20, %v396_v9  ;;  %v1377_v39 = vmax.f32 %v1376_v25, %v438_v15  ;;  %v1454_v40 = vmax.f32 %v1453_v26, %v480_v16  ;;  %v498_v54 = vld [vmem:[#allocation4 + $0xba8] sm:$0xff] }
  0xb1   :  { %4318 = vmatprep.subr.bf16.mxu0 %v8030_v27  ;;  %v8042_v27 = vld [vmem:[#allocation6 + $0x2d4] ss:$24 sps:$4 sm:$0xff]   ;;  %v1225_v51 = vrot.slane %v1224_v38, 4  ;;  %v1150_v5 = vmax.f32 %v1148_v45, %v1149_v58  ;;  %v1531_v7 = vmax.f32 %v1530_v60, %v522_v49  ;;  %v540_v15 = vld [vmem:[#allocation4 + $0xcf8] sm:$0xff]  ;;  %v9041_v17 = vmax.f32 %v1072_v57, %v1073_v4 }
  0xb2   :  { %v994_v37 = vmax.f32 %v992_v10, %v993_v23  ;;  %v1455_v53 = vmax.f32 %v1454_v40, %v486_v29  ;;  %v558_v55 = vld [vmem:[#allocation4 + $0xd88] sm:$0xff]  ;;  %v612_v10 = vld [vmem:[#allocation4 + $0xf38] sm:$0xff] }
  0xb3   :  { %v1226_v63 = vmax.f32 %v1224_v38, %v1225_v51  ;;  %v570_v3 = vld [vmem:[#allocation4 + $0xde8] sm:$0xff]  ;;  %v1608_v14 = vmax.f32 %v558_v55, %v564_v56  ;;  %v576_v16 = vld [vmem:[#allocation4 + $0xe18] sm:$0xff]  ;;  %10106 = vst [vmem:[#allocation21_spill] sm:$0xff] %v9041_v17  ;;  %v1151_v18 = vrot.slane %v1150_v5, 1  ;;  %v1532_v20 = vmax.f32 %v1531_v7, %v528_v61 }
  0xb4   :  { %4319 = vmatpush1.bf16.msra.mxu0 %v8032_v46  ;;  %v1301_v46 = vmax.f32 %v1300_v33, %v402_v22  ;;  %v995_v50 = vrot.slane %v994_v37, 1  ;;  %v1456_v1 = vmax.f32 %v1455_v53, %v492_v42  ;;  %v534_v8 = vld [vmem:[#allocation4 + $0xcc8] sm:$0xff]  ;;  %v660_v23 = vld [vmem:[#allocation4 + $0x10b8] sm:$0xff] }
  0xb5   :  { %4320 = vmatprep.subr.bf16.mxu0 %v8036_v52  ;;  %v1378_v52 = vmax.f32 %v1377_v39, %v444_v28  ;;  %v606_v9 = vld [vmem:[#allocation4 + $0xf08] sm:$0xff]  ;;  %v1227_v11 = vrot.slane %v1226_v63, 2  ;;  %v9043_v30 = vmax.f32 %v1150_v5, %v1151_v18  ;;  %v1533_v32 = vmax.f32 %v1532_v20, %v534_v8  ;;  %v624_v35 = vld [vmem:[#allocation4 + $0xf98] sm:$0xff] }
  0xb6   :  { %v1302_v59 = vmax.f32 %v1301_v46, %v408_v34  ;;  %v9039_v62 = vmax.f32 %v994_v37, %v995_v50  ;;  %v1457_v13 = vmax.f32 %v1456_v1, %v498_v54  ;;  %v654_v22 = vld [vmem:[#allocation4 + $0x1088] sm:$0xff]  ;;  %v1686_v33 = vmax.f32 %v606_v9, %v612_v10  ;;  %v552_v34 = vld [vmem:[#allocation4 + $0xd58] sm:$0xff] }
  0xb7   :  { %v1379_v0 = vmax.f32 %v1378_v52, %v450_v41  ;;  %v1228_v24 = vmax.f32 %v1226_v63, %v1227_v11  ;;  %v546_v28 = vld [vmem:[#allocation4 + $0xd28] sm:$0xff]  ;;  %10107 = vst [vmem:[#allocation22_spill] sm:$0xff] %v9043_v30  ;;  %v588_v41 = vld [vmem:[#allocation4 + $0xe78] sm:$0xff]  ;;  %v1534_v46 = vmax.f32 %v1533_v32, %v540_v15 }
  0xb8   :  { %4321 = vmatpush1.bf16.msra.mxu0 %v8038_v21  ;;  %10105 = vst [vmem:[#allocation20_spill] sm:$0xff] %v9039_v62  ;;  %v1303_v6 = vrot.slane %v1302_v59, 4  ;;  %v618_v21 = vld [vmem:[#allocation4 + $0xf68] sm:$0xff]  ;;  %v1458_v26 = vmax.f32 %v1457_v13, %v504_v2  ;;  %v708_v44 = vld [vmem:[#allocation4 + $0x1238] sm:$0xff] }
  0xb9   :  { %4322 = vmatprep.subr.bf16.mxu0 %v8042_v27  ;;  %v1380_v12 = vmax.f32 %v1379_v0, %v456_v48  ;;  %v1609_v27 = vmax.f32 %v1608_v14, %v570_v3  ;;  %v582_v29 = vld [vmem:[#allocation4 + $0xe48] sm:$0xff]  ;;  %v1229_v37 = vrot.slane %v1228_v24, 1  ;;  %v1764_v48 = vmax.f32 %v654_v22, %v660_v23  ;;  %v672_v51 = vld [vmem:[#allocation4 + $0x1118] sm:$0xff] }
  0xba   :  { %v1304_v19 = vmax.f32 %v1302_v59, %v1303_v6  ;;  %v666_v36 = vld [vmem:[#allocation4 + $0x10e8] sm:$0xff]  ;;  %v1459_v39 = vrot.slane %v1458_v26, 4  ;;  %v600_v56 = vld [vmem:[#allocation4 + $0xed8] sm:$0xff]  ;;  %v1535_v60 = vmax.f32 %v1534_v46, %v546_v28 }
  0xbb   :  { %v1381_v25 = vrot.slane %v1380_v12, 4  ;;  %v1610_v40 = vmax.f32 %v1609_v27, %v576_v16  ;;  %v702_v42 = vld [vmem:[#allocation4 + $0x1208] sm:$0xff]  ;;  %v9045_v52 = vmax.f32 %v1228_v24, %v1229_v37  ;;  %v636_v57 = vld [vmem:[#allocation4 + $0xff8] sm:$0xff]  ;;  %v1765_v63 = vmax.f32 %v1764_v48, %v666_v36 }
  0xbc   :  { %4323 = vmatpush1.bf16.msra.mxu0 %v8044_v47  ;;  %v1305_v31 = vrot.slane %v1304_v19, 2  ;;  %v1687_v47 = vmax.f32 %v1686_v33, %v618_v21  ;;  %v594_v49 = vld [vmem:[#allocation4 + $0xea8] sm:$0xff]  ;;  %v1460_v54 = vmax.f32 %v1458_v26, %v1459_v39  ;;  %v756_v2 = vld [vmem:[#allocation4 + $0x13b8] sm:$0xff]  ;;  %v1842_v6 = vmax.f32 %v702_v42, %v708_v44 }
  0xbd   :  { %v1382_v38 = vmax.f32 %v1380_v12, %v1381_v25  ;;  %v630_v50 = vld [vmem:[#allocation4 + $0xfc8] sm:$0xff]  ;;  %10108 = vst [vmem:[#allocation23_spill] sm:$0xff] %v9045_v52  ;;  %v1611_v55 = vmax.f32 %v1610_v40, %v582_v29  ;;  %v684_v8 = vld [vmem:[#allocation4 + $0x1178] sm:$0xff]  ;;  %v1536_v11 = vmax.f32 %v1535_v60, %v552_v34  ;;  %v1766_v13 = vmax.f32 %v1765_v63, %v672_v51 }
  0xbe   :  { %v1306_v45 = vmax.f32 %v1304_v19, %v1305_v31  ;;  %v714_v58 = vld [vmem:[#allocation4 + $0x1268] sm:$0xff]  ;;  %v1688_v61 = vmax.f32 %v1687_v47, %v624_v35  ;;  %v1461_v4 = vrot.slane %v1460_v54, 2  ;;  %v720_v9 = vld [vmem:[#allocation4 + $0x1298] sm:$0xff] }
  0xbf   :  { %v1383_v53 = vrot.slane %v1382_v38, 2  ;;  %v678_v0 = vld [vmem:[#allocation4 + $0x1148] sm:$0xff]  ;;  %v1612_v5 = vmax.f32 %v1611_v55, %v588_v41  ;;  %v648_v14 = vld [vmem:[#allocation4 + $0x1058] sm:$0xff]  ;;  %v1843_v22 = vmax.f32 %v1842_v6, %v714_v58  ;;  %v1537_v26 = vrot.slane %v1536_v11, 4 }
  0xc0   :  { %v1307_v59 = vrot.slane %v1306_v45, 1  ;;  %v750_v1 = vld [vmem:[#allocation4 + $0x1388] sm:$0xff]  ;;  %v1689_v12 = vmax.f32 %v1688_v61, %v630_v50  ;;  %v1462_v20 = vmax.f32 %v1460_v54, %v1461_v4  ;;  %v732_v23 = vld [vmem:[#allocation4 + $0x12f8] sm:$0xff]  ;;  %v1767_v28 = vmax.f32 %v1766_v13, %v678_v0 }
  0xc1   :  { %v1384_v3 = vmax.f32 %v1382_v38, %v1383_v53  ;;  %v642_v7 = vld [vmem:[#allocation4 + $0x1028] sm:$0xff]  ;;  %v1613_v21 = vmax.f32 %v1612_v5, %v594_v49  ;;  %v804_v25 = vld [vmem:[#allocation4 + $0x1538] sm:$0xff]  ;;  %v1920_v29 = vmax.f32 %v750_v1, %v756_v2  ;;  %v1844_v37 = vmax.f32 %v1843_v22, %v720_v9 }
  0xc2   :  { %v9047_v10 = vmax.f32 %v1306_v45, %v1307_v59  ;;  %v690_v15 = vld [vmem:[#allocation4 + $0x11a8] sm:$0xff]  ;;  %v1690_v27 = vmax.f32 %v1689_v12, %v636_v57  ;;  %v768_v31 = vld [vmem:[#allocation4 + $0x1418] sm:$0xff]  ;;  %v1463_v35 = vrot.slane %v1462_v20, 1  ;;  %v1538_v39 = vmax.f32 %v1536_v11, %v1537_v26 }
  0xc3   :  { %v726_v16 = vld [vmem:[#allocation4 + $0x12c8] sm:$0xff]  ;;  %v1385_v19 = vrot.slane %v1384_v3, 1  ;;  %v1614_v36 = vmax.f32 %v1613_v21, %v600_v56  ;;  %v852_v38 = vld [vmem:[#allocation4 + $0x16b8] sm:$0xff]  ;;  %v1768_v41 = vmax.f32 %v1767_v28, %v684_v8 }
  0xc4   :  { %10109 = vst [vmem:[#allocation24_spill] sm:$0xff] %v9047_v10  ;;  %v762_v18 = vld [vmem:[#allocation4 + $0x13e8] sm:$0xff]  ;;  %v1691_v40 = vmax.f32 %v1690_v27, %v642_v7  ;;  %v696_v44 = vld [vmem:[#allocation4 + $0x11d8] sm:$0xff]  ;;  %v9051_v46 = vmax.f32 %v1462_v20, %v1463_v35  ;;  %v1845_v48 = vmax.f32 %v1844_v37, %v726_v16  ;;  %v1539_v55 = vrot.slane %v1538_v39, 2 }
  0xc5   :  { %v798_v24 = vld [vmem:[#allocation4 + $0x1508] sm:$0xff]  ;;  %v9049_v34 = vmax.f32 %v1384_v3, %v1385_v19  ;;  %v1921_v42 = vmax.f32 %v1920_v29, %v762_v18  ;;  %v1615_v47 = vrot.slane %v1614_v36, 4  ;;  %v8050_v50 = vld [vmem:[#allocation6 + $0x304] ss:$24 sps:$4 sm:$0xff]   ;;  %v1769_v56 = vmax.f32 %v1768_v41, %v690_v15 }
  0xc6   :  { %v810_v32 = vld [vmem:[#allocation4 + $0x1568] sm:$0xff]  ;;  %10111 = vst [vmem:[#allocation26_spill] sm:$0xff] %v9051_v46  ;;  %v1998_v49 = vmax.f32 %v798_v24, %v804_v25  ;;  %v816_v53 = vld [vmem:[#allocation4 + $0x1598] sm:$0xff]  ;;  %v1692_v57 = vmax.f32 %v1691_v40, %v648_v14  ;;  %v1846_v61 = vmax.f32 %v1845_v48, %v732_v23  ;;  %4335 = vmatprep.subr.bf16.mxu0 %v8050_v50 }
  0xc7   :  { %v846_v33 = vld [vmem:[#allocation4 + $0x1688] sm:$0xff]  ;;  %10110 = vst [vmem:[#allocation25_spill] sm:$0xff] %v9049_v34  ;;  %v1922_v58 = vmax.f32 %v1921_v42, %v768_v31  ;;  %v780_v59 = vld [vmem:[#allocation4 + $0x1478] sm:$0xff]  ;;  %v1616_v60 = vmax.f32 %v1614_v36, %v1615_v47  ;;  %v1540_v4 = vmax.f32 %v1538_v39, %v1539_v55  ;;  %v1770_v6 = vmax.f32 %v1769_v56, %v696_v44 }
  0xc8   :  { %v774_v45 = vld [vmem:[#allocation4 + $0x1448] sm:$0xff]  ;;  %v1999_v63 = vmax.f32 %v1998_v49, %v810_v32  ;;  %v2076_v0 = vmax.f32 %v846_v33, %v852_v38  ;;  %v744_v1 = vld [vmem:[#allocation4 + $0x1358] sm:$0xff]  ;;  %v1693_v5 = vrot.slane %v1692_v57, 4  ;;  %v2142_v44 = vpack.c.bf16 %v9037_v43, %v9037_v43 }
  0xc9   :  { %v738_v51 = vld [vmem:[#allocation4 + $0x1328] sm:$0xff]  ;;  %v864_v3 = vld [vmem:[#allocation4 + $0x1718] sm:$0xff]  ;;  %v1923_v7 = vmax.f32 %v1922_v58, %v774_v45  ;;  %v1617_v9 = vrot.slane %v1616_v60, 2  ;;  %v1541_v16 = vrot.slane %v1540_v4, 1  ;;  %v1771_v19 = vrot.slane %v1770_v6, 4 }
  0xca   :  { %v858_v54 = vld [vmem:[#allocation4 + $0x16e8] sm:$0xff]  ;;  %v1847_v11 = vmax.f32 %v1846_v61, %v738_v51  ;;  %v2000_v12 = vmax.f32 %v1999_v63, %v816_v53  ;;  %v828_v14 = vld [vmem:[#allocation4 + $0x15f8] sm:$0xff]  ;;  %v1694_v18 = vmax.f32 %v1692_v57, %v1693_v5  ;;  %v2148_v55 = vpack.c.bf16 %v9039_v62, %v9039_v62 }
  0xcb   :  { %v822_v2 = vld [vmem:[#allocation4 + $0x15c8] sm:$0xff]  ;;  %v2077_v13 = vmax.f32 %v2076_v0, %v858_v54  ;;  %v1924_v20 = vmax.f32 %v1923_v7, %v780_v59  ;;  %v792_v21 = vld [vmem:[#allocation4 + $0x14d8] sm:$0xff]  ;;  %v1618_v22 = vmax.f32 %v1616_v60, %v1617_v9  ;;  %v9053_v28 = vmax.f32 %v1540_v4, %v1541_v16 }
  0xcc   :  { %v786_v8 = vld [vmem:[#allocation4 + $0x14a8] sm:$0xff]  ;;  %v1848_v23 = vmax.f32 %v1847_v11, %v744_v1  ;;  %v2001_v24 = vmax.f32 %v2000_v12, %v822_v2  ;;  %v876_v27 = vld [vmem:[#allocation4 + $0x1778] sm:$0xff]  ;;  %v1695_v29 = vrot.slane %v1694_v18, 2  ;;  %v1772_v31 = vmax.f32 %v1770_v6, %v1771_v19 }
  0xcd   :  { %v870_v15 = vld [vmem:[#allocation4 + $0x1748] sm:$0xff]  ;;  %v2078_v25 = vmax.f32 %v2077_v13, %v864_v3  ;;  %10112 = vst [vmem:[#allocation27_spill] sm:$0xff] %v9053_v28  ;;  %v1925_v32 = vmax.f32 %v1924_v20, %v786_v8  ;;  %v1619_v33 = vrot.slane %v1618_v22, 1  ;;  %v840_v38 = vld [vmem:[#allocation4 + $0x1658] sm:$0xff]  ;;  %v2154_v59 = vpack.c.bf16 %v9041_v17, %v9041_v17 }
  0xce   :  { %v834_v26 = vld [vmem:[#allocation4 + $0x1628] sm:$0xff]  ;;  %v1849_v35 = vrot.slane %v1848_v23, 4  ;;  %v2002_v36 = vmax.f32 %v2001_v24, %v828_v14  ;;  %v1696_v40 = vmax.f32 %v1694_v18, %v1695_v29  ;;  %v1773_v41 = vrot.slane %v1772_v31, 2  ;;  %v888_v50 = vld [vmem:[#allocation4 + $0x17d8] sm:$0xff] }
  0xcf   :  { %v2079_v37 = vmax.f32 %v2078_v25, %v870_v15  ;;  %v882_v39 = vld [vmem:[#allocation4 + $0x17a8] sm:$0xff]  ;;  %v1926_v42 = vmax.f32 %v1925_v32, %v792_v21  ;;  %v9057_v45 = vmax.f32 %v1618_v22, %v1619_v33  ;;  %v2160_v0 = vpack.c.bf16 %v9043_v30, %v9043_v30 }
  0xd0   :  { %v1850_v47 = vmax.f32 %v1848_v23, %v1849_v35  ;;  %v2003_v48 = vmax.f32 %v2002_v36, %v834_v26  ;;  %v1697_v51 = vrot.slane %v1696_v40, 1  ;;  %v1774_v53 = vmax.f32 %v1772_v31, %v1773_v41 }
  0xd1   :  { %10113 = vst [vmem:[#allocation28_spill] sm:$0xff] %v9057_v45  ;;  %v2080_v49 = vmax.f32 %v2079_v37, %v876_v27  ;;  %v1927_v54 = vrot.slane %v1926_v42, 4  ;;  %v2166_v4 = vpack.c.bf16 %v9045_v52, %v9045_v52  ;;  %v2172_v7 = vpack.c.bf16 %v9047_v10, %v9047_v10  ;;  %v779_v52 = vld [vmem:[#allocation4 + $0x1470] sm:$0xff] }
  0xd2   :  { %v1851_v57 = vrot.slane %v1850_v47, 2  ;;  %v2004_v56 = vmax.f32 %v2003_v48, %v840_v38  ;;  %v9063_v60 = vmax.f32 %v1696_v40, %v1697_v51  ;;  %v1775_v61 = vrot.slane %v1774_v53, 1 }
  0xd3   :  { %v2081_v58 = vmax.f32 %v2080_v49, %v882_v39  ;;  %v1928_v63 = vmax.f32 %v1926_v42, %v1927_v54  ;;  %v2178_v8 = vpack.c.bf16 %v9049_v34, %v9049_v34  ;;  %v2184_v13 = vpack.c.bf16 %v9051_v46, %v9051_v46  ;;  %v125_v42 = vld [vmem:[#allocation4] sm:$0xff] }
  0xd4   :  { %10114 = vst [vmem:[#allocation29_spill] sm:$0xff] %v9063_v60  ;;  %v1852_v1 = vmax.f32 %v1850_v47, %v1851_v57  ;;  %v2005_v2 = vrot.slane %v2004_v56, 4  ;;  %v9069_v5 = vmax.f32 %v1774_v53, %v1775_v61  ;;  %v2190_v15 = vpack.c.bf16 %v9053_v28, %v9053_v28  ;;  %v137_v57 = vld [vmem:[#allocation4 + $0x60] sm:$0xff] }
  0xd5   :  { %v2082_v3 = vmax.f32 %v2081_v58, %v888_v50  ;;  %v1929_v6 = vrot.slane %v1928_v63, 2  ;;  %v2196_v16 = vpack.c.bf16 %v9057_v45, %v9057_v45  ;;  %v2202_v18 = vpack.c.bf16 %v9063_v60, %v9063_v60  ;;  %v179_v58 = vld [vmem:[#allocation4 + $0x1b0] sm:$0xff]  ;;  %v8179_v28 = vld [vmem:[#allocation6 + $0x5ac] ss:$24 sps:$4 sm:$0xff]  }
  0xd6   :  { %10115 = vst [vmem:[#allocation30_spill] sm:$0xff] %v9069_v5  ;;  %v1853_v9 = vrot.slane %v1852_v1, 1  ;;  %v2006_v11 = vmax.f32 %v2004_v56, %v2005_v2  ;;  %v2208_v22 = vpack.c.bf16 %v9069_v5, %v9069_v5  ;;  %v2654_v24 = vunpack.c.l.b16 %v2142_v44  ;;  %v131_v44 = vld [vmem:[#allocation4 + $0x30] sm:$0xff]  ;;  %v173_v56 = vld [vmem:[#allocation4 + $0x180] sm:$0xff] }
  0xd7   :  { %v2083_v12 = vrot.slane %v2082_v3, 4  ;;  %v1930_v14 = vmax.f32 %v1928_v63, %v1929_v6  ;;  %v2660_v25 = vunpack.c.l.b16 %v2148_v55  ;;  %v2666_v26 = vunpack.c.l.b16 %v2154_v59  ;;  %v821_v5 = vld [vmem:[#allocation4 + $0x15c0] sm:$0xff] }
  0xd8   :  { %v9083_v19 = vmax.f32 %v1852_v1, %v1853_v9  ;;  %v2007_v20 = vrot.slane %v2006_v11, 2  ;;  %v2672_v32 = vunpack.c.l.b16 %v2160_v0  ;;  %v2678_v35 = vunpack.c.l.b16 %v2166_v4  ;;  %v143_v0 = vld [vmem:[#allocation4 + $0x90] sm:$0xff]  ;;  %v185_v1 = vld [vmem:[#allocation4 + $0x1e0] sm:$0xff] }
  0xd9   :  { %v2084_v21 = vmax.f32 %v2082_v3, %v2083_v12  ;;  %v1931_v23 = vrot.slane %v1930_v14, 1  ;;  %v2684_v36 = vunpack.c.l.b16 %v2172_v7  ;;  %v2690_v37 = vunpack.c.l.b16 %v2178_v8  ;;  %v149_v8 = vld [vmem:[#allocation4 + $0xc0] sm:$0xff]  ;;  %v191_v9 = vld [vmem:[#allocation4 + $0x210] sm:$0xff] }
  0xda   :  { %10116 = vst [vmem:[#allocation31_spill] sm:$0xff] %v9083_v19  ;;  %v2008_v27 = vmax.f32 %v2006_v11, %v2007_v20  ;;  %v2214_v31 = vpack.c.bf16 %v9083_v19, %v9083_v19  ;;  %v2696_v40 = vunpack.c.l.b16 %v2184_v13  ;;  %v2702_v41 = vunpack.c.l.b16 %v2190_v15  ;;  %v221_v11 = vld [vmem:[#allocation4 + $0x300] sm:$0xff]  ;;  %v227_v12 = vld [vmem:[#allocation4 + $0x330] sm:$0xff] }
  0xdb   :  { %v2085_v29 = vrot.slane %v2084_v21, 2  ;;  %v9089_v33 = vmax.f32 %v1930_v14, %v1931_v23  ;;  %v2708_v48 = vunpack.c.l.b16 %v2196_v16  ;;  %v2714_v49 = vunpack.c.l.b16 %v2202_v18  ;;  %v233_v15 = vld [vmem:[#allocation4 + $0x360] sm:$0xff]  ;;  %v275_v18 = vld [vmem:[#allocation4 + $0x4b0] sm:$0xff] }
  0xdc   :  { %v2009_v38 = vrot.slane %v2008_v27, 1  ;;  %v2720_v50 = vunpack.c.l.b16 %v2208_v22  ;;  %v2726_v54 = vunpack.c.l.b16 %v2214_v31  ;;  %v2763_v55 = vsel %vm2749_vm0, %v2660_v25, %v2654_v24  ;;  %v269_v16 = vld [vmem:[#allocation4 + $0x480] sm:$0xff]  ;;  %v323_v31 = vld [vmem:[#allocation4 + $0x630] sm:$0xff] }
  0xdd   :  { %10117 = vst [vmem:[#allocation32_spill] sm:$0xff] %v9089_v33  ;;  %v2086_v39 = vmax.f32 %v2084_v21, %v2085_v29  ;;  %v2220_v47 = vpack.c.bf16 %v9089_v33, %v9089_v33  ;;  %v2764_v61 = vsel %vm2751_vm1, %v2666_v26, %v2763_v55  ;;  %v2805_v63 = vsel %vm2749_vm0, %v2708_v48, %v2702_v41  ;;  %v155_v26 = vld [vmem:[#allocation4 + $0xf0] sm:$0xff]  ;;  %v317_v29 = vld [vmem:[#allocation4 + $0x600] sm:$0xff] }
  0xde   :  { %v9093_v51 = vmax.f32 %v2008_v27, %v2009_v38  ;;  %v893_v2 = vmax.f32 %v125_v42, %v131_v44  ;;  %v2765_v6 = vsel %vm2753_vm2, %v2672_v32, %v2764_v61  ;;  %v2806_v7 = vsel %vm2751_vm1, %v2714_v49, %v2805_v63  ;;  %v197_v27 = vld [vmem:[#allocation4 + $0x240] sm:$0xff]  ;;  %v419_v42 = vld [vmem:[#allocation4 + $0x930] sm:$0xff] }
  0xdf   :  { %v2087_v53 = vrot.slane %v2086_v39, 1  ;;  %v2732_v59 = vunpack.c.l.b16 %v2220_v47  ;;  %v2766_v13 = vsel %vm2755_vm3, %v2678_v35, %v2765_v6  ;;  %v2807_v14 = vsel %vm2753_vm2, %v2720_v50, %v2806_v7  ;;  %v365_v32 = vld [vmem:[#allocation4 + $0x780] sm:$0xff]  ;;  %v683_v19 = vld [vmem:[#allocation4 + $0x1170] sm:$0xff] }
  0xe0   :  { %10118 = vst [vmem:[#allocation33_spill] sm:$0xff] %v9093_v51  ;;  %v2226_v4 = vpack.c.bf16 %v9093_v51, %v9093_v51  ;;  %v894_v20 = vmax.f32 %v893_v2, %v137_v57  ;;  %v971_v21 = vmax.f32 %v173_v56, %v179_v58  ;;  %v2767_v24 = vsel %vm2757_vm4, %v2684_v36, %v2766_v13  ;;  %v413_v41 = vld [vmem:[#allocation4 + $0x900] sm:$0xff]  ;;  %v467_v13 = vld [vmem:[#allocation4 + $0xab0] sm:$0xff] }
  0xe1   :  { %v9098_v3 = vmax.f32 %v2086_v39, %v2087_v53  ;;  %v2808_v25 = vsel %vm2755_vm3, %v2726_v54, %v2807_v14  ;;  %v2768_v35 = vsel %vm2759_vm5, %v2690_v37, %v2767_v24  ;;  %v371_v39 = vld [vmem:[#allocation4 + $0x7b0] sm:$0xff]  ;;  %v161_v50 = vld [vmem:[#allocation4 + $0x120] sm:$0xff]  ;;  %v1049_v57 = vmax.f32 %v221_v11, %v227_v12 }
  0xe2   :  { %v2738_v23 = vunpack.c.l.b16 %v2226_v4  ;;  %v2809_v38 = vsel %vm2757_vm4, %v2732_v59, %v2808_v25  ;;  %v895_v44 = vmax.f32 %v894_v20, %v143_v0  ;;  %v972_v47 = vmax.f32 %v971_v21, %v185_v1  ;;  %v203_v53 = vld [vmem:[#allocation4 + $0x270] sm:$0xff]  ;;  %v281_v55 = vld [vmem:[#allocation4 + $0x4e0] sm:$0xff] }
  0xe3   :  { %10119 = vst [vmem:[#allocation34_spill] sm:$0xff] %v9098_v3  ;;  %v2232_v22 = vpack.c.bf16 %v9098_v3, %v9098_v3  ;;  %v2769_v49 = vsel %vm2761_vm6, %v2696_v40, %v2768_v35  ;;  %v239_v54 = vld [vmem:[#allocation4 + $0x390] sm:$0xff]  ;;  %v245_v56 = vld [vmem:[#allocation4 + $0x3c0] sm:$0xff]  ;;  %v1127_v2 = vmax.f32 %v269_v16, %v275_v18  ;;  %v1205_v4 = vmax.f32 %v317_v29, %v323_v31 }
  0xe4   :  { %v2810_v36 = vsel %vm2759_vm5, %v2738_v23, %v2809_v38  ;;  %v329_v58 = vld [vmem:[#allocation4 + $0x660] sm:$0xff]  ;;  %v896_v59 = vmax.f32 %v895_v44, %v149_v8  ;;  %v973_v63 = vmax.f32 %v972_v47, %v191_v9  ;;  %v167_v1 = vld [vmem:[#allocation4 + $0x150] sm:$0xff]  ;;  %v1050_v14 = vmax.f32 %v1049_v57, %v233_v15 }
  0xe5   :  { %v2744_v48 = vunpack.c.l.b16 %v2232_v22  ;;  %v377_v37 = vld [vmem:[#allocation4 + $0x7e0] sm:$0xff]  ;;  %v287_v40 = vld [vmem:[#allocation4 + $0x510] sm:$0xff]  ;;  %v1283_v20 = vmax.f32 %v365_v32, %v371_v39  ;;  %v1361_v21 = vmax.f32 %v413_v41, %v419_v42  ;;  %v1128_v9 = vmax.f32 %v1127_v2, %v281_v55 }
  0xe6   :  { %v425_v61 = vld [vmem:[#allocation4 + $0x960] sm:$0xff]  ;;  %v335_v11 = vld [vmem:[#allocation4 + $0x690] sm:$0xff]  ;;  %v897_v24 = vmax.f32 %v896_v59, %v155_v26  ;;  %v974_v8 = vmax.f32 %v973_v63, %v197_v27  ;;  %v1051_v31 = vmax.f32 %v1050_v14, %v239_v54  ;;  %v1206_v35 = vmax.f32 %v1205_v4, %v329_v58 }
  0xe7   :  { %v2811_v0 = vsel %vm2761_vm6, %v2744_v48, %v2810_v36  ;;  %v209_v6 = vld [vmem:[#allocation4 + $0x2a0] sm:$0xff]  ;;  %v383_v12 = vld [vmem:[#allocation4 + $0x810] sm:$0xff]  ;;  %v1284_v38 = vmax.f32 %v1283_v20, %v377_v37  ;;  %v1362_v44 = vmax.f32 %v1361_v21, %v425_v61  ;;  %v1129_v47 = vmax.f32 %v1128_v9, %v287_v40 }
  0xe8   :  { %v461_v7 = vld [vmem:[#allocation4 + $0xa80] sm:$0xff]  ;;  %v9115_v22 = vpack.c.b16 %v2811_v0, %v2769_v49  ;;  %v431_v23 = vld [vmem:[#allocation4 + $0x990] sm:$0xff]  ;;  %v898_v41 = vmax.f32 %v897_v24, %v161_v50  ;;  %v975_v42 = vmax.f32 %v974_v8, %v203_v53  ;;  %v1052_v36 = vmax.f32 %v1051_v31, %v245_v56 }
  0xe9   :  { %v215_v16 = vld [vmem:[#allocation4 + $0x2d0] sm:$0xff]  ;;  %v293_v25 = vld [vmem:[#allocation4 + $0x540] sm:$0xff]  ;;  %v1439_v48 = vmax.f32 %v461_v7, %v467_v13  ;;  %v1207_v55 = vmax.f32 %v1206_v35, %v335_v11  ;;  %v1285_v57 = vmax.f32 %v1284_v38, %v383_v12  ;;  %v1363_v59 = vmax.f32 %v1362_v44, %v431_v23 }
  0xea   :  { %v251_v18 = vld [vmem:[#allocation4 + $0x3f0] sm:$0xff]  ;;  %v473_v29 = vld [vmem:[#allocation4 + $0xae0] sm:$0xff]  ;;  %4324 = vmatprep.mubr.bf16.mxu0 %v9115_v22  ;;  %4453 = vmatprep.mubr.bf16.mxu1 %v9115_v22  ;;  %v899_v61 = vmax.f32 %v898_v41, %v167_v1  ;;  %v976_v63 = vmax.f32 %v975_v42, %v209_v6  ;;  %v1130_v2 = vmax.f32 %v1129_v47, %v293_v25 }
  0xeb   :  { %v341_v15 = vld [vmem:[#allocation4 + $0x6c0] sm:$0xff]  ;;  %v299_v27 = vld [vmem:[#allocation4 + $0x570] sm:$0xff]  ;;  %v1440_v4 = vmax.f32 %v1439_v48, %v473_v29  ;;  %v1053_v40 = vmax.f32 %v1052_v36, %v251_v18 }
  0xec   :  { %v389_v32 = vld [vmem:[#allocation4 + $0x840] sm:$0xff]  ;;  %v479_v49 = vld [vmem:[#allocation4 + $0xb10] sm:$0xff]  ;;  %v1208_v7 = vmax.f32 %v1207_v55, %v341_v15  ;;  %v900_v11 = vrot.slane %v899_v61, 4  ;;  %v977_v12 = vmax.f32 %v976_v63, %v215_v16  ;;  %v1131_v23 = vmax.f32 %v1130_v2, %v299_v27 }
  0xed   :  { %v437_v39 = vld [vmem:[#allocation4 + $0x9c0] sm:$0xff]  ;;  %v347_v54 = vld [vmem:[#allocation4 + $0x6f0] sm:$0xff]  ;;  %v1286_v13 = vmax.f32 %v1285_v57, %v389_v32  ;;  %v1441_v24 = vmax.f32 %v1440_v4, %v479_v49 }
  0xee   :  { %v257_v26 = vld [vmem:[#allocation4 + $0x420] sm:$0xff]  ;;  %v395_v58 = vld [vmem:[#allocation4 + $0x870] sm:$0xff]  ;;  %v1364_v14 = vmax.f32 %v1363_v59, %v437_v39  ;;  %v1209_v6 = vmax.f32 %v1208_v7, %v347_v54  ;;  %v901_v18 = vmax.f32 %v899_v61, %v900_v11  ;;  %v978_v44 = vrot.slane %v977_v12, 4 }
  0xef   :  { %v443_v37 = vld [vmem:[#allocation4 + $0x9f0] sm:$0xff]  ;;  %v305_v53 = vld [vmem:[#allocation4 + $0x5a0] sm:$0xff]  ;;  %v1054_v1 = vmax.f32 %v1053_v40, %v257_v26  ;;  %v1287_v25 = vmax.f32 %v1286_v13, %v395_v58 }
  0xf0   :  { %v263_v50 = vld [vmem:[#allocation4 + $0x450] sm:$0xff]  ;;  %v485_v0 = vld [vmem:[#allocation4 + $0xb40] sm:$0xff]  ;;  %v1365_v29 = vmax.f32 %v1364_v14, %v443_v37  ;;  %v1132_v15 = vmax.f32 %v1131_v23, %v305_v53  ;;  %v902_v27 = vrot.slane %v901_v18, 2  ;;  %v979_v49 = vmax.f32 %v977_v12, %v978_v44 }
  0xf1   :  { %v353_v56 = vld [vmem:[#allocation4 + $0x720] sm:$0xff]  ;;  %v311_v8 = vld [vmem:[#allocation4 + $0x5d0] sm:$0xff]  ;;  %v1442_v32 = vmax.f32 %v1441_v24, %v485_v0  ;;  %v1055_v42 = vmax.f32 %v1054_v1, %v263_v50 }
  0xf2   :  { %v401_v20 = vld [vmem:[#allocation4 + $0x8a0] sm:$0xff]  ;;  %v491_v9 = vld [vmem:[#allocation4 + $0xb70] sm:$0xff]  ;;  %v1210_v47 = vmax.f32 %v1209_v6, %v353_v56  ;;  %v1133_v36 = vmax.f32 %v1132_v15, %v311_v8  ;;  %v9119_v61 = vmax.f32 %v901_v18, %v902_v27  ;;  %v980_v63 = vrot.slane %v979_v49, 2 }
  0xf3   :  { %v449_v21 = vld [vmem:[#allocation4 + $0xa20] sm:$0xff]  ;;  %v359_v31 = vld [vmem:[#allocation4 + $0x750] sm:$0xff]  ;;  %v1288_v16 = vmax.f32 %v1287_v25, %v401_v20  ;;  %v1443_v26 = vmax.f32 %v1442_v32, %v491_v9  ;;  %v1056_v57 = vrot.slane %v1055_v42, 4 }
  0xf4   :  { %v407_v35 = vld [vmem:[#allocation4 + $0x8d0] sm:$0xff]  ;;  %v497_v39 = vld [vmem:[#allocation4 + $0xba0] sm:$0xff]  ;;  %v1366_v48 = vmax.f32 %v1365_v29, %v449_v21  ;;  %v1211_v59 = vmax.f32 %v1210_v47, %v359_v31  ;;  %v1134_v2 = vrot.slane %v1133_v36, 4  ;;  %v904_v14 = vrot.slane %v9119_v61, 1 }
  0xf5   :  { %v455_v38 = vld [vmem:[#allocation4 + $0xa50] sm:$0xff]  ;;  %v1289_v54 = vmax.f32 %v1288_v16, %v407_v35  ;;  %v1444_v4 = vmax.f32 %v1443_v26, %v497_v39  ;;  %v509_v50 = vld [vmem:[#allocation4 + $0xc00] sm:$0xff]  ;;  %v1057_v0 = vmax.f32 %v1055_v42, %v1056_v57  ;;  %v981_v56 = vmax.f32 %v979_v49, %v980_v63 }
  0xf6   :  { %v503_v41 = vld [vmem:[#allocation4 + $0xbd0] sm:$0xff]  ;;  %v1367_v58 = vmax.f32 %v1366_v48, %v455_v38  ;;  %v1212_v40 = vrot.slane %v1211_v59, 4  ;;  %v1135_v20 = vmax.f32 %v1133_v36, %v1134_v2  ;;  %v8057_v11 = vld [vmem:[#allocation6 + $0x1ec] ss:$24 sps:$4 sm:$0xff]   ;;  %v8059_v12 = vld [vmem:[#allocation6 + $0x1e8] ss:$24 sps:$4 sm:$0xff]  }
  0xf7   :  { %v8051_v55 = vld [vmem:[#allocation6 + $0x1bc] ss:$24 sps:$4 sm:$0xff]   ;;  %v8053_v37 = vld [vmem:[#allocation6 + $0x1b8] ss:$24 sps:$4 sm:$0xff]   ;;  %v1290_v7 = vrot.slane %v1289_v54, 4  ;;  %v1445_v21 = vmax.f32 %v1444_v4, %v503_v41  ;;  %v521_v23 = vld [vmem:[#allocation4 + $0xc60] sm:$0xff] }
  0xf8   :  { %4439 = vmatprep.subr.bf16.mxu1 %v8051_v55  ;;  %v515_v53 = vld [vmem:[#allocation4 + $0xc30] sm:$0xff]  ;;  %v1368_v13 = vrot.slane %v1367_v58, 4  ;;  %v557_v24 = vld [vmem:[#allocation4 + $0xd80] sm:$0xff]  ;;  %v1058_v9 = vrot.slane %v1057_v0, 2  ;;  %v1213_v1 = vmax.f32 %v1211_v59, %v1212_v40  ;;  %v982_v29 = vrot.slane %v981_v56, 1 }
  0xf9   :  { %4440 = vmatpush1.bf16.msra.mxu1 %v8053_v37  ;;  %v563_v8 = vld [vmem:[#allocation4 + $0xdb0] sm:$0xff]  ;;  %v1291_v6 = vmax.f32 %v1289_v54, %v1290_v7  ;;  %v1136_v31 = vrot.slane %v1135_v20, 2  ;;  %v1446_v35 = vrot.slane %v1445_v21, 4  ;;  %v569_v44 = vld [vmem:[#allocation4 + $0xde0] sm:$0xff]  ;;  %v1517_v49 = vmax.f32 %v509_v50, %v515_v53 }
  0xfa   :  { %v1369_v25 = vmax.f32 %v1367_v58, %v1368_v13  ;;  %4441 = vmatprep.subr.bf16.mxu1 %v8057_v11  ;;  %v8063_v38 = vld [vmem:[#allocation6 + $0x21c] ss:$24 sps:$4 sm:$0xff]   ;;  %v1059_v15 = vmax.f32 %v1057_v0, %v1058_v9  ;;  %v1214_v32 = vrot.slane %v1213_v1, 2  ;;  %v8065_v42 = vld [vmem:[#allocation6 + $0x218] ss:$24 sps:$4 sm:$0xff]   ;;  %v9124_v47 = vld [vmem:[#allocation4 + $0xf00] sm:$0xff] }
  0xfb   :  { %v9122_v18 = vld [vmem:[#allocation4 + $0xc90] sm:$0xff]  ;;  %v1292_v39 = vrot.slane %v1291_v6, 2  ;;  %v1137_v48 = vmax.f32 %v1135_v20, %v1136_v31  ;;  %v1447_v27 = vmax.f32 %v1445_v21, %v1446_v35  ;;  %v533_v36 = vld [vmem:[#allocation4 + $0xcc0] sm:$0xff]  ;;  %v1518_v13 = vmax.f32 %v1517_v49, %v521_v23 }
  0xfc   :  { %v1370_v41 = vrot.slane %v1369_v25, 2  ;;  %v9126_v16 = vld [vmem:[#allocation4 + $0xf30] sm:$0xff]  ;;  %v9130_v55 = vld [vmem:[#allocation4 + $0x1080] sm:$0xff]  ;;  %v1060_v59 = vrot.slane %v1059_v15, 1  ;;  %v1215_v54 = vmax.f32 %v1213_v1, %v1214_v32  ;;  %v1595_v20 = vmax.f32 %v557_v24, %v563_v8 }
  0xfd   :  { %4442 = vmatpush1.bf16.msra.mxu1 %v8059_v12  ;;  %v9128_v26 = vld [vmem:[#allocation4 + $0xe10] sm:$0xff]  ;;  %v1293_v58 = vmax.f32 %v1291_v6, %v1292_v39  ;;  %v8069_v63 = vld [vmem:[#allocation6 + $0x24c] ss:$24 sps:$4 sm:$0xff]   ;;  %v1138_v40 = vrot.slane %v1137_v48, 1  ;;  %v1448_v7 = vrot.slane %v1447_v27, 2  ;;  %v9147_v1 = vmax.f32 %v9119_v61, %v904_v14 }
  0xfe   :  { %4443 = vmatprep.subr.bf16.mxu1 %v8063_v38  ;;  %v9132_v57 = vld [vmem:[#allocation4 + $0x10b0] sm:$0xff]  ;;  %v9134_v37 = vmax.f32 %v1369_v25, %v1370_v41  ;;  %v617_v2 = vld [vmem:[#allocation4 + $0xf60] sm:$0xff]  ;;  %v9149_v6 = vmax.f32 %v981_v56, %v982_v29  ;;  %v1216_v25 = vrot.slane %v1215_v54, 1  ;;  %v9153_v23 = vmax.f32 %v1059_v15, %v1060_v59 }
  0xff   :  { %v9136_v4 = vld [vmem:[#allocation4 + $0x1200] sm:$0xff]  ;;  %v9138_v0 = vld [vmem:[#allocation4 + $0x1230] sm:$0xff]  ;;  %v1294_v24 = vrot.slane %v1293_v58, 1  ;;  %v1519_v8 = vmax.f32 %v1518_v13, %v9122_v18  ;;  %v1596_v41 = vmax.f32 %v1595_v20, %v569_v44  ;;  %v9163_v46 = vmax.f32 %v1447_v27, %v1448_v7 }
 0x100   :  { %v9140_v50 = vld [vmem:[#allocation4 + $0x1380] sm:$0xff]  ;;  %v9142_v53 = vld [vmem:[#allocation4 + $0x13b0] sm:$0xff]  ;;  %10120 = vst [vmem:[#allocation35_spill] sm:$0xff] %v9153_v23  ;;  %v1673_v15 = vmax.f32 %v9124_v47, %v9126_v16  ;;  %v9173_v20 = vmax.f32 %v1215_v54, %v1216_v25  ;;  %v1751_v27 = vmax.f32 %v9130_v55, %v9132_v57  ;;  %v1829_v34 = vmax.f32 %v9136_v4, %v9138_v0 }
 0x101   :  { %v9144_v21 = vld [vmem:[#allocation4 + $0xcf0] sm:$0xff]  ;;  %v581_v11 = vld [vmem:[#allocation4 + $0xe40] sm:$0xff]  ;;  %4444 = vmatpush1.bf16.msra.mxu1 %v8065_v42  ;;  %v9160_v42 = vmax.f32 %v1137_v48, %v1138_v40  ;;  %v1520_v51 = vmax.f32 %v1519_v8, %v533_v36  ;;  %v1597_v48 = vmax.f32 %v1596_v41, %v9128_v26  ;;  %v1907_v33 = vmax.f32 %v9140_v50, %v9142_v53 }
 0x102   :  { %v665_v12 = vld [vmem:[#allocation4 + $0x10e0] sm:$0xff]  ;;  %v9151_v35 = vld [vmem:[#allocation4 + $0xf90] sm:$0xff]  ;;  %4445 = vmatprep.subr.bf16.mxu1 %v8069_v63  ;;  %10122 = vst [vmem:[#allocation37_spill] sm:$0xff] %v9173_v20  ;;  %v1674_v16 = vmax.f32 %v1673_v15, %v617_v2  ;;  %v9182_v8 = vmax.f32 %v1293_v58, %v1294_v24 }
 0x103   :  { %v797_v9 = vld [vmem:[#allocation4 + $0x1500] sm:$0xff]  ;;  %v803_v39 = vld [vmem:[#allocation4 + $0x1530] sm:$0xff]  ;;  %10121 = vst [vmem:[#allocation36_spill] sm:$0xff] %v9160_v42  ;;  %v1521_v55 = vmax.f32 %v1520_v51, %v9144_v21  ;;  %v1598_v57 = vmax.f32 %v1597_v48, %v581_v11  ;;  %v1752_v41 = vmax.f32 %v1751_v27, %v665_v12 }
 0x104   :  { %v8071_v31 = vld [vmem:[#allocation6 + $0x248] ss:$24 sps:$4 sm:$0xff]   ;;  %v8075_v49 = vld [vmem:[#allocation6 + $0x27c] ss:$24 sps:$4 sm:$0xff]   ;;  %v1985_v10 = vmax.f32 %v797_v9, %v803_v39  ;;  %v8077_v54 = vld [vmem:[#allocation6 + $0x278] ss:$24 sps:$4 sm:$0xff]   ;;  %v1675_v0 = vmax.f32 %v1674_v16, %v9151_v35 }
 0x105   :  { %v713_v38 = vld [vmem:[#allocation4 + $0x1260] sm:$0xff]  ;;  %v9156_v14 = vld [vmem:[#allocation4 + $0xe70] sm:$0xff]  ;;  %4446 = vmatpush1.bf16.msra.mxu1 %v8071_v31  ;;  %10123 = vst [vmem:[#allocation38_spill] sm:$0xff] %v9182_v8 }
 0x106   :  { %v761_v32 = vld [vmem:[#allocation4 + $0x13e0] sm:$0xff]  ;;  %v9158_v56 = vld [vmem:[#allocation4 + $0x1110] sm:$0xff]  ;;  %4447 = vmatprep.subr.bf16.mxu1 %v8075_v49  ;;  %v1830_v50 = vmax.f32 %v1829_v34, %v713_v38  ;;  %v1599_v51 = vmax.f32 %v1598_v57, %v9156_v14 }
 0x107   :  { %v545_v61 = vld [vmem:[#allocation4 + $0xd20] sm:$0xff]  ;;  %v9167_v18 = vld [vmem:[#allocation4 + $0x1290] sm:$0xff]  ;;  %v1908_v53 = vmax.f32 %v1907_v33, %v761_v32  ;;  %v1753_v21 = vmax.f32 %v1752_v41, %v9158_v56 }
 0x108   :  { %v809_v29 = vld [vmem:[#allocation4 + $0x1560] sm:$0xff]  ;;  %v9169_v44 = vld [vmem:[#allocation4 + $0x1410] sm:$0xff]  ;;  %v1522_v24 = vmax.f32 %v1521_v55, %v545_v61  ;;  %v1831_v27 = vmax.f32 %v1830_v50, %v9167_v18 }
 0x109   :  { %v629_v59 = vld [vmem:[#allocation4 + $0xfc0] sm:$0xff]  ;;  %v9171_v63 = vld [vmem:[#allocation4 + $0x1590] sm:$0xff]  ;;  %v1986_v9 = vmax.f32 %v1985_v10, %v809_v29  ;;  %v1909_v34 = vmax.f32 %v1908_v53, %v9169_v44  ;;  %4448 = vmatpush1.bf16.msra.mxu1 %v8077_v54 }
 0x10a   :  { %v845_v13 = vld [vmem:[#allocation4 + $0x1680] sm:$0xff]  ;;  %v551_v40 = vld [vmem:[#allocation4 + $0xd50] sm:$0xff]  ;;  %v1676_v48 = vmax.f32 %v1675_v0, %v629_v59 }
 0x10b   :  { %v593_v7 = vld [vmem:[#allocation4 + $0xea0] sm:$0xff]  ;;  %v851_v47 = vld [vmem:[#allocation4 + $0x16b0] sm:$0xff]  ;;  %v1987_v10 = vmax.f32 %v1986_v9, %v9171_v63  ;;  %v1523_v61 = vmax.f32 %v1522_v24, %v551_v40 }
 0x10c   :  { %v677_v3 = vld [vmem:[#allocation4 + $0x1140] sm:$0xff]  ;;  %v635_v36 = vld [vmem:[#allocation4 + $0xff0] sm:$0xff]  ;;  %v2063_v11 = vmax.f32 %v845_v13, %v851_v47  ;;  %v1600_v29 = vmax.f32 %v1599_v51, %v593_v7 }
 0x10d   :  { %v725_v25 = vld [vmem:[#allocation4 + $0x12c0] sm:$0xff]  ;;  %v599_v15 = vld [vmem:[#allocation4 + $0xed0] sm:$0xff]  ;;  %v1754_v14 = vmax.f32 %v1753_v21, %v677_v3  ;;  %v1677_v59 = vmax.f32 %v1676_v48, %v635_v36  ;;  %v1988_v57 = vmax.f32 %v1987_v10, %v821_v5  ;;  %v1524_v0 = vrot.slane %v1523_v61, 4 }
 0x10e   :  { %v773_v26 = vld [vmem:[#allocation4 + $0x1440] sm:$0xff]  ;;  %v731_v39 = vld [vmem:[#allocation4 + $0x12f0] sm:$0xff]  ;;  %v1832_v55 = vmax.f32 %v1831_v27, %v725_v25  ;;  %v1601_v50 = vmax.f32 %v1600_v29, %v599_v15 }
 0x10f   :  { %v8081_v2 = vld [vmem:[#allocation6 + $0x2ac] ss:$24 sps:$4 sm:$0xff]   ;;  %v827_v58 = vld [vmem:[#allocation4 + $0x15f0] sm:$0xff]  ;;  %v8083_v33 = vld [vmem:[#allocation6 + $0x2a8] ss:$24 sps:$4 sm:$0xff]   ;;  %v1910_v18 = vmax.f32 %v1909_v34, %v773_v26  ;;  %v1755_v53 = vmax.f32 %v1754_v14, %v683_v19  ;;  %v1525_v51 = vmax.f32 %v1523_v61, %v1524_v0 }
 0x110   :  { %v857_v4 = vld [vmem:[#allocation4 + $0x16e0] sm:$0xff]  ;;  %v863_v49 = vld [vmem:[#allocation4 + $0x1710] sm:$0xff]  ;;  %4449 = vmatprep.subr.bf16.mxu1 %v8081_v2  ;;  %v1833_v3 = vmax.f32 %v1832_v55, %v731_v39  ;;  %v1989_v2 = vmax.f32 %v1988_v57, %v827_v58  ;;  %v1602_v36 = vrot.slane %v1601_v50, 4 }
 0x111   :  { %v641_v31 = vld [vmem:[#allocation4 + $0x1020] sm:$0xff]  ;;  %v647_v35 = vld [vmem:[#allocation4 + $0x1050] sm:$0xff]  ;;  %v2064_v16 = vmax.f32 %v2063_v11, %v857_v4  ;;  %v1911_v4 = vmax.f32 %v1910_v18, %v779_v52  ;;  %4450 = vmatpush1.bf16.msra.mxu1 %v8083_v33  ;;  %v1526_v19 = vrot.slane %v1525_v51, 2 }
 0x112   :  { %v689_v12 = vld [vmem:[#allocation4 + $0x11a0] sm:$0xff]  ;;  %v8087_v56 = vld [vmem:[#allocation6 + $0x2dc] ss:$24 sps:$4 sm:$0xff]   ;;  %v1678_v7 = vmax.f32 %v1677_v59, %v641_v31  ;;  %v8089_v24 = vld [vmem:[#allocation6 + $0x2d8] ss:$24 sps:$4 sm:$0xff]  }
 0x113   :  { %v737_v38 = vld [vmem:[#allocation4 + $0x1320] sm:$0xff]  ;;  %v695_v13 = vld [vmem:[#allocation4 + $0x11d0] sm:$0xff]  ;;  %v2065_v9 = vmax.f32 %v2064_v16, %v863_v49  ;;  %v1756_v25 = vmax.f32 %v1755_v53, %v689_v12  ;;  %4451 = vmatprep.subr.bf16.mxu1 %v8087_v56  ;;  %v1603_v49 = vmax.f32 %v1601_v50, %v1602_v36  ;;  %v1527_v61 = vmax.f32 %v1525_v51, %v1526_v19 }
 0x114   :  { %v785_v32 = vld [vmem:[#allocation4 + $0x14a0] sm:$0xff]  ;;  %v743_v44 = vld [vmem:[#allocation4 + $0x1350] sm:$0xff]  ;;  %v1679_v11 = vmax.f32 %v1678_v7, %v647_v35  ;;  %v1834_v48 = vmax.f32 %v1833_v3, %v737_v38  ;;  %v1450_v56 = vrot.slane %v9163_v46, 1  ;;  %v10124_v7 = vrot.slane %v9134_v37, 1 }
 0x115   :  { %v869_v47 = vld [vmem:[#allocation4 + $0x1740] sm:$0xff]  ;;  %v791_v41 = vld [vmem:[#allocation4 + $0x14d0] sm:$0xff]  ;;  %v1912_v27 = vmax.f32 %v1911_v4, %v785_v32  ;;  %v1757_v34 = vmax.f32 %v1756_v25, %v695_v13  ;;  %4452 = vmatpush1.bf16.msra.mxu1 %v8089_v24  ;;  %v1604_v12 = vrot.slane %v1603_v49, 2 }
 0x116   :  { %v833_v63 = vld [vmem:[#allocation4 + $0x1620] sm:$0xff]  ;;  %v839_v54 = vld [vmem:[#allocation4 + $0x1650] sm:$0xff]  ;;  %v2066_v26 = vmax.f32 %v2065_v9, %v869_v47  ;;  %v1680_v52 = vrot.slane %v1679_v11, 4  ;;  %v1835_v58 = vmax.f32 %v1834_v48, %v743_v44  ;;  %v9195_v3 = vmax.f32 %v9134_v37, %v10124_v7 }
 0x117   :  { %v875_v40 = vld [vmem:[#allocation4 + $0x1770] sm:$0xff]  ;;  %v8095_v5 = vld [vmem:[#allocation6 + $0x30c] ss:$24 sps:$4 sm:$0xff]   ;;  %v1990_v15 = vmax.f32 %v1989_v2, %v833_v63  ;;  %v1913_v10 = vmax.f32 %v1912_v27, %v791_v41  ;;  %v1758_v29 = vrot.slane %v1757_v34, 4  ;;  %v1605_v47 = vmax.f32 %v1603_v49, %v1604_v12 }
 0x118   :  { %v881_v21 = vld [vmem:[#allocation4 + $0x17a0] sm:$0xff]  ;;  %v2067_v31 = vmax.f32 %v2066_v26, %v875_v40  ;;  %v887_v39 = vld [vmem:[#allocation4 + $0x17d0] sm:$0xff]  ;;  %4464 = vmatprep.subr.bf16.mxu1 %v8095_v5  ;;  %v1681_v16 = vmax.f32 %v1679_v11, %v1680_v52  ;;  %v1836_v35 = vrot.slane %v1835_v58, 4  ;;  %v1528_v41 = vrot.slane %v1527_v61, 1  ;;  %10125 = vst [vmem:[#allocation39_spill] sm:$0xff] %v9195_v3 }
 0x119   :  { %v1991_v33 = vmax.f32 %v1990_v15, %v839_v54  ;;  %v1914_v38 = vrot.slane %v1913_v10, 4  ;;  %v1759_v13 = vmax.f32 %v1757_v34, %v1758_v29  ;;  %v1606_v63 = vrot.slane %v1605_v47, 1 }
 0x11a   :  { %v2068_v14 = vmax.f32 %v2067_v31, %v881_v21  ;;  %v1682_v55 = vrot.slane %v1681_v16, 2  ;;  %v1837_v18 = vmax.f32 %v1835_v58, %v1836_v35  ;;  %v9198_v4 = vmax.f32 %v9163_v46, %v1450_v56 }
 0x11b   :  { %v1992_v32 = vrot.slane %v1991_v33, 4  ;;  %v1915_v57 = vmax.f32 %v1913_v10, %v1914_v38  ;;  %v1760_v54 = vrot.slane %v1759_v13, 2  ;;  %v9200_v5 = vmax.f32 %v1527_v61, %v1528_v41 }
 0x11c   :  { %v2069_v59 = vmax.f32 %v2068_v14, %v887_v39  ;;  %v1683_v50 = vmax.f32 %v1681_v16, %v1682_v55  ;;  %v1838_v53 = vrot.slane %v1837_v18, 2  ;;  %10126 = vst [vmem:[#allocation40_spill] sm:$0xff] %v9198_v4  ;;  %v9202_v21 = vmax.f32 %v1605_v47, %v1606_v63 }
 0x11d   :  { %v1993_v44 = vmax.f32 %v1991_v33, %v1992_v32  ;;  %v1916_v9 = vrot.slane %v1915_v57, 2  ;;  %v1761_v2 = vmax.f32 %v1759_v13, %v1760_v54  ;;  %10127 = vst [vmem:[#allocation41_spill] sm:$0xff] %v9200_v5  ;;  %v2141_v34 = vpack.c.bf16 %v9147_v1, %v9147_v1 }
 0x11e   :  { %v2070_v0 = vrot.slane %v2069_v59, 4  ;;  %v1684_v51 = vrot.slane %v1683_v50, 1  ;;  %v1839_v36 = vmax.f32 %v1837_v18, %v1838_v53  ;;  %10128 = vst [vmem:[#allocation42_spill] sm:$0xff] %v9202_v21  ;;  %v2147_v31 = vpack.c.bf16 %v9149_v6, %v9149_v6 }
 0x11f   :  { %v1994_v40 = vrot.slane %v1993_v44, 2  ;;  %v1917_v25 = vmax.f32 %v1915_v57, %v1916_v9  ;;  %v1762_v11 = vrot.slane %v1761_v2, 1  ;;  %v2153_v10 = vpack.c.bf16 %v9153_v23, %v9153_v23 }
 0x120   :  { %v2071_v24 = vmax.f32 %v2069_v59, %v2070_v0  ;;  %v9204_v27 = vmax.f32 %v1683_v50, %v1684_v51  ;;  %v1840_v15 = vrot.slane %v1839_v36, 1  ;;  %v2159_v61 = vpack.c.bf16 %v9160_v42, %v9160_v42  ;;  %v128_v0 = vld [vmem:[#allocation4 + $0x18] sm:$0xff]  ;;  %v134_v50 = vld [vmem:[#allocation4 + $0x48] sm:$0xff] }
 0x121   :  { %v1995_v26 = vmax.f32 %v1993_v44, %v1994_v40  ;;  %v1918_v37 = vrot.slane %v1917_v25, 1  ;;  %v9206_v49 = vmax.f32 %v1761_v2, %v1762_v11  ;;  %v2165_v12 = vpack.c.bf16 %v9173_v20, %v9173_v20 }
 0x122   :  { %v2072_v48 = vrot.slane %v2071_v24, 2  ;;  %10129 = vst [vmem:[#allocation43_spill] sm:$0xff] %v9204_v27  ;;  %v9212_v39 = vmax.f32 %v1839_v36, %v1840_v15  ;;  %v2171_v29 = vpack.c.bf16 %v9182_v8, %v9182_v8  ;;  %v2189_v14 = vpack.c.bf16 %v9200_v5, %v9200_v5  ;;  %v739_v5 = vld [vmem:[#allocation4 + $0x1330] sm:$0xff] }
 0x123   :  { %v1996_v19 = vrot.slane %v1995_v26, 1  ;;  %10130 = vst [vmem:[#allocation44_spill] sm:$0xff] %v9206_v49  ;;  %v9214_v52 = vmax.f32 %v1917_v25, %v1918_v37  ;;  %v2195_v16 = vpack.c.bf16 %v9202_v21, %v9202_v21  ;;  %v2201_v35 = vpack.c.bf16 %v9204_v27, %v9204_v27  ;;  %v140_v25 = vld [vmem:[#allocation4 + $0x78] sm:$0xff]  ;;  %v182_v37 = vld [vmem:[#allocation4 + $0x1c8] sm:$0xff]  ;;  %v643_v21 = vld [vmem:[#allocation4 + $0x1030] sm:$0xff] }
 0x124   :  { %v2073_v46 = vmax.f32 %v2071_v24, %v2072_v48  ;;  %10131 = vst [vmem:[#allocation45_spill] sm:$0xff] %v9212_v39  ;;  %v2207_v38 = vpack.c.bf16 %v9206_v49, %v9206_v49  ;;  %v2177_v56 = vpack.c.bf16 %v9195_v3, %v9195_v3  ;;  %v2183_v47 = vpack.c.bf16 %v9198_v4, %v9198_v4  ;;  %v8105_v4 = vld [vmem:[#allocation6 + $0x368] ss:$24 sps:$4 sm:$0xff]  }
 0x125   :  { %10132 = vst [vmem:[#allocation46_spill] sm:$0xff] %v9214_v52  ;;  %v9216_v58 = vmax.f32 %v1995_v26, %v1996_v19  ;;  %v2213_v13 = vpack.c.bf16 %v9212_v39, %v9212_v39  ;;  %v2219_v59 = vpack.c.bf16 %v9214_v52, %v9214_v52  ;;  %v2653_v18 = vunpack.c.l.b16 %v2141_v34  ;;  %v176_v26 = vld [vmem:[#allocation4 + $0x198] sm:$0xff] }
 0x126   :  { %v2074_v33 = vrot.slane %v2073_v46, 1  ;;  %v2659_v57 = vunpack.c.l.b16 %v2147_v31  ;;  %v2665_v41 = vunpack.c.l.b16 %v2153_v10  ;;  %v2671_v63 = vunpack.c.l.b16 %v2159_v61  ;;  %v188_v19 = vld [vmem:[#allocation4 + $0x1f8] sm:$0xff] }
 0x127   :  { %10133 = vst [vmem:[#allocation47_spill] sm:$0xff] %v9216_v58  ;;  %v2225_v55 = vpack.c.bf16 %v9216_v58, %v9216_v58  ;;  %v2677_v54 = vunpack.c.l.b16 %v2165_v12  ;;  %v2701_v53 = vunpack.c.l.b16 %v2189_v14  ;;  %v2707_v9 = vunpack.c.l.b16 %v2195_v16  ;;  %v194_v16 = vld [vmem:[#allocation4 + $0x228] sm:$0xff]  ;;  %v8074_v58 = vld [vmem:[#allocation6 + $0x3c4] ss:$24 sps:$4 sm:$0xff]  }
 0x128   :  { %v9234_v32 = vmax.f32 %v2073_v46, %v2074_v33  ;;  %v2713_v40 = vunpack.c.l.b16 %v2201_v35  ;;  %v2719_v7 = vunpack.c.l.b16 %v2207_v38  ;;  %v2683_v2 = vunpack.c.l.b16 %v2171_v29  ;;  %v146_v33 = vld [vmem:[#allocation4 + $0xa8] sm:$0xff]  ;;  %v224_v35 = vld [vmem:[#allocation4 + $0x318] sm:$0xff] }
 0x129   :  { %v2689_v24 = vunpack.c.l.b16 %v2177_v56  ;;  %v2695_v51 = vunpack.c.l.b16 %v2183_v47  ;;  %v2725_v36 = vunpack.c.l.b16 %v2213_v13  ;;  %v2731_v11 = vunpack.c.l.b16 %v2219_v59  ;;  %v230_v38 = vld [vmem:[#allocation4 + $0x348] sm:$0xff]  ;;  %v152_v59 = vld [vmem:[#allocation4 + $0xd8] sm:$0xff] }
 0x12a   :  { %10134 = vst [vmem:[#allocation48_spill] sm:$0xff] %v9234_v32  ;;  %v2231_v44 = vpack.c.bf16 %v9234_v32, %v9234_v32  ;;  %v2750_v48 = vsel %vm2749_vm0, %v2659_v57, %v2653_v18  ;;  %v2798_v15 = vsel %vm2749_vm0, %v2707_v9, %v2701_v53  ;;  %v932_v46 = vmax.f32 %v128_v0, %v134_v50  ;;  %v158_v50 = vld [vmem:[#allocation4 + $0x108] sm:$0xff]  ;;  %v200_v53 = vld [vmem:[#allocation4 + $0x258] sm:$0xff] }
 0x12b   :  { %v2737_v34 = vunpack.c.l.b16 %v2225_v55  ;;  %v2752_v31 = vsel %vm2751_vm1, %v2665_v41, %v2750_v48  ;;  %v2799_v10 = vsel %vm2751_vm1, %v2713_v40, %v2798_v15  ;;  %v1010_v61 = vmax.f32 %v176_v26, %v182_v37  ;;  %v236_v55 = vld [vmem:[#allocation4 + $0x378] sm:$0xff]  ;;  %v242_v9 = vld [vmem:[#allocation4 + $0x3a8] sm:$0xff] }
 0x12c   :  { %v2743_v12 = vunpack.c.l.b16 %v2231_v44  ;;  %v2754_v29 = vsel %vm2753_vm2, %v2671_v63, %v2752_v31  ;;  %v2800_v14 = vsel %vm2753_vm2, %v2719_v7, %v2799_v10  ;;  %v933_v56 = vmax.f32 %v932_v46, %v140_v25  ;;  %v8048_v41 = vld [vmem:[#allocation6 + $0x300] ss:$24 sps:$4 sm:$0xff]   ;;  %v8056_v25 = vld [vmem:[#allocation6 + $0x334] ss:$24 sps:$4 sm:$0xff]  }
 0x12d   :  { %v2756_v47 = vsel %vm2755_vm3, %v2677_v54, %v2754_v29  ;;  %v2801_v13 = vsel %vm2755_vm3, %v2725_v36, %v2800_v14  ;;  %v1011_v18 = vmax.f32 %v1010_v61, %v188_v19  ;;  %v1088_v57 = vmax.f32 %v224_v35, %v230_v38  ;;  %v8093_v63 = vld [vmem:[#allocation6 + $0x308] ss:$24 sps:$4 sm:$0xff]   ;;  %v8101_v36 = vld [vmem:[#allocation6 + $0x33c] ss:$24 sps:$4 sm:$0xff]  }
 0x12e   :  { %v2758_v0 = vsel %vm2757_vm4, %v2683_v2, %v2756_v47  ;;  %v2802_v44 = vsel %vm2757_vm4, %v2731_v11, %v2801_v13  ;;  %v934_v40 = vmax.f32 %v933_v56, %v146_v33  ;;  %v272_v26 = vld [vmem:[#allocation4 + $0x498] sm:$0xff]  ;;  %v278_v48 = vld [vmem:[#allocation4 + $0x4c8] sm:$0xff] }
 0x12f   :  { %v2760_v7 = vsel %vm2759_vm5, %v2689_v24, %v2758_v0  ;;  %v2803_v54 = vsel %vm2759_vm5, %v2737_v34, %v2802_v44  ;;  %v284_v15 = vld [vmem:[#allocation4 + $0x4f8] sm:$0xff]  ;;  %v1012_v37 = vmax.f32 %v1011_v18, %v194_v16  ;;  %v1089_v19 = vmax.f32 %v1088_v57, %v236_v55  ;;  %v206_v31 = vld [vmem:[#allocation4 + $0x288] sm:$0xff] }
 0x130   :  { %v2762_v2 = vsel %vm2761_vm6, %v2695_v51, %v2760_v7  ;;  %v2804_v11 = vsel %vm2761_vm6, %v2743_v12, %v2803_v54  ;;  %v164_v46 = vld [vmem:[#allocation4 + $0x138] sm:$0xff]  ;;  %v935_v61 = vmax.f32 %v934_v40, %v152_v59  ;;  %v1166_v33 = vmax.f32 %v272_v26, %v278_v48  ;;  %v170_v24 = vld [vmem:[#allocation4 + $0x168] sm:$0xff] }
 0x131   :  { %v248_v10 = vld [vmem:[#allocation4 + $0x3d8] sm:$0xff]  ;;  %v9262_v29 = vpack.c.b16 %v2804_v11, %v2762_v2  ;;  %v290_v14 = vld [vmem:[#allocation4 + $0x528] sm:$0xff]  ;;  %v1013_v38 = vmax.f32 %v1012_v37, %v200_v53  ;;  %v1090_v56 = vmax.f32 %v1089_v19, %v242_v9 }
 0x132   :  { %v212_v34 = vld [vmem:[#allocation4 + $0x2b8] sm:$0xff]  ;;  %v8054_v47 = vld [vmem:[#allocation6 + $0x330] ss:$24 sps:$4 sm:$0xff]   ;;  %v936_v18 = vmax.f32 %v935_v61, %v158_v50  ;;  %v1167_v12 = vmax.f32 %v1166_v33, %v284_v15  ;;  %v8107_v59 = vld [vmem:[#allocation6 + $0x36c] ss:$24 sps:$4 sm:$0xff]  }
 0x133   :  { %v320_v35 = vld [vmem:[#allocation4 + $0x618] sm:$0xff]  ;;  %v254_v13 = vld [vmem:[#allocation4 + $0x408] sm:$0xff]  ;;  %4325 = vmatmul.mubr.bf16.vlgmr.msra.gmra.mrb[0].mxu0 %v9262_v29  ;;  %4454 = vmatmul.mubr.bf16.vlgmr.msra.gmra.mrb[0].mxu1 %v9262_v29  ;;  %v1014_v7 = vmax.f32 %v1013_v38, %v206_v31  ;;  %v1091_v54 = vmax.f32 %v1090_v56, %v248_v10 }
 0x134   :  { %v8099_v16 = vld [vmem:[#allocation6 + $0x338] ss:$24 sps:$4 sm:$0xff]   ;;  %v326_v55 = vld [vmem:[#allocation4 + $0x648] sm:$0xff]  ;;  %v8062_v57 = vld [vmem:[#allocation6 + $0x364] ss:$24 sps:$4 sm:$0xff]   ;;  %4336 = vmatpush1.bf16.msra.mxu0 %v8048_v41  ;;  %4465 = vmatpush1.bf16.msra.mxu1 %v8093_v63  ;;  %v937_v37 = vmax.f32 %v936_v18, %v164_v46  ;;  %v1168_v50 = vmax.f32 %v1167_v12, %v290_v14 }
 0x135   :  { %v332_v51 = vld [vmem:[#allocation4 + $0x678] sm:$0xff]  ;;  %v218_v0 = vld [vmem:[#allocation4 + $0x2e8] sm:$0xff]  ;;  %v1244_v53 = vmax.f32 %v320_v35, %v326_v55  ;;  %4337 = vmatprep.subr.bf16.mxu0 %v8056_v25  ;;  %4466 = vmatprep.subr.bf16.mxu1 %v8101_v36  ;;  %v1015_v11 = vmax.f32 %v1014_v7, %v212_v34  ;;  %v1092_v61 = vmax.f32 %v1091_v54, %v254_v13 }
 0x136   :  { %v260_v44 = vld [vmem:[#allocation4 + $0x438] sm:$0xff]  ;;  %v338_v9 = vld [vmem:[#allocation4 + $0x6a8] sm:$0xff]  ;;  %v938_v41 = vmax.f32 %v937_v37, %v170_v24 }
 0x137   :  { %v296_v40 = vld [vmem:[#allocation4 + $0x558] sm:$0xff]  ;;  %v374_v48 = vld [vmem:[#allocation4 + $0x7c8] sm:$0xff]  ;;  %v1245_v33 = vmax.f32 %v1244_v53, %v332_v51  ;;  %v1016_v25 = vmax.f32 %v1015_v11, %v218_v0  ;;  %v1093_v36 = vmax.f32 %v1092_v61, %v260_v44 }
 0x138   :  { %v368_v26 = vld [vmem:[#allocation4 + $0x798] sm:$0xff]  ;;  %v266_v15 = vld [vmem:[#allocation4 + $0x468] sm:$0xff]  ;;  %v1169_v63 = vmax.f32 %v1168_v50, %v296_v40  ;;  %4338 = vmatpush1.bf16.msra.mxu0 %v8054_v47  ;;  %4467 = vmatpush1.bf16.msra.mxu1 %v8099_v16  ;;  %v939_v12 = vrot.slane %v938_v41, 4 }
 0x139   :  { %v302_v19 = vld [vmem:[#allocation4 + $0x588] sm:$0xff]  ;;  %v380_v2 = vld [vmem:[#allocation4 + $0x7f8] sm:$0xff]  ;;  %v1322_v38 = vmax.f32 %v368_v26, %v374_v48  ;;  %v1246_v18 = vmax.f32 %v1245_v33, %v338_v9  ;;  %4339 = vmatprep.subr.bf16.mxu0 %v8062_v57  ;;  %4468 = vmatprep.subr.bf16.mxu1 %v8107_v59  ;;  %v1017_v48 = vrot.slane %v1016_v25, 4  ;;  %v1094_v37 = vmax.f32 %v1093_v36, %v266_v15 }
 0x13a   :  { %v8060_v32 = vld [vmem:[#allocation6 + $0x360] ss:$24 sps:$4 sm:$0xff]   ;;  %v386_v35 = vld [vmem:[#allocation4 + $0x828] sm:$0xff]  ;;  %v8113_v34 = vld [vmem:[#allocation6 + $0x39c] ss:$24 sps:$4 sm:$0xff]   ;;  %v1170_v7 = vmax.f32 %v1169_v63, %v302_v19  ;;  %v940_v16 = vmax.f32 %v938_v41, %v939_v12 }
 0x13b   :  { %v308_v31 = vld [vmem:[#allocation4 + $0x5b8] sm:$0xff]  ;;  %v8068_v56 = vld [vmem:[#allocation6 + $0x394] ss:$24 sps:$4 sm:$0xff]   ;;  %v1323_v54 = vmax.f32 %v1322_v38, %v380_v2  ;;  %v8066_v0 = vld [vmem:[#allocation6 + $0x390] ss:$24 sps:$4 sm:$0xff]   ;;  %v1018_v63 = vmax.f32 %v1016_v25, %v1017_v48  ;;  %v1095_v57 = vrot.slane %v1094_v37, 4 }
 0x13c   :  { %v344_v10 = vld [vmem:[#allocation4 + $0x6d8] sm:$0xff]  ;;  %v422_v46 = vld [vmem:[#allocation4 + $0x948] sm:$0xff]  ;;  %v1171_v11 = vmax.f32 %v1170_v7, %v308_v31  ;;  %4340 = vmatpush1.bf16.msra.mxu0 %v8060_v32  ;;  %4469 = vmatpush1.bf16.msra.mxu1 %v8105_v4 }
 0x13d   :  { %v416_v55 = vld [vmem:[#allocation4 + $0x918] sm:$0xff]  ;;  %v314_v13 = vld [vmem:[#allocation4 + $0x5e8] sm:$0xff]  ;;  %v1247_v50 = vmax.f32 %v1246_v18, %v344_v10  ;;  %v1324_v61 = vmax.f32 %v1323_v54, %v386_v35  ;;  %4341 = vmatprep.subr.bf16.mxu0 %v8068_v56  ;;  %4470 = vmatprep.subr.bf16.mxu1 %v8113_v34  ;;  %v1096_v12 = vmax.f32 %v1094_v37, %v1095_v57 }
 0x13e   :  { %v428_v14 = vld [vmem:[#allocation4 + $0x978] sm:$0xff]  ;;  %v350_v51 = vld [vmem:[#allocation4 + $0x708] sm:$0xff]  ;;  %v1400_v53 = vmax.f32 %v416_v55, %v422_v46  ;;  %v941_v46 = vrot.slane %v940_v16, 2  ;;  %v1172_v36 = vmax.f32 %v1171_v11, %v314_v13 }
 0x13f   :  { %v392_v24 = vld [vmem:[#allocation4 + $0x858] sm:$0xff]  ;;  %v434_v40 = vld [vmem:[#allocation4 + $0x9a8] sm:$0xff]  ;;  %v1248_v59 = vmax.f32 %v1247_v50, %v350_v51 }
 0x140   :  { %v464_v26 = vld [vmem:[#allocation4 + $0xa98] sm:$0xff]  ;;  %v470_v9 = vld [vmem:[#allocation4 + $0xac8] sm:$0xff]  ;;  %v1401_v33 = vmax.f32 %v1400_v53, %v428_v14  ;;  %v1325_v18 = vmax.f32 %v1324_v61, %v392_v24  ;;  %v1019_v14 = vrot.slane %v1018_v63, 2  ;;  %v942_v32 = vmax.f32 %v940_v16, %v941_v46  ;;  %4342 = vmatpush1.bf16.msra.mxu0 %v8066_v0 }
 0x141   :  { %v356_v44 = vld [vmem:[#allocation4 + $0x738] sm:$0xff]  ;;  %v398_v19 = vld [vmem:[#allocation4 + $0x888] sm:$0xff]  ;;  %v1478_v38 = vmax.f32 %v464_v26, %v470_v9  ;;  %v1173_v4 = vrot.slane %v1172_v36, 4  ;;  %4343 = vmatprep.subr.bf16.mxu0 %v8074_v58 }
 0x142   :  { %v476_v47 = vld [vmem:[#allocation4 + $0xaf8] sm:$0xff]  ;;  %v362_v15 = vld [vmem:[#allocation4 + $0x768] sm:$0xff]  ;;  %v1402_v3 = vmax.f32 %v1401_v33, %v434_v40  ;;  %v1249_v25 = vmax.f32 %v1248_v59, %v356_v44  ;;  %v1326_v53 = vmax.f32 %v1325_v18, %v398_v19  ;;  %v1020_v24 = vmax.f32 %v1018_v63, %v1019_v14 }
 0x143   :  { %v440_v2 = vld [vmem:[#allocation4 + $0x9d8] sm:$0xff]  ;;  %v482_v10 = vld [vmem:[#allocation4 + $0xb28] sm:$0xff]  ;;  %v1479_v7 = vmax.f32 %v1478_v38, %v476_v47  ;;  %v1097_v40 = vrot.slane %v1096_v12, 2  ;;  %v943_v44 = vrot.slane %v942_v32, 1  ;;  %v1174_v47 = vmax.f32 %v1172_v36, %v1173_v4 }
 0x144   :  { %v8111_v55 = vld [vmem:[#allocation6 + $0x398] ss:$24 sps:$4 sm:$0xff]   ;;  %v8119_v31 = vld [vmem:[#allocation6 + $0x3cc] ss:$24 sps:$4 sm:$0xff]   ;;  %v1403_v26 = vmax.f32 %v1402_v3, %v440_v2  ;;  %v1250_v56 = vmax.f32 %v1249_v25, %v362_v15  ;;  %v8117_v9 = vld [vmem:[#allocation6 + $0x3c8] ss:$24 sps:$4 sm:$0xff]  }
 0x145   :  { %v404_v35 = vld [vmem:[#allocation4 + $0x8b8] sm:$0xff]  ;;  %v446_v41 = vld [vmem:[#allocation4 + $0xa08] sm:$0xff]  ;;  %v1480_v34 = vmax.f32 %v1479_v7, %v482_v10  ;;  %4471 = vmatpush1.bf16.msra.mxu1 %v8111_v55  ;;  %v1021_v2 = vrot.slane %v1020_v24, 1  ;;  %v1098_v57 = vmax.f32 %v1096_v12, %v1097_v40  ;;  %v9266_v10 = vmax.f32 %v942_v32, %v943_v44 }
 0x146   :  { %v8072_v51 = vld [vmem:[#allocation6 + $0x3c0] ss:$24 sps:$4 sm:$0xff]   ;;  %v8080_v48 = vld [vmem:[#allocation6 + $0x3f4] ss:$24 sps:$4 sm:$0xff]   ;;  %v1327_v61 = vmax.f32 %v1326_v53, %v404_v35  ;;  %v1404_v33 = vmax.f32 %v1403_v26, %v446_v41  ;;  %4472 = vmatprep.subr.bf16.mxu1 %v8119_v31  ;;  %v1251_v63 = vrot.slane %v1250_v56, 4  ;;  %v1175_v46 = vrot.slane %v1174_v47, 2 }
 0x147   :  { %v488_v54 = vld [vmem:[#allocation4 + $0xb58] sm:$0xff]  ;;  %v410_v50 = vld [vmem:[#allocation4 + $0x8e8] sm:$0xff]  ;;  %10135 = vst [vmem:[#allocation49_spill] sm:$0xff] %v9266_v10  ;;  %v9268_v31 = vmax.f32 %v1020_v24, %v1021_v2  ;;  %v1099_v14 = vrot.slane %v1098_v57, 1  ;;  %4344 = vmatpush1.bf16.msra.mxu0 %v8072_v51 }
 0x148   :  { %v452_v13 = vld [vmem:[#allocation4 + $0xa38] sm:$0xff]  ;;  %v494_v37 = vld [vmem:[#allocation4 + $0xb88] sm:$0xff]  ;;  %v1481_v59 = vmax.f32 %v1480_v34, %v488_v54  ;;  %v1328_v18 = vmax.f32 %v1327_v61, %v410_v50  ;;  %v1252_v25 = vmax.f32 %v1250_v56, %v1251_v63  ;;  %v1176_v53 = vmax.f32 %v1174_v47, %v1175_v46  ;;  %4345 = vmatprep.subr.bf16.mxu0 %v8080_v48 }
 0x149   :  { %v8125_v11 = vld [vmem:[#allocation6 + $0x3fc] ss:$24 sps:$4 sm:$0xff]   ;;  %v458_v16 = vld [vmem:[#allocation4 + $0xa68] sm:$0xff]  ;;  %v1405_v36 = vmax.f32 %v1404_v33, %v452_v13  ;;  %v8123_v35 = vld [vmem:[#allocation6 + $0x3f8] ss:$24 sps:$4 sm:$0xff]   ;;  %10136 = vst [vmem:[#allocation50_spill] sm:$0xff] %v9268_v31  ;;  %4473 = vmatpush1.bf16.msra.mxu1 %v8117_v9  ;;  %v9270_v44 = vmax.f32 %v1098_v57, %v1099_v14 }
 0x14a   :  { %v512_v3 = vld [vmem:[#allocation4 + $0xc18] sm:$0xff]  ;;  %v518_v19 = vld [vmem:[#allocation4 + $0xc48] sm:$0xff]  ;;  %v1482_v7 = vmax.f32 %v1481_v59, %v494_v37  ;;  %v1329_v26 = vrot.slane %v1328_v18, 4  ;;  %4474 = vmatprep.subr.bf16.mxu1 %v8125_v11  ;;  %v1253_v24 = vrot.slane %v1252_v25, 2  ;;  %v1177_v2 = vrot.slane %v1176_v53, 1 }
 0x14b   :  { %v8078_v38 = vld [vmem:[#allocation6 + $0x3f0] ss:$24 sps:$4 sm:$0xff]   ;;  %v500_v15 = vld [vmem:[#allocation4 + $0xbb8] sm:$0xff]  ;;  %v1406_v32 = vmax.f32 %v1405_v36, %v458_v16  ;;  %v1556_v40 = vmax.f32 %v512_v3, %v518_v19  ;;  %v8131_v13 = vld [vmem:[#allocation6 + $0x42c] ss:$24 sps:$4 sm:$0xff]   ;;  %10137 = vst [vmem:[#allocation51_spill] sm:$0xff] %v9270_v44 }
 0x14c   :  { %v560_v0 = vld [vmem:[#allocation4 + $0xd98] sm:$0xff]  ;;  %v566_v55 = vld [vmem:[#allocation4 + $0xdc8] sm:$0xff]  ;;  %v1483_v61 = vmax.f32 %v1482_v7, %v500_v15  ;;  %v1330_v63 = vmax.f32 %v1328_v18, %v1329_v26  ;;  %v1254_v11 = vmax.f32 %v1252_v25, %v1253_v24  ;;  %4346 = vmatpush1.bf16.msra.mxu0 %v8078_v38  ;;  %v9272_v14 = vmax.f32 %v1176_v53, %v1177_v2 }
 0x14d   :  { %v506_v41 = vld [vmem:[#allocation4 + $0xbe8] sm:$0xff]  ;;  %v524_v58 = vld [vmem:[#allocation4 + $0xc78] sm:$0xff]  ;;  %v1634_v56 = vmax.f32 %v560_v0, %v566_v55  ;;  %v1407_v47 = vrot.slane %v1406_v32, 4  ;;  %4475 = vmatpush1.bf16.msra.mxu1 %v8123_v35 }
 0x14e   :  { %v572_v12 = vld [vmem:[#allocation4 + $0xdf8] sm:$0xff]  ;;  %v614_v4 = vld [vmem:[#allocation4 + $0xf48] sm:$0xff]  ;;  %v1557_v59 = vmax.f32 %v1556_v40, %v524_v58  ;;  %v1484_v46 = vmax.f32 %v1483_v61, %v506_v41  ;;  %10138 = vst [vmem:[#allocation52_spill] sm:$0xff] %v9272_v14  ;;  %v1331_v7 = vrot.slane %v1330_v63, 2  ;;  %4476 = vmatprep.subr.bf16.mxu1 %v8131_v13  ;;  %v1255_v8 = vrot.slane %v1254_v11, 1 }
 0x14f   :  { %v608_v54 = vld [vmem:[#allocation4 + $0xf18] sm:$0xff]  ;;  %v530_v34 = vld [vmem:[#allocation4 + $0xca8] sm:$0xff]  ;;  %v1635_v36 = vmax.f32 %v1634_v56, %v572_v12  ;;  %v1408_v52 = vmax.f32 %v1406_v32, %v1407_v47 }
 0x150   :  { %v8086_v50 = vld [vmem:[#allocation6 + $0x424] ss:$24 sps:$4 sm:$0xff]   ;;  %v8084_v37 = vld [vmem:[#allocation6 + $0x420] ss:$24 sps:$4 sm:$0xff]   ;;  %v578_v9 = vld [vmem:[#allocation4 + $0xe28] sm:$0xff]  ;;  %v1712_v57 = vmax.f32 %v608_v54, %v614_v4  ;;  %v1558_v18 = vmax.f32 %v1557_v59, %v530_v34  ;;  %v1485_v25 = vrot.slane %v1484_v46, 4  ;;  %v1332_v61 = vmax.f32 %v1330_v63, %v1331_v7 }
 0x151   :  { %v8129_v51 = vld [vmem:[#allocation6 + $0x428] ss:$24 sps:$4 sm:$0xff]   ;;  %v620_v33 = vld [vmem:[#allocation4 + $0xf78] sm:$0xff]  ;;  %v8092_v16 = vld [vmem:[#allocation6 + $0x454] ss:$24 sps:$4 sm:$0xff]   ;;  %4347 = vmatprep.subr.bf16.mxu0 %v8086_v50  ;;  %v1636_v41 = vmax.f32 %v1635_v36, %v578_v9  ;;  %v1409_v53 = vrot.slane %v1408_v52, 2  ;;  %v9274_v59 = vmax.f32 %v1254_v11, %v1255_v8 }
 0x152   :  { %v536_v3 = vld [vmem:[#allocation4 + $0xcd8] sm:$0xff]  ;;  %v662_v19 = vld [vmem:[#allocation4 + $0x10c8] sm:$0xff]  ;;  %v1713_v12 = vmax.f32 %v1712_v57, %v620_v33  ;;  %v1486_v39 = vmax.f32 %v1484_v46, %v1485_v25  ;;  %4348 = vmatpush1.bf16.msra.mxu0 %v8084_v37  ;;  %4477 = vmatpush1.bf16.msra.mxu1 %v8129_v51  ;;  %v1333_v49 = vrot.slane %v1332_v61, 1 }
 0x153   :  { %v656_v48 = vld [vmem:[#allocation4 + $0x1098] sm:$0xff]  ;;  %v626_v55 = vld [vmem:[#allocation4 + $0xfa8] sm:$0xff]  ;;  %v1559_v56 = vmax.f32 %v1558_v18, %v536_v3  ;;  %10139 = vst [vmem:[#allocation53_spill] sm:$0xff] %v9274_v59  ;;  %v1410_v63 = vmax.f32 %v1408_v52, %v1409_v53  ;;  %4349 = vmatprep.subr.bf16.mxu0 %v8092_v16 }
 0x154   :  { %v8137_v15 = vld [vmem:[#allocation6 + $0x45c] ss:$24 sps:$4 sm:$0xff]   ;;  %v542_v58 = vld [vmem:[#allocation4 + $0xd08] sm:$0xff]  ;;  %v8135_v38 = vld [vmem:[#allocation6 + $0x458] ss:$24 sps:$4 sm:$0xff]   ;;  %v1790_v2 = vmax.f32 %v656_v48, %v662_v19  ;;  %v1714_v9 = vmax.f32 %v1713_v12, %v626_v55  ;;  %v1487_v30 = vrot.slane %v1486_v39, 2 }
 0x155   :  { %v584_v0 = vld [vmem:[#allocation4 + $0xe58] sm:$0xff]  ;;  %v590_v26 = vld [vmem:[#allocation4 + $0xe88] sm:$0xff]  ;;  %v1560_v7 = vmax.f32 %v1559_v56, %v542_v58  ;;  %4478 = vmatprep.subr.bf16.mxu1 %v8137_v15  ;;  %v1411_v12 = vrot.slane %v1410_v63, 1 }
 0x156   :  { %v668_v40 = vld [vmem:[#allocation4 + $0x10f8] sm:$0xff]  ;;  %v8090_v54 = vld [vmem:[#allocation6 + $0x450] ss:$24 sps:$4 sm:$0xff]   ;;  %v8143_v34 = vld [vmem:[#allocation6 + $0x48c] ss:$24 sps:$4 sm:$0xff]   ;;  %v1637_v20 = vmax.f32 %v1636_v41, %v584_v0  ;;  %v9276_v41 = vmax.f32 %v1332_v61, %v1333_v49  ;;  %v1488_v56 = vmax.f32 %v1486_v39, %v1487_v30  ;;  %4479 = vmatpush1.bf16.msra.mxu1 %v8135_v38 }
 0x157   :  { %v632_v35 = vld [vmem:[#allocation4 + $0xfd8] sm:$0xff]  ;;  %v710_v24 = vld [vmem:[#allocation4 + $0x1248] sm:$0xff]  ;;  %v1791_v3 = vmax.f32 %v1790_v2, %v668_v40  ;;  %4350 = vmatpush1.bf16.msra.mxu0 %v8090_v54  ;;  %4480 = vmatprep.subr.bf16.mxu1 %v8143_v34 }
 0x158   :  { %v704_v4 = vld [vmem:[#allocation4 + $0x1218] sm:$0xff]  ;;  %v554_v13 = vld [vmem:[#allocation4 + $0xd68] sm:$0xff]  ;;  %v1638_v8 = vmax.f32 %v1637_v20, %v590_v26  ;;  %v1715_v11 = vmax.f32 %v1714_v9, %v632_v35  ;;  %10140 = vst [vmem:[#allocation54_spill] sm:$0xff] %v9276_v41  ;;  %v1489_v9 = vrot.slane %v1488_v56, 1 }
 0x159   :  { %v8098_v32 = vld [vmem:[#allocation6 + $0x484] ss:$24 sps:$4 sm:$0xff]   ;;  %v674_v47 = vld [vmem:[#allocation4 + $0x1128] sm:$0xff]  ;;  %v1868_v46 = vmax.f32 %v704_v4, %v710_v24  ;;  %v8096_v0 = vld [vmem:[#allocation6 + $0x480] ss:$24 sps:$4 sm:$0xff]   ;;  %v9278_v24 = vmax.f32 %v1410_v63, %v1411_v12 }
 0x15a   :  { %v548_v50 = vld [vmem:[#allocation4 + $0xd38] sm:$0xff]  ;;  %v638_v36 = vld [vmem:[#allocation4 + $0x1008] sm:$0xff]  ;;  %v1792_v58 = vmax.f32 %v1791_v3, %v674_v47  ;;  %4351 = vmatprep.subr.bf16.mxu0 %v8098_v32 }
 0x15b   :  { %v596_v33 = vld [vmem:[#allocation4 + $0xeb8] sm:$0xff]  ;;  %v602_v48 = vld [vmem:[#allocation4 + $0xee8] sm:$0xff]  ;;  %v1561_v52 = vmax.f32 %v1560_v7, %v548_v50  ;;  %v1716_v42 = vmax.f32 %v1715_v11, %v638_v36  ;;  %10141 = vst [vmem:[#allocation55_spill] sm:$0xff] %v9278_v24  ;;  %4352 = vmatpush1.bf16.msra.mxu0 %v8096_v0 }
 0x15c   :  { %v716_v57 = vld [vmem:[#allocation4 + $0x1278] sm:$0xff]  ;;  %v8141_v55 = vld [vmem:[#allocation6 + $0x488] ss:$24 sps:$4 sm:$0xff]   ;;  %v8104_v40 = vld [vmem:[#allocation6 + $0x4b4] ss:$24 sps:$4 sm:$0xff]   ;;  %v1639_v2 = vmax.f32 %v1638_v8, %v596_v33 }
 0x15d   :  { %v644_v19 = vld [vmem:[#allocation4 + $0x1038] sm:$0xff]  ;;  %v686_v37 = vld [vmem:[#allocation4 + $0x1188] sm:$0xff]  ;;  %v1869_v20 = vmax.f32 %v1868_v46, %v716_v57  ;;  %v1562_v49 = vmax.f32 %v1561_v52, %v554_v13  ;;  %v9280_v46 = vmax.f32 %v1488_v56, %v1489_v9  ;;  %4481 = vmatpush1.bf16.msra.mxu1 %v8141_v55  ;;  %4353 = vmatprep.subr.bf16.mxu0 %v8104_v40 }
 0x15e   :  { %v680_v18 = vld [vmem:[#allocation4 + $0x1158] sm:$0xff]  ;;  %v722_v51 = vld [vmem:[#allocation4 + $0x12a8] sm:$0xff]  ;;  %v1640_v7 = vmax.f32 %v1639_v2, %v602_v48  ;;  %v1717_v3 = vmax.f32 %v1716_v42, %v644_v19 }
 0x15f   :  { %v752_v25 = vld [vmem:[#allocation4 + $0x1398] sm:$0xff]  ;;  %v758_v16 = vld [vmem:[#allocation4 + $0x13c8] sm:$0xff]  ;;  %v1793_v61 = vmax.f32 %v1792_v58, %v680_v18  ;;  %v1870_v30 = vmax.f32 %v1869_v20, %v722_v51  ;;  %v1563_v36 = vrot.slane %v1562_v49, 4  ;;  %10142 = vst [vmem:[#allocation56_spill] sm:$0xff] %v9280_v46 }
 0x160   :  { %v800_v15 = vld [vmem:[#allocation4 + $0x1518] sm:$0xff]  ;;  %v806_v53 = vld [vmem:[#allocation4 + $0x1548] sm:$0xff]  ;;  %v1946_v38 = vmax.f32 %v752_v25, %v758_v16  ;;  %v1641_v13 = vrot.slane %v1640_v7, 4 }
 0x161   :  { %v650_v26 = vld [vmem:[#allocation4 + $0x1068] sm:$0xff]  ;;  %v692_v35 = vld [vmem:[#allocation4 + $0x11b8] sm:$0xff]  ;;  %v1794_v54 = vmax.f32 %v1793_v61, %v686_v37  ;;  %v2024_v57 = vmax.f32 %v800_v15, %v806_v53  ;;  %v1564_v19 = vmax.f32 %v1562_v49, %v1563_v36 }
 0x162   :  { %v728_v4 = vld [vmem:[#allocation4 + $0x12d8] sm:$0xff]  ;;  %v698_v50 = vld [vmem:[#allocation4 + $0x11e8] sm:$0xff]  ;;  %v1718_v32 = vmax.f32 %v1717_v3, %v650_v26  ;;  %v1642_v58 = vmax.f32 %v1640_v7, %v1641_v13 }
 0x163   :  { %v764_v47 = vld [vmem:[#allocation4 + $0x13f8] sm:$0xff]  ;;  %v734_v39 = vld [vmem:[#allocation4 + $0x1308] sm:$0xff]  ;;  %v1871_v34 = vmax.f32 %v1870_v30, %v728_v4  ;;  %v1795_v51 = vmax.f32 %v1794_v54, %v692_v35  ;;  %v1565_v20 = vrot.slane %v1564_v19, 2 }
 0x164   :  { %v812_v33 = vld [vmem:[#allocation4 + $0x1578] sm:$0xff]  ;;  %v770_v8 = vld [vmem:[#allocation4 + $0x1428] sm:$0xff]  ;;  %v1947_v12 = vmax.f32 %v1946_v38, %v764_v47  ;;  %v1719_v16 = vrot.slane %v1718_v32, 4  ;;  %v1643_v9 = vrot.slane %v1642_v58, 2 }
 0x165   :  { %v848_v11 = vld [vmem:[#allocation4 + $0x1698] sm:$0xff]  ;;  %v854_v63 = vld [vmem:[#allocation4 + $0x16c8] sm:$0xff]  ;;  %v1872_v15 = vmax.f32 %v1871_v34, %v734_v39  ;;  %v2025_v53 = vmax.f32 %v2024_v57, %v812_v33  ;;  %v1796_v26 = vmax.f32 %v1795_v51, %v698_v50  ;;  %v1566_v30 = vmax.f32 %v1564_v19, %v1565_v20 }
 0x166   :  { %v8102_v18 = vld [vmem:[#allocation6 + $0x4b0] ss:$24 sps:$4 sm:$0xff]   ;;  %v740_v48 = vld [vmem:[#allocation4 + $0x1338] sm:$0xff]  ;;  %v1948_v0 = vmax.f32 %v1947_v12, %v770_v8  ;;  %v2102_v4 = vmax.f32 %v848_v11, %v854_v63  ;;  %v1720_v49 = vmax.f32 %v1718_v32, %v1719_v16  ;;  %v8116_v33 = vld [vmem:[#allocation6 + $0x514] ss:$24 sps:$4 sm:$0xff]   ;;  %v1644_v50 = vmax.f32 %v1642_v58, %v1643_v9 }
 0x167   :  { %v818_v42 = vld [vmem:[#allocation4 + $0x15a8] sm:$0xff]  ;;  %v8110_v37 = vld [vmem:[#allocation6 + $0x4e4] ss:$24 sps:$4 sm:$0xff]   ;;  %v1873_v35 = vmax.f32 %v1872_v15, %v740_v48  ;;  %4354 = vmatpush1.bf16.msra.mxu0 %v8102_v18  ;;  %v8108_v40 = vld [vmem:[#allocation6 + $0x4e0] ss:$24 sps:$4 sm:$0xff]   ;;  %v1797_v7 = vrot.slane %v1796_v26, 4 }
 0x168   :  { %v776_v25 = vld [vmem:[#allocation4 + $0x1458] sm:$0xff]  ;;  %v746_v56 = vld [vmem:[#allocation4 + $0x1368] sm:$0xff]  ;;  %v2026_v47 = vmax.f32 %v2025_v53, %v818_v42  ;;  %4355 = vmatprep.subr.bf16.mxu0 %v8110_v37  ;;  %v1721_v57 = vrot.slane %v1720_v49, 2  ;;  %v1567_v13 = vrot.slane %v1566_v30, 1  ;;  %v1645_v51 = vrot.slane %v1644_v50, 1 }
 0x169   :  { %v860_v52 = vld [vmem:[#allocation4 + $0x16f8] sm:$0xff]  ;;  %v782_v55 = vld [vmem:[#allocation4 + $0x1488] sm:$0xff]  ;;  %v1949_v36 = vmax.f32 %v1948_v0, %v776_v25  ;;  %v1874_v8 = vmax.f32 %v1873_v35, %v746_v56  ;;  %v1798_v32 = vmax.f32 %v1796_v26, %v1797_v7 }
 0x16a   :  { %v824_v2 = vld [vmem:[#allocation4 + $0x15d8] sm:$0xff]  ;;  %v866_v61 = vld [vmem:[#allocation4 + $0x1728] sm:$0xff]  ;;  %v2103_v39 = vmax.f32 %v2102_v4, %v860_v52  ;;  %v1722_v19 = vmax.f32 %v1720_v49, %v1721_v57  ;;  %v9282_v16 = vmax.f32 %v1566_v30, %v1567_v13  ;;  %v9284_v20 = vmax.f32 %v1644_v50, %v1645_v51 }
 0x16b   :  { %v830_v3 = vld [vmem:[#allocation4 + $0x1608] sm:$0xff]  ;;  %v788_v54 = vld [vmem:[#allocation4 + $0x14b8] sm:$0xff]  ;;  %v2027_v11 = vmax.f32 %v2026_v47, %v824_v2  ;;  %v1950_v34 = vmax.f32 %v1949_v36, %v782_v55  ;;  %v1875_v12 = vrot.slane %v1874_v8, 4  ;;  %4356 = vmatpush1.bf16.msra.mxu0 %v8108_v40  ;;  %v1799_v58 = vrot.slane %v1798_v32, 2 }
 0x16c   :  { %v872_v38 = vld [vmem:[#allocation4 + $0x1758] sm:$0xff]  ;;  %v2104_v48 = vmax.f32 %v2103_v39, %v866_v61  ;;  %v794_v18 = vld [vmem:[#allocation4 + $0x14e8] sm:$0xff]  ;;  %10143 = vst [vmem:[#allocation57_spill] sm:$0xff] %v9282_v16  ;;  %4357 = vmatprep.subr.bf16.mxu0 %v8116_v33  ;;  %10144 = vst [vmem:[#allocation58_spill] sm:$0xff] %v9284_v20  ;;  %v1723_v26 = vrot.slane %v1722_v19, 1  ;;  %v2144_v49 = vpack.c.bf16 %v9266_v10, %v9266_v10 }
 0x16d   :  { %v836_v63 = vld [vmem:[#allocation4 + $0x1638] sm:$0xff]  ;;  %v878_v42 = vld [vmem:[#allocation4 + $0x1788] sm:$0xff]  ;;  %v2028_v25 = vmax.f32 %v2027_v11, %v830_v3  ;;  %v1951_v15 = vmax.f32 %v1950_v34, %v788_v54  ;;  %v1876_v0 = vmax.f32 %v1874_v8, %v1875_v12  ;;  %v1800_v55 = vmax.f32 %v1798_v32, %v1799_v58 }
 0x16e   :  { %v8114_v37 = vld [vmem:[#allocation6 + $0x510] ss:$24 sps:$4 sm:$0xff]   ;;  %v2105_v53 = vmax.f32 %v2104_v48, %v872_v38  ;;  %v8122_v56 = vld [vmem:[#allocation6 + $0x544] ss:$24 sps:$4 sm:$0xff]   ;;  %v9288_v47 = vmax.f32 %v1722_v19, %v1723_v26  ;;  %v2150_v30 = vpack.c.bf16 %v9268_v31, %v9268_v31  ;;  %v8120_v7 = vld [vmem:[#allocation6 + $0x540] ss:$24 sps:$4 sm:$0xff]   ;;  %v2156_v54 = vpack.c.bf16 %v9270_v44, %v9270_v44 }
 0x16f   :  { %v842_v52 = vld [vmem:[#allocation4 + $0x1668] sm:$0xff]  ;;  %v884_v2 = vld [vmem:[#allocation4 + $0x17b8] sm:$0xff]  ;;  %v2029_v4 = vmax.f32 %v2028_v25, %v836_v63  ;;  %v1952_v61 = vmax.f32 %v1951_v15, %v794_v18  ;;  %v1877_v40 = vrot.slane %v1876_v0, 2  ;;  %4358 = vmatpush1.bf16.msra.mxu0 %v8114_v37  ;;  %v1801_v36 = vrot.slane %v1800_v55, 1 }
 0x170   :  { %v2106_v9 = vmax.f32 %v2105_v53, %v878_v42  ;;  %v890_v35 = vld [vmem:[#allocation4 + $0x17e8] sm:$0xff]  ;;  %10145 = vst [vmem:[#allocation59_spill] sm:$0xff] %v9288_v47  ;;  %4359 = vmatprep.subr.bf16.mxu0 %v8122_v56  ;;  %v2162_v8 = vpack.c.bf16 %v9272_v14, %v9272_v14  ;;  %v2168_v11 = vpack.c.bf16 %v9274_v59, %v9274_v59  ;;  %v8134_v58 = vld [vmem:[#allocation6 + $0x5a4] ss:$24 sps:$4 sm:$0xff]  }
 0x171   :  { %v2030_v3 = vmax.f32 %v2029_v4, %v842_v52  ;;  %v1953_v39 = vrot.slane %v1952_v61, 4  ;;  %v8128_v38 = vld [vmem:[#allocation6 + $0x574] ss:$24 sps:$4 sm:$0xff]   ;;  %v1878_v50 = vmax.f32 %v1876_v0, %v1877_v40  ;;  %v9298_v63 = vmax.f32 %v1800_v55, %v1801_v36  ;;  %v8126_v19 = vld [vmem:[#allocation6 + $0x570] ss:$24 sps:$4 sm:$0xff]  }
 0x172   :  { %v2107_v33 = vmax.f32 %v2106_v9, %v884_v2  ;;  %v2174_v34 = vpack.c.bf16 %v9276_v41, %v9276_v41  ;;  %v2180_v42 = vpack.c.bf16 %v9278_v24, %v9278_v24  ;;  %v2186_v51 = vpack.c.bf16 %v9280_v46, %v9280_v46  ;;  %v277_v46 = vld [vmem:[#allocation4 + $0x4c0] sm:$0xff]  ;;  %v163_v24 = vld [vmem:[#allocation4 + $0x130] sm:$0xff] }
 0x173   :  { %v2031_v57 = vrot.slane %v2030_v3, 4  ;;  %10146 = vst [vmem:[#allocation60_spill] sm:$0xff] %v9298_v63  ;;  %v1954_v13 = vmax.f32 %v1952_v61, %v1953_v39  ;;  %v1879_v48 = vrot.slane %v1878_v50, 1  ;;  %4360 = vmatpush1.bf16.msra.mxu0 %v8120_v7  ;;  %v2192_v37 = vpack.c.bf16 %v9282_v16, %v9282_v16 }
 0x174   :  { %v2108_v32 = vmax.f32 %v2107_v33, %v890_v35  ;;  %v2198_v52 = vpack.c.bf16 %v9284_v20, %v9284_v20  ;;  %4361 = vmatprep.subr.bf16.mxu0 %v8128_v38  ;;  %v2204_v56 = vpack.c.bf16 %v9288_v47, %v9288_v47  ;;  %v2210_v2 = vpack.c.bf16 %v9298_v63, %v9298_v63  ;;  %v8140_v38 = vld [vmem:[#allocation6 + $0x5d4] ss:$24 sps:$4 sm:$0xff]   ;;  %v205_v63 = vld [vmem:[#allocation4 + $0x280] sm:$0xff] }
 0x175   :  { %v2032_v18 = vmax.f32 %v2030_v3, %v2031_v57  ;;  %v1955_v12 = vrot.slane %v1954_v13, 2  ;;  %v9310_v15 = vmax.f32 %v1878_v50, %v1879_v48  ;;  %v2656_v4 = vunpack.c.l.b16 %v2144_v49  ;;  %v8132_v3 = vld [vmem:[#allocation6 + $0x5a0] ss:$24 sps:$4 sm:$0xff]  }
 0x176   :  { %v2109_v25 = vrot.slane %v2108_v32, 4  ;;  %v2662_v55 = vunpack.c.l.b16 %v2150_v30  ;;  %v2668_v35 = vunpack.c.l.b16 %v2156_v54  ;;  %v2674_v40 = vunpack.c.l.b16 %v2162_v8  ;;  %v133_v54 = vld [vmem:[#allocation4 + $0x40] sm:$0xff]  ;;  %v8138_v8 = vld [vmem:[#allocation6 + $0x5d0] ss:$24 sps:$4 sm:$0xff]  }
 0x177   :  { %10147 = vst [vmem:[#allocation61_spill] sm:$0xff] %v9310_v15  ;;  %v2033_v53 = vrot.slane %v2032_v18, 2  ;;  %v1956_v26 = vmax.f32 %v1954_v13, %v1955_v12  ;;  %v2216_v9 = vpack.c.bf16 %v9310_v15, %v9310_v15  ;;  %4362 = vmatpush1.bf16.msra.mxu0 %v8126_v19  ;;  %v2680_v39 = vunpack.c.l.b16 %v2168_v11  ;;  %v127_v12 = vld [vmem:[#allocation4 + $0x10] sm:$0xff]  ;;  %v9386_v20 = vld [vmem:[#allocation4 + $0x1120] sm:$0xff] }
 0x178   :  { %v2110_v0 = vmax.f32 %v2108_v32, %v2109_v25  ;;  %v2686_v33 = vunpack.c.l.b16 %v2174_v34  ;;  %4363 = vmatprep.subr.bf16.mxu0 %v8134_v58  ;;  %v2692_v57 = vunpack.c.l.b16 %v2180_v42  ;;  %v2698_v13 = vunpack.c.l.b16 %v2186_v51  ;;  %v8146_v34 = vld [vmem:[#allocation6 + $0x604] ss:$24 sps:$4 sm:$0xff]   ;;  %v139_v58 = vld [vmem:[#allocation4 + $0x70] sm:$0xff] }
 0x179   :  { %v2034_v61 = vmax.f32 %v2032_v18, %v2033_v53  ;;  %v1957_v7 = vrot.slane %v1956_v26, 1  ;;  %v2704_v32 = vunpack.c.l.b16 %v2192_v37  ;;  %v2710_v48 = vunpack.c.l.b16 %v2198_v52 }
 0x17a   :  { %v2111_v36 = vrot.slane %v2110_v0, 2  ;;  %v2716_v18 = vunpack.c.l.b16 %v2204_v56  ;;  %v2722_v25 = vunpack.c.l.b16 %v2210_v2  ;;  %v2728_v53 = vunpack.c.l.b16 %v2216_v9  ;;  %v145_v56 = vld [vmem:[#allocation4 + $0xa0] sm:$0xff]  ;;  %v223_v9 = vld [vmem:[#allocation4 + $0x310] sm:$0xff] }
 0x17b   :  { %v2035_v50 = vrot.slane %v2034_v61, 1  ;;  %v9318_v49 = vmax.f32 %v1956_v26, %v1957_v7  ;;  %v2777_v11 = vsel %vm2749_vm0, %v2662_v55, %v2656_v4  ;;  %4364 = vmatpush1.bf16.msra.mxu0 %v8132_v3  ;;  %v2819_v52 = vsel %vm2749_vm0, %v2710_v48, %v2704_v32  ;;  %v175_v26 = vld [vmem:[#allocation4 + $0x190] sm:$0xff]  ;;  %v229_v3 = vld [vmem:[#allocation4 + $0x340] sm:$0xff] }
 0x17c   :  { %v2112_v30 = vmax.f32 %v2110_v0, %v2111_v36  ;;  %v2778_v37 = vsel %vm2751_vm1, %v2668_v35, %v2777_v11  ;;  %v181_v0 = vld [vmem:[#allocation4 + $0x1c0] sm:$0xff]  ;;  %4365 = vmatprep.subr.bf16.mxu0 %v8140_v38  ;;  %v2820_v55 = vsel %vm2751_vm1, %v2716_v18, %v2819_v52  ;;  %v919_v7 = vmax.f32 %v127_v12, %v133_v54  ;;  %v151_v48 = vld [vmem:[#allocation4 + $0xd0] sm:$0xff] }
 0x17d   :  { %10148 = vst [vmem:[#allocation62_spill] sm:$0xff] %v9318_v49  ;;  %v9320_v19 = vmax.f32 %v2034_v61, %v2035_v50  ;;  %v2222_v51 = vpack.c.bf16 %v9318_v49, %v9318_v49  ;;  %v2779_v4 = vsel %vm2753_vm2, %v2674_v40, %v2778_v37  ;;  %v187_v61 = vld [vmem:[#allocation4 + $0x1f0] sm:$0xff]  ;;  %v2821_v32 = vsel %vm2753_vm2, %v2722_v25, %v2820_v55  ;;  %v193_v37 = vld [vmem:[#allocation4 + $0x220] sm:$0xff] }
 0x17e   :  { %v2113_v42 = vrot.slane %v2112_v30, 1  ;;  %v2780_v50 = vsel %vm2755_vm3, %v2680_v39, %v2779_v4  ;;  %v235_v38 = vld [vmem:[#allocation4 + $0x370] sm:$0xff]  ;;  %v2822_v18 = vsel %vm2755_vm3, %v2728_v53, %v2821_v32  ;;  %v325_v49 = vld [vmem:[#allocation4 + $0x640] sm:$0xff]  ;;  %v1075_v32 = vmax.f32 %v223_v9, %v229_v3 }
 0x17f   :  { %10149 = vst [vmem:[#allocation63_spill] sm:$0xff] %v9320_v19  ;;  %v2228_v2 = vpack.c.bf16 %v9320_v19, %v9320_v19  ;;  %v2734_v35 = vunpack.c.l.b16 %v2222_v51  ;;  %v271_v11 = vld [vmem:[#allocation4 + $0x490] sm:$0xff]  ;;  %v2781_v40 = vsel %vm2757_vm4, %v2686_v33, %v2780_v50  ;;  %4366 = vmatpush1.bf16.msra.mxu0 %v8138_v8  ;;  %v373_v51 = vld [vmem:[#allocation4 + $0x7c0] sm:$0xff]  ;;  %v997_v33 = vmax.f32 %v175_v26, %v181_v0 }
 0x180   :  { %v9331_v36 = vmax.f32 %v2112_v30, %v2113_v42  ;;  %v319_v52 = vld [vmem:[#allocation4 + $0x610] sm:$0xff]  ;;  %v920_v30 = vmax.f32 %v919_v7, %v139_v58  ;;  %v2782_v54 = vsel %vm2759_vm5, %v2692_v57, %v2781_v40  ;;  %v157_v42 = vld [vmem:[#allocation4 + $0x100] sm:$0xff]  ;;  %4378 = vmatprep.subr.bf16.mxu0 %v8146_v34  ;;  %v1153_v15 = vmax.f32 %v271_v11, %v277_v46 }
 0x181   :  { %v2740_v19 = vunpack.c.l.b16 %v2228_v2  ;;  %v367_v12 = vld [vmem:[#allocation4 + $0x790] sm:$0xff]  ;;  %v2823_v25 = vsel %vm2757_vm4, %v2734_v35, %v2822_v18  ;;  %v421_v4 = vld [vmem:[#allocation4 + $0x940] sm:$0xff]  ;;  %v2783_v53 = vsel %vm2761_vm6, %v2698_v13, %v2782_v54  ;;  %v998_v18 = vmax.f32 %v997_v33, %v187_v61 }
 0x182   :  { %10150 = vst [vmem:[#allocation64_spill] sm:$0xff] %v9331_v36  ;;  %v2234_v39 = vpack.c.bf16 %v9331_v36, %v9331_v36  ;;  %v415_v2 = vld [vmem:[#allocation4 + $0x910] sm:$0xff]  ;;  %v921_v7 = vmax.f32 %v920_v30, %v145_v56  ;;  %v241_v57 = vld [vmem:[#allocation4 + $0x3a0] sm:$0xff]  ;;  %v1231_v41 = vmax.f32 %v319_v52, %v325_v49  ;;  %v1309_v34 = vmax.f32 %v367_v12, %v373_v51 }
 0x183   :  { %v2824_v55 = vsel %vm2759_vm5, %v2740_v19, %v2823_v25  ;;  %v199_v50 = vld [vmem:[#allocation4 + $0x250] sm:$0xff]  ;;  %v289_v26 = vld [vmem:[#allocation4 + $0x520] sm:$0xff]  ;;  %v1076_v19 = vmax.f32 %v1075_v32, %v235_v38  ;;  %v1387_v25 = vmax.f32 %v415_v2, %v421_v4 }
 0x184   :  { %v283_v58 = vld [vmem:[#allocation4 + $0x4f0] sm:$0xff]  ;;  %v2746_v36 = vunpack.c.l.b16 %v2234_v39  ;;  %v337_v0 = vld [vmem:[#allocation4 + $0x6a0] sm:$0xff]  ;;  %v922_v54 = vmax.f32 %v921_v7, %v151_v48  ;;  %v999_v39 = vmax.f32 %v998_v18, %v193_v37 }
 0x185   :  { %v331_v8 = vld [vmem:[#allocation4 + $0x670] sm:$0xff]  ;;  %v169_v56 = vld [vmem:[#allocation4 + $0x160] sm:$0xff]  ;;  %v1154_v47 = vmax.f32 %v1153_v15, %v283_v58  ;;  %v1077_v48 = vmax.f32 %v1076_v19, %v241_v57 }
 0x186   :  { %v247_v40 = vld [vmem:[#allocation4 + $0x3d0] sm:$0xff]  ;;  %v2825_v59 = vsel %vm2761_vm6, %v2746_v36, %v2824_v55  ;;  %v385_v9 = vld [vmem:[#allocation4 + $0x820] sm:$0xff]  ;;  %v1232_v14 = vmax.f32 %v1231_v41, %v331_v8  ;;  %v923_v33 = vmax.f32 %v922_v54, %v157_v42  ;;  %v1000_v36 = vmax.f32 %v999_v39, %v199_v50 }
 0x187   :  { %v379_v35 = vld [vmem:[#allocation4 + $0x7f0] sm:$0xff]  ;;  %v469_v30 = vld [vmem:[#allocation4 + $0xac0] sm:$0xff]  ;;  %v9344_v61 = vpack.c.b16 %v2825_v59, %v2783_v53  ;;  %v1155_v4 = vmax.f32 %v1154_v47, %v289_v26  ;;  %v1078_v58 = vmax.f32 %v1077_v48, %v247_v40 }
 0x188   :  { %v427_v13 = vld [vmem:[#allocation4 + $0x970] sm:$0xff]  ;;  %v433_v52 = vld [vmem:[#allocation4 + $0x9a0] sm:$0xff]  ;;  %v1310_v38 = vmax.f32 %v1309_v34, %v379_v35  ;;  %v1233_v55 = vmax.f32 %v1232_v14, %v337_v0  ;;  %v924_v53 = vmax.f32 %v923_v33, %v163_v24  ;;  %v1001_v18 = vmax.f32 %v1000_v36, %v205_v63 }
 0x189   :  { %v463_v3 = vld [vmem:[#allocation4 + $0xa90] sm:$0xff]  ;;  %v253_v12 = vld [vmem:[#allocation4 + $0x400] sm:$0xff]  ;;  %v1388_v7 = vmax.f32 %v1387_v25, %v427_v13  ;;  %4367 = vmatprep.mubr.bf16.mxu0 %v9344_v61  ;;  %4496 = vmatprep.mubr.bf16.mxu1 %v9344_v61 }
 0x18a   :  { %v211_v46 = vld [vmem:[#allocation4 + $0x2b0] sm:$0xff]  ;;  %v217_v15 = vld [vmem:[#allocation4 + $0x2e0] sm:$0xff]  ;;  %v1311_v8 = vmax.f32 %v1310_v38, %v385_v9  ;;  %v1465_v32 = vmax.f32 %v463_v3, %v469_v30  ;;  %v925_v0 = vmax.f32 %v924_v53, %v169_v56  ;;  %v1079_v13 = vmax.f32 %v1078_v58, %v253_v12 }
 0x18b   :  { %v295_v49 = vld [vmem:[#allocation4 + $0x550] sm:$0xff]  ;;  %v301_v41 = vld [vmem:[#allocation4 + $0x580] sm:$0xff]  ;;  %v1389_v50 = vmax.f32 %v1388_v7, %v433_v52  ;;  %v1002_v3 = vmax.f32 %v1001_v18, %v211_v46 }
 0x18c   :  { %v343_v11 = vld [vmem:[#allocation4 + $0x6d0] sm:$0xff]  ;;  %v349_v59 = vld [vmem:[#allocation4 + $0x700] sm:$0xff]  ;;  %v1156_v54 = vmax.f32 %v1155_v4, %v295_v49  ;;  %v926_v52 = vrot.slane %v925_v0, 4 }
 0x18d   :  { %v391_v51 = vld [vmem:[#allocation4 + $0x850] sm:$0xff]  ;;  %v397_v57 = vld [vmem:[#allocation4 + $0x880] sm:$0xff]  ;;  %v1234_v19 = vmax.f32 %v1233_v55, %v343_v11  ;;  %v1003_v56 = vmax.f32 %v1002_v3, %v217_v15 }
 0x18e   :  { %v475_v2 = vld [vmem:[#allocation4 + $0xaf0] sm:$0xff]  ;;  %v481_v35 = vld [vmem:[#allocation4 + $0xb20] sm:$0xff]  ;;  %v1312_v34 = vmax.f32 %v1311_v8, %v391_v51  ;;  %v1157_v30 = vmax.f32 %v1156_v54, %v301_v41  ;;  %v927_v58 = vmax.f32 %v925_v0, %v926_v52 }
 0x18f   :  { %v439_v37 = vld [vmem:[#allocation4 + $0x9d0] sm:$0xff]  ;;  %v445_v26 = vld [vmem:[#allocation4 + $0xa00] sm:$0xff]  ;;  %v1466_v25 = vmax.f32 %v1465_v32, %v475_v2  ;;  %v1235_v39 = vmax.f32 %v1234_v19, %v349_v59 }
 0x190   :  { %v259_v42 = vld [vmem:[#allocation4 + $0x430] sm:$0xff]  ;;  %v265_v24 = vld [vmem:[#allocation4 + $0x460] sm:$0xff]  ;;  %v1390_v33 = vmax.f32 %v1389_v50, %v439_v37  ;;  %v1313_v38 = vmax.f32 %v1312_v34, %v397_v57  ;;  %v1004_v37 = vrot.slane %v1003_v56, 4  ;;  %v928_v57 = vrot.slane %v927_v58, 2 }
 0x191   :  { %v307_v14 = vld [vmem:[#allocation4 + $0x5b0] sm:$0xff]  ;;  %v313_v63 = vld [vmem:[#allocation4 + $0x5e0] sm:$0xff]  ;;  %v1080_v48 = vmax.f32 %v1079_v13, %v259_v42  ;;  %v1467_v36 = vmax.f32 %v1466_v25, %v481_v35 }
 0x192   :  { %v355_v47 = vld [vmem:[#allocation4 + $0x730] sm:$0xff]  ;;  %v361_v49 = vld [vmem:[#allocation4 + $0x760] sm:$0xff]  ;;  %v1158_v12 = vmax.f32 %v1157_v30, %v307_v14  ;;  %v1391_v2 = vmax.f32 %v1390_v33, %v445_v26  ;;  %v1005_v14 = vmax.f32 %v1003_v56, %v1004_v37  ;;  %v929_v0 = vmax.f32 %v927_v58, %v928_v57 }
 0x193   :  { %v403_v40 = vld [vmem:[#allocation4 + $0x8b0] sm:$0xff]  ;;  %v409_v4 = vld [vmem:[#allocation4 + $0x8e0] sm:$0xff]  ;;  %v1236_v51 = vmax.f32 %v1235_v39, %v355_v47  ;;  %v1081_v46 = vmax.f32 %v1080_v48, %v265_v24 }
 0x194   :  { %v487_v9 = vld [vmem:[#allocation4 + $0xb50] sm:$0xff]  ;;  %v493_v55 = vld [vmem:[#allocation4 + $0xb80] sm:$0xff]  ;;  %v1314_v41 = vmax.f32 %v1313_v38, %v403_v40  ;;  %v1159_v8 = vmax.f32 %v1158_v12, %v313_v63  ;;  %v1006_v3 = vrot.slane %v1005_v14, 2 }
 0x195   :  { %v451_v11 = vld [vmem:[#allocation4 + $0xa30] sm:$0xff]  ;;  %v457_v7 = vld [vmem:[#allocation4 + $0xa60] sm:$0xff]  ;;  %v1468_v59 = vmax.f32 %v1467_v36, %v487_v9  ;;  %v1237_v32 = vmax.f32 %v1236_v51, %v361_v49  ;;  %v1082_v35 = vrot.slane %v1081_v46, 4  ;;  %v930_v49 = vrot.slane %v929_v0, 1 }
 0x196   :  { %v499_v53 = vld [vmem:[#allocation4 + $0xbb0] sm:$0xff]  ;;  %v1392_v18 = vmax.f32 %v1391_v2, %v451_v11  ;;  %v1315_v19 = vmax.f32 %v1314_v41, %v409_v4  ;;  %v505_v15 = vld [vmem:[#allocation4 + $0xbe0] sm:$0xff]  ;;  %v1160_v47 = vrot.slane %v1159_v8, 4  ;;  %v1007_v4 = vmax.f32 %v1005_v14, %v1006_v3 }
 0x197   :  { %v8147_v54 = vld [vmem:[#allocation6 + $0x4b8] ss:$24 sps:$4 sm:$0xff]   ;;  %v8149_v42 = vld [vmem:[#allocation6 + $0x4bc] ss:$24 sps:$4 sm:$0xff]   ;;  %v1469_v50 = vmax.f32 %v1468_v59, %v493_v55  ;;  %v1238_v26 = vrot.slane %v1237_v32, 4  ;;  %v1083_v34 = vmax.f32 %v1081_v46, %v1082_v35  ;;  %v517_v38 = vld [vmem:[#allocation4 + $0xc40] sm:$0xff]  ;;  %v9368_v3 = vmax.f32 %v929_v0, %v930_v49 }
 0x198   :  { %v1393_v13 = vmax.f32 %v1392_v18, %v457_v7  ;;  %4482 = vmatprep.subr.bf16.mxu1 %v8149_v42  ;;  %v1316_v25 = vrot.slane %v1315_v19, 4  ;;  %v8153_v40 = vld [vmem:[#allocation6 + $0x4e8] ss:$24 sps:$4 sm:$0xff]   ;;  %v8155_v9 = vld [vmem:[#allocation6 + $0x4ec] ss:$24 sps:$4 sm:$0xff]   ;;  %v1161_v30 = vmax.f32 %v1159_v8, %v1160_v47  ;;  %v511_v63 = vld [vmem:[#allocation4 + $0xc10] sm:$0xff] }
 0x199   :  { %v1470_v24 = vmax.f32 %v1469_v50, %v499_v53  ;;  %4483 = vmatpush1.bf16.msra.mxu1 %v8147_v54  ;;  %v1239_v39 = vmax.f32 %v1237_v32, %v1238_v26  ;;  %v1084_v11 = vrot.slane %v1083_v34, 2  ;;  %v523_v36 = vld [vmem:[#allocation4 + $0xc70] sm:$0xff]  ;;  %v9350_v7 = vld [vmem:[#allocation4 + $0xdc0] sm:$0xff]  ;;  %v1008_v32 = vrot.slane %v1007_v4, 1  ;;  %10151 = vst [vmem:[#allocation65_spill] sm:$0xff] %v9368_v3 }
 0x19a   :  { %v1394_v33 = vrot.slane %v1393_v13, 4  ;;  %v1317_v52 = vmax.f32 %v1315_v19, %v1316_v25  ;;  %4484 = vmatprep.subr.bf16.mxu1 %v8155_v9  ;;  %v1162_v55 = vrot.slane %v1161_v30, 2  ;;  %v8161_v51 = vld [vmem:[#allocation6 + $0x51c] ss:$24 sps:$4 sm:$0xff]   ;;  %v8159_v41 = vld [vmem:[#allocation6 + $0x518] ss:$24 sps:$4 sm:$0xff]   ;;  %v1543_v26 = vmax.f32 %v511_v63, %v517_v38 }
 0x19b   :  { %v1471_v48 = vmax.f32 %v1470_v24, %v505_v15  ;;  %v1240_v56 = vrot.slane %v1239_v39, 2  ;;  %v9348_v2 = vld [vmem:[#allocation4 + $0xd90] sm:$0xff]  ;;  %v1085_v53 = vmax.f32 %v1083_v34, %v1084_v11  ;;  %v9352_v59 = vld [vmem:[#allocation4 + $0xca0] sm:$0xff]  ;;  %v9374_v63 = vmax.f32 %v1007_v4, %v1008_v32 }
 0x19c   :  { %v1395_v12 = vmax.f32 %v1393_v13, %v1394_v33  ;;  %v1318_v58 = vrot.slane %v1317_v52, 2  ;;  %v9354_v37 = vld [vmem:[#allocation4 + $0xf10] sm:$0xff]  ;;  %v9356_v8 = vld [vmem:[#allocation4 + $0xf40] sm:$0xff]  ;;  %v1163_v18 = vmax.f32 %v1161_v30, %v1162_v55  ;;  %v1621_v27 = vmax.f32 %v9348_v2, %v9350_v7 }
 0x19d   :  { %v1472_v46 = vrot.slane %v1471_v48, 4  ;;  %4485 = vmatpush1.bf16.msra.mxu1 %v8153_v40  ;;  %v1241_v54 = vmax.f32 %v1239_v39, %v1240_v56  ;;  %v571_v57 = vld [vmem:[#allocation4 + $0xdf0] sm:$0xff]  ;;  %v9360_v19 = vld [vmem:[#allocation4 + $0x10c0] sm:$0xff]  ;;  %v1086_v15 = vrot.slane %v1085_v53, 1  ;;  %10152 = vst [vmem:[#allocation66_spill] sm:$0xff] %v9374_v63 }
 0x19e   :  { %v1396_v42 = vrot.slane %v1395_v12, 2  ;;  %4486 = vmatprep.subr.bf16.mxu1 %v8161_v51  ;;  %v9358_v35 = vld [vmem:[#allocation4 + $0x1090] sm:$0xff]  ;;  %v1319_v14 = vmax.f32 %v1317_v52, %v1318_v58  ;;  %v8167_v13 = vld [vmem:[#allocation6 + $0x54c] ss:$24 sps:$4 sm:$0xff]   ;;  %v1164_v30 = vrot.slane %v1163_v18, 1  ;;  %v1544_v51 = vmax.f32 %v1543_v26, %v523_v36 }
 0x19f   :  { %v9362_v50 = vld [vmem:[#allocation4 + $0x1210] sm:$0xff]  ;;  %v1473_v47 = vmax.f32 %v1471_v48, %v1472_v46  ;;  %v709_v24 = vld [vmem:[#allocation4 + $0x1240] sm:$0xff]  ;;  %v1242_v39 = vrot.slane %v1241_v54, 1  ;;  %v9380_v60 = vmax.f32 %v1085_v53, %v1086_v15  ;;  %v1622_v23 = vmax.f32 %v1621_v27, %v571_v57 }
 0x1a0   :  { %v535_v34 = vld [vmem:[#allocation4 + $0xcd0] sm:$0xff]  ;;  %v9366_v9 = vld [vmem:[#allocation4 + $0x13c0] sm:$0xff]  ;;  %v1397_v33 = vmax.f32 %v1395_v12, %v1396_v42  ;;  %v1320_v48 = vrot.slane %v1319_v14, 1  ;;  %v9382_v12 = vmax.f32 %v1163_v18, %v1164_v30  ;;  %v1545_v53 = vmax.f32 %v1544_v51, %v9352_v59 }
 0x1a1   :  { %v619_v25 = vld [vmem:[#allocation4 + $0xf70] sm:$0xff]  ;;  %v9370_v11 = vld [vmem:[#allocation4 + $0xe20] sm:$0xff]  ;;  %v1474_v38 = vrot.slane %v1473_v47, 2  ;;  %4487 = vmatpush1.bf16.msra.mxu1 %v8159_v41  ;;  %10153 = vst [vmem:[#allocation67_spill] sm:$0xff] %v9380_v60  ;;  %v9390_v16 = vmax.f32 %v1241_v54, %v1242_v39  ;;  %v1699_v18 = vmax.f32 %v9354_v37, %v9356_v8  ;;  %v1777_v54 = vmax.f32 %v9358_v35, %v9360_v19 }
 0x1a2   :  { %v9364_v40 = vld [vmem:[#allocation4 + $0x1390] sm:$0xff]  ;;  %v8165_v58 = vld [vmem:[#allocation6 + $0x548] ss:$24 sps:$4 sm:$0xff]   ;;  %10154 = vst [vmem:[#allocation68_spill] sm:$0xff] %v9382_v12  ;;  %v1398_v42 = vrot.slane %v1397_v33, 1  ;;  %4488 = vmatprep.subr.bf16.mxu1 %v8167_v13  ;;  %v9403_v17 = vmax.f32 %v1319_v14, %v1320_v48  ;;  %v1623_v35 = vmax.f32 %v1622_v23, %v9370_v11 }
 0x1a3   :  { %v667_v55 = vld [vmem:[#allocation4 + $0x10f0] sm:$0xff]  ;;  %v9376_v46 = vld [vmem:[#allocation4 + $0xd00] sm:$0xff]  ;;  %10155 = vst [vmem:[#allocation69_spill] sm:$0xff] %v9390_v16  ;;  %v9392_v44 = vmax.f32 %v1473_v47, %v1474_v38  ;;  %v1855_v47 = vmax.f32 %v9362_v50, %v709_v24  ;;  %v1546_v38 = vmax.f32 %v1545_v53, %v535_v34  ;;  %v1700_v51 = vmax.f32 %v1699_v18, %v619_v25 }
 0x1a4   :  { %v715_v56 = vld [vmem:[#allocation4 + $0x1270] sm:$0xff]  ;;  %v9378_v0 = vld [vmem:[#allocation4 + $0xfa0] sm:$0xff]  ;;  %10156 = vst [vmem:[#allocation70_spill] sm:$0xff] %v9403_v17  ;;  %v9410_v8 = vmax.f32 %v1397_v33, %v1398_v42  ;;  %v1933_v45 = vmax.f32 %v9364_v40, %v9366_v9  ;;  %v1778_v19 = vmax.f32 %v1777_v54, %v667_v55 }
 0x1a5   :  { %v9372_v52 = vld [vmem:[#allocation4 + $0x1510] sm:$0xff]  ;;  %v9388_v36 = vld [vmem:[#allocation4 + $0x12a0] sm:$0xff]  ;;  %4489 = vmatpush1.bf16.msra.mxu1 %v8165_v58  ;;  %v1856_v50 = vmax.f32 %v1855_v47, %v715_v56  ;;  %v1547_v9 = vmax.f32 %v1546_v38, %v9376_v46  ;;  %v1701_v58 = vmax.f32 %v1700_v51, %v9378_v0 }
 0x1a6   :  { %v763_v49 = vld [vmem:[#allocation4 + $0x13f0] sm:$0xff]  ;;  %v805_v41 = vld [vmem:[#allocation4 + $0x1540] sm:$0xff]  ;;  %10157 = vst [vmem:[#allocation71_spill] sm:$0xff] %v9410_v8 }
 0x1a7   :  { %v8173_v4 = vld [vmem:[#allocation6 + $0x57c] ss:$24 sps:$4 sm:$0xff]   ;;  %v9397_v7 = vld [vmem:[#allocation4 + $0x1420] sm:$0xff]  ;;  %v8171_v14 = vld [vmem:[#allocation6 + $0x578] ss:$24 sps:$4 sm:$0xff]   ;;  %v2011_v24 = vmax.f32 %v9372_v52, %v805_v41  ;;  %v1934_v18 = vmax.f32 %v1933_v45, %v763_v49  ;;  %v1779_v52 = vmax.f32 %v1778_v19, %v9386_v20 }
 0x1a8   :  { %v583_v32 = vld [vmem:[#allocation4 + $0xe50] sm:$0xff]  ;;  %v9401_v30 = vld [vmem:[#allocation4 + $0x16c0] sm:$0xff]  ;;  %4490 = vmatprep.subr.bf16.mxu1 %v8173_v4  ;;  %v1857_v4 = vmax.f32 %v1856_v50, %v9388_v36 }
 0x1a9   :  { %v811_v26 = vld [vmem:[#allocation4 + $0x1570] sm:$0xff]  ;;  %v9408_v59 = vld [vmem:[#allocation4 + $0xe80] sm:$0xff]  ;;  %v1624_v56 = vmax.f32 %v1623_v35, %v583_v32  ;;  %v1935_v46 = vmax.f32 %v1934_v18, %v9397_v7  ;;  %4491 = vmatpush1.bf16.msra.mxu1 %v8171_v14 }
 0x1aa   :  { %v547_v15 = vld [vmem:[#allocation4 + $0xd30] sm:$0xff]  ;;  %v553_v48 = vld [vmem:[#allocation4 + $0xd60] sm:$0xff]  ;;  %v2012_v41 = vmax.f32 %v2011_v24, %v811_v26  ;;  %4492 = vmatprep.subr.bf16.mxu1 %v8179_v28 }
 0x1ab   :  { %v631_v2 = vld [vmem:[#allocation4 + $0xfd0] sm:$0xff]  ;;  %v637_v27 = vld [vmem:[#allocation4 + $0x1000] sm:$0xff]  ;;  %v1548_v31 = vmax.f32 %v1547_v9, %v547_v15  ;;  %v1625_v32 = vmax.f32 %v1624_v56, %v9408_v59 }
 0x1ac   :  { %v9399_v13 = vld [vmem:[#allocation4 + $0x1690] sm:$0xff]  ;;  %v685_v42 = vld [vmem:[#allocation4 + $0x1180] sm:$0xff]  ;;  %v1702_v40 = vmax.f32 %v1701_v58, %v631_v2 }
 0x1ad   :  { %v679_v39 = vld [vmem:[#allocation4 + $0x1150] sm:$0xff]  ;;  %v733_v34 = vld [vmem:[#allocation4 + $0x1300] sm:$0xff]  ;;  %v2089_v45 = vmax.f32 %v9399_v13, %v9401_v30  ;;  %v1549_v50 = vmax.f32 %v1548_v31, %v553_v48 }
 0x1ae   :  { %v727_v37 = vld [vmem:[#allocation4 + $0x12d0] sm:$0xff]  ;;  %v817_v25 = vld [vmem:[#allocation4 + $0x15a0] sm:$0xff]  ;;  %v1780_v20 = vmax.f32 %v1779_v52, %v679_v39  ;;  %v1703_v7 = vmax.f32 %v1702_v40, %v637_v27 }
 0x1af   :  { %v775_v57 = vld [vmem:[#allocation4 + $0x1450] sm:$0xff]  ;;  %v781_v23 = vld [vmem:[#allocation4 + $0x1480] sm:$0xff]  ;;  %v1858_v51 = vmax.f32 %v1857_v4, %v727_v37  ;;  %v2013_v36 = vmax.f32 %v2012_v41, %v817_v25  ;;  %v1550_v39 = vrot.slane %v1549_v50, 4 }
 0x1b0   :  { %v595_v33 = vld [vmem:[#allocation4 + $0xeb0] sm:$0xff]  ;;  %v865_v55 = vld [vmem:[#allocation4 + $0x1720] sm:$0xff]  ;;  %v1936_v24 = vmax.f32 %v1935_v46, %v775_v57  ;;  %v1781_v18 = vmax.f32 %v1780_v20, %v685_v42  ;;  %v1704_v37 = vmax.f32 %v1703_v7, %v643_v21 }
 0x1b1   :  { %v823_v53 = vld [vmem:[#allocation4 + $0x15d0] sm:$0xff]  ;;  %v601_v54 = vld [vmem:[#allocation4 + $0xee0] sm:$0xff]  ;;  %v1626_v58 = vmax.f32 %v1625_v32, %v595_v33  ;;  %v1859_v10 = vmax.f32 %v1858_v51, %v733_v34  ;;  %v1551_v57 = vmax.f32 %v1549_v50, %v1550_v39 }
 0x1b2   :  { %v859_v11 = vld [vmem:[#allocation4 + $0x16f0] sm:$0xff]  ;;  %v8177_v0 = vld [vmem:[#allocation6 + $0x5a8] ss:$24 sps:$4 sm:$0xff]   ;;  %v2014_v59 = vmax.f32 %v2013_v36, %v823_v53  ;;  %v1937_v25 = vmax.f32 %v1936_v24, %v781_v23  ;;  %v8191_v48 = vld [vmem:[#allocation6 + $0x60c] ss:$24 sps:$4 sm:$0xff]  }
 0x1b3   :  { %v691_v47 = vld [vmem:[#allocation4 + $0x11b0] sm:$0xff]  ;;  %v649_v49 = vld [vmem:[#allocation4 + $0x1060] sm:$0xff]  ;;  %v2090_v9 = vmax.f32 %v2089_v45, %v859_v11  ;;  %4493 = vmatpush1.bf16.msra.mxu1 %v8177_v0  ;;  %v1627_v52 = vmax.f32 %v1626_v58, %v601_v54  ;;  %v1860_v41 = vmax.f32 %v1859_v10, %v739_v5  ;;  %v1552_v23 = vrot.slane %v1551_v57, 2 }
 0x1b4   :  { %v787_v38 = vld [vmem:[#allocation4 + $0x14b0] sm:$0xff]  ;;  %v697_v35 = vld [vmem:[#allocation4 + $0x11e0] sm:$0xff]  ;;  %v1782_v4 = vmax.f32 %v1781_v18, %v691_v47  ;;  %v1705_v40 = vmax.f32 %v1704_v37, %v649_v49 }
 0x1b5   :  { %v8185_v26 = vld [vmem:[#allocation6 + $0x5dc] ss:$24 sps:$4 sm:$0xff]   ;;  %v745_v19 = vld [vmem:[#allocation4 + $0x1360] sm:$0xff]  ;;  %v2091_v28 = vmax.f32 %v2090_v9, %v865_v55  ;;  %v8183_v56 = vld [vmem:[#allocation6 + $0x5d8] ss:$24 sps:$4 sm:$0xff]   ;;  %v1938_v11 = vmax.f32 %v1937_v25, %v787_v38  ;;  %v1628_v34 = vrot.slane %v1627_v52, 4  ;;  %v1553_v20 = vmax.f32 %v1551_v57, %v1552_v23 }
 0x1b6   :  { %v829_v15 = vld [vmem:[#allocation4 + $0x1600] sm:$0xff]  ;;  %v835_v2 = vld [vmem:[#allocation4 + $0x1630] sm:$0xff]  ;;  %4494 = vmatprep.subr.bf16.mxu1 %v8185_v26  ;;  %v1783_v53 = vmax.f32 %v1782_v4, %v697_v35  ;;  %v1861_v46 = vmax.f32 %v1860_v41, %v745_v19  ;;  %v1706_v55 = vrot.slane %v1705_v40, 4 }
 0x1b7   :  { %v793_v13 = vld [vmem:[#allocation4 + $0x14e0] sm:$0xff]  ;;  %v871_v30 = vld [vmem:[#allocation4 + $0x1750] sm:$0xff]  ;;  %v2015_v31 = vmax.f32 %v2014_v59, %v829_v15  ;;  %4495 = vmatpush1.bf16.msra.mxu1 %v8183_v56  ;;  %v1629_v5 = vmax.f32 %v1627_v52, %v1628_v34  ;;  %v1554_v15 = vrot.slane %v1553_v20, 1 }
 0x1b8   :  { %v877_v14 = vld [vmem:[#allocation4 + $0x1780] sm:$0xff]  ;;  %v2092_v33 = vmax.f32 %v2091_v28, %v871_v30  ;;  %v883_v42 = vld [vmem:[#allocation4 + $0x17b0] sm:$0xff]  ;;  %v1939_v45 = vmax.f32 %v1938_v11, %v793_v13  ;;  %v1784_v10 = vrot.slane %v1783_v53, 4  ;;  %v1862_v47 = vrot.slane %v1861_v46, 4  ;;  %4507 = vmatprep.subr.bf16.mxu1 %v8191_v48 }
 0x1b9   :  { %v841_v27 = vld [vmem:[#allocation4 + $0x1660] sm:$0xff]  ;;  %v2016_v21 = vmax.f32 %v2015_v31, %v835_v2  ;;  %v1707_v49 = vmax.f32 %v1705_v40, %v1706_v55  ;;  %v1630_v36 = vrot.slane %v1629_v5, 2  ;;  %v9430_v52 = vmax.f32 %v1553_v20, %v1554_v15 }
 0x1ba   :  { %v2093_v0 = vmax.f32 %v2092_v33, %v877_v14  ;;  %v889_v54 = vld [vmem:[#allocation4 + $0x17e0] sm:$0xff]  ;;  %v1940_v38 = vrot.slane %v1939_v45, 4  ;;  %v1785_v26 = vmax.f32 %v1783_v53, %v1784_v10  ;;  %v1863_v35 = vmax.f32 %v1861_v46, %v1862_v47 }
 0x1bb   :  { %v2017_v32 = vmax.f32 %v2016_v21, %v841_v27  ;;  %v1708_v2 = vrot.slane %v1707_v49, 2  ;;  %v1631_v24 = vmax.f32 %v1629_v5, %v1630_v36  ;;  %v10158_v14 = vrot.slane %v9392_v44, 1  ;;  %10160 = vst [vmem:[#allocation73_spill] sm:$0xff] %v9430_v52 }
 0x1bc   :  { %v2094_v51 = vmax.f32 %v2093_v0, %v883_v42  ;;  %v1941_v50 = vmax.f32 %v1939_v45, %v1940_v38  ;;  %v1786_v9 = vrot.slane %v1785_v26, 2  ;;  %v1864_v13 = vrot.slane %v1863_v35, 2 }
 0x1bd   :  { %v2018_v19 = vrot.slane %v2017_v32, 4  ;;  %v9428_v58 = vmax.f32 %v9392_v44, %v10158_v14  ;;  %v1709_v18 = vmax.f32 %v1707_v49, %v1708_v2  ;;  %v1632_v37 = vrot.slane %v1631_v24, 1 }
 0x1be   :  { %v2095_v7 = vmax.f32 %v2094_v51, %v889_v54  ;;  %v1942_v59 = vrot.slane %v1941_v50, 2  ;;  %v1787_v25 = vmax.f32 %v1785_v26, %v1786_v9  ;;  %v1865_v28 = vmax.f32 %v1863_v35, %v1864_v13 }
 0x1bf   :  { %v2019_v30 = vmax.f32 %v2017_v32, %v2018_v19  ;;  %10159 = vst [vmem:[#allocation72_spill] sm:$0xff] %v9428_v58  ;;  %v1710_v4 = vrot.slane %v1709_v18, 1  ;;  %v2143_v40 = vpack.c.bf16 %v9368_v3, %v9368_v3  ;;  %v9434_v44 = vmax.f32 %v1631_v24, %v1632_v37  ;;  %v136_v37 = vld [vmem:[#allocation4 + $0x58] sm:$0xff] }
 0x1c0   :  { %v2096_v39 = vrot.slane %v2095_v7, 4  ;;  %v1943_v41 = vmax.f32 %v1941_v50, %v1942_v59  ;;  %v1788_v48 = vrot.slane %v1787_v25, 1  ;;  %v1866_v27 = vrot.slane %v1865_v28, 1 }
 0x1c1   :  { %v2020_v56 = vrot.slane %v2019_v30, 2  ;;  %10161 = vst [vmem:[#allocation74_spill] sm:$0xff] %v9434_v44  ;;  %v9436_v11 = vmax.f32 %v1709_v18, %v1710_v4  ;;  %v2149_v21 = vpack.c.bf16 %v9374_v63, %v9374_v63  ;;  %v2155_v45 = vpack.c.bf16 %v9380_v60, %v9380_v60  ;;  %v639_v63 = vld [vmem:[#allocation4 + $0x1010] sm:$0xff] }
 0x1c2   :  { %v2097_v31 = vmax.f32 %v2095_v7, %v2096_v39  ;;  %v1944_v33 = vrot.slane %v1943_v41, 1  ;;  %v9438_v34 = vmax.f32 %v1787_v25, %v1788_v48  ;;  %v9440_v53 = vmax.f32 %v1865_v28, %v1866_v27  ;;  %v178_v25 = vld [vmem:[#allocation4 + $0x1a8] sm:$0xff]  ;;  %v184_v28 = vld [vmem:[#allocation4 + $0x1d8] sm:$0xff] }
 0x1c3   :  { %v2021_v57 = vmax.f32 %v2019_v30, %v2020_v56  ;;  %10162 = vst [vmem:[#allocation75_spill] sm:$0xff] %v9436_v11  ;;  %v2161_v0 = vpack.c.bf16 %v9382_v12, %v9382_v12  ;;  %v2167_v5 = vpack.c.bf16 %v9390_v16, %v9390_v16  ;;  %v2173_v10 = vpack.c.bf16 %v9403_v17, %v9403_v17  ;;  %v130_v30 = vld [vmem:[#allocation4 + $0x28] sm:$0xff] }
 0x1c4   :  { %v2098_v42 = vrot.slane %v2097_v31, 2  ;;  %10163 = vst [vmem:[#allocation76_spill] sm:$0xff] %v9438_v34  ;;  %10164 = vst [vmem:[#allocation77_spill] sm:$0xff] %v9440_v53  ;;  %v9444_v23 = vmax.f32 %v1943_v41, %v1944_v33  ;;  %v2179_v47 = vpack.c.bf16 %v9410_v8, %v9410_v8  ;;  %v2185_v20 = vpack.c.bf16 %v9428_v58, %v9428_v58  ;;  %v142_v33 = vld [vmem:[#allocation4 + $0x88] sm:$0xff] }
 0x1c5   :  { %v2022_v46 = vrot.slane %v2021_v57, 1  ;;  %v2191_v49 = vpack.c.bf16 %v9430_v52, %v9430_v52  ;;  %v2197_v38 = vpack.c.bf16 %v9434_v44, %v9434_v44  ;;  %v2203_v51 = vpack.c.bf16 %v9436_v11, %v9436_v11 }
 0x1c6   :  { %10165 = vst [vmem:[#allocation78_spill] sm:$0xff] %v9444_v23  ;;  %v2099_v55 = vmax.f32 %v2097_v31, %v2098_v42  ;;  %v2209_v36 = vpack.c.bf16 %v9438_v34, %v9438_v34  ;;  %v2215_v26 = vpack.c.bf16 %v9440_v53, %v9440_v53  ;;  %v2221_v35 = vpack.c.bf16 %v9444_v23, %v9444_v23  ;;  %v190_v42 = vld [vmem:[#allocation4 + $0x208] sm:$0xff]  ;;  %v8156_v23 = vld [vmem:[#allocation6 + $0x660] ss:$24 sps:$4 sm:$0xff]  }
 0x1c7   :  { %v9450_v54 = vmax.f32 %v2021_v57, %v2022_v46  ;;  %v2655_v2 = vunpack.c.l.b16 %v2143_v40  ;;  %v2661_v50 = vunpack.c.l.b16 %v2149_v21  ;;  %v2667_v7 = vunpack.c.l.b16 %v2155_v45  ;;  %v226_v46 = vld [vmem:[#allocation4 + $0x328] sm:$0xff]  ;;  %v232_v45 = vld [vmem:[#allocation4 + $0x358] sm:$0xff] }
 0x1c8   :  { %v2100_v32 = vrot.slane %v2099_v55, 1  ;;  %v2673_v24 = vunpack.c.l.b16 %v2161_v0  ;;  %v2679_v9 = vunpack.c.l.b16 %v2167_v5  ;;  %v2685_v13 = vunpack.c.l.b16 %v2173_v10  ;;  %v238_v0 = vld [vmem:[#allocation4 + $0x388] sm:$0xff]  ;;  %v760_v34 = vld [vmem:[#allocation4 + $0x13d8] sm:$0xff] }
 0x1c9   :  { %10166 = vst [vmem:[#allocation79_spill] sm:$0xff] %v9450_v54  ;;  %v2227_v15 = vpack.c.bf16 %v9450_v54, %v9450_v54  ;;  %v2691_v18 = vunpack.c.l.b16 %v2179_v47  ;;  %v2703_v59 = vunpack.c.l.b16 %v2191_v49  ;;  %v2709_v39 = vunpack.c.l.b16 %v2197_v38  ;;  %v148_v49 = vld [vmem:[#allocation4 + $0xb8] sm:$0xff]  ;;  %v154_v38 = vld [vmem:[#allocation4 + $0xe8] sm:$0xff] }
 0x1ca   :  { %v9472_v19 = vmax.f32 %v2099_v55, %v2100_v32  ;;  %v2697_v56 = vunpack.c.l.b16 %v2185_v20  ;;  %v2715_v4 = vunpack.c.l.b16 %v2203_v51  ;;  %v2721_v41 = vunpack.c.l.b16 %v2209_v36  ;;  %v196_v51 = vld [vmem:[#allocation4 + $0x238] sm:$0xff] }
 0x1cb   :  { %v2727_v31 = vunpack.c.l.b16 %v2215_v26  ;;  %v2733_v48 = vunpack.c.l.b16 %v2221_v35  ;;  %v2739_v27 = vunpack.c.l.b16 %v2227_v15  ;;  %v2770_v57 = vsel %vm2749_vm0, %v2661_v50, %v2655_v2  ;;  %v244_v15 = vld [vmem:[#allocation4 + $0x3b8] sm:$0xff]  ;;  %v274_v2 = vld [vmem:[#allocation4 + $0x4a8] sm:$0xff] }
 0x1cc   :  { %10167 = vst [vmem:[#allocation80_spill] sm:$0xff] %v9472_v19  ;;  %v2233_v14 = vpack.c.bf16 %v9472_v19, %v9472_v19  ;;  %v2812_v40 = vsel %vm2749_vm0, %v2709_v39, %v2703_v59  ;;  %v2771_v21 = vsel %vm2751_vm1, %v2667_v7, %v2770_v57  ;;  %v958_v5 = vmax.f32 %v130_v30, %v136_v37  ;;  %v280_v50 = vld [vmem:[#allocation4 + $0x4d8] sm:$0xff]  ;;  %v8189_v39 = vld [vmem:[#allocation6 + $0x608] ss:$24 sps:$4 sm:$0xff]   ;;  %v8152_v57 = vld [vmem:[#allocation6 + $0x634] ss:$24 sps:$4 sm:$0xff]  }
 0x1cd   :  { %v2813_v55 = vsel %vm2751_vm1, %v2715_v4, %v2812_v40  ;;  %v1036_v10 = vmax.f32 %v178_v25, %v184_v28  ;;  %v2772_v32 = vsel %vm2753_vm2, %v2673_v24, %v2771_v21  ;;  %v1114_v36 = vmax.f32 %v226_v46, %v232_v45  ;;  %v8144_v30 = vld [vmem:[#allocation6 + $0x600] ss:$24 sps:$4 sm:$0xff]   ;;  %v202_v25 = vld [vmem:[#allocation4 + $0x268] sm:$0xff]  ;;  %v8197_v40 = vld [vmem:[#allocation6 + $0x63c] ss:$24 sps:$4 sm:$0xff]  }
 0x1ce   :  { %v2745_v47 = vunpack.c.l.b16 %v2233_v14  ;;  %v2814_v20 = vsel %vm2753_vm2, %v2721_v41, %v2813_v55  ;;  %v2773_v26 = vsel %vm2755_vm3, %v2679_v9, %v2772_v32  ;;  %v959_v7 = vmax.f32 %v958_v5, %v142_v33  ;;  %v160_v37 = vld [vmem:[#allocation4 + $0x118] sm:$0xff]  ;;  %v286_v28 = vld [vmem:[#allocation4 + $0x508] sm:$0xff] }
 0x1cf   :  { %v2815_v35 = vsel %vm2755_vm3, %v2727_v31, %v2814_v20  ;;  %v1037_v59 = vmax.f32 %v1036_v10, %v190_v42  ;;  %v2774_v14 = vsel %vm2757_vm4, %v2685_v13, %v2773_v26  ;;  %v1115_v4 = vmax.f32 %v1114_v36, %v238_v0  ;;  %v208_v46 = vld [vmem:[#allocation4 + $0x298] sm:$0xff]  ;;  %v250_v33 = vld [vmem:[#allocation4 + $0x3e8] sm:$0xff] }
 0x1d0   :  { %v2816_v24 = vsel %vm2757_vm4, %v2733_v48, %v2815_v35  ;;  %v1192_v41 = vmax.f32 %v274_v2, %v280_v50  ;;  %v2775_v9 = vsel %vm2759_vm5, %v2691_v18, %v2774_v14  ;;  %v292_v42 = vld [vmem:[#allocation4 + $0x538] sm:$0xff]  ;;  %v960_v21 = vmax.f32 %v959_v7, %v148_v49  ;;  %v166_v45 = vld [vmem:[#allocation4 + $0x148] sm:$0xff] }
 0x1d1   :  { %v2817_v31 = vsel %vm2759_vm5, %v2739_v27, %v2816_v24  ;;  %v1038_v55 = vmax.f32 %v1037_v59, %v196_v51  ;;  %v2776_v13 = vsel %vm2761_vm6, %v2697_v56, %v2775_v9  ;;  %v322_v5 = vld [vmem:[#allocation4 + $0x628] sm:$0xff]  ;;  %v328_v10 = vld [vmem:[#allocation4 + $0x658] sm:$0xff]  ;;  %v1116_v32 = vmax.f32 %v1115_v4, %v244_v15 }
 0x1d2   :  { %v2818_v48 = vsel %vm2761_vm6, %v2745_v47, %v2817_v31  ;;  %v334_v0 = vld [vmem:[#allocation4 + $0x688] sm:$0xff]  ;;  %v1193_v20 = vmax.f32 %v1192_v41, %v286_v28  ;;  %v256_v36 = vld [vmem:[#allocation4 + $0x418] sm:$0xff]  ;;  %v961_v35 = vmax.f32 %v960_v21, %v154_v38  ;;  %v1270_v50 = vmax.f32 %v322_v5, %v328_v10 }
 0x1d3   :  { %v9492_v18 = vpack.c.b16 %v2818_v48, %v2776_v13  ;;  %v214_v27 = vld [vmem:[#allocation4 + $0x2c8] sm:$0xff]  ;;  %v1039_v2 = vmax.f32 %v1038_v55, %v202_v25  ;;  %v8195_v51 = vld [vmem:[#allocation6 + $0x638] ss:$24 sps:$4 sm:$0xff]   ;;  %v1117_v24 = vmax.f32 %v1116_v32, %v250_v33  ;;  %v8158_v15 = vld [vmem:[#allocation6 + $0x664] ss:$24 sps:$4 sm:$0xff]  }
 0x1d4   :  { %v298_v26 = vld [vmem:[#allocation4 + $0x568] sm:$0xff]  ;;  %v172_v7 = vld [vmem:[#allocation4 + $0x178] sm:$0xff]  ;;  %v1194_v9 = vmax.f32 %v1193_v20, %v292_v42  ;;  %v962_v25 = vmax.f32 %v961_v35, %v160_v37  ;;  %v1271_v21 = vmax.f32 %v1270_v50, %v334_v0 }
 0x1d5   :  { %v8150_v49 = vld [vmem:[#allocation6 + $0x630] ss:$24 sps:$4 sm:$0xff]   ;;  %v220_v56 = vld [vmem:[#allocation4 + $0x2f8] sm:$0xff]  ;;  %4368 = vmatmul.mubr.bf16.vlgmr.msra.gmra.mrb[0].mxu0 %v9492_v18  ;;  %4497 = vmatmul.mubr.bf16.vlgmr.msra.gmra.mrb[0].mxu1 %v9492_v18  ;;  %v8203_v28 = vld [vmem:[#allocation6 + $0x66c] ss:$24 sps:$4 sm:$0xff]   ;;  %v1040_v31 = vmax.f32 %v1039_v2, %v208_v46  ;;  %v1118_v5 = vmax.f32 %v1117_v24, %v256_v36 }
 0x1d6   :  { %v262_v59 = vld [vmem:[#allocation4 + $0x448] sm:$0xff]  ;;  %v340_v47 = vld [vmem:[#allocation4 + $0x6b8] sm:$0xff]  ;;  %4379 = vmatpush1.bf16.msra.mxu0 %v8144_v30  ;;  %4508 = vmatpush1.bf16.msra.mxu1 %v8189_v39  ;;  %v1195_v33 = vmax.f32 %v1194_v9, %v298_v26  ;;  %v963_v19 = vmax.f32 %v962_v25, %v166_v45 }
 0x1d7   :  { %v370_v14 = vld [vmem:[#allocation4 + $0x7a8] sm:$0xff]  ;;  %v304_v4 = vld [vmem:[#allocation4 + $0x598] sm:$0xff]  ;;  %4380 = vmatprep.subr.bf16.mxu0 %v8152_v57  ;;  %4509 = vmatprep.subr.bf16.mxu1 %v8197_v40  ;;  %v1041_v54 = vmax.f32 %v1040_v31, %v214_v27  ;;  %v1272_v58 = vmax.f32 %v1271_v21, %v340_v47  ;;  %v1119_v30 = vmax.f32 %v1118_v5, %v262_v59 }
 0x1d8   :  { %v376_v41 = vld [vmem:[#allocation4 + $0x7d8] sm:$0xff]  ;;  %v382_v38 = vld [vmem:[#allocation4 + $0x808] sm:$0xff]  ;;  %v1196_v39 = vmax.f32 %v1195_v33, %v304_v4  ;;  %v964_v57 = vmax.f32 %v963_v19, %v172_v7 }
 0x1d9   :  { %v268_v55 = vld [vmem:[#allocation4 + $0x478] sm:$0xff]  ;;  %v310_v13 = vld [vmem:[#allocation4 + $0x5c8] sm:$0xff]  ;;  %v1348_v42 = vmax.f32 %v370_v14, %v376_v41  ;;  %v1042_v40 = vmax.f32 %v1041_v54, %v220_v56 }
 0x1da   :  { %v346_v48 = vld [vmem:[#allocation4 + $0x6e8] sm:$0xff]  ;;  %v388_v10 = vld [vmem:[#allocation4 + $0x838] sm:$0xff]  ;;  %4381 = vmatpush1.bf16.msra.mxu0 %v8150_v49  ;;  %4510 = vmatpush1.bf16.msra.mxu1 %v8195_v51  ;;  %v1120_v9 = vmax.f32 %v1119_v30, %v268_v55  ;;  %v1197_v41 = vmax.f32 %v1196_v39, %v310_v13  ;;  %v965_v31 = vrot.slane %v964_v57, 4 }
 0x1db   :  { %v418_v32 = vld [vmem:[#allocation4 + $0x928] sm:$0xff]  ;;  %v424_v20 = vld [vmem:[#allocation4 + $0x958] sm:$0xff]  ;;  %v1349_v35 = vmax.f32 %v1348_v42, %v382_v38  ;;  %v1273_v24 = vmax.f32 %v1272_v58, %v346_v48  ;;  %4382 = vmatprep.subr.bf16.mxu0 %v8158_v15  ;;  %4511 = vmatprep.subr.bf16.mxu1 %v8203_v28  ;;  %v1043_v21 = vrot.slane %v1042_v40, 4 }
 0x1dc   :  { %v8201_v37 = vld [vmem:[#allocation6 + $0x668] ss:$24 sps:$4 sm:$0xff]   ;;  %v352_v46 = vld [vmem:[#allocation4 + $0x718] sm:$0xff]  ;;  %v1426_v2 = vmax.f32 %v418_v32, %v424_v20  ;;  %v8164_v50 = vld [vmem:[#allocation6 + $0x694] ss:$24 sps:$4 sm:$0xff]   ;;  %v1121_v58 = vrot.slane %v1120_v9, 4  ;;  %v966_v13 = vmax.f32 %v964_v57, %v965_v31 }
 0x1dd   :  { %v430_v0 = vld [vmem:[#allocation4 + $0x988] sm:$0xff]  ;;  %v316_v36 = vld [vmem:[#allocation4 + $0x5f8] sm:$0xff]  ;;  %v1350_v25 = vmax.f32 %v1349_v35, %v388_v10  ;;  %v1274_v5 = vmax.f32 %v1273_v24, %v352_v46  ;;  %v1044_v42 = vmax.f32 %v1042_v40, %v1043_v21 }
 0x1de   :  { %v358_v26 = vld [vmem:[#allocation4 + $0x748] sm:$0xff]  ;;  %v436_v45 = vld [vmem:[#allocation4 + $0x9b8] sm:$0xff]  ;;  %v1427_v33 = vmax.f32 %v1426_v2, %v430_v0  ;;  %v1198_v49 = vmax.f32 %v1197_v41, %v316_v36  ;;  %4383 = vmatpush1.bf16.msra.mxu0 %v8156_v23  ;;  %4512 = vmatpush1.bf16.msra.mxu1 %v8201_v37  ;;  %v1122_v46 = vmax.f32 %v1120_v9, %v1121_v58 }
 0x1df   :  { %v394_v14 = vld [vmem:[#allocation4 + $0x868] sm:$0xff]  ;;  %v472_v47 = vld [vmem:[#allocation4 + $0xad8] sm:$0xff]  ;;  %v1275_v15 = vmax.f32 %v1274_v5, %v358_v26  ;;  %4384 = vmatprep.subr.bf16.mxu0 %v8164_v50  ;;  %v1045_v24 = vrot.slane %v1044_v42, 2 }
 0x1e0   :  { %v466_v27 = vld [vmem:[#allocation4 + $0xaa8] sm:$0xff]  ;;  %v8209_v59 = vld [vmem:[#allocation6 + $0x69c] ss:$24 sps:$4 sm:$0xff]   ;;  %v1351_v51 = vmax.f32 %v1350_v25, %v394_v14  ;;  %v1428_v28 = vmax.f32 %v1427_v33, %v436_v45  ;;  %v8207_v32 = vld [vmem:[#allocation6 + $0x698] ss:$24 sps:$4 sm:$0xff]   ;;  %v1199_v0 = vrot.slane %v1198_v49, 4 }
 0x1e1   :  { %v400_v4 = vld [vmem:[#allocation4 + $0x898] sm:$0xff]  ;;  %v478_v38 = vld [vmem:[#allocation4 + $0xb08] sm:$0xff]  ;;  %v1504_v7 = vmax.f32 %v466_v27, %v472_v47  ;;  %4513 = vmatprep.subr.bf16.mxu1 %v8209_v59  ;;  %v967_v14 = vrot.slane %v966_v13, 2  ;;  %v1123_v45 = vrot.slane %v1122_v46, 2  ;;  %v1046_v25 = vmax.f32 %v1044_v42, %v1045_v24 }
 0x1e2   :  { %v364_v19 = vld [vmem:[#allocation4 + $0x778] sm:$0xff]  ;;  %v442_v54 = vld [vmem:[#allocation4 + $0x9e8] sm:$0xff]  ;;  %v1352_v30 = vmax.f32 %v1351_v51, %v400_v4  ;;  %v1200_v23 = vmax.f32 %v1198_v49, %v1199_v0  ;;  %4514 = vmatpush1.bf16.msra.mxu1 %v8207_v32 }
 0x1e3   :  { %v8162_v56 = vld [vmem:[#allocation6 + $0x690] ss:$24 sps:$4 sm:$0xff]   ;;  %v484_v55 = vld [vmem:[#allocation4 + $0xb38] sm:$0xff]  ;;  %v1505_v39 = vmax.f32 %v1504_v7, %v478_v38  ;;  %v8215_v35 = vld [vmem:[#allocation6 + $0x6cc] ss:$24 sps:$4 sm:$0xff]   ;;  %v1276_v57 = vmax.f32 %v1275_v15, %v364_v19  ;;  %v1429_v40 = vmax.f32 %v1428_v28, %v442_v54  ;;  %v968_v9 = vmax.f32 %v966_v13, %v967_v14 }
 0x1e4   :  { %v406_v48 = vld [vmem:[#allocation4 + $0x8c8] sm:$0xff]  ;;  %v8170_v10 = vld [vmem:[#allocation6 + $0x6c4] ss:$24 sps:$4 sm:$0xff]   ;;  %v8168_v47 = vld [vmem:[#allocation6 + $0x6c0] ss:$24 sps:$4 sm:$0xff]   ;;  %4385 = vmatpush1.bf16.msra.mxu0 %v8162_v56  ;;  %v1124_v21 = vmax.f32 %v1122_v46, %v1123_v45  ;;  %v1201_v5 = vrot.slane %v1200_v23, 2  ;;  %4515 = vmatprep.subr.bf16.mxu1 %v8215_v35 }
 0x1e5   :  { %v448_v20 = vld [vmem:[#allocation4 + $0xa18] sm:$0xff]  ;;  %v490_v36 = vld [vmem:[#allocation4 + $0xb68] sm:$0xff]  ;;  %v1353_v27 = vmax.f32 %v1352_v30, %v406_v48  ;;  %v1506_v37 = vmax.f32 %v1505_v39, %v484_v55  ;;  %v1277_v4 = vrot.slane %v1276_v57, 4  ;;  %4386 = vmatprep.subr.bf16.mxu0 %v8170_v10  ;;  %v969_v51 = vrot.slane %v968_v9, 1 }
 0x1e6   :  { %v412_v2 = vld [vmem:[#allocation4 + $0x8f8] sm:$0xff]  ;;  %v454_v26 = vld [vmem:[#allocation4 + $0xa48] sm:$0xff]  ;;  %v1430_v38 = vmax.f32 %v1429_v40, %v448_v20  ;;  %v1047_v7 = vrot.slane %v1046_v25, 1  ;;  %v1125_v32 = vrot.slane %v1124_v21, 1  ;;  %v1202_v20 = vmax.f32 %v1200_v23, %v1201_v5 }
 0x1e7   :  { %v496_v41 = vld [vmem:[#allocation4 + $0xb98] sm:$0xff]  ;;  %v8176_v50 = vld [vmem:[#allocation6 + $0x6f4] ss:$24 sps:$4 sm:$0xff]   ;;  %v8213_v59 = vld [vmem:[#allocation6 + $0x6c8] ss:$24 sps:$4 sm:$0xff]   ;;  %v1354_v33 = vmax.f32 %v1353_v27, %v412_v2  ;;  %v1507_v19 = vmax.f32 %v1506_v37, %v490_v36  ;;  %v1278_v48 = vmax.f32 %v1276_v57, %v1277_v4  ;;  %v9496_v2 = vmax.f32 %v968_v9, %v969_v51 }
 0x1e8   :  { %v460_v31 = vld [vmem:[#allocation4 + $0xa78] sm:$0xff]  ;;  %v502_v58 = vld [vmem:[#allocation4 + $0xbc8] sm:$0xff]  ;;  %v1431_v55 = vmax.f32 %v1430_v38, %v454_v26  ;;  %v9498_v36 = vmax.f32 %v1046_v25, %v1047_v7  ;;  %4387 = vmatpush1.bf16.msra.mxu0 %v8168_v47  ;;  %4516 = vmatpush1.bf16.msra.mxu1 %v8213_v59  ;;  %v9500_v45 = vmax.f32 %v1124_v21, %v1125_v32  ;;  %v1203_v23 = vrot.slane %v1202_v20, 1 }
 0x1e9   :  { %v8221_v54 = vld [vmem:[#allocation6 + $0x6fc] ss:$24 sps:$4 sm:$0xff]   ;;  %v514_v49 = vld [vmem:[#allocation4 + $0xc28] sm:$0xff]  ;;  %v8219_v42 = vld [vmem:[#allocation6 + $0x6f8] ss:$24 sps:$4 sm:$0xff]   ;;  %v1355_v46 = vrot.slane %v1354_v33, 4  ;;  %v1508_v0 = vmax.f32 %v1507_v19, %v496_v41  ;;  %4388 = vmatprep.subr.bf16.mxu0 %v8176_v50 }
 0x1ea   :  { %v8174_v13 = vld [vmem:[#allocation6 + $0x6f0] ss:$24 sps:$4 sm:$0xff]   ;;  %v520_v56 = vld [vmem:[#allocation4 + $0xc58] sm:$0xff]  ;;  %10168 = vst [vmem:[#allocation81_spill] sm:$0xff] %v9496_v2  ;;  %10169 = vst [vmem:[#allocation82_spill] sm:$0xff] %v9498_v36  ;;  %v1279_v14 = vrot.slane %v1278_v48, 2  ;;  %v1432_v24 = vmax.f32 %v1431_v55, %v460_v31  ;;  %4517 = vmatprep.subr.bf16.mxu1 %v8221_v54  ;;  %v9502_v7 = vmax.f32 %v1202_v20, %v1203_v23 }
 0x1eb   :  { %v562_v15 = vld [vmem:[#allocation4 + $0xda8] sm:$0xff]  ;;  %v568_v28 = vld [vmem:[#allocation4 + $0xdd8] sm:$0xff]  ;;  %10170 = vst [vmem:[#allocation83_spill] sm:$0xff] %v9500_v45  ;;  %v1356_v27 = vmax.f32 %v1354_v33, %v1355_v46  ;;  %v1509_v37 = vmax.f32 %v1508_v0, %v502_v58  ;;  %v1582_v5 = vmax.f32 %v514_v49, %v520_v56 }
 0x1ec   :  { %v8182_v30 = vld [vmem:[#allocation6 + $0x724] ss:$24 sps:$4 sm:$0xff]   ;;  %v610_v10 = vld [vmem:[#allocation4 + $0xf28] sm:$0xff]  ;;  %v1280_v38 = vmax.f32 %v1278_v48, %v1279_v14  ;;  %v1433_v25 = vrot.slane %v1432_v24, 4  ;;  %v1660_v19 = vmax.f32 %v562_v15, %v568_v28  ;;  %v8180_v31 = vld [vmem:[#allocation6 + $0x720] ss:$24 sps:$4 sm:$0xff]   ;;  %4389 = vmatpush1.bf16.msra.mxu0 %v8174_v13  ;;  %4518 = vmatpush1.bf16.msra.mxu1 %v8219_v42 }
 0x1ed   :  { %v508_v39 = vld [vmem:[#allocation4 + $0xbf8] sm:$0xff]  ;;  %v8227_v57 = vld [vmem:[#allocation6 + $0x72c] ss:$24 sps:$4 sm:$0xff]   ;;  %v8225_v47 = vld [vmem:[#allocation6 + $0x728] ss:$24 sps:$4 sm:$0xff]   ;;  %10171 = vst [vmem:[#allocation84_spill] sm:$0xff] %v9502_v7  ;;  %4390 = vmatprep.subr.bf16.mxu0 %v8182_v30 }
 0x1ee   :  { %v616_v35 = vld [vmem:[#allocation4 + $0xf58] sm:$0xff]  ;;  %v526_v40 = vld [vmem:[#allocation4 + $0xc88] sm:$0xff]  ;;  %v1357_v21 = vrot.slane %v1356_v27, 2  ;;  %v1510_v55 = vmax.f32 %v1509_v37, %v508_v39  ;;  %v1281_v0 = vrot.slane %v1280_v38, 1  ;;  %v1434_v8 = vmax.f32 %v1432_v24, %v1433_v25  ;;  %4519 = vmatprep.subr.bf16.mxu1 %v8227_v57 }
 0x1ef   :  { %v574_v26 = vld [vmem:[#allocation4 + $0xe08] sm:$0xff]  ;;  %v664_v9 = vld [vmem:[#allocation4 + $0x10d8] sm:$0xff]  ;;  %v1738_v32 = vmax.f32 %v610_v10, %v616_v35  ;;  %v1583_v48 = vmax.f32 %v1582_v5, %v526_v40 }
 0x1f0   :  { %v622_v41 = vld [vmem:[#allocation4 + $0xf88] sm:$0xff]  ;;  %v532_v59 = vld [vmem:[#allocation4 + $0xcb8] sm:$0xff]  ;;  %v1661_v14 = vmax.f32 %v1660_v19, %v574_v26  ;;  %v1358_v28 = vmax.f32 %v1356_v27, %v1357_v21  ;;  %v1511_v20 = vrot.slane %v1510_v55, 4  ;;  %v9504_v37 = vmax.f32 %v1280_v38, %v1281_v0  ;;  %4391 = vmatpush1.bf16.msra.mxu0 %v8180_v31  ;;  %4520 = vmatpush1.bf16.msra.mxu1 %v8225_v47 }
 0x1f1   :  { %v658_v4 = vld [vmem:[#allocation4 + $0x10a8] sm:$0xff]  ;;  %v580_v51 = vld [vmem:[#allocation4 + $0xe38] sm:$0xff]  ;;  %v1739_v23 = vmax.f32 %v1738_v32, %v622_v41  ;;  %v1435_v17 = vrot.slane %v1434_v8, 2  ;;  %v1584_v24 = vmax.f32 %v1583_v48, %v532_v59 }
 0x1f2   :  { %v8188_v33 = vld [vmem:[#allocation6 + $0x754] ss:$24 sps:$4 sm:$0xff]   ;;  %v628_v54 = vld [vmem:[#allocation4 + $0xfb8] sm:$0xff]  ;;  %v1816_v53 = vmax.f32 %v658_v4, %v664_v9  ;;  %10172 = vst [vmem:[#allocation85_spill] sm:$0xff] %v9504_v37  ;;  %v1662_v40 = vmax.f32 %v1661_v14, %v580_v51  ;;  %v8186_v26 = vld [vmem:[#allocation6 + $0x750] ss:$24 sps:$4 sm:$0xff]   ;;  %v1512_v21 = vmax.f32 %v1510_v55, %v1511_v20 }
 0x1f3   :  { %v8233_v58 = vld [vmem:[#allocation6 + $0x75c] ss:$24 sps:$4 sm:$0xff]   ;;  %v538_v50 = vld [vmem:[#allocation4 + $0xce8] sm:$0xff]  ;;  %v8231_v13 = vld [vmem:[#allocation6 + $0x758] ss:$24 sps:$4 sm:$0xff]   ;;  %v1359_v27 = vrot.slane %v1358_v28, 1  ;;  %v1740_v41 = vmax.f32 %v1739_v23, %v628_v54  ;;  %v1436_v38 = vmax.f32 %v1434_v8, %v1435_v17  ;;  %4392 = vmatprep.subr.bf16.mxu0 %v8188_v33 }
 0x1f4   :  { %v670_v46 = vld [vmem:[#allocation4 + $0x1108] sm:$0xff]  ;;  %v712_v15 = vld [vmem:[#allocation4 + $0x1258] sm:$0xff]  ;;  %v1585_v0 = vmax.f32 %v1584_v24, %v538_v50  ;;  %v1513_v12 = vrot.slane %v1512_v21, 2  ;;  %4521 = vmatprep.subr.bf16.mxu1 %v8233_v58  ;;  %4393 = vmatpush1.bf16.msra.mxu0 %v8186_v26 }
 0x1f5   :  { %v586_v49 = vld [vmem:[#allocation4 + $0xe68] sm:$0xff]  ;;  %v544_v39 = vld [vmem:[#allocation4 + $0xd18] sm:$0xff]  ;;  %v1817_v4 = vmax.f32 %v1816_v53, %v670_v46  ;;  %v9506_v11 = vmax.f32 %v1358_v28, %v1359_v27  ;;  %v1437_v23 = vrot.slane %v1436_v38, 1  ;;  %4522 = vmatpush1.bf16.msra.mxu1 %v8231_v13 }
 0x1f6   :  { %v706_v56 = vld [vmem:[#allocation4 + $0x1228] sm:$0xff]  ;;  %v676_v35 = vld [vmem:[#allocation4 + $0x1138] sm:$0xff]  ;;  %v1663_v16 = vmax.f32 %v1662_v40, %v586_v49  ;;  %v1586_v17 = vmax.f32 %v1585_v0, %v544_v39  ;;  %v1514_v24 = vmax.f32 %v1512_v21, %v1513_v12 }
 0x1f7   :  { %v634_v10 = vld [vmem:[#allocation4 + $0xfe8] sm:$0xff]  ;;  %v592_v25 = vld [vmem:[#allocation4 + $0xe98] sm:$0xff]  ;;  %v1894_v59 = vmax.f32 %v706_v56, %v712_v15  ;;  %10173 = vst [vmem:[#allocation86_spill] sm:$0xff] %v9506_v11  ;;  %v1818_v54 = vmax.f32 %v1817_v4, %v676_v35 }
 0x1f8   :  { %v550_v42 = vld [vmem:[#allocation4 + $0xd48] sm:$0xff]  ;;  %v640_v5 = vld [vmem:[#allocation4 + $0x1018] sm:$0xff]  ;;  %v1741_v55 = vmax.f32 %v1740_v41, %v634_v10  ;;  %v1664_v8 = vmax.f32 %v1663_v16, %v592_v25  ;;  %v9508_v41 = vmax.f32 %v1436_v38, %v1437_v23  ;;  %v1515_v0 = vrot.slane %v1514_v24, 1 }
 0x1f9   :  { %v718_v19 = vld [vmem:[#allocation4 + $0x1288] sm:$0xff]  ;;  %v8194_v30 = vld [vmem:[#allocation6 + $0x784] ss:$24 sps:$4 sm:$0xff]   ;;  %v8192_v49 = vld [vmem:[#allocation6 + $0x780] ss:$24 sps:$4 sm:$0xff]   ;;  %v1587_v4 = vmax.f32 %v1586_v17, %v550_v42 }
 0x1fa   :  { %v8239_v57 = vld [vmem:[#allocation6 + $0x78c] ss:$24 sps:$4 sm:$0xff]   ;;  %v556_v51 = vld [vmem:[#allocation4 + $0xd78] sm:$0xff]  ;;  %v1895_v50 = vmax.f32 %v1894_v59, %v718_v19  ;;  %v8237_v31 = vld [vmem:[#allocation6 + $0x788] ss:$24 sps:$4 sm:$0xff]   ;;  %v1742_v28 = vmax.f32 %v1741_v55, %v640_v5  ;;  %10174 = vst [vmem:[#allocation87_spill] sm:$0xff] %v9508_v41  ;;  %4394 = vmatprep.subr.bf16.mxu0 %v8194_v30 }
 0x1fb   :  { %v682_v9 = vld [vmem:[#allocation4 + $0x1168] sm:$0xff]  ;;  %v724_v14 = vld [vmem:[#allocation4 + $0x12b8] sm:$0xff]  ;;  %4523 = vmatprep.subr.bf16.mxu1 %v8239_v57  ;;  %4395 = vmatpush1.bf16.msra.mxu0 %v8192_v49 }
 0x1fc   :  { %v754_v32 = vld [vmem:[#allocation4 + $0x13a8] sm:$0xff]  ;;  %v688_v46 = vld [vmem:[#allocation4 + $0x1198] sm:$0xff]  ;;  %v1819_v40 = vmax.f32 %v1818_v54, %v682_v9  ;;  %v1896_v39 = vmax.f32 %v1895_v50, %v724_v14  ;;  %v9510_v14 = vmax.f32 %v1514_v24, %v1515_v0  ;;  %4524 = vmatpush1.bf16.msra.mxu1 %v8237_v31 }
 0x1fd   :  { %v598_v48 = vld [vmem:[#allocation4 + $0xec8] sm:$0xff]  ;;  %v604_v47 = vld [vmem:[#allocation4 + $0xef8] sm:$0xff]  ;;  %v1972_v27 = vmax.f32 %v754_v32, %v760_v34  ;;  %v1588_v32 = vmax.f32 %v1587_v4, %v556_v51 }
 0x1fe   :  { %v646_v53 = vld [vmem:[#allocation4 + $0x1048] sm:$0xff]  ;;  %v652_v56 = vld [vmem:[#allocation4 + $0x1078] sm:$0xff]  ;;  %v1665_v44 = vmax.f32 %v1664_v8, %v598_v48  ;;  %v1820_v12 = vmax.f32 %v1819_v40, %v688_v46  ;;  %10175 = vst [vmem:[#allocation88_spill] sm:$0xff] %v9510_v14 }
 0x1ff   :  { %v766_v20 = vld [vmem:[#allocation4 + $0x1408] sm:$0xff]  ;;  %v700_v33 = vld [vmem:[#allocation4 + $0x11f8] sm:$0xff]  ;;  %v1743_v59 = vmax.f32 %v1742_v28, %v646_v53  ;;  %v1589_v53 = vrot.slane %v1588_v32, 4 }
 0x200   :  { %v730_v15 = vld [vmem:[#allocation4 + $0x12e8] sm:$0xff]  ;;  %v772_v58 = vld [vmem:[#allocation4 + $0x1438] sm:$0xff]  ;;  %v1973_v5 = vmax.f32 %v1972_v27, %v766_v20  ;;  %v1666_v38 = vmax.f32 %v1665_v44, %v604_v47 }
 0x201   :  { %v8200_v10 = vld [vmem:[#allocation6 + $0x7b4] ss:$24 sps:$4 sm:$0xff]   ;;  %v736_v16 = vld [vmem:[#allocation4 + $0x1318] sm:$0xff]  ;;  %v1897_v55 = vmax.f32 %v1896_v39, %v730_v15  ;;  %v1744_v26 = vmax.f32 %v1743_v59, %v652_v56  ;;  %v8198_v57 = vld [vmem:[#allocation6 + $0x7b0] ss:$24 sps:$4 sm:$0xff]   ;;  %v1590_v40 = vmax.f32 %v1588_v32, %v1589_v53 }
 0x202   :  { %v694_v35 = vld [vmem:[#allocation4 + $0x11c8] sm:$0xff]  ;;  %v808_v19 = vld [vmem:[#allocation4 + $0x1558] sm:$0xff]  ;;  %v1974_v54 = vmax.f32 %v1973_v5, %v772_v58  ;;  %v1667_v46 = vrot.slane %v1666_v38, 4  ;;  %4396 = vmatprep.subr.bf16.mxu0 %v8200_v10 }
 0x203   :  { %v802_v25 = vld [vmem:[#allocation4 + $0x1528] sm:$0xff]  ;;  %v856_v9 = vld [vmem:[#allocation4 + $0x16d8] sm:$0xff]  ;;  %v1821_v13 = vmax.f32 %v1820_v12, %v694_v35  ;;  %v1898_v20 = vmax.f32 %v1897_v55, %v736_v16  ;;  %v1745_v44 = vrot.slane %v1744_v26, 4  ;;  %v1591_v0 = vrot.slane %v1590_v40, 2  ;;  %4397 = vmatpush1.bf16.msra.mxu0 %v8198_v57 }
 0x204   :  { %v778_v34 = vld [vmem:[#allocation4 + $0x1468] sm:$0xff]  ;;  %v784_v23 = vld [vmem:[#allocation4 + $0x1498] sm:$0xff]  ;;  %v2050_v30 = vmax.f32 %v802_v25, %v808_v19  ;;  %v1668_v27 = vmax.f32 %v1666_v38, %v1667_v46 }
 0x205   :  { %v850_v21 = vld [vmem:[#allocation4 + $0x16a8] sm:$0xff]  ;;  %v748_v8 = vld [vmem:[#allocation4 + $0x1378] sm:$0xff]  ;;  %v1822_v50 = vmax.f32 %v1821_v13, %v700_v33  ;;  %v1975_v47 = vmax.f32 %v1974_v54, %v778_v34  ;;  %v1746_v39 = vmax.f32 %v1744_v26, %v1745_v44 }
 0x206   :  { %v742_v42 = vld [vmem:[#allocation4 + $0x1348] sm:$0xff]  ;;  %v820_v51 = vld [vmem:[#allocation4 + $0x15b8] sm:$0xff]  ;;  %v2128_v15 = vmax.f32 %v850_v21, %v856_v9  ;;  %v1669_v59 = vrot.slane %v1668_v27, 2 }
 0x207   :  { %v814_v48 = vld [vmem:[#allocation4 + $0x1588] sm:$0xff]  ;;  %v8206_v24 = vld [vmem:[#allocation6 + $0x7e4] ss:$24 sps:$4 sm:$0xff]   ;;  %v1899_v35 = vmax.f32 %v1898_v20, %v742_v42  ;;  %v1823_v16 = vrot.slane %v1822_v50, 4  ;;  %v1976_v49 = vmax.f32 %v1975_v47, %v784_v23  ;;  %v8204_v10 = vld [vmem:[#allocation6 + $0x7e0] ss:$24 sps:$4 sm:$0xff]   ;;  %v1592_v42 = vmax.f32 %v1590_v40, %v1591_v0 }
 0x208   :  { %v862_v17 = vld [vmem:[#allocation4 + $0x1708] sm:$0xff]  ;;  %v868_v28 = vld [vmem:[#allocation4 + $0x1738] sm:$0xff]  ;;  %v2051_v58 = vmax.f32 %v2050_v30, %v814_v48  ;;  %v1747_v34 = vrot.slane %v1746_v39, 2  ;;  %4398 = vmatprep.subr.bf16.mxu0 %v8206_v24  ;;  %v1670_v48 = vmax.f32 %v1668_v27, %v1669_v59  ;;  %v2146_v0 = vpack.c.bf16 %v9496_v2, %v9496_v2  ;;  %v603_v2 = vld [vmem:[#allocation4 + $0xef0] sm:$0xff] }
 0x209   :  { %v790_v56 = vld [vmem:[#allocation4 + $0x14c8] sm:$0xff]  ;;  %v2129_v25 = vmax.f32 %v2128_v15, %v862_v17  ;;  %v796_v31 = vld [vmem:[#allocation4 + $0x14f8] sm:$0xff]  ;;  %v1900_v33 = vmax.f32 %v1899_v35, %v748_v8  ;;  %v1824_v21 = vmax.f32 %v1822_v50, %v1823_v16  ;;  %v1593_v30 = vrot.slane %v1592_v42, 1  ;;  %4399 = vmatpush1.bf16.msra.mxu0 %v8204_v10 }
 0x20a   :  { %v826_v4 = vld [vmem:[#allocation4 + $0x15e8] sm:$0xff]  ;;  %v2052_v12 = vmax.f32 %v2051_v58, %v820_v51  ;;  %v832_v5 = vld [vmem:[#allocation4 + $0x1618] sm:$0xff]  ;;  %v1977_v9 = vmax.f32 %v1976_v49, %v790_v56  ;;  %v1748_v23 = vmax.f32 %v1746_v39, %v1747_v34  ;;  %v1671_v57 = vrot.slane %v1670_v48, 1 }
 0x20b   :  { %v874_v19 = vld [vmem:[#allocation4 + $0x1768] sm:$0xff]  ;;  %v2130_v32 = vmax.f32 %v2129_v25, %v868_v28  ;;  %v880_v55 = vld [vmem:[#allocation4 + $0x1798] sm:$0xff]  ;;  %v1901_v26 = vrot.slane %v1900_v33, 4  ;;  %v1825_v17 = vrot.slane %v1824_v21, 2  ;;  %v9512_v27 = vmax.f32 %v1592_v42, %v1593_v30 }
 0x20c   :  { %v8212_v38 = vld [vmem:[#allocation6 + $0x814] ss:$24 sps:$4 sm:$0xff]   ;;  %v2053_v13 = vmax.f32 %v2052_v12, %v826_v4  ;;  %v1978_v53 = vmax.f32 %v1977_v9, %v796_v31  ;;  %v8210_v44 = vld [vmem:[#allocation6 + $0x810] ss:$24 sps:$4 sm:$0xff]   ;;  %v844_v50 = vld [vmem:[#allocation4 + $0x1678] sm:$0xff]  ;;  %v1749_v47 = vrot.slane %v1748_v23, 1  ;;  %v9514_v35 = vmax.f32 %v1670_v48, %v1671_v57 }
 0x20d   :  { %v838_v54 = vld [vmem:[#allocation4 + $0x1648] sm:$0xff]  ;;  %v2131_v46 = vmax.f32 %v2130_v32, %v874_v19  ;;  %v1902_v8 = vmax.f32 %v1900_v33, %v1901_v26  ;;  %v1826_v15 = vmax.f32 %v1824_v21, %v1825_v17  ;;  %4400 = vmatprep.subr.bf16.mxu0 %v8212_v38  ;;  %v8218_v28 = vld [vmem:[#allocation6 + $0x844] ss:$24 sps:$4 sm:$0xff]   ;;  %10176 = vst [vmem:[#allocation89_spill] sm:$0xff] %v9512_v27  ;;  %v8216_v33 = vld [vmem:[#allocation6 + $0x840] ss:$24 sps:$4 sm:$0xff]  }
 0x20e   :  { %v886_v20 = vld [vmem:[#allocation4 + $0x17c8] sm:$0xff]  ;;  %v2054_v51 = vmax.f32 %v2053_v13, %v832_v5  ;;  %v1979_v24 = vrot.slane %v1978_v53, 4  ;;  %v892_v40 = vld [vmem:[#allocation4 + $0x17f8] sm:$0xff]  ;;  %10177 = vst [vmem:[#allocation90_spill] sm:$0xff] %v9514_v35  ;;  %v9516_v39 = vmax.f32 %v1748_v23, %v1749_v47  ;;  %v2152_v59 = vpack.c.bf16 %v9498_v36, %v9498_v36  ;;  %4401 = vmatpush1.bf16.msra.mxu0 %v8210_v44 }
 0x20f   :  { %v2132_v56 = vmax.f32 %v2131_v46, %v880_v55  ;;  %v1903_v58 = vrot.slane %v1902_v8, 2  ;;  %v1827_v16 = vrot.slane %v1826_v15, 1  ;;  %v2158_v34 = vpack.c.bf16 %v9500_v45, %v9500_v45  ;;  %4402 = vmatprep.subr.bf16.mxu0 %v8218_v28  ;;  %v8224_v21 = vld [vmem:[#allocation6 + $0x874] ss:$24 sps:$4 sm:$0xff]   ;;  %v8222_v46 = vld [vmem:[#allocation6 + $0x870] ss:$24 sps:$4 sm:$0xff]  }
 0x210   :  { %v2055_v4 = vmax.f32 %v2054_v51, %v838_v54  ;;  %10178 = vst [vmem:[#allocation91_spill] sm:$0xff] %v9516_v39  ;;  %v1980_v49 = vmax.f32 %v1978_v53, %v1979_v24  ;;  %v2164_v38 = vpack.c.bf16 %v9502_v7, %v9502_v7  ;;  %v2170_v55 = vpack.c.bf16 %v9504_v37, %v9504_v37  ;;  %v8230_v51 = vld [vmem:[#allocation6 + $0x8a4] ss:$24 sps:$4 sm:$0xff]   ;;  %v8267_v36 = vld [vmem:[#allocation6 + $0x878] ss:$24 sps:$4 sm:$0xff]  }
 0x211   :  { %v2133_v25 = vmax.f32 %v2132_v56, %v886_v20  ;;  %v1904_v31 = vmax.f32 %v1902_v8, %v1903_v58  ;;  %v9522_v12 = vmax.f32 %v1826_v15, %v1827_v16  ;;  %v2176_v26 = vpack.c.bf16 %v9506_v11, %v9506_v11  ;;  %v801_v7 = vld [vmem:[#allocation4 + $0x1520] sm:$0xff] }
 0x212   :  { %v2056_v19 = vmax.f32 %v2055_v4, %v844_v50  ;;  %v1981_v10 = vrot.slane %v1980_v49, 2  ;;  %v2182_v13 = vpack.c.bf16 %v9508_v41, %v9508_v41  ;;  %v2188_v17 = vpack.c.bf16 %v9510_v14, %v9510_v14  ;;  %4403 = vmatpush1.bf16.msra.mxu0 %v8216_v33  ;;  %v417_v14 = vld [vmem:[#allocation4 + $0x920] sm:$0xff]  ;;  %v471_v41 = vld [vmem:[#allocation4 + $0xad0] sm:$0xff] }
 0x213   :  { %10179 = vst [vmem:[#allocation92_spill] sm:$0xff] %v9522_v12  ;;  %v2134_v5 = vmax.f32 %v2133_v25, %v892_v40  ;;  %v1905_v9 = vrot.slane %v1904_v31, 1  ;;  %v2194_v53 = vpack.c.bf16 %v9512_v27, %v9512_v27  ;;  %v2200_v57 = vpack.c.bf16 %v9514_v35, %v9514_v35  ;;  %4404 = vmatprep.subr.bf16.mxu0 %v8224_v21  ;;  %v8228_v25 = vld [vmem:[#allocation6 + $0x8a0] ss:$24 sps:$4 sm:$0xff]   ;;  %v8236_v21 = vld [vmem:[#allocation6 + $0x8d4] ss:$24 sps:$4 sm:$0xff]  }
 0x214   :  { %v2057_v32 = vrot.slane %v2056_v19, 4  ;;  %v1982_v42 = vmax.f32 %v1980_v49, %v1981_v10  ;;  %v2206_v8 = vpack.c.bf16 %v9516_v39, %v9516_v39  ;;  %v2212_v50 = vpack.c.bf16 %v9522_v12, %v9522_v12  ;;  %v8269_v39 = vld [vmem:[#allocation6 + $0x87c] ss:$24 sps:$4 sm:$0xff]  }
 0x215   :  { %v2135_v48 = vrot.slane %v2134_v5, 4  ;;  %v9534_v54 = vmax.f32 %v1904_v31, %v1905_v9  ;;  %v2658_v15 = vunpack.c.l.b16 %v2146_v0  ;;  %v2664_v28 = vunpack.c.l.b16 %v2152_v59  ;;  %v135_v0 = vld [vmem:[#allocation4 + $0x50] sm:$0xff] }
 0x216   :  { %v2058_v23 = vmax.f32 %v2056_v19, %v2057_v32  ;;  %v1983_v20 = vrot.slane %v1982_v42, 1  ;;  %v2670_v40 = vunpack.c.l.b16 %v2158_v34  ;;  %v2676_v4 = vunpack.c.l.b16 %v2164_v38  ;;  %4405 = vmatpush1.bf16.msra.mxu0 %v8222_v46  ;;  %v177_v38 = vld [vmem:[#allocation4 + $0x1a0] sm:$0xff]  ;;  %v807_v35 = vld [vmem:[#allocation4 + $0x1550] sm:$0xff] }
 0x217   :  { %10180 = vst [vmem:[#allocation93_spill] sm:$0xff] %v9534_v54  ;;  %v2136_v30 = vmax.f32 %v2134_v5, %v2135_v48  ;;  %v2218_v47 = vpack.c.bf16 %v9534_v54, %v9534_v54  ;;  %v2682_v16 = vunpack.c.l.b16 %v2170_v55  ;;  %v2688_v49 = vunpack.c.l.b16 %v2176_v26  ;;  %v129_v5 = vld [vmem:[#allocation4 + $0x20] sm:$0xff]  ;;  %4406 = vmatprep.subr.bf16.mxu0 %v8230_v51  ;;  %v183_v55 = vld [vmem:[#allocation4 + $0x1d0] sm:$0xff] }
 0x218   :  { %v2059_v44 = vrot.slane %v2058_v23, 2  ;;  %v9548_v24 = vmax.f32 %v1982_v42, %v1983_v20  ;;  %v2694_v33 = vunpack.c.l.b16 %v2182_v13  ;;  %v9552_v10 = vunpack.c.l.b16 %v2188_v17  ;;  %v141_v46 = vld [vmem:[#allocation4 + $0x80] sm:$0xff]  ;;  %v8234_v20 = vld [vmem:[#allocation6 + $0x8d0] ss:$24 sps:$4 sm:$0xff]  }
 0x219   :  { %v2137_v56 = vrot.slane %v2136_v30, 2  ;;  %v2706_v59 = vunpack.c.l.b16 %v2194_v53  ;;  %v2712_v34 = vunpack.c.l.b16 %v2200_v57  ;;  %v2718_v32 = vunpack.c.l.b16 %v2206_v8  ;;  %v189_v51 = vld [vmem:[#allocation4 + $0x200] sm:$0xff] }
 0x21a   :  { %10181 = vst [vmem:[#allocation94_spill] sm:$0xff] %v9548_v24  ;;  %v2060_v58 = vmax.f32 %v2058_v23, %v2059_v44  ;;  %v2224_v19 = vpack.c.bf16 %v9548_v24, %v9548_v24  ;;  %v2724_v48 = vunpack.c.l.b16 %v2212_v50  ;;  %v2730_v26 = vunpack.c.l.b16 %v2218_v47  ;;  %4407 = vmatpush1.bf16.msra.mxu0 %v8228_v25  ;;  %v147_v50 = vld [vmem:[#allocation4 + $0xb0] sm:$0xff]  ;;  %v153_v47 = vld [vmem:[#allocation4 + $0xe0] sm:$0xff] }
 0x21b   :  { %v2138_v31 = vmax.f32 %v2136_v30, %v2137_v56  ;;  %v2791_v13 = vsel %vm2749_vm0, %v2664_v28, %v2658_v15  ;;  %v2833_v17 = vsel %vm2749_vm0, %v2712_v34, %v2706_v59  ;;  %v945_v44 = vmax.f32 %v129_v5, %v135_v0  ;;  %v195_v56 = vld [vmem:[#allocation4 + $0x230] sm:$0xff]  ;;  %4408 = vmatprep.subr.bf16.mxu0 %v8236_v21  ;;  %v201_v5 = vld [vmem:[#allocation4 + $0x260] sm:$0xff] }
 0x21c   :  { %v2061_v9 = vrot.slane %v2060_v58, 1  ;;  %v2736_v23 = vunpack.c.l.b16 %v2224_v19  ;;  %v2792_v57 = vsel %vm2751_vm1, %v2670_v40, %v2791_v13  ;;  %v2834_v8 = vsel %vm2751_vm1, %v2718_v32, %v2833_v17  ;;  %v225_v25 = vld [vmem:[#allocation4 + $0x320] sm:$0xff]  ;;  %v159_v34 = vld [vmem:[#allocation4 + $0x110] sm:$0xff] }
 0x21d   :  { %v2139_v42 = vrot.slane %v2138_v31, 1  ;;  %v1023_v19 = vmax.f32 %v177_v38, %v183_v55  ;;  %v2793_v15 = vsel %vm2753_vm2, %v2676_v4, %v2792_v57  ;;  %v2835_v28 = vsel %vm2753_vm2, %v2724_v48, %v2834_v8  ;;  %v237_v21 = vld [vmem:[#allocation4 + $0x380] sm:$0xff]  ;;  %v279_v38 = vld [vmem:[#allocation4 + $0x4d0] sm:$0xff] }
 0x21e   :  { %v9554_v30 = vmax.f32 %v2060_v58, %v2061_v9  ;;  %v946_v0 = vmax.f32 %v945_v44, %v141_v46  ;;  %v2794_v9 = vsel %vm2755_vm3, %v2682_v16, %v2793_v15  ;;  %v2836_v59 = vsel %vm2755_vm3, %v2730_v26, %v2835_v28  ;;  %v273_v32 = vld [vmem:[#allocation4 + $0x4a0] sm:$0xff]  ;;  %v207_v13 = vld [vmem:[#allocation4 + $0x290] sm:$0xff]  ;;  %4409 = vmatpush1.bf16.msra.mxu0 %v8234_v20 }
 0x21f   :  { %v9558_v53 = vmax.f32 %v2138_v31, %v2139_v42  ;;  %v231_v31 = vld [vmem:[#allocation4 + $0x350] sm:$0xff]  ;;  %v1024_v55 = vmax.f32 %v1023_v19, %v189_v51  ;;  %v2795_v4 = vsel %vm2757_vm4, %v2688_v49, %v2794_v9  ;;  %v2837_v48 = vsel %vm2757_vm4, %v2736_v23, %v2836_v59  ;;  %v285_v46 = vld [vmem:[#allocation4 + $0x500] sm:$0xff] }
 0x220   :  { %10182 = vst [vmem:[#allocation95_spill] sm:$0xff] %v9554_v30  ;;  %v2230_v58 = vpack.c.bf16 %v9554_v30, %v9554_v30  ;;  %v243_v17 = vld [vmem:[#allocation4 + $0x3b0] sm:$0xff]  ;;  %v321_v44 = vld [vmem:[#allocation4 + $0x620] sm:$0xff]  ;;  %v947_v8 = vmax.f32 %v946_v0, %v147_v50  ;;  %v2796_v26 = vsel %vm2759_vm5, %v2694_v33, %v2795_v4  ;;  %v1101_v19 = vmax.f32 %v225_v25, %v231_v31 }
 0x221   :  { %10183 = vst [vmem:[#allocation96_spill] sm:$0xff] %v9558_v53  ;;  %v2236_v40 = vpack.c.bf16 %v9558_v53, %v9558_v53  ;;  %v327_v57 = vld [vmem:[#allocation4 + $0x650] sm:$0xff]  ;;  %v165_v15 = vld [vmem:[#allocation4 + $0x140] sm:$0xff]  ;;  %v1025_v51 = vmax.f32 %v1024_v55, %v195_v56  ;;  %v2797_v49 = vsel %vm2761_vm6, %v9552_v10, %v2796_v26  ;;  %v1179_v0 = vmax.f32 %v273_v32, %v279_v38 }
 0x222   :  { %v2742_v42 = vunpack.c.l.b16 %v2230_v58  ;;  %v291_v28 = vld [vmem:[#allocation4 + $0x530] sm:$0xff]  ;;  %v369_v53 = vld [vmem:[#allocation4 + $0x7a0] sm:$0xff]  ;;  %v948_v20 = vmax.f32 %v947_v8, %v153_v47  ;;  %v1102_v25 = vmax.f32 %v1101_v19, %v237_v21  ;;  %v1257_v31 = vmax.f32 %v321_v44, %v327_v57 }
 0x223   :  { %v2748_v16 = vunpack.c.l.b16 %v2236_v40  ;;  %v375_v30 = vld [vmem:[#allocation4 + $0x7d0] sm:$0xff]  ;;  %v213_v58 = vld [vmem:[#allocation4 + $0x2c0] sm:$0xff]  ;;  %v1026_v56 = vmax.f32 %v1025_v51, %v201_v5  ;;  %v1180_v11 = vmax.f32 %v1179_v0, %v285_v46 }
 0x224   :  { %v2838_v23 = vsel %vm2759_vm5, %v2742_v42, %v2837_v48  ;;  %v249_v9 = vld [vmem:[#allocation4 + $0x3e0] sm:$0xff]  ;;  %v423_v50 = vld [vmem:[#allocation4 + $0x950] sm:$0xff]  ;;  %v949_v54 = vmax.f32 %v948_v20, %v159_v34  ;;  %v1335_v12 = vmax.f32 %v369_v53, %v375_v30 }
 0x225   :  { %v333_v59 = vld [vmem:[#allocation4 + $0x680] sm:$0xff]  ;;  %v2839_v33 = vsel %vm2761_vm6, %v2748_v16, %v2838_v23  ;;  %v171_v40 = vld [vmem:[#allocation4 + $0x170] sm:$0xff]  ;;  %v1027_v8 = vmax.f32 %v1026_v56, %v207_v13  ;;  %v1103_v16 = vmax.f32 %v1102_v25, %v243_v17  ;;  %v1413_v37 = vmax.f32 %v417_v14, %v423_v50 }
 0x226   :  { %v381_v4 = vld [vmem:[#allocation4 + $0x800] sm:$0xff]  ;;  %v9577_v55 = vpack.c.b16 %v2839_v33, %v2797_v49  ;;  %v219_v10 = vld [vmem:[#allocation4 + $0x2f0] sm:$0xff]  ;;  %v1258_v23 = vmax.f32 %v1257_v31, %v333_v59  ;;  %v950_v57 = vmax.f32 %v949_v54, %v165_v15  ;;  %v1181_v51 = vmax.f32 %v1180_v11, %v291_v28 }
 0x227   :  { %v465_v24 = vld [vmem:[#allocation4 + $0xaa0] sm:$0xff]  ;;  %v255_v42 = vld [vmem:[#allocation4 + $0x410] sm:$0xff]  ;;  %v1336_v19 = vmax.f32 %v1335_v12, %v381_v4  ;;  %v1028_v30 = vmax.f32 %v1027_v8, %v213_v58  ;;  %v1104_v53 = vmax.f32 %v1103_v16, %v249_v9 }
 0x228   :  { %v339_v48 = vld [vmem:[#allocation4 + $0x6b0] sm:$0xff]  ;;  %v429_v26 = vld [vmem:[#allocation4 + $0x980] sm:$0xff]  ;;  %4410 = vmatprep.mubr.bf16.mxu0 %v9577_v55  ;;  %v1491_v49 = vmax.f32 %v465_v24, %v471_v41  ;;  %4539 = vmatprep.mubr.bf16.mxu1 %v9577_v55  ;;  %v951_v50 = vmax.f32 %v950_v57, %v171_v40 }
 0x229   :  { %v297_v47 = vld [vmem:[#allocation4 + $0x560] sm:$0xff]  ;;  %v387_v32 = vld [vmem:[#allocation4 + $0x830] sm:$0xff]  ;;  %v1259_v20 = vmax.f32 %v1258_v23, %v339_v48  ;;  %v1414_v0 = vmax.f32 %v1413_v37, %v429_v26  ;;  %v1029_v15 = vmax.f32 %v1028_v30, %v219_v10  ;;  %v1105_v28 = vmax.f32 %v1104_v53, %v255_v42 }
 0x22a   :  { %v477_v38 = vld [vmem:[#allocation4 + $0xb00] sm:$0xff]  ;;  %v435_v44 = vld [vmem:[#allocation4 + $0x9b0] sm:$0xff]  ;;  %v1182_v56 = vmax.f32 %v1181_v51, %v297_v47  ;;  %v1337_v25 = vmax.f32 %v1336_v19, %v387_v32  ;;  %v952_v48 = vrot.slane %v951_v50, 4 }
 0x22b   :  { %v261_v5 = vld [vmem:[#allocation4 + $0x440] sm:$0xff]  ;;  %v303_v33 = vld [vmem:[#allocation4 + $0x590] sm:$0xff]  ;;  %v1492_v54 = vmax.f32 %v1491_v49, %v477_v38  ;;  %v1415_v9 = vmax.f32 %v1414_v0, %v435_v44  ;;  %v1030_v32 = vrot.slane %v1029_v15, 4 }
 0x22c   :  { %v345_v21 = vld [vmem:[#allocation4 + $0x6e0] sm:$0xff]  ;;  %v483_v46 = vld [vmem:[#allocation4 + $0xb30] sm:$0xff]  ;;  %v1183_v26 = vmax.f32 %v1182_v56, %v303_v33  ;;  %v1106_v38 = vmax.f32 %v1105_v28, %v261_v5  ;;  %v953_v10 = vmax.f32 %v951_v50, %v952_v48 }
 0x22d   :  { %v393_v34 = vld [vmem:[#allocation4 + $0x860] sm:$0xff]  ;;  %v267_v13 = vld [vmem:[#allocation4 + $0x470] sm:$0xff]  ;;  %v1260_v58 = vmax.f32 %v1259_v20, %v345_v21  ;;  %v1493_v16 = vmax.f32 %v1492_v54, %v483_v46  ;;  %v1031_v53 = vmax.f32 %v1029_v15, %v1030_v32 }
 0x22e   :  { %v309_v14 = vld [vmem:[#allocation4 + $0x5c0] sm:$0xff]  ;;  %v351_v17 = vld [vmem:[#allocation4 + $0x710] sm:$0xff]  ;;  %v1338_v8 = vmax.f32 %v1337_v25, %v393_v34  ;;  %v1107_v20 = vmax.f32 %v1106_v38, %v267_v13  ;;  %v954_v46 = vrot.slane %v953_v10, 2 }
 0x22f   :  { %v441_v59 = vld [vmem:[#allocation4 + $0x9e0] sm:$0xff]  ;;  %v315_v11 = vld [vmem:[#allocation4 + $0x5f0] sm:$0xff]  ;;  %v1261_v57 = vmax.f32 %v1260_v58, %v351_v17  ;;  %v1184_v42 = vmax.f32 %v1183_v26, %v309_v14 }
 0x230   :  { %v357_v12 = vld [vmem:[#allocation4 + $0x740] sm:$0xff]  ;;  %v399_v41 = vld [vmem:[#allocation4 + $0x890] sm:$0xff]  ;;  %v1416_v51 = vmax.f32 %v1415_v9, %v441_v59  ;;  %v1032_v59 = vrot.slane %v1031_v53, 2  ;;  %v1108_v28 = vrot.slane %v1107_v20, 4  ;;  %v9581_v14 = vmax.f32 %v953_v10, %v954_v46 }
 0x231   :  { %v489_v24 = vld [vmem:[#allocation4 + $0xb60] sm:$0xff]  ;;  %v363_v4 = vld [vmem:[#allocation4 + $0x770] sm:$0xff]  ;;  %v1339_v21 = vmax.f32 %v1338_v8, %v399_v41  ;;  %v1262_v0 = vmax.f32 %v1261_v57, %v357_v12  ;;  %v1185_v56 = vmax.f32 %v1184_v42, %v315_v11 }
 0x232   :  { %v405_v37 = vld [vmem:[#allocation4 + $0x8c0] sm:$0xff]  ;;  %v447_v31 = vld [vmem:[#allocation4 + $0xa10] sm:$0xff]  ;;  %v1494_v44 = vmax.f32 %v1493_v16, %v489_v24  ;;  %v9583_v12 = vmax.f32 %v1031_v53, %v1032_v59  ;;  %v1109_v9 = vmax.f32 %v1107_v20, %v1108_v28 }
 0x233   :  { %v411_v23 = vld [vmem:[#allocation4 + $0x8f0] sm:$0xff]  ;;  %v453_v40 = vld [vmem:[#allocation4 + $0xa40] sm:$0xff]  ;;  %v1417_v33 = vmax.f32 %v1416_v51, %v447_v31  ;;  %v1340_v25 = vmax.f32 %v1339_v21, %v405_v37  ;;  %v1263_v58 = vmax.f32 %v1262_v0, %v363_v4  ;;  %v1186_v41 = vrot.slane %v1185_v56, 4 }
 0x234   :  { %v495_v47 = vld [vmem:[#allocation4 + $0xb90] sm:$0xff]  ;;  %v501_v49 = vld [vmem:[#allocation4 + $0xbc0] sm:$0xff]  ;;  %v1110_v32 = vrot.slane %v1109_v9, 2  ;;  %v956_v51 = vrot.slane %v9581_v14, 1 }
 0x235   :  { %v459_v19 = vld [vmem:[#allocation4 + $0xa70] sm:$0xff]  ;;  %v1495_v54 = vmax.f32 %v1494_v44, %v495_v47  ;;  %v1418_v50 = vmax.f32 %v1417_v33, %v453_v40  ;;  %v1341_v24 = vmax.f32 %v1340_v25, %v411_v23  ;;  %v8249_v13 = vld [vmem:[#allocation6 + $0x7e8] ss:$24 sps:$4 sm:$0xff]   ;;  %v1264_v11 = vrot.slane %v1263_v58, 4  ;;  %v8251_v31 = vld [vmem:[#allocation6 + $0x7ec] ss:$24 sps:$4 sm:$0xff]  }
 0x236   :  { %v8242_v30 = vld [vmem:[#allocation6 + $0x14] ss:$24 sps:$4 sm:$0xff]   ;;  %v8243_v34 = vld [vmem:[#allocation6 + $0x7b8] ss:$24 sps:$4 sm:$0xff]   ;;  %v513_v48 = vld [vmem:[#allocation4 + $0xc20] sm:$0xff]  ;;  %v1187_v16 = vmax.f32 %v1185_v56, %v1186_v41  ;;  %v1111_v53 = vmax.f32 %v1109_v9, %v1110_v32 }
 0x237   :  { %4550 = vmatprep.subr.bf16.mxu0 %v8242_v30  ;;  %v8245_v5 = vld [vmem:[#allocation6 + $0x7bc] ss:$24 sps:$4 sm:$0xff]   ;;  %v1496_v15 = vmax.f32 %v1495_v54, %v501_v49  ;;  %v1419_v37 = vmax.f32 %v1418_v50, %v459_v19  ;;  %v561_v8 = vld [vmem:[#allocation4 + $0xda0] sm:$0xff]  ;;  %v1342_v4 = vrot.slane %v1341_v24, 4  ;;  %v1265_v38 = vmax.f32 %v1263_v58, %v1264_v11  ;;  %v8255_v33 = vld [vmem:[#allocation6 + $0x818] ss:$24 sps:$4 sm:$0xff]  }
 0x238   :  { %v507_v17 = vld [vmem:[#allocation4 + $0xbf0] sm:$0xff]  ;;  %4525 = vmatprep.subr.bf16.mxu1 %v8245_v5  ;;  %v525_v47 = vld [vmem:[#allocation4 + $0xc80] sm:$0xff]  ;;  %v1188_v49 = vrot.slane %v1187_v16, 2  ;;  %v1034_v30 = vrot.slane %v9583_v12, 1  ;;  %v1112_v58 = vrot.slane %v1111_v53, 1 }
 0x239   :  { %4526 = vmatpush1.bf16.msra.mxu1 %v8243_v34  ;;  %v519_v26 = vld [vmem:[#allocation4 + $0xc50] sm:$0xff]  ;;  %v1497_v40 = vmax.f32 %v1496_v15, %v507_v17  ;;  %v1420_v23 = vrot.slane %v1419_v37, 4  ;;  %v1343_v10 = vmax.f32 %v1341_v24, %v1342_v4  ;;  %v573_v44 = vld [vmem:[#allocation4 + $0xe00] sm:$0xff]  ;;  %v1266_v20 = vrot.slane %v1265_v38, 2 }
 0x23a   :  { %4527 = vmatprep.subr.bf16.mxu1 %v8251_v31  ;;  %v567_v57 = vld [vmem:[#allocation4 + $0xdd0] sm:$0xff]  ;;  %v9591_v46 = vld [vmem:[#allocation4 + $0xf20] sm:$0xff]  ;;  %v1189_v25 = vmax.f32 %v1187_v16, %v1188_v49  ;;  %v1569_v17 = vmax.f32 %v513_v48, %v519_v26  ;;  %v9624_v27 = vmax.f32 %v1111_v53, %v1112_v58 }
 0x23b   :  { %v1498_v42 = vrot.slane %v1497_v40, 4  ;;  %v8257_v19 = vld [vmem:[#allocation6 + $0x81c] ss:$24 sps:$4 sm:$0xff]   ;;  %v1421_v0 = vmax.f32 %v1419_v37, %v1420_v23  ;;  %v1344_v54 = vrot.slane %v1343_v10, 2  ;;  %v537_v59 = vld [vmem:[#allocation4 + $0xce0] sm:$0xff]  ;;  %v1267_v50 = vmax.f32 %v1265_v38, %v1266_v20 }
 0x23c   :  { %v9586_v21 = vld [vmem:[#allocation4 + $0xcb0] sm:$0xff]  ;;  %v9595_v28 = vld [vmem:[#allocation4 + $0x10a0] sm:$0xff]  ;;  %v1647_v24 = vmax.f32 %v561_v8, %v567_v57  ;;  %v1190_v16 = vrot.slane %v1189_v25, 1  ;;  %v1570_v26 = vmax.f32 %v1569_v17, %v525_v47  ;;  %v9617_v47 = vmax.f32 %v9583_v12, %v1034_v30 }
 0x23d   :  { %4528 = vmatpush1.bf16.msra.mxu1 %v8249_v13  ;;  %v9589_v34 = vld [vmem:[#allocation4 + $0xe30] sm:$0xff]  ;;  %v1499_v5 = vmax.f32 %v1497_v40, %v1498_v42  ;;  %v1422_v41 = vrot.slane %v1421_v0, 2  ;;  %v8263_v15 = vld [vmem:[#allocation6 + $0x84c] ss:$24 sps:$4 sm:$0xff]   ;;  %v9601_v4 = vmax.f32 %v1343_v10, %v1344_v54  ;;  %v1268_v8 = vrot.slane %v1267_v50, 1 }
 0x23e   :  { %v9593_v56 = vld [vmem:[#allocation4 + $0xf50] sm:$0xff]  ;;  %4529 = vmatprep.subr.bf16.mxu1 %v8257_v19  ;;  %v585_v13 = vld [vmem:[#allocation4 + $0xe60] sm:$0xff]  ;;  %v1648_v57 = vmax.f32 %v1647_v24, %v573_v44  ;;  %v9614_v10 = vmax.f32 %v9581_v14, %v956_v51  ;;  %v1571_v17 = vmax.f32 %v1570_v26, %v9586_v21  ;;  %v9626_v52 = vmax.f32 %v1189_v25, %v1190_v16 }
 0x23f   :  { %v621_v9 = vld [vmem:[#allocation4 + $0xf80] sm:$0xff]  ;;  %v663_v11 = vld [vmem:[#allocation4 + $0x10d0] sm:$0xff]  ;;  %v1500_v48 = vrot.slane %v1499_v5, 2  ;;  %v9619_v54 = vmax.f32 %v1421_v0, %v1422_v41  ;;  %v1725_v12 = vmax.f32 %v9591_v46, %v9593_v56 }
 0x240   :  { %v9597_v37 = vld [vmem:[#allocation4 + $0x1220] sm:$0xff]  ;;  %v9599_v31 = vld [vmem:[#allocation4 + $0x1250] sm:$0xff]  ;;  %v1649_v14 = vmax.f32 %v1648_v57, %v9589_v34  ;;  %v1572_v53 = vmax.f32 %v1571_v17, %v537_v59  ;;  %v1803_v25 = vmax.f32 %v9595_v28, %v663_v11  ;;  %v9637_v57 = vmax.f32 %v1267_v50, %v1268_v8 }
 0x241   :  { %v9603_v40 = vld [vmem:[#allocation4 + $0xd10] sm:$0xff]  ;;  %v669_v32 = vld [vmem:[#allocation4 + $0x1100] sm:$0xff]  ;;  %4530 = vmatpush1.bf16.msra.mxu1 %v8255_v33  ;;  %v9634_v45 = vmax.f32 %v1499_v5, %v1500_v48  ;;  %v1726_v56 = vmax.f32 %v1725_v12, %v621_v9  ;;  %v1881_v60 = vmax.f32 %v9597_v37, %v9599_v31  ;;  %v2037_v17 = vmax.f32 %v801_v7, %v807_v35 }
 0x242   :  { %v9605_v23 = vld [vmem:[#allocation4 + $0x13a0] sm:$0xff]  ;;  %v9607_v38 = vld [vmem:[#allocation4 + $0x13d0] sm:$0xff]  ;;  %4531 = vmatprep.subr.bf16.mxu1 %v8263_v15  ;;  %v1650_v46 = vmax.f32 %v1649_v14, %v585_v13  ;;  %v1573_v59 = vmax.f32 %v1572_v53, %v9603_v40  ;;  %v1804_v28 = vmax.f32 %v1803_v25, %v669_v32 }
 0x243   :  { %v8261_v49 = vld [vmem:[#allocation6 + $0x848] ss:$24 sps:$4 sm:$0xff]   ;;  %v9609_v42 = vld [vmem:[#allocation4 + $0xe90] sm:$0xff]  ;;  %v1959_v11 = vmax.f32 %v9605_v23, %v9607_v38  ;;  %v8275_v50 = vld [vmem:[#allocation6 + $0x8ac] ss:$24 sps:$4 sm:$0xff]  }
 0x244   :  { %v9611_v19 = vld [vmem:[#allocation4 + $0xfb0] sm:$0xff]  ;;  %v717_v20 = vld [vmem:[#allocation4 + $0x1280] sm:$0xff]  ;;  %v1651_v37 = vmax.f32 %v1650_v46, %v9609_v42 }
 0x245   :  { %v549_v44 = vld [vmem:[#allocation4 + $0xd40] sm:$0xff]  ;;  %v9622_v33 = vld [vmem:[#allocation4 + $0x1130] sm:$0xff]  ;;  %4532 = vmatpush1.bf16.msra.mxu1 %v8261_v49  ;;  %v1727_v31 = vmax.f32 %v1726_v56, %v9611_v19  ;;  %v1882_v49 = vmax.f32 %v1881_v60, %v717_v20 }
 0x246   :  { %v765_v24 = vld [vmem:[#allocation4 + $0x1400] sm:$0xff]  ;;  %v9631_v21 = vld [vmem:[#allocation4 + $0x12b0] sm:$0xff]  ;;  %4533 = vmatprep.subr.bf16.mxu1 %v8269_v39  ;;  %v1574_v32 = vmax.f32 %v1573_v59, %v549_v44  ;;  %v1805_v53 = vmax.f32 %v1804_v28, %v9622_v33 }
 0x247   :  { %v597_v51 = vld [vmem:[#allocation4 + $0xec0] sm:$0xff]  ;;  %v855_v15 = vld [vmem:[#allocation4 + $0x16d0] sm:$0xff]  ;;  %v1960_v23 = vmax.f32 %v1959_v11, %v765_v24  ;;  %v1883_v43 = vmax.f32 %v1882_v49, %v9631_v21 }
 0x248   :  { %v633_v30 = vld [vmem:[#allocation4 + $0xfe0] sm:$0xff]  ;;  %v555_v58 = vld [vmem:[#allocation4 + $0xd70] sm:$0xff]  ;;  %v1652_v3 = vmax.f32 %v1651_v37, %v597_v51 }
 0x249   :  { %v813_v0 = vld [vmem:[#allocation4 + $0x1580] sm:$0xff]  ;;  %v771_v34 = vld [vmem:[#allocation4 + $0x1430] sm:$0xff]  ;;  %v1728_v62 = vmax.f32 %v1727_v31, %v633_v30  ;;  %4534 = vmatpush1.bf16.msra.mxu1 %v8267_v36  ;;  %v1575_v35 = vmax.f32 %v1574_v32, %v555_v58 }
 0x24a   :  { %v849_v41 = vld [vmem:[#allocation4 + $0x16a0] sm:$0xff]  ;;  %v687_v13 = vld [vmem:[#allocation4 + $0x1190] sm:$0xff]  ;;  %v2038_v42 = vmax.f32 %v2037_v17, %v813_v0  ;;  %v1961_v46 = vmax.f32 %v1960_v23, %v771_v34  ;;  %4535 = vmatprep.subr.bf16.mxu1 %v8275_v50 }
 0x24b   :  { %v681_v16 = vld [vmem:[#allocation4 + $0x1160] sm:$0xff]  ;;  %v819_v48 = vld [vmem:[#allocation4 + $0x15b0] sm:$0xff]  ;;  %v2115_v39 = vmax.f32 %v849_v41, %v855_v15  ;;  %v1653_v15 = vmax.f32 %v1652_v3, %v603_v2  ;;  %v1729_v59 = vmax.f32 %v1728_v62, %v639_v63  ;;  %v1576_v36 = vrot.slane %v1575_v35, 4 }
 0x24c   :  { %v729_v26 = vld [vmem:[#allocation4 + $0x12e0] sm:$0xff]  ;;  %v735_v12 = vld [vmem:[#allocation4 + $0x1310] sm:$0xff]  ;;  %v1806_v20 = vmax.f32 %v1805_v53, %v681_v16  ;;  %v2039_v30 = vmax.f32 %v2038_v42, %v819_v48 }
 0x24d   :  { %v777_v9 = vld [vmem:[#allocation4 + $0x1460] sm:$0xff]  ;;  %v867_v40 = vld [vmem:[#allocation4 + $0x1730] sm:$0xff]  ;;  %v1884_v51 = vmax.f32 %v1883_v43, %v729_v26  ;;  %v1654_v58 = vrot.slane %v1653_v15, 4  ;;  %v1577_v17 = vmax.f32 %v1575_v35, %v1576_v36 }
 0x24e   :  { %v861_v8 = vld [vmem:[#allocation4 + $0x1700] sm:$0xff]  ;;  %v783_v25 = vld [vmem:[#allocation4 + $0x1490] sm:$0xff]  ;;  %v1807_v11 = vmax.f32 %v1806_v20, %v687_v13  ;;  %v1962_v37 = vmax.f32 %v1961_v46, %v777_v9 }
 0x24f   :  { %v645_v14 = vld [vmem:[#allocation4 + $0x1040] sm:$0xff]  ;;  %v651_v60 = vld [vmem:[#allocation4 + $0x1070] sm:$0xff]  ;;  %v2116_v56 = vmax.f32 %v2115_v39, %v861_v8  ;;  %v1885_v34 = vmax.f32 %v1884_v51, %v735_v12  ;;  %v1655_v2 = vmax.f32 %v1653_v15, %v1654_v58 }
 0x250   :  { %v825_v5 = vld [vmem:[#allocation4 + $0x15e0] sm:$0xff]  ;;  %v8281_v44 = vld [vmem:[#allocation6 + $0x8dc] ss:$24 sps:$4 sm:$0xff]   ;;  %v1730_v16 = vmax.f32 %v1729_v59, %v645_v14  ;;  %v8279_v50 = vld [vmem:[#allocation6 + $0x8d8] ss:$24 sps:$4 sm:$0xff]   ;;  %v1963_v3 = vmax.f32 %v1962_v37, %v783_v25  ;;  %v1502_v59 = vrot.slane %v9634_v45, 1 }
 0x251   :  { %v693_v38 = vld [vmem:[#allocation4 + $0x11c0] sm:$0xff]  ;;  %v699_v33 = vld [vmem:[#allocation4 + $0x11f0] sm:$0xff]  ;;  %v2117_v31 = vmax.f32 %v2116_v56, %v867_v40  ;;  %v2040_v8 = vmax.f32 %v2039_v30, %v825_v5  ;;  %v1578_v40 = vrot.slane %v1577_v17, 2  ;;  %v1656_v23 = vrot.slane %v1655_v2, 2 }
 0x252   :  { %v8273_v19 = vld [vmem:[#allocation6 + $0x8a8] ss:$24 sps:$4 sm:$0xff]   ;;  %v747_v28 = vld [vmem:[#allocation4 + $0x1370] sm:$0xff]  ;;  %v1808_v32 = vmax.f32 %v1807_v11, %v693_v38  ;;  %v1731_v26 = vmax.f32 %v1730_v16, %v651_v60 }
 0x253   :  { %v741_v7 = vld [vmem:[#allocation4 + $0x1340] sm:$0xff]  ;;  %v831_v21 = vld [vmem:[#allocation4 + $0x1610] sm:$0xff]  ;;  %4536 = vmatpush1.bf16.msra.mxu1 %v8273_v19  ;;  %v1579_v38 = vmax.f32 %v1577_v17, %v1578_v40  ;;  %v1657_v46 = vmax.f32 %v1655_v2, %v1656_v23  ;;  %v9661_v17 = vmax.f32 %v9634_v45, %v1502_v59  ;;  %v2145_v45 = vpack.c.bf16 %v9614_v10, %v9614_v10 }
 0x254   :  { %v789_v24 = vld [vmem:[#allocation4 + $0x14c0] sm:$0xff]  ;;  %v879_v0 = vld [vmem:[#allocation4 + $0x1790] sm:$0xff]  ;;  %4537 = vmatprep.subr.bf16.mxu1 %v8281_v44  ;;  %v1886_v48 = vmax.f32 %v1885_v34, %v741_v7  ;;  %v2041_v13 = vmax.f32 %v2040_v8, %v831_v21  ;;  %v1809_v53 = vmax.f32 %v1808_v32, %v699_v33  ;;  %v1732_v39 = vrot.slane %v1731_v26, 4 }
 0x255   :  { %v873_v41 = vld [vmem:[#allocation4 + $0x1760] sm:$0xff]  ;;  %v795_v43 = vld [vmem:[#allocation4 + $0x14f0] sm:$0xff]  ;;  %v1964_v14 = vmax.f32 %v1963_v3, %v789_v24  ;;  %v10184_v44 = vrot.slane %v9601_v4, 1  ;;  %v1580_v21 = vrot.slane %v1579_v38, 1  ;;  %v1658_v37 = vrot.slane %v1657_v46, 1 }
 0x256   :  { %v837_v49 = vld [vmem:[#allocation4 + $0x1640] sm:$0xff]  ;;  %v2118_v62 = vmax.f32 %v2117_v31, %v873_v41  ;;  %v843_v9 = vld [vmem:[#allocation4 + $0x1670] sm:$0xff]  ;;  %v1887_v42 = vmax.f32 %v1886_v48, %v747_v28  ;;  %v1810_v25 = vrot.slane %v1809_v53, 4  ;;  %v1733_v56 = vmax.f32 %v1731_v26, %v1732_v39 }
 0x257   :  { %v885_v63 = vld [vmem:[#allocation4 + $0x17c0] sm:$0xff]  ;;  %v891_v5 = vld [vmem:[#allocation4 + $0x17f0] sm:$0xff]  ;;  %v2042_v19 = vmax.f32 %v2041_v13, %v837_v49  ;;  %4538 = vmatpush1.bf16.msra.mxu1 %v8279_v50  ;;  %v1965_v35 = vmax.f32 %v1964_v14, %v795_v43  ;;  %v9652_v33 = vmax.f32 %v9601_v4, %v10184_v44  ;;  %v10185_v34 = vrot.slane %v9619_v54, 1 }
 0x258   :  { %v2119_v12 = vmax.f32 %v2118_v62, %v879_v0  ;;  %v1888_v60 = vrot.slane %v1887_v42, 4  ;;  %v1811_v24 = vmax.f32 %v1809_v53, %v1810_v25  ;;  %v1734_v51 = vrot.slane %v1733_v56, 2 }
 0x259   :  { %v2043_v7 = vmax.f32 %v2042_v19, %v843_v9  ;;  %v1966_v41 = vrot.slane %v1965_v35, 4  ;;  %v9658_v4 = vmax.f32 %v9619_v54, %v10185_v34  ;;  %v9663_v43 = vmax.f32 %v1579_v38, %v1580_v21 }
 0x25a   :  { %v2120_v20 = vmax.f32 %v2119_v12, %v885_v63  ;;  %v1889_v30 = vmax.f32 %v1887_v42, %v1888_v60  ;;  %v1812_v0 = vrot.slane %v1811_v24, 2  ;;  %v1735_v31 = vmax.f32 %v1733_v56, %v1734_v51 }
 0x25b   :  { %v2044_v28 = vrot.slane %v2043_v7, 4  ;;  %v1967_v36 = vmax.f32 %v1965_v35, %v1966_v41  ;;  %v9665_v48 = vmax.f32 %v1657_v46, %v1658_v37  ;;  %v2151_v23 = vpack.c.bf16 %v9617_v47, %v9617_v47 }
 0x25c   :  { %v2121_v15 = vmax.f32 %v2120_v20, %v891_v5  ;;  %v1890_v58 = vrot.slane %v1889_v30, 2  ;;  %v1813_v8 = vmax.f32 %v1811_v24, %v1812_v0  ;;  %v1736_v32 = vrot.slane %v1735_v31, 1 }
 0x25d   :  { %v2045_v16 = vmax.f32 %v2043_v7, %v2044_v28  ;;  %v1968_v50 = vrot.slane %v1967_v36, 2  ;;  %v2157_v39 = vpack.c.bf16 %v9624_v27, %v9624_v27  ;;  %v2163_v38 = vpack.c.bf16 %v9626_v52, %v9626_v52 }
 0x25e   :  { %v2122_v11 = vrot.slane %v2121_v15, 4  ;;  %v1891_v3 = vmax.f32 %v1889_v30, %v1890_v58  ;;  %v1814_v63 = vrot.slane %v1813_v8, 1  ;;  %v9667_v13 = vmax.f32 %v1735_v31, %v1736_v32 }
 0x25f   :  { %v2046_v62 = vrot.slane %v2045_v16, 2  ;;  %v1969_v2 = vmax.f32 %v1967_v36, %v1968_v50  ;;  %v2169_v25 = vpack.c.bf16 %v9637_v57, %v9637_v57  ;;  %v2193_v20 = vpack.c.bf16 %v9663_v43, %v9663_v43 }
 0x260   :  { %v2123_v49 = vmax.f32 %v2121_v15, %v2122_v11  ;;  %v1892_v54 = vrot.slane %v1891_v3, 1  ;;  %v9669_v40 = vmax.f32 %v1813_v8, %v1814_v63  ;;  %v2199_v46 = vpack.c.bf16 %v9665_v48, %v9665_v48 }
 0x261   :  { %v2047_v9 = vmax.f32 %v2045_v16, %v2046_v62  ;;  %v1970_v53 = vrot.slane %v1969_v2, 1  ;;  %v2205_v56 = vpack.c.bf16 %v9667_v13, %v9667_v13  ;;  %v2175_v7 = vpack.c.bf16 %v9652_v33, %v9652_v33 }
 0x262   :  { %v2124_v26 = vrot.slane %v2123_v49, 2  ;;  %v9673_v12 = vmax.f32 %v1891_v3, %v1892_v54  ;;  %v2211_v44 = vpack.c.bf16 %v9669_v40, %v9669_v40  ;;  %v2181_v41 = vpack.c.bf16 %v9658_v4, %v9658_v4 }
 0x263   :  { %v2048_v5 = vrot.slane %v2047_v9, 1  ;;  %v9679_v42 = vmax.f32 %v1969_v2, %v1970_v53  ;;  %v2657_v59 = vunpack.c.l.b16 %v2145_v45  ;;  %v2663_v51 = vunpack.c.l.b16 %v2151_v23 }
 0x264   :  { %v2125_v14 = vmax.f32 %v2123_v49, %v2124_v26  ;;  %v2217_v24 = vpack.c.bf16 %v9673_v12, %v9673_v12  ;;  %v2187_v30 = vpack.c.bf16 %v9661_v17, %v9661_v17  ;;  %v2669_v21 = vunpack.c.l.b16 %v2157_v39 }
 0x265   :  { %v9685_v35 = vmax.f32 %v2047_v9, %v2048_v5  ;;  %v2223_v15 = vpack.c.bf16 %v9679_v42, %v9679_v42  ;;  %v2675_v0 = vunpack.c.l.b16 %v2163_v38  ;;  %v2705_v11 = vunpack.c.l.b16 %v2193_v20  ;;  %v8240_v20 = vld [vmem:[#allocation6 + $0x10] ss:$24 sps:$4 sm:$0xff]  }
 0x266   :  { %v2126_v19 = vrot.slane %v2125_v14, 1  ;;  %v2711_v37 = vunpack.c.l.b16 %v2199_v46  ;;  %v2717_v31 = vunpack.c.l.b16 %v2205_v56  ;;  %v2681_v58 = vunpack.c.l.b16 %v2169_v25  ;;  %v8248_v46 = vld [vmem:[#allocation6 + $0x44] ss:$24 sps:$4 sm:$0xff]  }
 0x267   :  { %v2229_v28 = vpack.c.bf16 %v9685_v35, %v9685_v35  ;;  %v2723_v16 = vunpack.c.l.b16 %v2211_v44  ;;  %v2729_v34 = vunpack.c.l.b16 %v2217_v24  ;;  %v2687_v8 = vunpack.c.l.b16 %v2175_v7  ;;  %v8246_v7 = vld [vmem:[#allocation6 + $0x40] ss:$24 sps:$4 sm:$0xff]   ;;  %v8254_v44 = vld [vmem:[#allocation6 + $0x74] ss:$24 sps:$4 sm:$0xff]   ;;  %v8252_v24 = vld [vmem:[#allocation6 + $0x70] ss:$24 sps:$4 sm:$0xff]  }
 0x268   :  { %v9693_v60 = vmax.f32 %v2125_v14, %v2126_v19  ;;  %v2735_v50 = vunpack.c.l.b16 %v2223_v15  ;;  %v2784_v49 = vsel %vm2749_vm0, %v2663_v51, %v2657_v59  ;;  %v2826_v32 = vsel %vm2749_vm0, %v2711_v37, %v2705_v11  ;;  %v8258_v15 = vld [vmem:[#allocation6 + $0xa0] ss:$24 sps:$4 sm:$0xff]   ;;  %v8266_v59 = vld [vmem:[#allocation6 + $0xd4] ss:$24 sps:$4 sm:$0xff]   ;;  %v8264_v51 = vld [vmem:[#allocation6 + $0xd0] ss:$24 sps:$4 sm:$0xff]  }
 0x269   :  { %v2693_v3 = vunpack.c.l.b16 %v2181_v41  ;;  %v2741_v62 = vunpack.c.l.b16 %v2229_v28  ;;  %v2785_v63 = vsel %vm2751_vm1, %v2669_v21, %v2784_v49  ;;  %v2827_v2 = vsel %vm2751_vm1, %v2717_v31, %v2826_v32  ;;  %v8260_v41 = vld [vmem:[#allocation6 + $0xa4] ss:$24 sps:$4 sm:$0xff]   ;;  %v8270_v28 = vld [vmem:[#allocation6 + $0x100] ss:$24 sps:$4 sm:$0xff]   ;;  %v8278_v21 = vld [vmem:[#allocation6 + $0x134] ss:$24 sps:$4 sm:$0xff]  }
 0x26a   :  { %v2235_v36 = vpack.c.bf16 %v9693_v60, %v9693_v60  ;;  %v2699_v26 = vunpack.c.l.b16 %v2187_v30  ;;  %v2786_v9 = vsel %vm2753_vm2, %v2675_v0, %v2785_v63  ;;  %v2828_v53 = vsel %vm2753_vm2, %v2723_v16, %v2827_v2  ;;  %v8272_v30 = vld [vmem:[#allocation6 + $0x104] ss:$24 sps:$4 sm:$0xff]   ;;  %v8276_v0 = vld [vmem:[#allocation6 + $0x130] ss:$24 sps:$4 sm:$0xff]   ;;  %v8287_v11 = vld [vmem:[#allocation6 + $0x194] ss:$24 sps:$4 sm:$0xff]  }
 0x26b   :  { %v2787_v14 = vsel %vm2755_vm3, %v2681_v58, %v2786_v9  ;;  %v2829_v45 = vsel %vm2755_vm3, %v2729_v34, %v2828_v53  ;;  %v8285_v37 = vld [vmem:[#allocation6 + $0x190] ss:$24 sps:$4 sm:$0xff]   ;;  %v8290_v31 = vld [vmem:[#allocation6 + $0x1c4] ss:$24 sps:$4 sm:$0xff]   ;;  %v8288_v58 = vld [vmem:[#allocation6 + $0x1c0] ss:$24 sps:$4 sm:$0xff]  }
 0x26c   :  { %v2747_v54 = vunpack.c.l.b16 %v2235_v36  ;;  %v2788_v5 = vsel %vm2757_vm4, %v2687_v8, %v2787_v14  ;;  %v2830_v23 = vsel %vm2757_vm4, %v2735_v50, %v2829_v45  ;;  %v8282_v36 = vld [vmem:[#allocation6 + $0x160] ss:$24 sps:$4 sm:$0xff]   ;;  %v8293_v16 = vld [vmem:[#allocation6 + $0x1f4] ss:$24 sps:$4 sm:$0xff]   ;;  %v8291_v34 = vld [vmem:[#allocation6 + $0x1f0] ss:$24 sps:$4 sm:$0xff]  }
 0x26d   :  { %v2789_v39 = vsel %vm2759_vm5, %v2693_v3, %v2788_v5  ;;  %v2831_v19 = vsel %vm2759_vm5, %v2741_v62, %v2830_v23  ;;  %v8296_v8 = vld [vmem:[#allocation6 + $0x224] ss:$24 sps:$4 sm:$0xff]   ;;  %v8294_v50 = vld [vmem:[#allocation6 + $0x220] ss:$24 sps:$4 sm:$0xff]   ;;  %v8299_v49 = vld [vmem:[#allocation6 + $0x254] ss:$24 sps:$4 sm:$0xff]  }
 0x26e   :  { %v2790_v38 = vsel %vm2761_vm6, %v2699_v26, %v2789_v39  ;;  %v2832_v25 = vsel %vm2761_vm6, %v2747_v54, %v2831_v19  ;;  %v8297_v32 = vld [vmem:[#allocation6 + $0x250] ss:$24 sps:$4 sm:$0xff]   ;;  %v8302_v3 = vld [vmem:[#allocation6 + $0x284] ss:$24 sps:$4 sm:$0xff]   ;;  %v8300_v62 = vld [vmem:[#allocation6 + $0x280] ss:$24 sps:$4 sm:$0xff]  }
 0x26f   :  { %v9725_v56 = vpack.c.b16 %v2832_v25, %v2790_v38  ;;  %v8305_v63 = vld [vmem:[#allocation6 + $0x2b4] ss:$24 sps:$4 sm:$0xff]   ;;  %v8303_v2 = vld [vmem:[#allocation6 + $0x2b0] ss:$24 sps:$4 sm:$0xff]   ;;  %v8308_v26 = vld [vmem:[#allocation6 + $0x2e4] ss:$24 sps:$4 sm:$0xff]  }
 0x270   :  { %v4731_v54 = vld [vmem:[#allocation9 + $0x80] sm:$0xff]  ;;  %v4732_v9 = vld [vmem:[#allocation9 + $0x88] sm:$0xff]  ;;  %v8306_v5 = vld [vmem:[#allocation6 + $0x2e0] ss:$24 sps:$4 sm:$0xff]  }
 0x271   :  { %4411 = vmatmul.mubr.bf16.vlgmr.msra.gmra.mrb[0].mxu0 %v9725_v56  ;;  %4540 = vmatmul.mubr.bf16.vlgmr.msra.gmra.mrb[0].mxu1 %v9725_v56  ;;  %v7740_v53 = vpack.c.bf16 %v4732_v9, %v4731_v54  ;;  %v4715_v14 = vld [vmem:[#allocation9] sm:$0xff]  ;;  %v4716_v45 = vld [vmem:[#allocation9 + $0x8] sm:$0xff]  ;;  %v4733_v38 = vld [vmem:[#allocation9 + $0x90] sm:$0xff] }
 0x272   :  { %4551 = vmatpush1.bf16.msra.mxu0 %v8240_v20  ;;  %4582 = vmatprep.mubr.bf16.mxu0 %v9115_v22  ;;  %v8284_v22 = vld [vmem:[#allocation6 + $0x164] ss:$24 sps:$4 sm:$0xff]   ;;  %v8311_v23 = vld [vmem:[#allocation6 + $0x314] ss:$24 sps:$4 sm:$0xff]   ;;  %v7742_v39 = vpack.c.bf16 %v4716_v45, %v4715_v14  ;;  %v8309_v19 = vld [vmem:[#allocation6 + $0x310] ss:$24 sps:$4 sm:$0xff]  }
 0x273   :  { %4552 = vmatprep.subr.bf16.mxu0 %v8248_v46  ;;  %7741 = vmatprep.subr.bf16.mxu1 %v7740_v53  ;;  %v4734_v25 = vld [vmem:[#allocation9 + $0x98] sm:$0xff]  ;;  %v4743_v54 = vld [vmem:[#allocation9 + $0xe0] sm:$0xff]  ;;  %v4744_v9 = vld [vmem:[#allocation9 + $0xe8] sm:$0xff] }
 0x274   :  { %7743 = vmatpush3.bf16.msra.mxu1 %v7742_v39  ;;  %v8314_v20 = vld [vmem:[#allocation6 + $0x344] ss:$24 sps:$4 sm:$0xff]   ;;  %v7744_v46 = vpack.c.bf16 %v4734_v25, %v4733_v38  ;;  %v8323_v53 = vld [vmem:[#allocation6 + $0x3d4] ss:$24 sps:$4 sm:$0xff]   ;;  %v8321_v45 = vld [vmem:[#allocation6 + $0x3d0] ss:$24 sps:$4 sm:$0xff]   ;;  %v7764_v39 = vpack.c.bf16 %v4744_v9, %v4743_v54 }
 0x275   :  { %v8329_v38 = vld [vmem:[#allocation6 + $0x434] ss:$24 sps:$4 sm:$0xff]   ;;  %v8362_v54 = vld [vmem:[#allocation6 + $0x644] ss:$24 sps:$4 sm:$0xff]   ;;  %v8360_v9 = vld [vmem:[#allocation6 + $0x640] ss:$24 sps:$4 sm:$0xff]  }
 0x276   :  { %4553 = vmatpush1.bf16.msra.mxu0 %v8246_v7  ;;  %v4717_v7 = vld [vmem:[#allocation9 + $0x10] sm:$0xff]  ;;  %7745 = vmatprep.subr.bf16.mxu1 %v7744_v46  ;;  %v4727_v25 = vld [vmem:[#allocation9 + $0x60] sm:$0xff] }
 0x277   :  { %4554 = vmatprep.subr.bf16.mxu0 %v8254_v44  ;;  %v4718_v44 = vld [vmem:[#allocation9 + $0x18] sm:$0xff] }
 0x27a   :  { %4555 = vmatpush1.bf16.msra.mxu0 %v8252_v24  ;;  %v7746_v24 = vpack.c.bf16 %v4718_v44, %v4717_v7  ;;  %v8327_v7 = vld [vmem:[#allocation6 + $0x430] ss:$24 sps:$4 sm:$0xff]   ;;  %v4745_v44 = vld [vmem:[#allocation9 + $0xf0] sm:$0xff] }
 0x27b   :  { %4556 = vmatprep.subr.bf16.mxu0 %v8260_v41  ;;  %v8312_v41 = vld [vmem:[#allocation6 + $0x340] ss:$24 sps:$4 sm:$0xff]  }
 0x27c   :  { %7747 = vmatpush3.bf16.msra.mxu1 %v7746_v24  ;;  %v4746_v24 = vld [vmem:[#allocation9 + $0xf8] sm:$0xff] }
 0x27e   :  { %4557 = vmatpush1.bf16.msra.mxu0 %v8258_v15  ;;  %v4735_v15 = vld [vmem:[#allocation9 + $0xa0] sm:$0xff] }
 0x27f   :  { %4558 = vmatprep.subr.bf16.mxu0 %v8266_v59  ;;  %v4736_v59 = vld [vmem:[#allocation9 + $0xa8] sm:$0xff] }
 0x282   :  { %4559 = vmatpush1.bf16.msra.mxu0 %v8264_v51  ;;  %v7748_v51 = vpack.c.bf16 %v4736_v59, %v4735_v15  ;;  %v7768_v15 = vpack.c.bf16 %v4746_v24, %v4745_v44  ;;  %v4729_v59 = vld [vmem:[#allocation9 + $0x70] sm:$0xff] }
 0x283   :  { %4560 = vmatprep.subr.bf16.mxu0 %v8272_v30  ;;  %v4719_v30 = vld [vmem:[#allocation9 + $0x20] sm:$0xff]  ;;  %v8384_v24 = vld [vmem:[#allocation6 + $0x7c0] ss:$24 sps:$4 sm:$0xff]  }
 0x284   :  { %7749 = vmatprep.subr.bf16.mxu1 %v7748_v51  ;;  %v4730_v51 = vld [vmem:[#allocation9 + $0x78] sm:$0xff] }
 0x285   :  { %v8386_v44 = vld [vmem:[#allocation6 + $0x7c4] ss:$24 sps:$4 sm:$0xff]  }
 0x286   :  { %4561 = vmatpush1.bf16.msra.mxu0 %v8270_v28  ;;  %v4720_v28 = vld [vmem:[#allocation9 + $0x28] sm:$0xff] }
 0x287   :  { %4562 = vmatprep.subr.bf16.mxu0 %v8278_v21  ;;  %v4737_v21 = vld [vmem:[#allocation9 + $0xb0] sm:$0xff] }
 0x28a   :  { %4563 = vmatpush1.bf16.msra.mxu0 %v8276_v0  ;;  %v7750_v0 = vpack.c.bf16 %v4720_v28, %v4719_v30  ;;  %v7770_v30 = vpack.c.bf16 %v4730_v51, %v4729_v59  ;;  %v4763_v28 = vld [vmem:[#allocation9 + $0x180] sm:$0xff]  ;;  %v8390_v51 = vld [vmem:[#allocation6 + $0x820] ss:$24 sps:$4 sm:$0xff]  }
 0x28b   :  { %4564 = vmatprep.subr.bf16.mxu0 %v8284_v22  ;;  %v4738_v22 = vld [vmem:[#allocation9 + $0xb8] sm:$0xff] }
 0x28c   :  { %7751 = vmatpush3.bf16.msra.mxu1 %v7750_v0  ;;  %v8330_v0 = vld [vmem:[#allocation6 + $0x460] ss:$24 sps:$4 sm:$0xff]   ;;  %v8392_v59 = vld [vmem:[#allocation6 + $0x824] ss:$24 sps:$4 sm:$0xff]  }
 0x28e   :  { %4565 = vmatpush1.bf16.msra.mxu0 %v8282_v36  ;;  %v4721_v36 = vld [vmem:[#allocation9 + $0x30] sm:$0xff] }
 0x28f   :  { %4566 = vmatprep.subr.bf16.mxu0 %v8287_v11  ;;  %v4722_v11 = vld [vmem:[#allocation9 + $0x38] sm:$0xff] }
 0x292   :  { %4567 = vmatpush1.bf16.msra.mxu0 %v8285_v37  ;;  %v8317_v37 = vld [vmem:[#allocation6 + $0x374] ss:$24 sps:$4 sm:$0xff]  }
 0x293   :  { %4568 = vmatprep.subr.bf16.mxu0 %v8290_v31  ;;  %v7752_v31 = vpack.c.bf16 %v4738_v22, %v4737_v21  ;;  %v4764_v21 = vld [vmem:[#allocation9 + $0x188] sm:$0xff] }
 0x294   :  { %v8335_v22 = vld [vmem:[#allocation6 + $0x494] ss:$24 sps:$4 sm:$0xff]  }
 0x295   :  { %7753 = vmatprep.subr.bf16.mxu1 %v7752_v31  ;;  %v8336_v31 = vld [vmem:[#allocation6 + $0x4c0] ss:$24 sps:$4 sm:$0xff]  }
 0x296   :  { %4569 = vmatpush1.bf16.msra.mxu0 %v8288_v58  ;;  %v4739_v58 = vld [vmem:[#allocation9 + $0xc0] sm:$0xff] }
 0x297   :  { %4570 = vmatprep.subr.bf16.mxu0 %v8293_v16  ;;  %v4740_v16 = vld [vmem:[#allocation9 + $0xc8] sm:$0xff] }
 0x29a   :  { %4571 = vmatpush1.bf16.msra.mxu0 %v8291_v34  ;;  %v8315_v34 = vld [vmem:[#allocation6 + $0x370] ss:$24 sps:$4 sm:$0xff]  }
 0x29b   :  { %4572 = vmatprep.subr.bf16.mxu0 %v8296_v8  ;;  %v8320_v8 = vld [vmem:[#allocation6 + $0x3a4] ss:$24 sps:$4 sm:$0xff]  }
 0x29e   :  { %4573 = vmatpush1.bf16.msra.mxu0 %v8294_v50  ;;  %v7756_v50 = vpack.c.bf16 %v4740_v16, %v4739_v58  ;;  %v8341_v58 = vld [vmem:[#allocation6 + $0x4f4] ss:$24 sps:$4 sm:$0xff]   ;;  %v8339_v16 = vld [vmem:[#allocation6 + $0x4f0] ss:$24 sps:$4 sm:$0xff]  }
 0x29f   :  { %4574 = vmatprep.subr.bf16.mxu0 %v8299_v49  ;;  %v4723_v49 = vld [vmem:[#allocation9 + $0x40] sm:$0xff] }
 0x2a2   :  { %4575 = vmatpush1.bf16.msra.mxu0 %v8297_v32  ;;  %v4724_v32 = vld [vmem:[#allocation9 + $0x48] sm:$0xff] }
 0x2a3   :  { %4576 = vmatprep.subr.bf16.mxu0 %v8302_v3  ;;  %v4742_v3 = vld [vmem:[#allocation9 + $0xd8] sm:$0xff] }
 0x2a6   :  { %4577 = vmatpush1.bf16.msra.mxu0 %v8300_v62  ;;  %v4725_v62 = vld [vmem:[#allocation9 + $0x50] sm:$0xff] }
 0x2a7   :  { %4578 = vmatprep.subr.bf16.mxu0 %v8305_v63  ;;  %v4726_v63 = vld [vmem:[#allocation9 + $0x58] sm:$0xff] }
 0x2aa   :  { %4579 = vmatpush1.bf16.msra.mxu0 %v8303_v2  ;;  %v8318_v2 = vld [vmem:[#allocation6 + $0x3a0] ss:$24 sps:$4 sm:$0xff]  }
 0x2ab   :  { %4580 = vmatprep.subr.bf16.mxu0 %v8308_v26  ;;  %v7758_v26 = vpack.c.bf16 %v4724_v32, %v4723_v49  ;;  %v8350_v49 = vld [vmem:[#allocation6 + $0x584] ss:$24 sps:$4 sm:$0xff]   ;;  %v8348_v32 = vld [vmem:[#allocation6 + $0x580] ss:$24 sps:$4 sm:$0xff]  }
 0x2ae   :  { %4581 = vmatpush1.bf16.msra.mxu0 %v8306_v5  ;;  %v7762_v5 = vpack.c.bf16 %v4726_v63, %v4725_v62  ;;  %v8356_v62 = vld [vmem:[#allocation6 + $0x5e4] ss:$24 sps:$4 sm:$0xff]   ;;  %v8354_v63 = vld [vmem:[#allocation6 + $0x5e0] ss:$24 sps:$4 sm:$0xff]  }
 0x2af   :  { %4593 = vmatprep.subr.bf16.mxu0 %v8311_v23  ;;  %v8326_v23 = vld [vmem:[#allocation6 + $0x404] ss:$24 sps:$4 sm:$0xff]  }
 0x2b1   :  { %4583 = vmatmul.mubr.bf16.vlgmr.msra.gmra.mrb[4].mxu0 %v9262_v29  ;;  %v7754_v29 = vpack.c.bf16 %v4722_v11, %v4721_v36  ;;  %v7772_v36 = vpack.c.bf16 %v4764_v21, %v4763_v28  ;;  %v8333_v11 = vld [vmem:[#allocation6 + $0x490] ss:$24 sps:$4 sm:$0xff]   ;;  %v8398_v21 = vld [vmem:[#allocation6 + $0x884] ss:$24 sps:$4 sm:$0xff]  }
 0x2b2   :  { %4594 = vmatpush1.bf16.msra.mxu0 %v8309_v19  ;;  %4625 = vmatprep.mubr.bf16.mxu0 %v9344_v61  ;;  %v4741_v61 = vld [vmem:[#allocation9 + $0xd0] sm:$0xff]  ;;  %v8393_v28 = vld [vmem:[#allocation6 + $0x850] ss:$24 sps:$4 sm:$0xff]  }
 0x2b3   :  { %4595 = vmatprep.subr.bf16.mxu0 %v8314_v20  ;;  %7755 = vmatpush3.bf16.msra.mxu1 %v7754_v29  ;;  %v7760_v14 = vpack.c.bf16 %v4742_v3, %v4741_v61  ;;  %v8324_v19 = vld [vmem:[#allocation6 + $0x400] ss:$24 sps:$4 sm:$0xff]   ;;  %v4728_v20 = vld [vmem:[#allocation9 + $0x68] sm:$0xff] }
 0x2b4   :  { %7757 = vmatprep.subr.bf16.mxu1 %v7756_v50  ;;  %v7766_v46 = vpack.c.bf16 %v4728_v20, %v4727_v25  ;;  %v8342_v29 = vld [vmem:[#allocation6 + $0x520] ss:$24 sps:$4 sm:$0xff]   ;;  %v8345_v50 = vld [vmem:[#allocation6 + $0x550] ss:$24 sps:$4 sm:$0xff]   ;;  %v8353_v61 = vld [vmem:[#allocation6 + $0x5b4] ss:$24 sps:$4 sm:$0xff]  }
 0x2b5   :  { %v8351_v3 = vld [vmem:[#allocation6 + $0x5b0] ss:$24 sps:$4 sm:$0xff]   ;;  %v8380_v25 = vld [vmem:[#allocation6 + $0x764] ss:$24 sps:$4 sm:$0xff]   ;;  %v8378_v20 = vld [vmem:[#allocation6 + $0x760] ss:$24 sps:$4 sm:$0xff]  }
 0x2b6   :  { %4596 = vmatpush1.bf16.msra.mxu0 %v8312_v41  ;;  %v8332_v41 = vld [vmem:[#allocation6 + $0x464] ss:$24 sps:$4 sm:$0xff]  }
 0x2b7   :  { %4597 = vmatprep.subr.bf16.mxu0 %v8317_v37  ;;  %7759 = vmatpush3.bf16.msra.mxu1 %v7758_v26  ;;  %v8338_v37 = vld [vmem:[#allocation6 + $0x4c4] ss:$24 sps:$4 sm:$0xff]   ;;  %v8357_v26 = vld [vmem:[#allocation6 + $0x610] ss:$24 sps:$4 sm:$0xff]  }
 0x2b8   :  { %7761 = vmatprep.subr.bf16.mxu1 %v7760_v14  ;;  %v8363_v14 = vld [vmem:[#allocation6 + $0x670] ss:$24 sps:$4 sm:$0xff]  }
 0x2ba   :  { %4598 = vmatpush1.bf16.msra.mxu0 %v8315_v34  ;;  %v8344_v34 = vld [vmem:[#allocation6 + $0x524] ss:$24 sps:$4 sm:$0xff]  }
 0x2bb   :  { %4599 = vmatprep.subr.bf16.mxu0 %v8320_v8  ;;  %7763 = vmatpush3.bf16.msra.mxu1 %v7762_v5  ;;  %v8347_v8 = vld [vmem:[#allocation6 + $0x554] ss:$24 sps:$4 sm:$0xff]   ;;  %v8366_v5 = vld [vmem:[#allocation6 + $0x6a0] ss:$24 sps:$4 sm:$0xff]  }
 0x2bc   :  { %7765 = vmatprep.subr.bf16.mxu1 %v7764_v39  ;;  %v8369_v39 = vld [vmem:[#allocation6 + $0x6d0] ss:$24 sps:$4 sm:$0xff]  }
 0x2be   :  { %4600 = vmatpush1.bf16.msra.mxu0 %v8318_v2  ;;  %v8359_v2 = vld [vmem:[#allocation6 + $0x614] ss:$24 sps:$4 sm:$0xff]  }
 0x2bf   :  { %4601 = vmatprep.subr.bf16.mxu0 %v8323_v53  ;;  %7767 = vmatpush3.bf16.msra.mxu1 %v7766_v46  ;;  %v8365_v53 = vld [vmem:[#allocation6 + $0x674] ss:$24 sps:$4 sm:$0xff]  }
 0x2c0   :  { %7769 = vmatprep.subr.bf16.mxu1 %v7768_v15  ;;  %v8383_v46 = vld [vmem:[#allocation6 + $0x794] ss:$24 sps:$4 sm:$0xff]   ;;  %v8387_v15 = vld [vmem:[#allocation6 + $0x7f0] ss:$24 sps:$4 sm:$0xff]  }
 0x2c2   :  { %4602 = vmatpush1.bf16.msra.mxu0 %v8321_v45  ;;  %v8368_v45 = vld [vmem:[#allocation6 + $0x6a4] ss:$24 sps:$4 sm:$0xff]  }
 0x2c3   :  { %4603 = vmatprep.subr.bf16.mxu0 %v8326_v23  ;;  %7771 = vmatpush3.bf16.msra.mxu1 %v7770_v30  ;;  %v8371_v23 = vld [vmem:[#allocation6 + $0x6d4] ss:$24 sps:$4 sm:$0xff]  }
 0x2c4   :  { %7773 = vmatprep.subr.bf16.mxu1 %v7772_v36  ;;  %v8395_v30 = vld [vmem:[#allocation6 + $0x854] ss:$24 sps:$4 sm:$0xff]   ;;  %v8399_v36 = vld [vmem:[#allocation6 + $0x8b0] ss:$24 sps:$4 sm:$0xff]  }
 0x2c6   :  { %4604 = vmatpush1.bf16.msra.mxu0 %v8324_v19  ;;  %v8374_v19 = vld [vmem:[#allocation6 + $0x704] ss:$24 sps:$4 sm:$0xff]  }
 0x2c7   :  { %4605 = vmatprep.subr.bf16.mxu0 %v8329_v38  ;;  %v8377_v38 = vld [vmem:[#allocation6 + $0x734] ss:$24 sps:$4 sm:$0xff]  }
 0x2ca   :  { %4606 = vmatpush1.bf16.msra.mxu0 %v8327_v7  ;;  %v8381_v7 = vld [vmem:[#allocation6 + $0x790] ss:$24 sps:$4 sm:$0xff]  }
 0x2cb   :  { %4607 = vmatprep.subr.bf16.mxu0 %v8332_v41  ;;  %v8389_v41 = vld [vmem:[#allocation6 + $0x7f4] ss:$24 sps:$4 sm:$0xff]  }
 0x2ce   :  { %4608 = vmatpush1.bf16.msra.mxu0 %v8330_v0  ;;  %v8396_v0 = vld [vmem:[#allocation6 + $0x880] ss:$24 sps:$4 sm:$0xff]  }
 0x2cf   :  { %4609 = vmatprep.subr.bf16.mxu0 %v8335_v22  ;;  %v8401_v22 = vld [vmem:[#allocation6 + $0x8b4] ss:$24 sps:$4 sm:$0xff]  }
 0x2d2   :  { %4610 = vmatpush1.bf16.msra.mxu0 %v8333_v11  ;;  %v8404_v11 = vld [vmem:[#allocation6 + $0x8e4] ss:$24 sps:$4 sm:$0xff]  }
 0x2d3   :  { %4611 = vmatprep.subr.bf16.mxu0 %v8338_v37  ;;  %v8402_v37 = vld [vmem:[#allocation6 + $0x8e0] ss:$24 sps:$4 sm:$0xff]  }
 0x2d6   :  { %4612 = vmatpush1.bf16.msra.mxu0 %v8336_v31  ;;  %v2527_v31 = vlaneseq }
 0x2d7   :  { %4613 = vmatprep.subr.bf16.mxu0 %v8341_v58 }
 0x2d8   :  { %v9735_v58 = vshrl.u32 %v2527_v31, 7  ;;  %v4769_v31 = vld [vmem:[#allocation9 + $0x1b0] sm:$0xff] }
 0x2da   :  { %4614 = vmatpush1.bf16.msra.mxu0 %v8339_v16  ;;  %v2529_v16 = vsub.s32 0, %v9735_v58 }
 0x2db   :  { %4615 = vmatprep.subr.bf16.mxu0 %v8344_v34  ;;  %v9738_v34 = vld [vmem:[#allocation8] sm:$0x3f] }
 0x2de   :  { %4616 = vmatpush1.bf16.msra.mxu0 %v8342_v29  ;;  %v2533_v29 = vsub.s32 1, %v9735_v58 }
 0x2df   :  { %4617 = vmatprep.subr.bf16.mxu0 %v8347_v8  ;;  %v2541_v8 = vsub.s32 3, %v9735_v58 }
 0x2e2   :  { %4618 = vmatpush1.bf16.msra.mxu0 %v8345_v50  ;;  %v2530_v50 = vrot.slane %v9738_v34, %v2529_v16 }
 0x2e3   :  { %4619 = vmatprep.subr.bf16.mxu0 %v8350_v49  ;;  %v2534_v49 = vrot.slane %v9738_v34, %v2533_v29 }
 0x2e6   :  { %4620 = vmatpush1.bf16.msra.mxu0 %v8348_v32 }
 0x2e7   :  { %4621 = vmatprep.subr.bf16.mxu0 %v8353_v61 }
 0x2ea   :  { %4622 = vmatpush1.bf16.msra.mxu0 %v8351_v3 }
 0x2eb   :  { %4623 = vmatprep.subr.bf16.mxu0 %v8356_v62 }
 0x2ee   :  { %4624 = vmatpush1.bf16.msra.mxu0 %v8354_v63  ;;  %v4747_v63 = vld [vmem:[#allocation9 + $0x100] sm:$0xff] }
 0x2ef   :  { %4636 = vmatprep.subr.bf16.mxu0 %v8359_v2 }
 0x2f1   :  { %4626 = vmatmul.mubr.bf16.vlgmr.msra.gmra.mrb[4].mxu0 %v9492_v18  ;;  %v8372_v18 = vld [vmem:[#allocation6 + $0x700] ss:$24 sps:$4 sm:$0xff]  }
 0x2f2   :  { %4637 = vmatpush1.bf16.msra.mxu0 %v8357_v26  ;;  %4668 = vmatprep.mubr.bf16.mxu0 %v9577_v55  ;;  %v8375_v55 = vld [vmem:[#allocation6 + $0x730] ss:$24 sps:$4 sm:$0xff]  }
 0x2f3   :  { %4638 = vmatprep.subr.bf16.mxu0 %v8362_v54 }
 0x2f6   :  { %4639 = vmatpush1.bf16.msra.mxu0 %v8360_v9  ;;  %v4748_v9 = vld [vmem:[#allocation9 + $0x108] sm:$0xff] }
 0x2f7   :  { %4640 = vmatprep.subr.bf16.mxu0 %v8365_v53  ;;  %v4765_v53 = vld [vmem:[#allocation9 + $0x190] sm:$0xff] }
 0x2fa   :  { %4641 = vmatpush1.bf16.msra.mxu0 %v8363_v14  ;;  %v4766_v14 = vld [vmem:[#allocation9 + $0x198] sm:$0xff] }
 0x2fb   :  { %4642 = vmatprep.subr.bf16.mxu0 %v8368_v45 }
 0x2fe   :  { %4643 = vmatpush1.bf16.msra.mxu0 %v8366_v5 }
 0x2ff   :  { %4644 = vmatprep.subr.bf16.mxu0 %v8371_v23 }
 0x302   :  { %4645 = vmatpush1.bf16.msra.mxu0 %v8369_v39 }
 0x303   :  { %4646 = vmatprep.subr.bf16.mxu0 %v8374_v19 }
 0x306   :  { %4647 = vmatpush1.bf16.msra.mxu0 %v8372_v18 }
 0x307   :  { %4648 = vmatprep.subr.bf16.mxu0 %v8377_v38 }
 0x30a   :  { %4649 = vmatpush1.bf16.msra.mxu0 %v8375_v55 }
 0x30b   :  { %4650 = vmatprep.subr.bf16.mxu0 %v8380_v25  ;;  %v7774_v25 = vpack.c.bf16 %v4748_v9, %v4747_v63  ;;  %v4771_v63 = vld [vmem:[#allocation9 + $0x1c0] sm:$0xff] }
 0x30c   :  { %v4755_v9 = vld [vmem:[#allocation9 + $0x140] sm:$0xff] }
 0x30e   :  { %4651 = vmatpush1.bf16.msra.mxu0 %v8378_v20  ;;  %v7776_v20 = vpack.c.bf16 %v4766_v14, %v4765_v53  ;;  %v4756_v53 = vld [vmem:[#allocation9 + $0x148] sm:$0xff]  ;;  %v4773_v14 = vld [vmem:[#allocation9 + $0x1d0] sm:$0xff] }
 0x30f   :  { %4652 = vmatprep.subr.bf16.mxu0 %v8383_v46  ;;  %v4749_v46 = vld [vmem:[#allocation9 + $0x110] sm:$0xff] }
 0x312   :  { %4653 = vmatpush1.bf16.msra.mxu0 %v8381_v7 }
 0x313   :  { %4654 = vmatprep.subr.bf16.mxu0 %v8386_v44 }
 0x316   :  { %4655 = vmatpush1.bf16.msra.mxu0 %v8384_v24  ;;  %v4750_v24 = vld [vmem:[#allocation9 + $0x118] sm:$0xff] }
 0x317   :  { %4656 = vmatprep.subr.bf16.mxu0 %v8389_v41 }
 0x31a   :  { %4657 = vmatpush1.bf16.msra.mxu0 %v8387_v15 }
 0x31b   :  { %4658 = vmatprep.subr.bf16.mxu0 %v8392_v59 }
 0x31e   :  { %4659 = vmatpush1.bf16.msra.mxu0 %v8390_v51  ;;  %v4767_v51 = vld [vmem:[#allocation9 + $0x1a0] sm:$0xff] }
 0x31f   :  { %4660 = vmatprep.subr.bf16.mxu0 %v8395_v30  ;;  %v4768_v30 = vld [vmem:[#allocation9 + $0x1a8] sm:$0xff] }
 0x322   :  { %4661 = vmatpush1.bf16.msra.mxu0 %v8393_v28 }
 0x323   :  { %4662 = vmatprep.subr.bf16.mxu0 %v8398_v21  ;;  %v7778_v21 = vpack.c.bf16 %v4750_v24, %v4749_v46  ;;  %v4759_v24 = vld [vmem:[#allocation9 + $0x160] sm:$0xff] }
 0x326   :  { %4663 = vmatpush1.bf16.msra.mxu0 %v8396_v0  ;;  %v7780_v0 = vpack.c.bf16 %v4768_v30, %v4767_v51 }
 0x327   :  { %4664 = vmatprep.subr.bf16.mxu0 %v8401_v22  ;;  %v4751_v22 = vld [vmem:[#allocation9 + $0x120] sm:$0xff] }
 0x32a   :  { %4665 = vmatpush1.bf16.msra.mxu0 %v8399_v36  ;;  %v4752_v36 = vld [vmem:[#allocation9 + $0x128] sm:$0xff] }
 0x32b   :  { %4666 = vmatprep.subr.bf16.mxu0 %v8404_v11 }
 0x32e   :  { %4667 = vmatpush1.bf16.msra.mxu0 %v8402_v37 }
 0x331   :  { %4669 = vmatmul.mubr.bf16.vlgmr.msra.gmra.mrb[4].mxu0 %v9725_v56  ;;  %v9751_v56 = vrot.slane %v9738_v34, %v2541_v8 }
 0x344   :  { %v4412_v32 = vpop.f32.mrb[0].mxu0  ;;  %v9753_v61 = vpop.f32.mrb[0].mxu1 }
 0x345   :  { %v7900_v3 = vadd.f32 %v4412_v32, %v2530_v50  ;;  %v4414_v62 = vpop.f32.mrb[1].mxu0  ;;  %v4543_v2 = vpop.f32.mrb[1].mxu1 }
 0x346   :  { %v7901_v26 = vadd.f32 %v4414_v62, %v2534_v49  ;;  %v4416_v54 = vpop.f32.mrb[2].mxu0  ;;  %v7905_v45 = vadd.f32 %v4543_v2, %v9751_v56  ;;  %v9756_v5 = vpop.f32.mrb[2].mxu1  ;;  %v4754_v62 = vld [vmem:[#allocation9 + $0x138] sm:$0xff]  ;;  %v4772_v2 = vld [vmem:[#allocation9 + $0x1c8] sm:$0xff] }
 0x347   :  { %v4691_v23 = vmul.f32 0.01, %v7900_v3  ;;  %v7902_v39 = vadd.f32 %v4416_v54, %v2530_v50  ;;  %v4418_v19 = vpop.f32.mrb[3].mxu0  ;;  %v9758_v18 = vpop.f32.mrb[3].mxu1  ;;  %vm4679_vm7 = vcmp.gt.f32.partialorder %v7900_v3, 0.0  ;;  %v4770_v50 = vld [vmem:[#allocation9 + $0x1b8] sm:$0xff]  ;;  %v7788_v54 = vpack.c.bf16 %v4772_v2, %v4771_v63 }
 0x348   :  { %v4692_v38 = vmul.f32 0.01, %v7901_v26  ;;  %v7903_v55 = vadd.f32 %v4418_v19, %v2534_v49  ;;  %vm4680_vm8 = vcmp.gt.f32.partialorder %v7901_v26, 0.0  ;;  %v4694_v41 = vmul.f32 0.01, %v7905_v45 }
 0x349   :  { %v4697_v15 = vmul.f32 0.01, %v7902_v39  ;;  %v4703_v59 = vsel %vm4679_vm7, %v7900_v3, %v4691_v23  ;;  %vm4682_vm10 = vcmp.gt.f32.partialorder %v7905_v45, 0.0  ;;  %vm4685_vm11 = vcmp.gt.f32.partialorder %v7902_v39, 0.0  ;;  %v4753_v3 = vld [vmem:[#allocation9 + $0x130] sm:$0xff] }
 0x34a   :  { %v4698_v7 = vmul.f32 0.01, %v7903_v55  ;;  %v4704_v44 = vsel %vm4680_vm8, %v7901_v26, %v4692_v38  ;;  %vm4686_vm9 = vcmp.gt.f32.partialorder %v7903_v55, 0.0  ;;  %v4706_v11 = vsel %vm4682_vm10, %v7905_v45, %v4694_v41  ;;  %v4774_v45 = vld [vmem:[#allocation9 + $0x1d8] sm:$0xff]  ;;  %v4757_v38 = vld [vmem:[#allocation9 + $0x150] sm:$0xff]  ;;  %v4760_v41 = vld [vmem:[#allocation9 + $0x168] sm:$0xff] }
 0x34b   :  { %4875 = vmatprep.mubr.f32.mxu1 %v4704_v44  ;;  %v4709_v37 = vsel %vm4685_vm11, %v7902_v39, %v4697_v15  ;;  %v7782_v49 = vpack.c.bf16 %v4752_v36, %v4751_v22  ;;  %v7784_v32 = vpack.c.bf16 %v4770_v50, %v4769_v31  ;;  %v7786_v26 = vpack.c.bf16 %v4754_v62, %v4753_v3  ;;  %v4777_v15 = vld [vmem:[#allocation9 + $0x1f0] sm:$0xff]  ;;  %v4795_v22 = vld [vmem:[#allocation9 + $0x280] sm:$0xff]  ;;  %v4796_v36 = vld [vmem:[#allocation9 + $0x288] sm:$0xff] }
 0x34c   :  { %4876 = vmatmul.mubr.f32.vlgmr.msra.gmra.mrb[4].mxu1 %v4703_v59  ;;  %v4710_v28 = vsel %vm4686_vm9, %v7903_v55, %v4698_v7  ;;  %v7790_v23 = vpack.c.bf16 %v4756_v53, %v4755_v9  ;;  %v2537_v39 = vsub.s32 2, %v9735_v58  ;;  %v7792_v19 = vpack.c.bf16 %v4774_v45, %v4773_v14  ;;  %v4758_v55 = vld [vmem:[#allocation9 + $0x158] sm:$0xff]  ;;  %v4797_v3 = vld [vmem:[#allocation9 + $0x290] sm:$0xff]  ;;  %v4799_v53 = vld [vmem:[#allocation9 + $0x2a0] sm:$0xff] }
 0x34d   :  { %7775 = vmatpush3.bf16.msra.mxu1 %v7774_v25  ;;  %4880 = vmatprep.mubr.f32.mxu1 %v4710_v28  ;;  %v4775_v25 = vld [vmem:[#allocation9 + $0x1e0] sm:$0xff]  ;;  %v7794_v46 = vpack.c.bf16 %v4758_v55, %v4757_v38  ;;  %v4778_v59 = vld [vmem:[#allocation9 + $0x1f8] sm:$0xff]  ;;  %v7798_v30 = vpack.c.bf16 %v4760_v41, %v4759_v24  ;;  %v7804_v50 = vpack.c.bf16 %v4796_v36, %v4795_v22  ;;  %v4800_v14 = vld [vmem:[#allocation9 + $0x2a8] sm:$0xff]  ;;  %vm5040_vm10 = vcmask 7168  }
 0x34e   :  { %7777 = vmatprep.subr.bf16.mxu1 %v7776_v20  ;;  %v4776_v20 = vld [vmem:[#allocation9 + $0x1e8] sm:$0xff]  ;;  %v2538_v7 = vrot.slane %v9738_v34, %v2537_v39  ;;  %v7800_v28 = vpack.c.bf16 %v4778_v59, %v4777_v15  ;;  %v4798_v62 = vld [vmem:[#allocation9 + $0x298] sm:$0xff]  ;;  %v4803_v41 = vld [vmem:[#allocation9 + $0x2c0] sm:$0xff] }
 0x34f   :  { %v7796_v44 = vpack.c.bf16 %v4776_v20, %v4775_v25  ;;  %v4784_v38 = vld [vmem:[#allocation9 + $0x228] sm:$0xff]  ;;  %v4801_v25 = vld [vmem:[#allocation9 + $0x2b0] sm:$0xff]  ;;  %v4802_v20 = vld [vmem:[#allocation9 + $0x2b8] sm:$0xff] }
 0x350   :  { %4881 = vmatmul.mubr.f32.gmra.mrb[6].mxu1 %v4709_v37  ;;  %v7904_v51 = vadd.f32 %v9753_v61, %v2538_v7  ;;  %v7906_v61 = vadd.f32 %v9756_v5, %v2538_v7  ;;  %v7816_v7 = vpack.c.bf16 %v4802_v20, %v4801_v25  ;;  %v4786_v24 = vld [vmem:[#allocation9 + $0x238] sm:$0xff]  ;;  %v4804_v15 = vld [vmem:[#allocation9 + $0x2c8] sm:$0xff] }
 0x351   :  { %7779 = vmatpush3.bf16.msra.mxu1 %v7778_v21  ;;  %4950 = vmatprep.mubr.f32.mxu1 %v4706_v11  ;;  %v4761_v21 = vld [vmem:[#allocation9 + $0x170] sm:$0xff]  ;;  %v7907_v11 = vadd.f32 %v9758_v18, %v9751_v56  ;;  %v4782_v18 = vld [vmem:[#allocation9 + $0x218] sm:$0xff] }
 0x352   :  { %7781 = vmatprep.subr.bf16.mxu1 %v7780_v0  ;;  %v4762_v0 = vld [vmem:[#allocation9 + $0x178] sm:$0xff]  ;;  %v4693_v37 = vmul.f32 0.01, %v7904_v51  ;;  %vm4681_vm12 = vcmp.gt.f32.partialorder %v7904_v51, 0.0  ;;  %v4781_v56 = vld [vmem:[#allocation9 + $0x210] sm:$0xff]  ;;  %vm4687_vm14 = vcmp.gt.f32.partialorder %v7906_v61, 0.0 }
 0x353   :  { %v7802_v31 = vpack.c.bf16 %v4762_v0, %v4761_v21  ;;  %v4700_v63 = vmul.f32 0.01, %v7907_v11  ;;  %vm4688_vm13 = vcmp.gt.f32.partialorder %v7907_v11, 0.0  ;;  %v4699_v9 = vmul.f32 0.01, %v7906_v61  ;;  %v4805_v21 = vld [vmem:[#allocation9 + $0x2d0] sm:$0xff] }
 0x354   :  { %v4705_v2 = vsel %vm4681_vm12, %v7904_v51, %v4693_v37  ;;  %v7810_v5 = vpack.c.bf16 %v4782_v18, %v4781_v56  ;;  %v7820_v51 = vpack.c.bf16 %v4804_v15, %v4803_v41  ;;  %v4806_v0 = vld [vmem:[#allocation9 + $0x2d8] sm:$0xff] }
 0x355   :  { %7783 = vmatpush3.bf16.msra.mxu1 %v7782_v49  ;;  %v4779_v49 = vld [vmem:[#allocation9 + $0x200] sm:$0xff]  ;;  %v4712_v45 = vsel %vm4688_vm13, %v7907_v11, %v4700_v63  ;;  %v4711_v55 = vsel %vm4687_vm14, %v7906_v61, %v4699_v9  ;;  %v7824_v36 = vpack.c.bf16 %v4806_v0, %v4805_v21  ;;  %v4789_v11 = vld [vmem:[#allocation9 + $0x250] sm:$0xff]  ;;  %v4790_v37 = vld [vmem:[#allocation9 + $0x258] sm:$0xff]  ;;  %v2545_v9 = vsub.s32 4, %v9735_v58 }
 0x356   :  { %7785 = vmatprep.subr.bf16.mxu1 %v7784_v32  ;;  %v4780_v32 = vld [vmem:[#allocation9 + $0x208] sm:$0xff]  ;;  %v4791_v61 = vld [vmem:[#allocation9 + $0x260] sm:$0xff]  ;;  %v4809_v63 = vld [vmem:[#allocation9 + $0x2f0] sm:$0xff] }
 0x357   :  { %v4794_v56 = vld [vmem:[#allocation9 + $0x278] sm:$0xff] }
 0x359   :  { %7787 = vmatpush3.bf16.msra.mxu1 %v7786_v26  ;;  %v7806_v26 = vpack.c.bf16 %v4780_v32, %v4779_v49  ;;  %v4808_v49 = vld [vmem:[#allocation9 + $0x2e8] sm:$0xff] }
 0x35a   :  { %7789 = vmatprep.subr.bf16.mxu1 %v7788_v54  ;;  %v7808_v54 = vpack.c.bf16 %v4798_v62, %v4797_v3  ;;  %v4792_v3 = vld [vmem:[#allocation9 + $0x268] sm:$0xff] }
 0x35b   :  { %v7830_v62 = vpack.c.bf16 %v4792_v3, %v4791_v61 }
 0x35d   :  { %7791 = vmatpush3.bf16.msra.mxu1 %v7790_v23  ;;  %v7812_v23 = vpack.c.bf16 %v4800_v14, %v4799_v53  ;;  %v2549_v53 = vsub.s32 5, %v9735_v58  ;;  %v2546_v14 = vrot.slane %v9738_v34, %v2545_v9  ;;  %v8411_v9 = vld [vmem:[#allocation11 + $0x20] ss:$16 sps:$4 sm:$0xff]  }
 0x35e   :  { %7793 = vmatprep.subr.bf16.mxu1 %v7792_v19  ;;  %v4783_v19 = vld [vmem:[#allocation9 + $0x220] sm:$0xff] }
 0x361   :  { %7795 = vmatpush3.bf16.msra.mxu1 %v7794_v46  ;;  %v7814_v46 = vpack.c.bf16 %v4784_v38, %v4783_v19 }
 0x362   :  { %7797 = vmatprep.subr.bf16.mxu1 %v7796_v44  ;;  %v4785_v44 = vld [vmem:[#allocation9 + $0x230] sm:$0xff] }
 0x363   :  { %v7818_v59 = vpack.c.bf16 %v4786_v24, %v4785_v44 }
 0x365   :  { %7799 = vmatpush3.bf16.msra.mxu1 %v7798_v30  ;;  %v4787_v30 = vld [vmem:[#allocation9 + $0x240] sm:$0xff] }
 0x366   :  { %7801 = vmatprep.subr.bf16.mxu1 %v7800_v28  ;;  %v4788_v28 = vld [vmem:[#allocation9 + $0x248] sm:$0xff] }
 0x367   :  { %v7822_v22 = vpack.c.bf16 %v4788_v28, %v4787_v30 }
 0x369   :  { %7803 = vmatpush3.bf16.msra.mxu1 %v7802_v31  ;;  %v7826_v31 = vpack.c.bf16 %v4790_v37, %v4789_v11 }
 0x36a   :  { %7805 = vmatprep.subr.bf16.mxu1 %v7804_v50  ;;  %v4807_v50 = vld [vmem:[#allocation9 + $0x2e0] sm:$0xff] }
 0x36b   :  { %v7828_v32 = vpack.c.bf16 %v4808_v49, %v4807_v50 }
 0x36c   :  { %4951 = vmatmul.mubr.f32.vlgmr.msra.gmra.mrb[8].mxu1 %v4705_v2  ;;  %v4810_v2 = vld [vmem:[#allocation9 + $0x2f8] sm:$0xff] }
 0x36d   :  { %4955 = vmatprep.mubr.f32.mxu1 %v4712_v45  ;;  %7807 = vmatpush3.bf16.msra.mxu1 %v7806_v26  ;;  %v7832_v26 = vpack.c.bf16 %v4810_v2, %v4809_v63  ;;  %v2550_v45 = vrot.slane %v9738_v34, %v2549_v53  ;;  %v8405_v63 = vld [vmem:[#allocation11] ss:$16 sps:$4 sm:$0xff]   ;;  %v8407_v2 = vld [vmem:[#allocation11 + $0x4] ss:$16 sps:$4 sm:$0xff]   ;;  %v8414_v53 = vld [vmem:[#allocation11 + $0x28] ss:$16 sps:$4 sm:$0xff]  }
 0x36e   :  { %7809 = vmatprep.subr.bf16.mxu1 %v7808_v54  ;;  %v4793_v54 = vld [vmem:[#allocation9 + $0x270] sm:$0xff] }
 0x36f   :  { %v7834_v18 = vpack.c.bf16 %v4794_v56, %v4793_v54  ;;  %v8410_v54 = vld [vmem:[#allocation11 + $0xc] ss:$16 sps:$4 sm:$0xff]   ;;  %v8413_v56 = vld [vmem:[#allocation11 + $0x24] ss:$16 sps:$4 sm:$0xff]  }
 0x370   :  { %4956 = vmatmul.mubr.f32.gmra.mrb[10].mxu1 %v4711_v55  ;;  %6716 = vmatprep.subr.bf16.mxu0 %v8410_v54 }
 0x371   :  { %7811 = vmatpush3.bf16.msra.mxu1 %v7810_v5 }
 0x372   :  { %7813 = vmatprep.subr.bf16.mxu1 %v7812_v23 }
 0x375   :  { %7815 = vmatpush3.bf16.msra.mxu1 %v7814_v46 }
 0x376   :  { %7817 = vmatprep.subr.bf16.mxu1 %v7816_v7 }
 0x379   :  { %7819 = vmatpush3.bf16.msra.mxu1 %v7818_v59 }
 0x37a   :  { %7821 = vmatprep.subr.bf16.mxu1 %v7820_v51 }
 0x37d   :  { %7823 = vmatpush3.bf16.msra.mxu1 %v7822_v22 }
 0x37e   :  { %7825 = vmatprep.subr.bf16.mxu1 %v7824_v36 }
 0x381   :  { %7827 = vmatpush3.bf16.msra.mxu1 %v7826_v31 }
 0x382   :  { %7829 = vmatprep.subr.bf16.mxu1 %v7828_v32 }
 0x385   :  { %7831 = vmatpush3.bf16.msra.mxu1 %v7830_v62  ;;  %v8882_v62 = vmov 0  }
 0x386   :  { %7833 = vmatprep.subr.bf16.mxu1 %v7832_v26  ;;  %7972 = vset.pattern.permute.xlu0 %v8882_v62  ;;  %v8408_v26 = vld [vmem:[#allocation11 + $0x8] ss:$16 sps:$4 sm:$0xff]   ;;  %v8459_v62 = vld [vmem:[#allocation11 + $0x120] ss:$16 sps:$4 sm:$0xff]  }
 0x387   :  { %6717 = vmatpush1.bf16.msra.mxu0 %v8408_v26 }
 0x389   :  { %7835 = vmatpush3.bf16.msra.mxu1 %v7834_v18  ;;  %v8416_v18 = vld [vmem:[#allocation11 + $0x2c] ss:$16 sps:$4 sm:$0xff]  }
 0x38a   :  { %6593 = vmatprep.subr.bf16.mxu1 %v8407_v2  ;;  %6718 = vmatprep.subr.bf16.mxu0 %v8416_v18 }
 0x38b   :  { %6719 = vmatpush1.bf16.msra.mxu0 %v8414_v53 }
 0x404   :  { %v4670_v5 = vpop.f32.mrb[4].mxu0 }
 0x405   :  { %v7908_v23 = vadd.f32 %v4670_v5, %v2546_v14  ;;  %v4672_v19 = vpop.f32.mrb[5].mxu0  ;;  %v8417_v5 = vld [vmem:[#allocation11 + $0x40] ss:$16 sps:$4 sm:$0xff]  }
 0x406   :  { %v7909_v38 = vadd.f32 %v4672_v19, %v2550_v45  ;;  %v4674_v55 = vpop.f32.mrb[6].mxu0  ;;  %v8425_v19 = vld [vmem:[#allocation11 + $0x64] ss:$16 sps:$4 sm:$0xff]  }
 0x407   :  { %v4695_v25 = vmul.f32 0.01, %v7908_v23  ;;  %v7910_v20 = vadd.f32 %v4674_v55, %v2546_v14  ;;  %v4676_v46 = vpop.f32.mrb[7].mxu0  ;;  %vm4683_vm15 = vcmp.gt.f32.partialorder %v7908_v23, 0.0  ;;  %v8419_v14 = vld [vmem:[#allocation11 + $0x44] ss:$16 sps:$4 sm:$0xff]  }
 0x408   :  { %v4696_v7 = vmul.f32 0.01, %v7909_v38  ;;  %v7911_v44 = vadd.f32 %v4676_v46, %v2550_v45  ;;  %vm4684_vm7 = vcmp.gt.f32.partialorder %v7909_v38, 0.0  ;;  %v8422_v45 = vld [vmem:[#allocation11 + $0x4c] ss:$16 sps:$4 sm:$0xff]  }
 0x409   :  { %v4707_v15 = vsel %vm4683_vm15, %v7908_v23, %v4695_v25  ;;  %v4701_v59 = vmul.f32 0.01, %v7910_v20  ;;  %vm4689_vm9 = vcmp.gt.f32.partialorder %v7910_v20, 0.0  ;;  %v8420_v23 = vld [vmem:[#allocation11 + $0x48] ss:$16 sps:$4 sm:$0xff]   ;;  %6720 = vmatprep.subr.bf16.mxu0 %v8422_v45 }
 0x40a   :  { %v4702_v24 = vmul.f32 0.01, %v7911_v44  ;;  %v4708_v41 = vsel %vm4684_vm7, %v7909_v38, %v4696_v7  ;;  %vm4690_vm8 = vcmp.gt.f32.partialorder %v7911_v44, 0.0  ;;  %v8428_v38 = vld [vmem:[#allocation11 + $0x6c] ss:$16 sps:$4 sm:$0xff]   ;;  %6721 = vmatpush1.bf16.msra.mxu0 %v8420_v23 }
 0x40b   :  { %5025 = vmatprep.mubr.f32.mxu1 %v4708_v41  ;;  %v4713_v51 = vsel %vm4689_vm9, %v7910_v20, %v4701_v59  ;;  %v8423_v55 = vld [vmem:[#allocation11 + $0x60] ss:$16 sps:$4 sm:$0xff]   ;;  %v8426_v25 = vld [vmem:[#allocation11 + $0x68] ss:$16 sps:$4 sm:$0xff]   ;;  %v8431_v20 = vld [vmem:[#allocation11 + $0x84] ss:$16 sps:$4 sm:$0xff]   ;;  %6722 = vmatprep.subr.bf16.mxu0 %v8428_v38 }
 0x40c   :  { %5026 = vmatmul.mubr.f32.vlgmr.msra.gmra.mrb[12].mxu1 %v4707_v15  ;;  %v4714_v34 = vsel %vm4690_vm8, %v7911_v44, %v4702_v24  ;;  %v8434_v46 = vld [vmem:[#allocation11 + $0x8c] ss:$16 sps:$4 sm:$0xff]   ;;  %v8429_v7 = vld [vmem:[#allocation11 + $0x80] ss:$16 sps:$4 sm:$0xff]   ;;  %v8432_v44 = vld [vmem:[#allocation11 + $0x88] ss:$16 sps:$4 sm:$0xff]  }
 0x40d   :  { %5030 = vmatprep.mubr.f32.mxu1 %v4714_v34  ;;  %6594 = vmatpush1.bf16.msra.mxu1 %v8405_v63  ;;  %v8437_v24 = vld [vmem:[#allocation11 + $0xa4] ss:$16 sps:$4 sm:$0xff]   ;;  %v8440_v41 = vld [vmem:[#allocation11 + $0xac] ss:$16 sps:$4 sm:$0xff]   ;;  %v8435_v15 = vld [vmem:[#allocation11 + $0xa0] ss:$16 sps:$4 sm:$0xff]  }
 0x40e   :  { %6595 = vmatprep.subr.bf16.mxu1 %v8413_v56  ;;  %6723 = vmatpush1.bf16.msra.mxu0 %v8426_v25  ;;  %v8438_v59 = vld [vmem:[#allocation11 + $0xa8] ss:$16 sps:$4 sm:$0xff]   ;;  %v8443_v34 = vld [vmem:[#allocation11 + $0xc4] ss:$16 sps:$4 sm:$0xff]   ;;  %v5037_v56 = vstv %s10020_s4 }
 0x40f   :  { %6724 = vmatprep.subr.bf16.mxu0 %v8434_v46  ;;  %v8462_v63 = vld [vmem:[#allocation11 + $0x128] ss:$16 sps:$4 sm:$0xff]  }
 0x410   :  { %5031 = vmatmul.mubr.f32.gmra.mrb[14].mxu1 %v4713_v51  ;;  %v8446_v51 = vld [vmem:[#allocation11 + $0xcc] ss:$16 sps:$4 sm:$0xff]  }
 0x411   :  { %6596 = vmatpush1.bf16.msra.mxu1 %v8411_v9 }
 0x412   :  { %6597 = vmatprep.subr.bf16.mxu1 %v8419_v14  ;;  %6725 = vmatpush1.bf16.msra.mxu0 %v8432_v44 }
 0x413   :  { %6726 = vmatprep.subr.bf16.mxu0 %v8440_v41 }
 0x415   :  { %6598 = vmatpush1.bf16.msra.mxu1 %v8417_v5 }
 0x416   :  { %6599 = vmatprep.subr.bf16.mxu1 %v8425_v19  ;;  %6727 = vmatpush1.bf16.msra.mxu0 %v8438_v59 }
 0x417   :  { %6728 = vmatprep.subr.bf16.mxu0 %v8446_v51 }
 0x419   :  { %6600 = vmatpush1.bf16.msra.mxu1 %v8423_v55 }
 0x41a   :  { %6601 = vmatprep.subr.bf16.mxu1 %v8431_v20 }
 0x41d   :  { %6602 = vmatpush1.bf16.msra.mxu1 %v8429_v7 }
 0x41e   :  { %6603 = vmatprep.subr.bf16.mxu1 %v8437_v24 }
 0x41f   :  { %v7588_v30 = vpop.f32.mrb[4].mxu1 }
 0x420   :  { %v7589_v28 = vpop.f32.mrb[5].mxu1 }
 0x421   :  { %v7590_v21 = vadd.f32 %v7589_v28, %v7588_v30  ;;  %6604 = vmatpush1.bf16.msra.mxu1 %v8435_v15  ;;  %v8441_v30 = vld [vmem:[#allocation11 + $0xc0] ss:$16 sps:$4 sm:$0xff]   ;;  %v8444_v28 = vld [vmem:[#allocation11 + $0xc8] ss:$16 sps:$4 sm:$0xff]  }
 0x422   :  { %6605 = vmatprep.subr.bf16.mxu1 %v8443_v34  ;;  %6729 = vmatpush1.bf16.msra.mxu0 %v8444_v28 }
 0x423   :  { %v7591_v0 = vpop.f32.mrb[6].mxu1 }
 0x424   :  { %v7592_v22 = vpop.f32.mrb[7].mxu1 }
 0x425   :  { %v7593_v36 = vadd.f32 %v7592_v22, %v7591_v0  ;;  %v8452_v0 = vld [vmem:[#allocation11 + $0xec] ss:$16 sps:$4 sm:$0xff]   ;;  %6606 = vmatpush1.bf16.msra.mxu1 %v8441_v30  ;;  %v8447_v22 = vld [vmem:[#allocation11 + $0xe0] ss:$16 sps:$4 sm:$0xff]  }
 0x426   :  { %6730 = vmatprep.subr.bf16.mxu0 %v8452_v0 }
 0x43f   :  { %v7626_v11 = vpop.f32.mrb[8].mxu1 }
 0x440   :  { %v7627_v37 = vpop.f32.mrb[9].mxu1 }
 0x441   :  { %v7628_v31 = vadd.f32 %v7627_v37, %v7626_v11  ;;  %v8455_v11 = vld [vmem:[#allocation11 + $0x104] ss:$16 sps:$4 sm:$0xff]   ;;  %v8458_v37 = vld [vmem:[#allocation11 + $0x10c] ss:$16 sps:$4 sm:$0xff]  }
 0x443   :  { %v9772_v50 = vadd.f32 %v7628_v31, %v7590_v21  ;;  %v7629_v49 = vpop.f32.mrb[10].mxu1  ;;  %v8449_v21 = vld [vmem:[#allocation11 + $0xe4] ss:$16 sps:$4 sm:$0xff]   ;;  %v8453_v31 = vld [vmem:[#allocation11 + $0x100] ss:$16 sps:$4 sm:$0xff]  }
 0x444   :  { %v7630_v32 = vpop.f32.mrb[11].mxu1  ;;  %6607 = vmatprep.subr.bf16.mxu1 %v8449_v21 }
 0x445   :  { %v7631_v61 = vadd.f32 %v7630_v32, %v7629_v49  ;;  %6608 = vmatpush1.bf16.msra.mxu1 %v8447_v22  ;;  %v8456_v49 = vld [vmem:[#allocation11 + $0x108] ss:$16 sps:$4 sm:$0xff]   ;;  %v8461_v32 = vld [vmem:[#allocation11 + $0x124] ss:$16 sps:$4 sm:$0xff]  }
 0x446   :  { %6609 = vmatprep.subr.bf16.mxu1 %v8455_v11 }
 0x447   :  { %v9774_v3 = vadd.f32 %v7631_v61, %v7593_v36  ;;  %v8450_v36 = vld [vmem:[#allocation11 + $0xe8] ss:$16 sps:$4 sm:$0xff]   ;;  %v8464_v61 = vld [vmem:[#allocation11 + $0x12c] ss:$16 sps:$4 sm:$0xff]  }
 0x448   :  { %6731 = vmatpush1.bf16.msra.mxu0 %v8450_v36 }
 0x449   :  { %6732 = vmatprep.subr.bf16.mxu0 %v8458_v37  ;;  %6610 = vmatpush1.bf16.msra.mxu1 %v8453_v31 }
 0x44a   :  { %6611 = vmatprep.subr.bf16.mxu1 %v8461_v32 }
 0x44c   :  { %6733 = vmatpush1.bf16.msra.mxu0 %v8456_v49 }
 0x44d   :  { %6734 = vmatprep.subr.bf16.mxu0 %v8464_v61  ;;  %6612 = vmatpush1.bf16.msra.mxu1 %v8459_v62 }
 0x450   :  { %6735 = vmatpush1.bf16.msra.mxu0 %v8462_v63 }
 0x4df   :  { %v7664_v2 = vpop.f32.mrb[12].mxu1 }
 0x4e0   :  { %v7665_v26 = vpop.f32.mrb[13].mxu1 }
 0x4e1   :  { %v7666_v54 = vadd.f32 %v7665_v26, %v7664_v2 }
 0x4e3   :  { %v5028_v18 = vadd.f32 %v7666_v54, %v9772_v50  ;;  %v7667_v9 = vpop.f32.mrb[14].mxu1 }
 0x4e4   :  { %v7668_v53 = vpop.f32.mrb[15].mxu1 }
 0x4e5   :  { %v5038_v14 = vadd.f32 %v5037_v56, %v5028_v18  ;;  %v7669_v45 = vadd.f32 %v7668_v53, %v7667_v9  ;;  %v8467_v53 = vld [vmem:[#allocation11 + $0x144] ss:$16 sps:$4 sm:$0xff]  }
 0x4e6   :  { %6613 = vmatprep.subr.bf16.mxu1 %v8467_v53  ;;  %v10195_v53 = vld [vmem:[#allocation42_spill] sm:$0xff] }
 0x4e7   :  { %v5041_v5 = vsel %vm5040_vm10, %v5038_v14, -inf  ;;  %v5033_v23 = vadd.f32 %v7669_v45, %v9774_v3 }
 0x4e8   :  { %v5042_v19 = vrot.slane %v5041_v5, 4 }
 0x4e9   :  { %v5039_v38 = vadd.f32 %v5037_v56, %v5033_v23  ;;  %v8468_v23 = vld [vmem:[#allocation11 + $0x148] ss:$16 sps:$4 sm:$0xff]  }
 0x4ea   :  { %v5043_v55 = vmax.f32 %v5041_v5, %v5042_v19  ;;  %v8465_v5 = vld [vmem:[#allocation11 + $0x140] ss:$16 sps:$4 sm:$0xff]  }
 0x4eb   :  { %v5048_v25 = vsel %vm5040_vm10, %v5039_v38, -inf  ;;  %6614 = vmatpush1.bf16.msra.mxu1 %v8465_v5  ;;  %v10197_v5 = vld [vmem:[#allocation28_spill] sm:$0xff] }
 0x4ec   :  { %v5044_v20 = vrot.slane %v5043_v55, 2  ;;  %v5049_v46 = vrot.slane %v5048_v25, 4 }
 0x4ee   :  { %v5045_v7 = vmax.f32 %v5043_v55, %v5044_v20  ;;  %v5050_v44 = vmax.f32 %v5048_v25, %v5049_v46  ;;  %v8476_v55 = vld [vmem:[#allocation11 + $0x16c] ss:$16 sps:$4 sm:$0xff]   ;;  %v8471_v25 = vld [vmem:[#allocation11 + $0x160] ss:$16 sps:$4 sm:$0xff]   ;;  %v8474_v20 = vld [vmem:[#allocation11 + $0x168] ss:$16 sps:$4 sm:$0xff]  }
 0x4ef   :  { %v8479_v46 = vld [vmem:[#allocation11 + $0x184] ss:$16 sps:$4 sm:$0xff]  }
 0x4f0   :  { %v5046_v24 = vrot.slane %v5045_v7, 1  ;;  %v5051_v50 = vrot.slane %v5050_v44, 2 }
 0x4f2   :  { %v5047_v41 = vmax.f32 %v5045_v7, %v5046_v24  ;;  %v5052_v15 = vmax.f32 %v5050_v44, %v5051_v50  ;;  %v8482_v7 = vld [vmem:[#allocation11 + $0x18c] ss:$16 sps:$4 sm:$0xff]   ;;  %v8477_v44 = vld [vmem:[#allocation11 + $0x180] ss:$16 sps:$4 sm:$0xff]   ;;  %v8480_v24 = vld [vmem:[#allocation11 + $0x188] ss:$16 sps:$4 sm:$0xff]  }
 0x4f3   :  { %v8485_v50 = vld [vmem:[#allocation11 + $0x1a4] ss:$16 sps:$4 sm:$0xff]  }
 0x4f4   :  { %v5055_v59 = vsub.f32 %v5038_v14, %v5047_v41  ;;  %v5053_v34 = vrot.slane %v5052_v15, 1  ;;  %v8470_v14 = vld [vmem:[#allocation11 + $0x14c] ss:$16 sps:$4 sm:$0xff]  }
 0x4f5   :  { %6736 = vmatprep.subr.bf16.mxu0 %v8470_v14  ;;  %v8488_v41 = vld [vmem:[#allocation11 + $0x1ac] ss:$16 sps:$4 sm:$0xff]  }
 0x4f6   :  { %v5057_v51 = vmul.f32 1.442695, %v5055_v59  ;;  %v5054_v30 = vmax.f32 %v5052_v15, %v5053_v34  ;;  %6737 = vmatpush1.bf16.msra.mxu0 %v8468_v23  ;;  %v8483_v15 = vld [vmem:[#allocation11 + $0x1a0] ss:$16 sps:$4 sm:$0xff]   ;;  %v8486_v59 = vld [vmem:[#allocation11 + $0x1a8] ss:$16 sps:$4 sm:$0xff]  }
 0x4f7   :  { %6738 = vmatprep.subr.bf16.mxu0 %v8476_v55  ;;  %v8491_v34 = vld [vmem:[#allocation11 + $0x1c4] ss:$16 sps:$4 sm:$0xff]  }
 0x4f8   :  { %8693 = vpow2.f32 %v5057_v51  ;;  %v5056_v28 = vsub.f32 %v5039_v38, %v5054_v30  ;;  %v8473_v38 = vld [vmem:[#allocation11 + $0x164] ss:$16 sps:$4 sm:$0xff]   ;;  %v8494_v51 = vld [vmem:[#allocation11 + $0x1cc] ss:$16 sps:$4 sm:$0xff]   ;;  %v8489_v30 = vld [vmem:[#allocation11 + $0x1c0] ss:$16 sps:$4 sm:$0xff]  }
 0x4f9   :  { %6615 = vmatprep.subr.bf16.mxu1 %v8473_v38  ;;  %v10199_v55 = vld [vmem:[#allocation21_spill] sm:$0xff] }
 0x4fa   :  { %v5059_v3 = vmul.f32 1.442695, %v5056_v28  ;;  %6616 = vmatpush1.bf16.msra.mxu1 %v8471_v25  ;;  %6739 = vmatpush1.bf16.msra.mxu0 %v8474_v20  ;;  %v8492_v28 = vld [vmem:[#allocation11 + $0x1c8] ss:$16 sps:$4 sm:$0xff]  }
 0x4fb   :  { %6617 = vmatprep.subr.bf16.mxu1 %v8479_v46  ;;  %6740 = vmatprep.subr.bf16.mxu0 %v8482_v7  ;;  %v10200_v20 = vld [vmem:[#allocation67_spill] sm:$0xff] }
 0x4fc   :  { %8695 = vpow2.f32 %v5059_v3  ;;  %v8495_v3 = vld [vmem:[#allocation11 + $0x1e0] ss:$16 sps:$4 sm:$0xff]  }
 0x4fe   :  { %6618 = vmatpush1.bf16.msra.mxu1 %v8477_v44  ;;  %6741 = vmatpush1.bf16.msra.mxu0 %v8480_v24  ;;  %v10202_v44 = vld [vmem:[#allocation83_spill] sm:$0xff] }
 0x4ff   :  { %6619 = vmatprep.subr.bf16.mxu1 %v8485_v50  ;;  %6742 = vmatprep.subr.bf16.mxu0 %v8488_v41  ;;  %v10203_v50 = vld [vmem:[#allocation73_spill] sm:$0xff]  ;;  %v10204_v41 = vld [vmem:[#allocation74_spill] sm:$0xff] }
 0x502   :  { %v8694_v21 = vpop.eup %8693  ;;  %6620 = vmatpush1.bf16.msra.mxu1 %v8483_v15  ;;  %6743 = vmatpush1.bf16.msra.mxu0 %v8486_v59  ;;  %v5241_v15 = vsel %vm2749_vm0, %v10204_v41, %v10203_v50  ;;  %v10205_v59 = vld [vmem:[#allocation57_spill] sm:$0xff] }
 0x503   :  { %v5061_v0 = vsel %vm5040_vm10, %v8694_v21, 0.0  ;;  %6621 = vmatprep.subr.bf16.mxu1 %v8491_v34  ;;  %6744 = vmatprep.subr.bf16.mxu0 %v8494_v51  ;;  %v10206_v34 = vld [vmem:[#allocation58_spill] sm:$0xff]  ;;  %v10228_v41 = vld [vmem:[#allocation45_spill] sm:$0xff] }
 0x504   :  { %v5062_v22 = vrot.slane %v5061_v0, 4  ;;  %v5248_v51 = vsel %vm2749_vm0, %v10206_v34, %v10205_v59  ;;  %v10229_v59 = vld [vmem:[#allocation31_spill] sm:$0xff] }
 0x506   :  { %v8696_v36 = vpop.eup %8695  ;;  %v5063_v11 = vadd.f32 %v5062_v22, %v5061_v0  ;;  %6622 = vmatpush1.bf16.msra.mxu1 %v8489_v30  ;;  %6745 = vmatpush1.bf16.msra.mxu0 %v8492_v28  ;;  %v8498_v0 = vld [vmem:[#allocation11 + $0x1e8] ss:$16 sps:$4 sm:$0xff]   ;;  %v8500_v22 = vld [vmem:[#allocation11 + $0x1ec] ss:$16 sps:$4 sm:$0xff]  }
 0x507   :  { %v5068_v37 = vsel %vm5040_vm10, %v8696_v36, 0.0  ;;  %6746 = vmatprep.subr.bf16.mxu0 %v8500_v22  ;;  %v10207_v30 = vld [vmem:[#allocation43_spill] sm:$0xff]  ;;  %v10210_v22 = vld [vmem:[#allocation90_spill] sm:$0xff] }
 0x508   :  { %v5069_v31 = vrot.slane %v5068_v37, 4  ;;  %v5064_v49 = vrot.slane %v5063_v11, 2 }
 0x50a   :  { %v5065_v32 = vadd.f32 %v5064_v49, %v5063_v11  ;;  %v5070_v61 = vadd.f32 %v5069_v31, %v5068_v37  ;;  %6747 = vmatpush1.bf16.msra.mxu0 %v8498_v0  ;;  %v8506_v11 = vld [vmem:[#allocation11 + $0x20c] ss:$16 sps:$4 sm:$0xff]   ;;  %v5185_v37 = vsel %vm2749_vm0, %v9149_v6, %v9147_v1  ;;  %v10186_v31 = vld [vmem:[#allocation19_spill] sm:$0xff]  ;;  %v10194_v6 = vld [vmem:[#allocation41_spill] sm:$0xff] }
 0x50b   :  { %6757 = vmatprep.subr.bf16.mxu0 %v8506_v11  ;;  %v10187_v49 = vld [vmem:[#allocation20_spill] sm:$0xff]  ;;  %v5227_v14 = vsel %vm2749_vm0, %v10195_v53, %v10194_v6  ;;  %v10209_v0 = vld [vmem:[#allocation89_spill] sm:$0xff]  ;;  %v10219_v6 = vld [vmem:[#allocation30_spill] sm:$0xff] }
 0x50c   :  { %v5066_v62 = vrot.slane %v5065_v32, 1  ;;  %v5071_v63 = vrot.slane %v5070_v61, 2  ;;  %v5228_v28 = vsel %vm2751_vm1, %v10207_v30, %v5227_v14  ;;  %v10211_v11 = vld [vmem:[#allocation36_spill] sm:$0xff] }
 0x50d   :  { %v10230_v30 = vld [vmem:[#allocation92_spill] sm:$0xff] }
 0x50e   :  { %v5067_v2 = vadd.f32 %v5066_v62, %v5065_v32  ;;  %v5072_v26 = vadd.f32 %v5071_v63, %v5070_v61  ;;  %v5192_v32 = vsel %vm2749_vm0, %v10187_v49, %v10186_v31  ;;  %v10188_v61 = vld [vmem:[#allocation65_spill] sm:$0xff]  ;;  %v10189_v62 = vld [vmem:[#allocation66_spill] sm:$0xff] }
 0x50f   :  { %v5199_v63 = vsel %vm2749_vm0, %v10189_v62, %v10188_v61  ;;  %v5193_v25 = vsel %vm2751_vm1, %v10199_v55, %v5192_v32  ;;  %v10212_v31 = vld [vmem:[#allocation22_spill] sm:$0xff]  ;;  %v10213_v32 = vld [vmem:[#allocation68_spill] sm:$0xff]  ;;  %v10223_v55 = vld [vmem:[#allocation69_spill] sm:$0xff] }
 0x510   :  { %8697 = vrcp.f32 %v5067_v2  ;;  %v5073_v54 = vrot.slane %v5072_v26, 1  ;;  %v10190_v2 = vld [vmem:[#allocation49_spill] sm:$0xff]  ;;  %v5194_v49 = vsel %vm2753_vm2, %v10212_v31, %v5193_v25  ;;  %v10214_v62 = vld [vmem:[#allocation52_spill] sm:$0xff]  ;;  %v10235_v31 = vld [vmem:[#allocation86_spill] sm:$0xff] }
 0x512   :  { %v5074_v56 = vadd.f32 %v5073_v54, %v5072_v26  ;;  %v10191_v26 = vld [vmem:[#allocation50_spill] sm:$0xff] }
 0x513   :  { %v5206_v54 = vsel %vm2749_vm0, %v10191_v26, %v10190_v2  ;;  %v10216_v26 = vld [vmem:[#allocation75_spill] sm:$0xff] }
 0x514   :  { %8699 = vrcp.f32 %v5074_v56  ;;  %v5213_v56 = vsel %vm2749_vm0, %v9617_v47, %v9614_v10  ;;  %v5200_v10 = vsel %vm2751_vm1, %v10200_v20, %v5199_v63  ;;  %v10201_v47 = vld [vmem:[#allocation51_spill] sm:$0xff]  ;;  %v10224_v20 = vld [vmem:[#allocation53_spill] sm:$0xff] }
 0x515   :  { %v5207_v46 = vsel %vm2751_vm1, %v10201_v47, %v5206_v54  ;;  %v5214_v7 = vsel %vm2751_vm1, %v9624_v27, %v5213_v56  ;;  %v5255_v27 = vsel %vm2749_vm0, %v9665_v48, %v9663_v43  ;;  %v5201_v61 = vsel %vm2753_vm2, %v10213_v32, %v5200_v10  ;;  %v10215_v43 = vld [vmem:[#allocation84_spill] sm:$0xff]  ;;  %v10217_v56 = vld [vmem:[#allocation59_spill] sm:$0xff] }
 0x516   :  { %v5208_v63 = vsel %vm2753_vm2, %v10214_v62, %v5207_v46  ;;  %v5215_v2 = vsel %vm2753_vm2, %v9626_v52, %v5214_v7  ;;  %v5242_v54 = vsel %vm2751_vm1, %v10216_v26, %v5241_v15  ;;  %v5256_v14 = vsel %vm2751_vm1, %v9667_v13, %v5255_v27  ;;  %v10225_v46 = vld [vmem:[#allocation85_spill] sm:$0xff]  ;;  %v10226_v7 = vld [vmem:[#allocation76_spill] sm:$0xff] }
 0x517   :  { %v5202_v25 = vsel %vm2755_vm3, %v10223_v55, %v5201_v61  ;;  %v5209_v10 = vsel %vm2755_vm3, %v10224_v20, %v5208_v63  ;;  %v5216_v47 = vsel %vm2755_vm3, %v9637_v57, %v5215_v2  ;;  %v10237_v61 = vld [vmem:[#allocation61_spill] sm:$0xff]  ;;  %v10238_v63 = vld [vmem:[#allocation46_spill] sm:$0xff] }
 0x51a   :  { %v8698_v18 = vpop.eup %8697 }
 0x51b   :  { %v5077_v9 = vmul.f32 %v8698_v18, %v8694_v21  ;;  %v8497_v21 = vld [vmem:[#allocation11 + $0x1e4] ss:$16 sps:$4 sm:$0xff]  }
 0x51c   :  { %6623 = vmatprep.subr.bf16.mxu1 %v8497_v21  ;;  %v10192_v18 = vld [vmem:[#allocation81_spill] sm:$0xff] }
 0x51d   :  { %5081 = vperm.xlu0 %7972, %v5077_v9   ;;  %6624 = vmatpush1.bf16.msra.mxu1 %v8495_v3  ;;  %v10193_v9 = vld [vmem:[#allocation82_spill] sm:$0xff]  ;;  %v10208_v3 = vld [vmem:[#allocation29_spill] sm:$0xff] }
 0x51e   :  { %v8700_v45 = vpop.eup %8699  ;;  %v5220_v1 = vsel %vm2749_vm0, %v10193_v9, %v10192_v18  ;;  %v5249_v18 = vsel %vm2751_vm1, %v10217_v56, %v5248_v51  ;;  %v10218_v9 = vld [vmem:[#allocation44_spill] sm:$0xff]  ;;  %v5257_v51 = vsel %vm2753_vm2, %v9669_v40, %v5256_v14  ;;  %v10241_v56 = vld [vmem:[#allocation39_spill] sm:$0xff] }
 0x51f   :  { %v5078_v19 = vmul.f32 %v8700_v45, %v8696_v36  ;;  %v8503_v36 = vld [vmem:[#allocation11 + $0x204] ss:$16 sps:$4 sm:$0xff]   ;;  %v5221_v24 = vsel %vm2751_vm1, %v10202_v44, %v5220_v1  ;;  %v5229_v1 = vsel %vm2753_vm2, %v10218_v9, %v5228_v28  ;;  %v5243_v44 = vsel %vm2753_vm2, %v10226_v7, %v5242_v54  ;;  %v10231_v28 = vld [vmem:[#allocation38_spill] sm:$0xff]  ;;  %v10251_v7 = vld [vmem:[#allocation40_spill] sm:$0xff] }
 0x520   :  { %6634 = vmatprep.subr.bf16.mxu1 %v8503_v36  ;;  %v10196_v45 = vld [vmem:[#allocation27_spill] sm:$0xff]  ;;  %v5262_v36 = vsel %vm2749_vm0, %v10210_v22, %v10209_v0  ;;  %v5222_v48 = vsel %vm2753_vm2, %v10215_v43, %v5221_v24  ;;  %v10227_v24 = vld [vmem:[#allocation60_spill] sm:$0xff]  ;;  %v5230_v15 = vsel %vm2755_vm3, %v10228_v41, %v5229_v1  ;;  %v10233_v0 = vld [vmem:[#allocation70_spill] sm:$0xff]  ;;  %v5258_v26 = vsel %vm2755_vm3, %v9673_v12, %v5257_v51 }
 0x521   :  { %5086 = vperm.xlu0 %7972, %v5078_v19   ;;  %v5234_v23 = vsel %vm2749_vm0, %v10197_v5, %v10196_v45  ;;  %v10198_v19 = vld [vmem:[#allocation35_spill] sm:$0xff]  ;;  %v10221_v5 = vld [vmem:[#allocation37_spill] sm:$0xff]  ;;  %v5223_v13 = vsel %vm2755_vm3, %v10225_v46, %v5222_v48  ;;  %v5250_v50 = vsel %vm2753_vm2, %v10227_v24, %v5249_v18  ;;  %v5203_v22 = vsel %vm2757_vm4, %v10233_v0, %v5202_v25  ;;  %v10239_v43 = vld [vmem:[#allocation32_spill] sm:$0xff] }
 0x522   :  { %v5186_v38 = vsel %vm2751_vm1, %v10198_v19, %v5185_v37  ;;  %v5235_v21 = vsel %vm2751_vm1, %v10208_v3, %v5234_v23  ;;  %v10220_v45 = vld [vmem:[#allocation91_spill] sm:$0xff]  ;;  %v5224_v40 = vsel %vm2757_vm4, %v10235_v31, %v5223_v13  ;;  %v5251_v62 = vsel %vm2755_vm3, %v10237_v61, %v5250_v50  ;;  %v10240_v54 = vld [vmem:[#allocation93_spill] sm:$0xff]  ;;  %v10250_v13 = vld [vmem:[#allocation94_spill] sm:$0xff] }
 0x523   :  { %v5187_v37 = vsel %vm2753_vm2, %v10211_v11, %v5186_v38  ;;  %v5236_v53 = vsel %vm2753_vm2, %v10219_v6, %v5235_v21  ;;  %v5263_v52 = vsel %vm2751_vm1, %v10220_v45, %v5262_v36  ;;  %v10222_v19 = vld [vmem:[#allocation23_spill] sm:$0xff]  ;;  %v10232_v21 = vld [vmem:[#allocation24_spill] sm:$0xff]  ;;  %v10234_v36 = vld [vmem:[#allocation54_spill] sm:$0xff]  ;;  %v5231_v2 = vsel %vm2757_vm4, %v10238_v63, %v5230_v15 }
 0x524   :  { %v5188_v23 = vsel %vm2755_vm3, %v10221_v5, %v5187_v37  ;;  %v5195_v38 = vsel %vm2755_vm3, %v10222_v19, %v5194_v49  ;;  %v5237_v34 = vsel %vm2755_vm3, %v10229_v59, %v5236_v53  ;;  %v5264_v57 = vsel %vm2753_vm2, %v10230_v30, %v5263_v52  ;;  %v10236_v49 = vld [vmem:[#allocation77_spill] sm:$0xff]  ;;  %v10243_v6 = vld [vmem:[#allocation71_spill] sm:$0xff]  ;;  %v10252_v24 = vld [vmem:[#allocation26_spill] sm:$0xff] }
 0x525   :  { %v5189_v3 = vsel %vm2757_vm4, %v10231_v28, %v5188_v23  ;;  %v5196_v27 = vsel %vm2757_vm4, %v10232_v21, %v5195_v38  ;;  %v5210_v11 = vsel %vm2757_vm4, %v10234_v36, %v5209_v10  ;;  %v5217_v37 = vsel %vm2757_vm4, %v9652_v33, %v5216_v47  ;;  %v10242_v9 = vld [vmem:[#allocation25_spill] sm:$0xff]  ;;  %v10244_v14 = vld [vmem:[#allocation55_spill] sm:$0xff]  ;;  %v10246_v23 = vld [vmem:[#allocation78_spill] sm:$0xff] }
 0x526   :  { %v5244_v32 = vsel %vm2755_vm3, %v10236_v49, %v5243_v44  ;;  %v5238_v48 = vsel %vm2757_vm4, %v10239_v43, %v5237_v34  ;;  %v5265_v33 = vsel %vm2755_vm3, %v10240_v54, %v5264_v57  ;;  %v5190_v18 = vsel %vm2759_vm5, %v10241_v56, %v5189_v3  ;;  %v10245_v5 = vld [vmem:[#allocation87_spill] sm:$0xff]  ;;  %v10247_v38 = vld [vmem:[#allocation62_spill] sm:$0xff]  ;;  %v10249_v10 = vld [vmem:[#allocation33_spill] sm:$0xff] }
 0x527   :  { %v5197_v1 = vsel %vm2759_vm5, %v10242_v9, %v5196_v27  ;;  %v5204_v53 = vsel %vm2759_vm5, %v10243_v6, %v5203_v22  ;;  %v5211_v45 = vsel %vm2759_vm5, %v10244_v14, %v5210_v11  ;;  %v5218_v52 = vsel %vm2759_vm5, %v9658_v4, %v5217_v37  ;;  %v10248_v25 = vld [vmem:[#allocation47_spill] sm:$0xff]  ;;  %v10253_v41 = vld [vmem:[#allocation72_spill] sm:$0xff]  ;;  %v10259_v36 = vld [vmem:[#allocation34_spill] sm:$0xff] }
 0x528   :  { %v5225_v12 = vsel %vm2759_vm5, %v10245_v5, %v5224_v40  ;;  %v5245_v19 = vsel %vm2757_vm4, %v10246_v23, %v5244_v32  ;;  %v5252_v55 = vsel %vm2757_vm4, %v10247_v38, %v5251_v62  ;;  %v5232_v20 = vsel %vm2759_vm5, %v10248_v25, %v5231_v2  ;;  %v10254_v59 = vld [vmem:[#allocation56_spill] sm:$0xff]  ;;  %v10256_v57 = vld [vmem:[#allocation79_spill] sm:$0xff] }
 0x529   :  { %v5239_v47 = vsel %vm2759_vm5, %v10249_v10, %v5238_v48  ;;  %v5259_v46 = vsel %vm2757_vm4, %v9679_v42, %v5258_v26  ;;  %v5266_v4 = vsel %vm2757_vm4, %v10250_v13, %v5265_v33  ;;  %v5191_v44 = vsel %vm2761_vm6, %v10251_v7, %v5190_v18  ;;  %v10255_v30 = vld [vmem:[#allocation88_spill] sm:$0xff]  ;;  %v10257_v3 = vld [vmem:[#allocation63_spill] sm:$0xff] }
 0x52a   :  { %v5198_v50 = vsel %vm2761_vm6, %v10252_v24, %v5197_v1  ;;  %v5205_v15 = vsel %vm2761_vm6, %v10253_v41, %v5204_v53  ;;  %v5212_v34 = vsel %vm2761_vm6, %v10254_v59, %v5211_v45  ;;  %v5219_v51 = vsel %vm2761_vm6, %v9661_v17, %v5218_v52  ;;  %v10258_v0 = vld [vmem:[#allocation48_spill] sm:$0xff]  ;;  %v10260_v17 = vld [vmem:[#allocation95_spill] sm:$0xff] }
 0x52b   :  { %v5226_v42 = vsel %vm2761_vm6, %v10255_v30, %v5225_v12  ;;  %v5246_v28 = vsel %vm2759_vm5, %v10256_v57, %v5245_v19  ;;  %v5253_v21 = vsel %vm2759_vm5, %v10257_v3, %v5252_v55  ;;  %v5233_v22 = vsel %vm2761_vm6, %v10258_v0, %v5232_v20  ;;  %v10261_v2 = vld [vmem:[#allocation80_spill] sm:$0xff] }
 0x52c   :  { %v5240_v11 = vsel %vm2761_vm6, %v10259_v36, %v5239_v47  ;;  %v5260_v37 = vsel %vm2759_vm5, %v9685_v35, %v5259_v46  ;;  %v5267_v31 = vsel %vm2759_vm5, %v10260_v17, %v5266_v4  ;;  %v5247_v43 = vsel %vm2761_vm6, %v10261_v2, %v5246_v28  ;;  %v10262_v48 = vld [vmem:[#allocation64_spill] sm:$0xff] }
 0x52d   :  { %v5254_v26 = vsel %vm2761_vm6, %v10262_v48, %v5253_v21  ;;  %v5261_v35 = vsel %vm2761_vm6, %v9693_v60, %v5260_v37  ;;  %v10263_v56 = vld [vmem:[#allocation96_spill] sm:$0xff]  ;;  %vm7066_vm4 = vcmask 1024  }
 0x52e   :  { %v5268_v18 = vsel %vm2761_vm6, %v10263_v56, %v5267_v31 }
 0x59c   :  { %v5082_v27 = vpop.permute.xlu0 %5081 }
 0x59d   :  { %v5281_v40 = vmul.f32 %v5191_v44, %v5082_v27  ;;  %v5282_v49 = vmul.f32 %v5198_v50, %v5082_v27  ;;  %v5283_v32 = vmul.f32 %v5205_v15, %v5082_v27  ;;  %v5284_v61 = vmul.f32 %v5212_v34, %v5082_v27 }
 0x59e   :  { %v5285_v62 = vmul.f32 %v5219_v51, %v5082_v27  ;;  %v9957_v63 = vmul.f32 %v5226_v42, %v5082_v27 }
 0x59f   :  { %v5293_v54 = vrot.slane %v5281_v40, 4  ;;  %v5305_v33 = vrot.slane %v5283_v32, 4  ;;  %v5299_v9 = vrot.slane %v5282_v49, 4  ;;  %v5311_v1 = vrot.slane %v5284_v61, 4 }
 0x5a0   :  { %v5317_v6 = vrot.slane %v5285_v62, 4  ;;  %v5323_v53 = vrot.slane %v9957_v63, 4  ;;  %v5087_v14 = vpop.permute.xlu0 %5086 }
 0x5a1   :  { %v5294_v45 = vadd.f32 %v5293_v54, %v5281_v40  ;;  %v5306_v52 = vadd.f32 %v5305_v33, %v5283_v32  ;;  %v5287_v5 = vmul.f32 %v5233_v22, %v5087_v14  ;;  %v5288_v12 = vmul.f32 %v5240_v11, %v5087_v14 }
 0x5a2   :  { %v9968_v23 = vadd.f32 %v5317_v6, %v5285_v62  ;;  %v5289_v19 = vmul.f32 %v5247_v43, %v5087_v14  ;;  %v5290_v38 = vmul.f32 %v5254_v26, %v5087_v14  ;;  %v5291_v55 = vmul.f32 %v5261_v35, %v5087_v14 }
 0x5a3   :  { %v5295_v25 = vrot.slane %v5294_v45, 2  ;;  %v5307_v60 = vrot.slane %v5306_v52, 2  ;;  %v5292_v20 = vmul.f32 %v5268_v18, %v5087_v14  ;;  %v5329_v10 = vrot.slane %v5287_v5, 4 }
 0x5a4   :  { %v5319_v47 = vrot.slane %v9968_v23, 2  ;;  %v5335_v46 = vrot.slane %v5288_v12, 4  ;;  %v5341_v13 = vrot.slane %v5289_v19, 4  ;;  %v5347_v4 = vrot.slane %v5290_v38, 4 }
 0x5a5   :  { %v5296_v7 = vadd.f32 %v5295_v25, %v5294_v45  ;;  %v5330_v44 = vadd.f32 %v5329_v10, %v5287_v5  ;;  %v5353_v24 = vrot.slane %v5291_v55, 4  ;;  %v5359_v50 = vrot.slane %v5292_v20, 4 }
 0x5a6   :  { %v5336_v41 = vadd.f32 %v5335_v46, %v5288_v12  ;;  %v5342_v15 = vadd.f32 %v5341_v13, %v5289_v19  ;;  %v5348_v59 = vadd.f32 %v5347_v4, %v5290_v38  ;;  %v5300_v34 = vadd.f32 %v5299_v9, %v5282_v49 }
 0x5a7   :  { %v5297_v51 = vrot.slane %v5296_v7, 1  ;;  %v5331_v30 = vrot.slane %v5330_v44, 2  ;;  %v5354_v42 = vadd.f32 %v5353_v24, %v5291_v55  ;;  %v5360_v57 = vadd.f32 %v5359_v50, %v5292_v20 }
 0x5a8   :  { %v5337_v28 = vrot.slane %v5336_v41, 2  ;;  %v5343_v3 = vrot.slane %v5342_v15, 2  ;;  %v5349_v21 = vrot.slane %v5348_v59, 2  ;;  %v5301_v27 = vrot.slane %v5300_v34, 2 }
 0x5a9   :  { %v5332_v0 = vadd.f32 %v5331_v30, %v5330_v44  ;;  %v5355_v22 = vrot.slane %v5354_v42, 2  ;;  %v5361_v36 = vrot.slane %v5360_v57, 2  ;;  %v5298_v11 = vadd.f32 %v5297_v51, %v5296_v7  ;;  %v8501_v51 = vld [vmem:[#allocation11 + $0x200] ss:$16 sps:$4 sm:$0xff]   ;;  %v8504_v30 = vld [vmem:[#allocation11 + $0x208] ss:$16 sps:$4 sm:$0xff]  }
 0x5aa   :  { %v5344_v37 = vadd.f32 %v5343_v3, %v5342_v15  ;;  %v5302_v17 = vadd.f32 %v5301_v27, %v5300_v34  ;;  %v5338_v31 = vadd.f32 %v5337_v28, %v5336_v41  ;;  %v5312_v40 = vadd.f32 %v5311_v1, %v5284_v61  ;;  %v8509_v27 = vld [vmem:[#allocation11 + $0x224] ss:$16 sps:$4 sm:$0xff]  }
 0x5ab   :  { %v5333_v32 = vrot.slane %v5332_v0, 1  ;;  %v5356_v62 = vadd.f32 %v5355_v22, %v5354_v42  ;;  %v5365_v2 = vpack.c.bf16 %v5298_v11, %v5298_v11  ;;  %v5350_v49 = vadd.f32 %v5349_v21, %v5348_v59 }
 0x5ac   :  { %v5345_v43 = vrot.slane %v5344_v37, 1  ;;  %v5303_v48 = vrot.slane %v5302_v17, 1  ;;  %v5339_v26 = vrot.slane %v5338_v31, 1  ;;  %v5313_v54 = vrot.slane %v5312_v40, 2 }
 0x5ad   :  { %v5334_v33 = vadd.f32 %v5333_v32, %v5332_v0  ;;  %v5357_v35 = vrot.slane %v5356_v62, 1  ;;  %v5603_v56 = vunpack.c.l.b16 %v5365_v2  ;;  %v5351_v18 = vrot.slane %v5350_v49, 1  ;;  %v8512_v0 = vld [vmem:[#allocation11 + $0x22c] ss:$16 sps:$4 sm:$0xff]   ;;  %v8510_v32 = vld [vmem:[#allocation11 + $0x228] ss:$16 sps:$4 sm:$0xff]  }
 0x5ae   :  { %v5304_v9 = vadd.f32 %v5303_v48, %v5302_v17  ;;  %v5340_v6 = vadd.f32 %v5339_v26, %v5338_v31  ;;  %v5314_v14 = vadd.f32 %v5313_v54, %v5312_v40  ;;  %v5308_v45 = vadd.f32 %v5307_v60, %v5306_v52 }
 0x5af   :  { %v5371_v5 = vpack.c.bf16 %v5334_v33, %v5334_v33  ;;  %v5352_v12 = vadd.f32 %v5351_v18, %v5350_v49  ;;  %v5346_v19 = vadd.f32 %v5345_v43, %v5344_v37  ;;  %v5324_v61 = vadd.f32 %v5323_v53, %v9957_v63  ;;  %v8518_v49 = vld [vmem:[#allocation11 + $0x24c] ss:$16 sps:$4 sm:$0xff]  }
 0x5b0   :  { %v5366_v1 = vpack.c.bf16 %v5304_v9, %v5304_v9  ;;  %v5372_v38 = vpack.c.bf16 %v5340_v6, %v5340_v6  ;;  %v5315_v55 = vrot.slane %v5314_v14, 1  ;;  %v5309_v25 = vrot.slane %v5308_v45, 1  ;;  %v8521_v6 = vld [vmem:[#allocation11 + $0x264] ss:$16 sps:$4 sm:$0xff]  }
 0x5b1   :  { %v5609_v20 = vunpack.c.l.b16 %v5371_v5  ;;  %v5374_v10 = vpack.c.bf16 %v5352_v12, %v5352_v12  ;;  %v5373_v46 = vpack.c.bf16 %v5346_v19, %v5346_v19  ;;  %v5325_v13 = vrot.slane %v5324_v61, 2  ;;  %v8519_v19 = vld [vmem:[#allocation11 + $0x260] ss:$16 sps:$4 sm:$0xff]  }
 0x5b2   :  { %v5604_v4 = vunpack.c.l.b16 %v5366_v1  ;;  %v5610_v7 = vunpack.c.l.b16 %v5372_v38  ;;  %v5316_v44 = vadd.f32 %v5315_v55, %v5314_v14  ;;  %v5310_v24 = vadd.f32 %v5309_v25, %v5308_v45  ;;  %v8524_v14 = vld [vmem:[#allocation11 + $0x26c] ss:$16 sps:$4 sm:$0xff]   ;;  %v8527_v1 = vld [vmem:[#allocation11 + $0x284] ss:$16 sps:$4 sm:$0xff]   ;;  %v8525_v55 = vld [vmem:[#allocation11 + $0x280] ss:$16 sps:$4 sm:$0xff]  }
 0x5b3   :  { %v5615_v50 = vsel %vm2749_vm0, %v5609_v20, %v5603_v56  ;;  %v5612_v52 = vunpack.c.l.b16 %v5374_v10  ;;  %v5611_v60 = vunpack.c.l.b16 %v5373_v46  ;;  %v5326_v41 = vadd.f32 %v5325_v13, %v5324_v61  ;;  %v8516_v56 = vld [vmem:[#allocation11 + $0x248] ss:$16 sps:$4 sm:$0xff]   ;;  %v8530_v38 = vld [vmem:[#allocation11 + $0x28c] ss:$16 sps:$4 sm:$0xff]   ;;  %v8533_v20 = vld [vmem:[#allocation11 + $0x2a4] ss:$16 sps:$4 sm:$0xff]  }
 0x5b4   :  { %v5616_v15 = vsel %vm2749_vm0, %v5610_v7, %v5604_v4  ;;  %v5621_v63 = vpack.c.b16 %v5615_v50, %v5615_v50  ;;  %v5368_v53 = vpack.c.bf16 %v5316_v44, %v5316_v44  ;;  %v5367_v59 = vpack.c.bf16 %v5310_v24, %v5310_v24  ;;  %v8522_v61 = vld [vmem:[#allocation11 + $0x268] ss:$16 sps:$4 sm:$0xff]   ;;  %v8536_v10 = vld [vmem:[#allocation11 + $0x2ac] ss:$16 sps:$4 sm:$0xff]   ;;  %v8531_v46 = vld [vmem:[#allocation11 + $0x2a0] ss:$16 sps:$4 sm:$0xff]  }
 0x5b5   :  { %v5622_v34 = vpack.c.b16 %v5616_v15, %v5616_v15  ;;  %v5327_v42 = vrot.slane %v5326_v41, 1  ;;  %v5362_v28 = vadd.f32 %v5361_v36, %v5360_v57  ;;  %v5320_v3 = vadd.f32 %v5319_v47, %v9968_v23  ;;  %v8507_v47 = vld [vmem:[#allocation11 + $0x220] ss:$16 sps:$4 sm:$0xff]   ;;  %v8528_v25 = vld [vmem:[#allocation11 + $0x288] ss:$16 sps:$4 sm:$0xff]  }
 0x5b6   :  { %v5606_v21 = vunpack.c.l.b16 %v5368_v53  ;;  %v5605_v22 = vunpack.c.l.b16 %v5367_v59  ;;  %v5358_v11 = vadd.f32 %v5357_v35, %v5356_v62  ;;  %v8515_v62 = vld [vmem:[#allocation11 + $0x244] ss:$16 sps:$4 sm:$0xff]   ;;  %v8513_v35 = vld [vmem:[#allocation11 + $0x240] ss:$16 sps:$4 sm:$0xff]   ;;  %v8534_v13 = vld [vmem:[#allocation11 + $0x2a8] ss:$16 sps:$4 sm:$0xff]  }
 0x5b7   :  { %6625 = vmatprep.mubr.bf16.mxu1 %v5622_v34  ;;  %6748 = vmatprep.mubr.bf16.mxu0 %v5622_v34  ;;  %v5328_v37 = vadd.f32 %v5327_v42, %v5326_v41  ;;  %v5363_v17 = vrot.slane %v5362_v28, 1  ;;  %v5321_v31 = vrot.slane %v5320_v3, 1  ;;  %v8539_v4 = vld [vmem:[#allocation11 + $0x2c4] ss:$16 sps:$4 sm:$0xff]   ;;  %v8542_v7 = vld [vmem:[#allocation11 + $0x2cc] ss:$16 sps:$4 sm:$0xff]  }
 0x5b8   :  { %6626 = vmatmul.mubr.bf16.vlgmr.msra.gmra.mrb[16].mxu1 %v5621_v63  ;;  %6749 = vmatmul.mubr.bf16.vlgmr.msra.gmra.mrb[8].mxu0 %v5621_v63  ;;  %v5618_v40 = vsel %vm2749_vm0, %v5612_v52, %v5606_v21  ;;  %v9979_v57 = vsel %vm2749_vm0, %v5611_v60, %v5605_v22  ;;  %v5375_v36 = vpack.c.bf16 %v5358_v11, %v5358_v11  ;;  %v8537_v44 = vld [vmem:[#allocation11 + $0x2c0] ss:$16 sps:$4 sm:$0xff]   ;;  %v8540_v24 = vld [vmem:[#allocation11 + $0x2c8] ss:$16 sps:$4 sm:$0xff]   ;;  %v8545_v50 = vld [vmem:[#allocation11 + $0x2e4] ss:$16 sps:$4 sm:$0xff]  }
 0x5b9   :  { %6635 = vmatpush1.bf16.msra.mxu1 %v8501_v51  ;;  %6758 = vmatpush1.bf16.msra.mxu0 %v8504_v30  ;;  %v5624_v23 = vpack.c.b16 %v5618_v40, %v5618_v40  ;;  %v5364_v2 = vadd.f32 %v5363_v17, %v5362_v28  ;;  %v5370_v43 = vpack.c.bf16 %v5328_v37, %v5328_v37  ;;  %v8548_v52 = vld [vmem:[#allocation11 + $0x2ec] ss:$16 sps:$4 sm:$0xff]   ;;  %v8543_v60 = vld [vmem:[#allocation11 + $0x2e0] ss:$16 sps:$4 sm:$0xff]   ;;  %v8546_v41 = vld [vmem:[#allocation11 + $0x2e8] ss:$16 sps:$4 sm:$0xff]  }
 0x5ba   :  { %6636 = vmatprep.subr.bf16.mxu1 %v8509_v27  ;;  %6759 = vmatprep.subr.bf16.mxu0 %v8512_v0  ;;  %v5322_v48 = vadd.f32 %v5321_v31, %v5320_v3  ;;  %v5613_v33 = vunpack.c.l.b16 %v5375_v36  ;;  %v8551_v15 = vld [vmem:[#allocation11 + $0x304] ss:$16 sps:$4 sm:$0xff]   ;;  %v8554_v63 = vld [vmem:[#allocation11 + $0x30c] ss:$16 sps:$4 sm:$0xff]   ;;  %v8549_v53 = vld [vmem:[#allocation11 + $0x300] ss:$16 sps:$4 sm:$0xff]  }
 0x5bb   :  { %6666 = vmatprep.mubr.bf16.mxu1 %v5624_v23  ;;  %6789 = vmatprep.mubr.bf16.mxu0 %v5624_v23  ;;  %v5376_v26 = vpack.c.bf16 %v5364_v2, %v5364_v2  ;;  %v5608_v18 = vunpack.c.l.b16 %v5370_v43  ;;  %v8552_v59 = vld [vmem:[#allocation11 + $0x308] ss:$16 sps:$4 sm:$0xff]   ;;  %v8557_v34 = vld [vmem:[#allocation11 + $0x324] ss:$16 sps:$4 sm:$0xff]   ;;  %v8560_v51 = vld [vmem:[#allocation11 + $0x32c] ss:$16 sps:$4 sm:$0xff]  }
 0x5bc   :  { %v5369_v54 = vpack.c.bf16 %v5322_v48, %v5322_v48  ;;  %v8555_v30 = vld [vmem:[#allocation11 + $0x320] ss:$16 sps:$4 sm:$0xff]   ;;  %v8558_v42 = vld [vmem:[#allocation11 + $0x328] ss:$16 sps:$4 sm:$0xff]   ;;  %v8563_v28 = vld [vmem:[#allocation11 + $0x344] ss:$16 sps:$4 sm:$0xff]  }
 0x5bd   :  { %6637 = vmatpush1.bf16.msra.mxu1 %v8507_v47  ;;  %6760 = vmatpush1.bf16.msra.mxu0 %v8510_v32  ;;  %v5614_v9 = vunpack.c.l.b16 %v5376_v26  ;;  %v8566_v3 = vld [vmem:[#allocation11 + $0x34c] ss:$16 sps:$4 sm:$0xff]   ;;  %v8561_v21 = vld [vmem:[#allocation11 + $0x340] ss:$16 sps:$4 sm:$0xff]   ;;  %v8564_v27 = vld [vmem:[#allocation11 + $0x348] ss:$16 sps:$4 sm:$0xff]  }
 0x5be   :  { %6638 = vmatprep.subr.bf16.mxu1 %v8515_v62  ;;  %6761 = vmatprep.subr.bf16.mxu0 %v8518_v49  ;;  %v5607_v45 = vunpack.c.l.b16 %v5369_v54  ;;  %v8569_v0 = vld [vmem:[#allocation11 + $0x364] ss:$16 sps:$4 sm:$0xff]   ;;  %v8572_v22 = vld [vmem:[#allocation11 + $0x36c] ss:$16 sps:$4 sm:$0xff]   ;;  %v8567_v11 = vld [vmem:[#allocation11 + $0x360] ss:$16 sps:$4 sm:$0xff]  }
 0x5bf   :  { %v9982_v5 = vsel %vm2749_vm0, %v5614_v9, %v5608_v18  ;;  %v8570_v37 = vld [vmem:[#allocation11 + $0x368] ss:$16 sps:$4 sm:$0xff]   ;;  %v8575_v17 = vld [vmem:[#allocation11 + $0x384] ss:$16 sps:$4 sm:$0xff]   ;;  %v8578_v31 = vld [vmem:[#allocation11 + $0x38c] ss:$16 sps:$4 sm:$0xff]  }
 0x5c0   :  { %v9985_v12 = vsel %vm2749_vm0, %v5613_v33, %v5607_v45  ;;  %v8573_v40 = vld [vmem:[#allocation11 + $0x380] ss:$16 sps:$4 sm:$0xff]   ;;  %v8576_v36 = vld [vmem:[#allocation11 + $0x388] ss:$16 sps:$4 sm:$0xff]   ;;  %v8581_v23 = vld [vmem:[#allocation11 + $0x3a4] ss:$16 sps:$4 sm:$0xff]   ;;  %v5626_v45 = vpack.c.b16 %v9982_v5, %v9982_v5 }
 0x5c1   :  { %6639 = vmatpush1.bf16.msra.mxu1 %v8513_v35  ;;  %6762 = vmatpush1.bf16.msra.mxu0 %v8516_v56  ;;  %v8584_v47 = vld [vmem:[#allocation11 + $0x3ac] ss:$16 sps:$4 sm:$0xff]   ;;  %v8579_v32 = vld [vmem:[#allocation11 + $0x3a0] ss:$16 sps:$4 sm:$0xff]   ;;  %v8582_v2 = vld [vmem:[#allocation11 + $0x3a8] ss:$16 sps:$4 sm:$0xff]  }
 0x5c2   :  { %6640 = vmatprep.subr.bf16.mxu1 %v8521_v6  ;;  %6763 = vmatprep.subr.bf16.mxu0 %v8524_v14  ;;  %v8587_v62 = vld [vmem:[#allocation11 + $0x3c4] ss:$16 sps:$4 sm:$0xff]   ;;  %v8590_v49 = vld [vmem:[#allocation11 + $0x3cc] ss:$16 sps:$4 sm:$0xff]   ;;  %v8585_v43 = vld [vmem:[#allocation11 + $0x3c0] ss:$16 sps:$4 sm:$0xff]   ;;  %v5623_v6 = vpack.c.b16 %v9979_v57, %v9979_v57 }
 0x5c3   :  { %v8588_v48 = vld [vmem:[#allocation11 + $0x3c8] ss:$16 sps:$4 sm:$0xff]   ;;  %v8593_v26 = vld [vmem:[#allocation11 + $0x3e4] ss:$16 sps:$4 sm:$0xff]   ;;  %v8596_v54 = vld [vmem:[#allocation11 + $0x3ec] ss:$16 sps:$4 sm:$0xff]  }
 0x5c4   :  { %v8591_v33 = vld [vmem:[#allocation11 + $0x3e0] ss:$16 sps:$4 sm:$0xff]   ;;  %v8594_v35 = vld [vmem:[#allocation11 + $0x3e8] ss:$16 sps:$4 sm:$0xff]   ;;  %v8599_v56 = vld [vmem:[#allocation11 + $0x404] ss:$16 sps:$4 sm:$0xff]  }
 0x5c5   :  { %6641 = vmatpush1.bf16.msra.mxu1 %v8519_v19  ;;  %6764 = vmatpush1.bf16.msra.mxu0 %v8522_v61  ;;  %v8602_v18 = vld [vmem:[#allocation11 + $0x40c] ss:$16 sps:$4 sm:$0xff]   ;;  %v8597_v9 = vld [vmem:[#allocation11 + $0x400] ss:$16 sps:$4 sm:$0xff]   ;;  %v8600_v14 = vld [vmem:[#allocation11 + $0x408] ss:$16 sps:$4 sm:$0xff]  }
 0x5c6   :  { %6642 = vmatprep.subr.bf16.mxu1 %v8527_v1  ;;  %6765 = vmatprep.subr.bf16.mxu0 %v8530_v38  ;;  %v8605_v19 = vld [vmem:[#allocation11 + $0x424] ss:$16 sps:$4 sm:$0xff]   ;;  %v8608_v61 = vld [vmem:[#allocation11 + $0x42c] ss:$16 sps:$4 sm:$0xff]   ;;  %v8603_v1 = vld [vmem:[#allocation11 + $0x420] ss:$16 sps:$4 sm:$0xff]  }
 0x5c7   :  { %v8606_v38 = vld [vmem:[#allocation11 + $0x428] ss:$16 sps:$4 sm:$0xff]   ;;  %v8614_v57 = vld [vmem:[#allocation11 + $0x44c] ss:$16 sps:$4 sm:$0xff]   ;;  %v8617_v5 = vld [vmem:[#allocation11 + $0x464] ss:$16 sps:$4 sm:$0xff]  }
 0x5c9   :  { %6643 = vmatpush1.bf16.msra.mxu1 %v8525_v55  ;;  %6766 = vmatpush1.bf16.msra.mxu0 %v8528_v25  ;;  %v8611_v55 = vld [vmem:[#allocation11 + $0x444] ss:$16 sps:$4 sm:$0xff]   ;;  %v8609_v25 = vld [vmem:[#allocation11 + $0x440] ss:$16 sps:$4 sm:$0xff]  }
 0x5ca   :  { %6644 = vmatprep.subr.bf16.mxu1 %v8533_v20  ;;  %6767 = vmatprep.subr.bf16.mxu0 %v8536_v10  ;;  %v8612_v20 = vld [vmem:[#allocation11 + $0x448] ss:$16 sps:$4 sm:$0xff]   ;;  %v8620_v10 = vld [vmem:[#allocation11 + $0x46c] ss:$16 sps:$4 sm:$0xff]  }
 0x5cd   :  { %6645 = vmatpush1.bf16.msra.mxu1 %v8531_v46  ;;  %6768 = vmatpush1.bf16.msra.mxu0 %v8534_v13  ;;  %v8615_v46 = vld [vmem:[#allocation11 + $0x460] ss:$16 sps:$4 sm:$0xff]   ;;  %v8618_v13 = vld [vmem:[#allocation11 + $0x468] ss:$16 sps:$4 sm:$0xff]  }
 0x5ce   :  { %6646 = vmatprep.subr.bf16.mxu1 %v8539_v4  ;;  %6769 = vmatprep.subr.bf16.mxu0 %v8542_v7  ;;  %v8623_v4 = vld [vmem:[#allocation11 + $0x484] ss:$16 sps:$4 sm:$0xff]   ;;  %v8626_v7 = vld [vmem:[#allocation11 + $0x48c] ss:$16 sps:$4 sm:$0xff]  }
 0x5d1   :  { %6647 = vmatpush1.bf16.msra.mxu1 %v8537_v44  ;;  %6770 = vmatpush1.bf16.msra.mxu0 %v8540_v24  ;;  %v8621_v44 = vld [vmem:[#allocation11 + $0x480] ss:$16 sps:$4 sm:$0xff]   ;;  %v8624_v24 = vld [vmem:[#allocation11 + $0x488] ss:$16 sps:$4 sm:$0xff]  }
 0x5d2   :  { %6648 = vmatprep.subr.bf16.mxu1 %v8545_v50  ;;  %6771 = vmatprep.subr.bf16.mxu0 %v8548_v52  ;;  %v8629_v50 = vld [vmem:[#allocation11 + $0x4a4] ss:$16 sps:$4 sm:$0xff]   ;;  %v8632_v52 = vld [vmem:[#allocation11 + $0x4ac] ss:$16 sps:$4 sm:$0xff]  }
 0x5d5   :  { %6649 = vmatpush1.bf16.msra.mxu1 %v8543_v60  ;;  %6772 = vmatpush1.bf16.msra.mxu0 %v8546_v41  ;;  %v8627_v60 = vld [vmem:[#allocation11 + $0x4a0] ss:$16 sps:$4 sm:$0xff]   ;;  %v8630_v41 = vld [vmem:[#allocation11 + $0x4a8] ss:$16 sps:$4 sm:$0xff]  }
 0x5d6   :  { %6650 = vmatprep.subr.bf16.mxu1 %v8551_v15  ;;  %6773 = vmatprep.subr.bf16.mxu0 %v8554_v63  ;;  %v8635_v15 = vld [vmem:[#allocation11 + $0x4c4] ss:$16 sps:$4 sm:$0xff]   ;;  %v8638_v63 = vld [vmem:[#allocation11 + $0x4cc] ss:$16 sps:$4 sm:$0xff]  }
 0x5d9   :  { %6651 = vmatpush1.bf16.msra.mxu1 %v8549_v53  ;;  %6774 = vmatpush1.bf16.msra.mxu0 %v8552_v59  ;;  %v8633_v53 = vld [vmem:[#allocation11 + $0x4c0] ss:$16 sps:$4 sm:$0xff]   ;;  %v8636_v59 = vld [vmem:[#allocation11 + $0x4c8] ss:$16 sps:$4 sm:$0xff]  }
 0x5da   :  { %6652 = vmatprep.subr.bf16.mxu1 %v8557_v34  ;;  %6775 = vmatprep.subr.bf16.mxu0 %v8560_v51  ;;  %v8641_v34 = vld [vmem:[#allocation11 + $0x4e4] ss:$16 sps:$4 sm:$0xff]   ;;  %v8644_v51 = vld [vmem:[#allocation11 + $0x4ec] ss:$16 sps:$4 sm:$0xff]  }
 0x5dd   :  { %6653 = vmatpush1.bf16.msra.mxu1 %v8555_v30  ;;  %6776 = vmatpush1.bf16.msra.mxu0 %v8558_v42  ;;  %v8639_v30 = vld [vmem:[#allocation11 + $0x4e0] ss:$16 sps:$4 sm:$0xff]   ;;  %v8642_v42 = vld [vmem:[#allocation11 + $0x4e8] ss:$16 sps:$4 sm:$0xff]  }
 0x5de   :  { %6654 = vmatprep.subr.bf16.mxu1 %v8563_v28  ;;  %6777 = vmatprep.subr.bf16.mxu0 %v8566_v3  ;;  %v8647_v28 = vld [vmem:[#allocation11 + $0x504] ss:$16 sps:$4 sm:$0xff]   ;;  %v8650_v3 = vld [vmem:[#allocation11 + $0x50c] ss:$16 sps:$4 sm:$0xff]  }
 0x5e1   :  { %6655 = vmatpush1.bf16.msra.mxu1 %v8561_v21  ;;  %6778 = vmatpush1.bf16.msra.mxu0 %v8564_v27  ;;  %v8645_v21 = vld [vmem:[#allocation11 + $0x500] ss:$16 sps:$4 sm:$0xff]   ;;  %v8648_v27 = vld [vmem:[#allocation11 + $0x508] ss:$16 sps:$4 sm:$0xff]  }
 0x5e2   :  { %6656 = vmatprep.subr.bf16.mxu1 %v8569_v0  ;;  %6779 = vmatprep.subr.bf16.mxu0 %v8572_v22  ;;  %v8653_v0 = vld [vmem:[#allocation11 + $0x524] ss:$16 sps:$4 sm:$0xff]   ;;  %v8656_v22 = vld [vmem:[#allocation11 + $0x52c] ss:$16 sps:$4 sm:$0xff]  }
 0x5e5   :  { %6657 = vmatpush1.bf16.msra.mxu1 %v8567_v11  ;;  %6780 = vmatpush1.bf16.msra.mxu0 %v8570_v37  ;;  %v8651_v11 = vld [vmem:[#allocation11 + $0x520] ss:$16 sps:$4 sm:$0xff]   ;;  %v8654_v37 = vld [vmem:[#allocation11 + $0x528] ss:$16 sps:$4 sm:$0xff]  }
 0x5e6   :  { %6658 = vmatprep.subr.bf16.mxu1 %v8575_v17  ;;  %6781 = vmatprep.subr.bf16.mxu0 %v8578_v31  ;;  %v8659_v17 = vld [vmem:[#allocation11 + $0x544] ss:$16 sps:$4 sm:$0xff]   ;;  %v8662_v31 = vld [vmem:[#allocation11 + $0x54c] ss:$16 sps:$4 sm:$0xff]  }
 0x5e9   :  { %6659 = vmatpush1.bf16.msra.mxu1 %v8573_v40  ;;  %6782 = vmatpush1.bf16.msra.mxu0 %v8576_v36  ;;  %v8657_v40 = vld [vmem:[#allocation11 + $0x540] ss:$16 sps:$4 sm:$0xff]   ;;  %v8660_v36 = vld [vmem:[#allocation11 + $0x548] ss:$16 sps:$4 sm:$0xff]  }
 0x5ea   :  { %6660 = vmatprep.subr.bf16.mxu1 %v8581_v23  ;;  %6783 = vmatprep.subr.bf16.mxu0 %v8584_v47  ;;  %v8665_v23 = vld [vmem:[#allocation11 + $0x564] ss:$16 sps:$4 sm:$0xff]   ;;  %v8668_v47 = vld [vmem:[#allocation11 + $0x56c] ss:$16 sps:$4 sm:$0xff]  }
 0x5ed   :  { %6661 = vmatpush1.bf16.msra.mxu1 %v8579_v32  ;;  %6784 = vmatpush1.bf16.msra.mxu0 %v8582_v2  ;;  %v8663_v32 = vld [vmem:[#allocation11 + $0x560] ss:$16 sps:$4 sm:$0xff]   ;;  %v8666_v2 = vld [vmem:[#allocation11 + $0x568] ss:$16 sps:$4 sm:$0xff]  }
 0x5ee   :  { %6662 = vmatprep.subr.bf16.mxu1 %v8587_v62  ;;  %6785 = vmatprep.subr.bf16.mxu0 %v8590_v49  ;;  %v8671_v62 = vld [vmem:[#allocation11 + $0x584] ss:$16 sps:$4 sm:$0xff]   ;;  %v8674_v49 = vld [vmem:[#allocation11 + $0x58c] ss:$16 sps:$4 sm:$0xff]  }
 0x5f1   :  { %6663 = vmatpush1.bf16.msra.mxu1 %v8585_v43  ;;  %6786 = vmatpush1.bf16.msra.mxu0 %v8588_v48  ;;  %v8669_v43 = vld [vmem:[#allocation11 + $0x580] ss:$16 sps:$4 sm:$0xff]   ;;  %v8672_v48 = vld [vmem:[#allocation11 + $0x588] ss:$16 sps:$4 sm:$0xff]  }
 0x5f2   :  { %6664 = vmatprep.subr.bf16.mxu1 %v8593_v26  ;;  %6787 = vmatprep.subr.bf16.mxu0 %v8596_v54  ;;  %v8677_v26 = vld [vmem:[#allocation11 + $0x5a4] ss:$16 sps:$4 sm:$0xff]   ;;  %v8680_v54 = vld [vmem:[#allocation11 + $0x5ac] ss:$16 sps:$4 sm:$0xff]  }
 0x5f5   :  { %6665 = vmatpush1.bf16.msra.mxu1 %v8591_v33  ;;  %6788 = vmatpush1.bf16.msra.mxu0 %v8594_v35  ;;  %v8675_v33 = vld [vmem:[#allocation11 + $0x5a0] ss:$16 sps:$4 sm:$0xff]   ;;  %v8678_v35 = vld [vmem:[#allocation11 + $0x5a8] ss:$16 sps:$4 sm:$0xff]  }
 0x5f6   :  { %6675 = vmatprep.subr.bf16.mxu1 %v8599_v56  ;;  %6798 = vmatprep.subr.bf16.mxu0 %v8602_v18  ;;  %v8683_v56 = vld [vmem:[#allocation11 + $0x5c4] ss:$16 sps:$4 sm:$0xff]   ;;  %v8686_v18 = vld [vmem:[#allocation11 + $0x5cc] ss:$16 sps:$4 sm:$0xff]  }
 0x5f8   :  { %6667 = vmatmul.mubr.bf16.vlgmr.msra.gmra.mrb[16].mxu1 %v5623_v6  ;;  %6790 = vmatmul.mubr.bf16.vlgmr.msra.gmra.mrb[8].mxu0 %v5623_v6  ;;  %v8684_v6 = vld [vmem:[#allocation11 + $0x5c8] ss:$16 sps:$4 sm:$0xff]  }
 0x5f9   :  { %6676 = vmatpush1.bf16.msra.mxu1 %v8597_v9  ;;  %6707 = vmatprep.mubr.bf16.mxu1 %v5626_v45  ;;  %v8681_v9 = vld [vmem:[#allocation11 + $0x5c0] ss:$16 sps:$4 sm:$0xff]  }
 0x5fa   :  { %6799 = vmatpush1.bf16.msra.mxu0 %v8600_v14  ;;  %6830 = vmatprep.mubr.bf16.mxu0 %v5626_v45  ;;  %v8689_v14 = vld [vmem:[#allocation11 + $0x5e4] ss:$16 sps:$4 sm:$0xff]   ;;  %v8692_v45 = vld [vmem:[#allocation11 + $0x5ec] ss:$16 sps:$4 sm:$0xff]  }
 0x5fb   :  { %6677 = vmatprep.subr.bf16.mxu1 %v8605_v19  ;;  %6800 = vmatprep.subr.bf16.mxu0 %v8608_v61  ;;  %v6867_v19 = vld [vmem:[#allocation14 + $0x80] sm:$0xff]  ;;  %v6868_v61 = vld [vmem:[#allocation14 + $0x88] sm:$0xff] }
 0x5fd   :  { %6678 = vmatpush1.bf16.msra.mxu1 %v8603_v1  ;;  %v8687_v1 = vld [vmem:[#allocation11 + $0x5e0] ss:$16 sps:$4 sm:$0xff]  }
 0x5fe   :  { %6801 = vmatpush1.bf16.msra.mxu0 %v8606_v38  ;;  %6679 = vmatprep.subr.bf16.mxu1 %v8611_v55  ;;  %v8690_v38 = vld [vmem:[#allocation11 + $0x5e8] ss:$16 sps:$4 sm:$0xff]   ;;  %v7836_v55 = vpack.c.bf16 %v6868_v61, %v6867_v19 }
 0x5ff   :  { %6802 = vmatprep.subr.bf16.mxu0 %v8614_v57  ;;  %v6851_v57 = vld [vmem:[#allocation14] sm:$0xff] }
 0x601   :  { %6680 = vmatpush1.bf16.msra.mxu1 %v8609_v25  ;;  %v6852_v25 = vld [vmem:[#allocation14 + $0x8] sm:$0xff] }
 0x602   :  { %6803 = vmatpush1.bf16.msra.mxu0 %v8612_v20  ;;  %6681 = vmatprep.subr.bf16.mxu1 %v8617_v5  ;;  %v6869_v20 = vld [vmem:[#allocation14 + $0x90] sm:$0xff]  ;;  %v6870_v5 = vld [vmem:[#allocation14 + $0x98] sm:$0xff] }
 0x603   :  { %6804 = vmatprep.subr.bf16.mxu0 %v8620_v10  ;;  %v7838_v10 = vpack.c.bf16 %v6852_v25, %v6851_v57  ;;  %v6883_v25 = vld [vmem:[#allocation14 + $0x100] sm:$0xff] }
 0x605   :  { %6682 = vmatpush1.bf16.msra.mxu1 %v8615_v46  ;;  %v5625_v46 = vpack.c.b16 %v9985_v12, %v9985_v12 }
 0x606   :  { %6805 = vmatpush1.bf16.msra.mxu0 %v8618_v13  ;;  %6683 = vmatprep.subr.bf16.mxu1 %v8623_v4  ;;  %v7840_v13 = vpack.c.bf16 %v6870_v5, %v6869_v20  ;;  %v6853_v4 = vld [vmem:[#allocation14 + $0x10] sm:$0xff]  ;;  %v6884_v20 = vld [vmem:[#allocation14 + $0x108] sm:$0xff] }
 0x607   :  { %6806 = vmatprep.subr.bf16.mxu0 %v8626_v7  ;;  %v6854_v7 = vld [vmem:[#allocation14 + $0x18] sm:$0xff] }
 0x609   :  { %6684 = vmatpush1.bf16.msra.mxu1 %v8621_v44  ;;  %v6871_v44 = vld [vmem:[#allocation14 + $0xa0] sm:$0xff] }
 0x60a   :  { %6807 = vmatpush1.bf16.msra.mxu0 %v8624_v24  ;;  %6685 = vmatprep.subr.bf16.mxu1 %v8629_v50  ;;  %v6872_v24 = vld [vmem:[#allocation14 + $0xa8] sm:$0xff]  ;;  %v7842_v50 = vpack.c.bf16 %v6854_v7, %v6853_v4 }
 0x60b   :  { %6808 = vmatprep.subr.bf16.mxu0 %v8632_v52  ;;  %v7844_v52 = vpack.c.bf16 %v6872_v24, %v6871_v44  ;;  %v7870_v44 = vpack.c.bf16 %v6884_v20, %v6883_v25 }
 0x60d   :  { %6686 = vmatpush1.bf16.msra.mxu1 %v8627_v60  ;;  %v6855_v60 = vld [vmem:[#allocation14 + $0x20] sm:$0xff] }
 0x60e   :  { %6809 = vmatpush1.bf16.msra.mxu0 %v8630_v41  ;;  %6687 = vmatprep.subr.bf16.mxu1 %v8635_v15  ;;  %v6856_v41 = vld [vmem:[#allocation14 + $0x28] sm:$0xff]  ;;  %v6873_v15 = vld [vmem:[#allocation14 + $0xb0] sm:$0xff] }
 0x60f   :  { %6810 = vmatprep.subr.bf16.mxu0 %v8638_v63  ;;  %v6874_v63 = vld [vmem:[#allocation14 + $0xb8] sm:$0xff] }
 0x610   :  { %v7848_v12 = vpack.c.bf16 %v6874_v63, %v6873_v15  ;;  %v6903_v15 = vld [vmem:[#allocation14 + $0x1a0] sm:$0xff]  ;;  %v6904_v63 = vld [vmem:[#allocation14 + $0x1a8] sm:$0xff] }
 0x611   :  { %6688 = vmatpush1.bf16.msra.mxu1 %v8633_v53  ;;  %v7846_v53 = vpack.c.bf16 %v6856_v41, %v6855_v60  ;;  %v6886_v60 = vld [vmem:[#allocation14 + $0x118] sm:$0xff] }
 0x612   :  { %6811 = vmatpush1.bf16.msra.mxu0 %v8636_v59  ;;  %6689 = vmatprep.subr.bf16.mxu1 %v8641_v34  ;;  %v6857_v59 = vld [vmem:[#allocation14 + $0x30] sm:$0xff]  ;;  %v6858_v34 = vld [vmem:[#allocation14 + $0x38] sm:$0xff] }
 0x613   :  { %6812 = vmatprep.subr.bf16.mxu0 %v8644_v51  ;;  %v6875_v51 = vld [vmem:[#allocation14 + $0xc0] sm:$0xff] }
 0x615   :  { %6690 = vmatpush1.bf16.msra.mxu1 %v8639_v30  ;;  %v6876_v30 = vld [vmem:[#allocation14 + $0xc8] sm:$0xff] }
 0x616   :  { %6813 = vmatpush1.bf16.msra.mxu0 %v8642_v42  ;;  %6691 = vmatprep.subr.bf16.mxu1 %v8647_v28  ;;  %v7850_v42 = vpack.c.bf16 %v6858_v34, %v6857_v59  ;;  %v7852_v28 = vpack.c.bf16 %v6876_v30, %v6875_v51  ;;  %v7876_v59 = vpack.c.bf16 %v6904_v63, %v6903_v15  ;;  %v6887_v34 = vld [vmem:[#allocation14 + $0x120] sm:$0xff]  ;;  %v6888_v51 = vld [vmem:[#allocation14 + $0x128] sm:$0xff]  ;;  %v6905_v30 = vld [vmem:[#allocation14 + $0x1b0] sm:$0xff] }
 0x617   :  { %6814 = vmatprep.subr.bf16.mxu0 %v8650_v3  ;;  %v6859_v3 = vld [vmem:[#allocation14 + $0x40] sm:$0xff] }
 0x619   :  { %6692 = vmatpush1.bf16.msra.mxu1 %v8645_v21  ;;  %v6860_v21 = vld [vmem:[#allocation14 + $0x48] sm:$0xff] }
 0x61a   :  { %6815 = vmatpush1.bf16.msra.mxu0 %v8648_v27  ;;  %6693 = vmatprep.subr.bf16.mxu1 %v8653_v0  ;;  %v6877_v27 = vld [vmem:[#allocation14 + $0xd0] sm:$0xff]  ;;  %v6878_v0 = vld [vmem:[#allocation14 + $0xd8] sm:$0xff] }
 0x61b   :  { %6816 = vmatprep.subr.bf16.mxu0 %v8656_v22  ;;  %v7854_v22 = vpack.c.bf16 %v6860_v21, %v6859_v3  ;;  %v6889_v21 = vld [vmem:[#allocation14 + $0x130] sm:$0xff] }
 0x61d   :  { %6694 = vmatpush1.bf16.msra.mxu1 %v8651_v11  ;;  %v7856_v11 = vpack.c.bf16 %v6878_v0, %v6877_v27  ;;  %v6890_v27 = vld [vmem:[#allocation14 + $0x138] sm:$0xff]  ;;  %v6907_v0 = vld [vmem:[#allocation14 + $0x1c0] sm:$0xff] }
 0x61e   :  { %6817 = vmatpush1.bf16.msra.mxu0 %v8654_v37  ;;  %6695 = vmatprep.subr.bf16.mxu1 %v8659_v17  ;;  %v6861_v37 = vld [vmem:[#allocation14 + $0x50] sm:$0xff]  ;;  %v6862_v17 = vld [vmem:[#allocation14 + $0x58] sm:$0xff] }
 0x61f   :  { %6818 = vmatprep.subr.bf16.mxu0 %v8662_v31  ;;  %v6879_v31 = vld [vmem:[#allocation14 + $0xe0] sm:$0xff] }
 0x621   :  { %6696 = vmatpush1.bf16.msra.mxu1 %v8657_v40  ;;  %v6880_v40 = vld [vmem:[#allocation14 + $0xe8] sm:$0xff] }
 0x622   :  { %6819 = vmatpush1.bf16.msra.mxu0 %v8660_v36  ;;  %6697 = vmatprep.subr.bf16.mxu1 %v8665_v23  ;;  %v7858_v36 = vpack.c.bf16 %v6862_v17, %v6861_v37  ;;  %v7860_v23 = vpack.c.bf16 %v6880_v40, %v6879_v31  ;;  %v6891_v17 = vld [vmem:[#allocation14 + $0x140] sm:$0xff]  ;;  %v6892_v31 = vld [vmem:[#allocation14 + $0x148] sm:$0xff]  ;;  %v6909_v40 = vld [vmem:[#allocation14 + $0x1d0] sm:$0xff] }
 0x623   :  { %6820 = vmatprep.subr.bf16.mxu0 %v8668_v47  ;;  %v6863_v47 = vld [vmem:[#allocation14 + $0x60] sm:$0xff] }
 0x625   :  { %6698 = vmatpush1.bf16.msra.mxu1 %v8663_v32  ;;  %v6864_v32 = vld [vmem:[#allocation14 + $0x68] sm:$0xff] }
 0x626   :  { %6821 = vmatpush1.bf16.msra.mxu0 %v8666_v2  ;;  %6699 = vmatprep.subr.bf16.mxu1 %v8671_v62  ;;  %v7862_v2 = vpack.c.bf16 %v6864_v32, %v6863_v47  ;;  %v6881_v62 = vld [vmem:[#allocation14 + $0xf0] sm:$0xff] }
 0x627   :  { %6822 = vmatprep.subr.bf16.mxu0 %v8674_v49  ;;  %v6882_v49 = vld [vmem:[#allocation14 + $0xf8] sm:$0xff]  ;;  %v6893_v32 = vld [vmem:[#allocation14 + $0x150] sm:$0xff] }
 0x629   :  { %6700 = vmatpush1.bf16.msra.mxu1 %v8669_v43  ;;  %v6865_v43 = vld [vmem:[#allocation14 + $0x70] sm:$0xff] }
 0x62a   :  { %6823 = vmatpush1.bf16.msra.mxu0 %v8672_v48  ;;  %6701 = vmatprep.subr.bf16.mxu1 %v8677_v26  ;;  %v7864_v48 = vpack.c.bf16 %v6882_v49, %v6881_v62  ;;  %v6866_v26 = vld [vmem:[#allocation14 + $0x78] sm:$0xff]  ;;  %v6911_v62 = vld [vmem:[#allocation14 + $0x1e0] sm:$0xff]  ;;  %v6912_v49 = vld [vmem:[#allocation14 + $0x1e8] sm:$0xff] }
 0x62b   :  { %6824 = vmatprep.subr.bf16.mxu0 %v8680_v54  ;;  %v7866_v54 = vpack.c.bf16 %v6866_v26, %v6865_v43  ;;  %v6895_v26 = vld [vmem:[#allocation14 + $0x160] sm:$0xff] }
 0x62d   :  { %6702 = vmatpush1.bf16.msra.mxu1 %v8675_v33  ;;  %v6899_v33 = vld [vmem:[#allocation14 + $0x180] sm:$0xff] }
 0x62e   :  { %6825 = vmatpush1.bf16.msra.mxu0 %v8678_v35  ;;  %6703 = vmatprep.subr.bf16.mxu1 %v8683_v56  ;;  %v6900_v35 = vld [vmem:[#allocation14 + $0x188] sm:$0xff] }
 0x62f   :  { %6826 = vmatprep.subr.bf16.mxu0 %v8686_v18  ;;  %v7868_v56 = vpack.c.bf16 %v6900_v35, %v6899_v33  ;;  %v9993_v18 = vld [vmem:[#allocation12] sm:$0xf]  ;;  %v6913_v35 = vld [vmem:[#allocation14 + $0x1f0] sm:$0xff] }
 0x630   :  { %v5582_v33 = vrot.slane %v9993_v18, %v2537_v39 }
 0x631   :  { %6704 = vmatpush1.bf16.msra.mxu1 %v8681_v9  ;;  %v5574_v9 = vrot.slane %v9993_v18, %v2529_v16 }
 0x632   :  { %6827 = vmatpush1.bf16.msra.mxu0 %v8684_v6  ;;  %6705 = vmatprep.subr.bf16.mxu1 %v8689_v14  ;;  %v5578_v6 = vrot.slane %v9993_v18, %v2533_v29  ;;  %v5586_v14 = vrot.slane %v9993_v18, %v2541_v8  ;;  %v6902_v29 = vld [vmem:[#allocation14 + $0x198] sm:$0xff] }
 0x633   :  { %6828 = vmatprep.subr.bf16.mxu0 %v8692_v45 }
 0x635   :  { %6706 = vmatpush1.bf16.msra.mxu1 %v8687_v1 }
 0x636   :  { %6829 = vmatpush1.bf16.msra.mxu0 %v8690_v38  ;;  %7837 = vmatprep.subr.bf16.mxu1 %v7836_v55 }
 0x638   :  { %6708 = vmatmul.mubr.bf16.vlgmr.msra.gmra.mrb[16].mxu1 %v5625_v46 }
 0x639   :  { %6831 = vmatmul.mubr.bf16.vlgmr.msra.gmra.mrb[8].mxu0 %v5625_v46  ;;  %7839 = vmatpush3.bf16.msra.mxu1 %v7838_v10 }
 0x63a   :  { %7841 = vmatprep.subr.bf16.mxu1 %v7840_v13  ;;  %v6901_v13 = vld [vmem:[#allocation14 + $0x190] sm:$0xff] }
 0x63d   :  { %7843 = vmatpush3.bf16.msra.mxu1 %v7842_v50  ;;  %v7872_v50 = vpack.c.bf16 %v6902_v29, %v6901_v13 }
 0x63e   :  { %7845 = vmatprep.subr.bf16.mxu1 %v7844_v52  ;;  %v6885_v52 = vld [vmem:[#allocation14 + $0x110] sm:$0xff] }
 0x641   :  { %7847 = vmatpush3.bf16.msra.mxu1 %v7846_v53 }
 0x642   :  { %7849 = vmatprep.subr.bf16.mxu1 %v7848_v12  ;;  %v7874_v12 = vpack.c.bf16 %v6886_v60, %v6885_v52 }
 0x645   :  { %7851 = vmatpush3.bf16.msra.mxu1 %v7850_v42  ;;  %v6906_v42 = vld [vmem:[#allocation14 + $0x1b8] sm:$0xff] }
 0x646   :  { %7853 = vmatprep.subr.bf16.mxu1 %v7852_v28  ;;  %v7878_v28 = vpack.c.bf16 %v6888_v51, %v6887_v34  ;;  %v7880_v3 = vpack.c.bf16 %v6906_v42, %v6905_v30 }
 0x649   :  { %7855 = vmatpush3.bf16.msra.mxu1 %v7854_v22  ;;  %v6908_v22 = vld [vmem:[#allocation14 + $0x1c8] sm:$0xff] }
 0x64a   :  { %7857 = vmatprep.subr.bf16.mxu1 %v7856_v11  ;;  %v7882_v11 = vpack.c.bf16 %v6890_v27, %v6889_v21  ;;  %v7884_v37 = vpack.c.bf16 %v6908_v22, %v6907_v0 }
 0x64d   :  { %7859 = vmatpush3.bf16.msra.mxu1 %v7858_v36  ;;  %v6910_v36 = vld [vmem:[#allocation14 + $0x1d8] sm:$0xff] }
 0x64e   :  { %7861 = vmatprep.subr.bf16.mxu1 %v7860_v23  ;;  %v7886_v23 = vpack.c.bf16 %v6892_v31, %v6891_v17  ;;  %v7888_v47 = vpack.c.bf16 %v6910_v36, %v6909_v40 }
 0x651   :  { %7863 = vmatpush3.bf16.msra.mxu1 %v7862_v2  ;;  %v6894_v2 = vld [vmem:[#allocation14 + $0x158] sm:$0xff] }
 0x652   :  { %7865 = vmatprep.subr.bf16.mxu1 %v7864_v48  ;;  %v7890_v43 = vpack.c.bf16 %v6894_v2, %v6893_v32  ;;  %v7892_v48 = vpack.c.bf16 %v6912_v49, %v6911_v62 }
 0x655   :  { %7867 = vmatpush3.bf16.msra.mxu1 %v7866_v54  ;;  %v6896_v54 = vld [vmem:[#allocation14 + $0x168] sm:$0xff] }
 0x656   :  { %7869 = vmatprep.subr.bf16.mxu1 %v7868_v56  ;;  %v6914_v56 = vld [vmem:[#allocation14 + $0x1f8] sm:$0xff] }
 0x70b   :  { %v6709_v45 = vpop.f32.mrb[16].mxu1 }
 0x70c   :  { %v7912_v19 = vadd.f32 %v6709_v45, %v5574_v9  ;;  %v10004_v61 = vpop.f32.mrb[8].mxu0  ;;  %v6711_v1 = vpop.f32.mrb[17].mxu1  ;;  %v7894_v9 = vpack.c.bf16 %v6896_v54, %v6895_v26  ;;  %v6898_v45 = vld [vmem:[#allocation14 + $0x178] sm:$0xff] }
 0x70d   :  { %v7913_v38 = vadd.f32 %v6711_v1, %v5578_v6  ;;  %v6834_v55 = vpop.f32.mrb[9].mxu0  ;;  %v6713_v57 = vpop.f32.mrb[18].mxu1  ;;  %v7896_v6 = vpack.c.bf16 %v6914_v56, %v6913_v35 }
 0x70e   :  { %v6843_v5 = vmul.f32 0.01, %v7912_v19  ;;  %v7915_v16 = vadd.f32 %v6834_v55, %v5586_v14  ;;  %v6836_v10 = vpop.f32.mrb[10].mxu0  ;;  %v6714_v46 = vpop.f32.mrb[19].mxu1  ;;  %vm6839_vm0 = vcmp.gt.f32.partialorder %v7912_v19, 0.0  ;;  %v6897_v14 = vld [vmem:[#allocation14 + $0x170] sm:$0xff] }
 0x70f   :  { %v6844_v4 = vmul.f32 0.01, %v7913_v38  ;;  %v6837_v7 = vpop.f32.mrb[11].mxu0  ;;  %vm6840_vm1 = vcmp.gt.f32.partialorder %v7913_v38, 0.0  ;;  %v7898_v1 = vpack.c.bf16 %v6898_v45, %v6897_v14 }
 0x710   :  { %v6846_v8 = vmul.f32 0.01, %v7915_v16  ;;  %vm6842_vm2 = vcmp.gt.f32.partialorder %v7915_v16, 0.0  ;;  %v6847_v41 = vsel %vm6839_vm0, %v7912_v19, %v6843_v5  ;;  %v7914_v19 = vadd.f32 %v10004_v61, %v5582_v33 }
 0x711   :  { %v6848_v24 = vsel %vm6840_vm1, %v7913_v38, %v6844_v4  ;;  %v7056_v5 = vstv %s10024_s8 }
 0x712   :  { %6979 = vmatprep.mubr.f32.mxu1 %v6848_v24  ;;  %v6850_v53 = vsel %vm6842_vm2, %v7915_v16, %v6846_v8  ;;  %v6845_v38 = vmul.f32 0.01, %v7914_v19  ;;  %vm6841_vm3 = vcmp.gt.f32.partialorder %v7914_v19, 0.0 }
 0x713   :  { %6980 = vmatmul.mubr.f32.vlgmr.msra.gmra.mrb[20].mxu1 %v6847_v41 }
 0x714   :  { %7871 = vmatpush3.bf16.msra.mxu1 %v7870_v44  ;;  %7049 = vmatprep.mubr.f32.mxu1 %v6850_v53  ;;  %v6849_v55 = vsel %vm6841_vm3, %v7914_v19, %v6845_v38 }
 0x715   :  { %7873 = vmatprep.subr.bf16.mxu1 %v7872_v50 }
 0x718   :  { %7875 = vmatpush3.bf16.msra.mxu1 %v7874_v12 }
 0x719   :  { %7877 = vmatprep.subr.bf16.mxu1 %v7876_v59 }
 0x71c   :  { %7879 = vmatpush3.bf16.msra.mxu1 %v7878_v28 }
 0x71d   :  { %7881 = vmatprep.subr.bf16.mxu1 %v7880_v3 }
 0x720   :  { %7883 = vmatpush3.bf16.msra.mxu1 %v7882_v11 }
 0x721   :  { %7885 = vmatprep.subr.bf16.mxu1 %v7884_v37 }
 0x724   :  { %7887 = vmatpush3.bf16.msra.mxu1 %v7886_v23 }
 0x725   :  { %7889 = vmatprep.subr.bf16.mxu1 %v7888_v47 }
 0x728   :  { %7891 = vmatpush3.bf16.msra.mxu1 %v7890_v43 }
 0x729   :  { %7893 = vmatprep.subr.bf16.mxu1 %v7892_v48 }
 0x72c   :  { %7895 = vmatpush3.bf16.msra.mxu1 %v7894_v9 }
 0x72d   :  { %7897 = vmatprep.subr.bf16.mxu1 %v7896_v6 }
 0x730   :  { %7899 = vmatpush3.bf16.msra.mxu1 %v7898_v1 }
 0x733   :  { %7050 = vmatmul.mubr.f32.vlgmr.msra.gmra.mrb[22].mxu1 %v6849_v55 }
 0x7e6   :  { %v7702_v58 = vpop.f32.mrb[20].mxu1 }
 0x7e7   :  { %v7703_v39 = vpop.f32.mrb[21].mxu1 }
 0x7e8   :  { %v7704_v18 = vadd.f32 %v7703_v39, %v7702_v58 }
 0x806   :  { %v7737_v57 = vpop.f32.mrb[22].mxu1 }
 0x807   :  { %v7738_v25 = vpop.f32.mrb[23].mxu1 }
 0x808   :  { %v7739_v20 = vadd.f32 %v7738_v25, %v7737_v57 }
 0x80a   :  { %v7052_v16 = vadd.f32 %v7739_v20, %v7704_v18 }
 0x80c   :  { %v7057_v61 = vadd.f32 %v7056_v5, %v7052_v16 }
 0x80e   :  { %v7058_v10 = vsub.f32 0.0, %v7057_v61 }
 0x810   :  { %v7059_v46 = vmul.f32 1.442695, %v7058_v10 }
 0x812   :  { %8701 = vpow2.f32 %v7059_v46 }
 0x81c   :  { %v8702_v13 = vpop.eup %8701 }
 0x81d   :  { %v7061_v29 = vadd.f32 1.0, %v8702_v13 }
 0x81f   :  { %8703 = vrcp.f32 %v7061_v29 }
 0x829   :  { %v8704_v4 = vpop.eup %8703 }
 0x82a   :  { %v7064_v7 = vmax.f32 %v8704_v4, 1e-05 }
 0x82c   :  { %v7065_v8 = vmin.f32 %v7064_v7, 0.99999 }
 0x82e   :  { %7067 = vst.msk [vmem:[%s10025_s9] sm:$0x3] %vm7066_vm4, %v7065_v8 }
 0x82f   :  { %7072 = vsyncpa [#allocation5], 1 }
 0x830   :  { %7073 = vsyncpa [#allocation7], 1 }
 0x831   :  { %7074 = vsyncpa [#allocation10], 1 }
 0x832   :  { %7075 = vsyncpa [#allocation13], 1 }

</bundles_post_ra>
